<compile_context>
chip_gen: v6e
topology: v6e:2x2x1
jax: 0.10.0
libtpu: 0.0.40
codegen_flags: <defaults>
</compile_context>

<pallas_src>
import functools
import math

import jax
import jax.numpy as jnp
from jax.experimental import pallas as pl
from jax.experimental.pallas import tpu as pltpu

F32 = jnp.float32


# ----------------------------------------------------------------------------
# small in-kernel helpers
# ----------------------------------------------------------------------------
def _dot(a, b):
    return jnp.dot(a, b, preferred_element_type=F32)


def _dot_nt(a, b):
    # a @ b.T without an explicit transpose (contract last dims).
    return jax.lax.dot_general(a, b, (((1,), (1,)), ((), ())),
                               preferred_element_type=F32)


# ----------------------------------------------------------------------------
# Kernel 1: both complex head conv1ds in ONE grid step.
#   input pre-padded along length ('same' conv), taps lane-concatenated,
#   bias folded in via ones column, real-embedding weights, 128-lane output.
# ----------------------------------------------------------------------------
def _head_conv_kernel(x_ref, w_ref, o_ref, *, K, L, Cin, Cout, B):
    outs = []
    for h in range(2):
        xh = x_ref[h]                                        # (B, L+2*pad, 2*Cin)
        taps = [xh[:, k:k + L, :].reshape(B * L, 2 * Cin) for k in range(K)]
        taps.append(jnp.ones((B * L, 1), F32))               # bias column
        slab = jnp.concatenate(taps, axis=-1)                # (B*L, K*2*Cin + 1)
        outs.append(_dot(slab, w_ref[h]))                    # (B*L, 2*Cout) packed
    o_ref[...] = jnp.concatenate(outs, axis=-1).reshape(B, L, 4 * Cout)


def head_convs(xh, w, *, L):
    # xh: (2 heads, B, L+2*pad, 2*Cin) packed [real|imag]; w: (2, K*2*Cin+1, 2*Cout)
    _, B, Lp, Cin2 = xh.shape
    KC1, Cout2 = w.shape[-2:]
    K = (KC1 - 1) // Cin2
    kernel = functools.partial(_head_conv_kernel, K=K, L=L, Cin=Cin2 // 2,
                               Cout=Cout2 // 2, B=B)
    return pl.pallas_call(
        kernel,
        out_shape=jax.ShapeDtypeStruct((B, L, 2 * Cout2), F32),
        grid=(1,),
        in_specs=[pl.BlockSpec((2, B, Lp, Cin2), lambda i: (0, 0, 0, 0)),
                  pl.BlockSpec((2, KC1, Cout2), lambda i: (0, 0, 0))],
        out_specs=pl.BlockSpec((B, L, 2 * Cout2), lambda i: (0, 0, 0)),
    )(xh, w)


# ----------------------------------------------------------------------------
# Kernel 2: one full SSCA block per grid step (grid (2,) over R/k stacks):
#   merged Q/K/V projections per source -> 4 attention variants (AA, BB, AB, BA)
#   -> cat over length -> CVECA channel attention -> complex conv1d.
#   Batch folded into the block; output packs batch along lanes (128-lane store).
# ----------------------------------------------------------------------------
def _ssca_kernel(src_ref, wab_ref, wo_ref, band_ref, conv_ref, o_ref,
                 *, B, L, D, H, dk, dv, K):
    eps = 1e-9
    D2 = 2 * D
    Hdk, Hdv = H * dk, H * dv
    Lf = 4 * L
    pad = K // 2

    srcA = src_ref[0, 0].reshape(B * L, D2)                  # packed [r|i]
    srcB = src_ref[0, 1].reshape(B * L, D2)
    projA = _dot(srcA, wab_ref[0, 0])                        # (B*L, 384)
    projB = _dot(srcB, wab_ref[0, 1])

    qw = 2 * Hdk
    kw = 2 * Hdk
    vw = 2 * Hdv
    oQ0, oQ1 = 0, qw
    oK0, oK1 = 2 * qw, 2 * qw + kw
    oV0, oV1 = 2 * qw + 2 * kw, 2 * qw + 2 * kw + vw
    # variant order matches cat((W, X, Y, Z)): AA, BB, AB, BA
    variants = (
        (projA[:, oQ0:oQ0 + qw], projA[:, oK0:oK0 + kw], projA[:, oV0:oV0 + vw]),
        (projB[:, oQ0:oQ0 + qw], projB[:, oK0:oK0 + kw], projB[:, oV0:oV0 + vw]),
        (projA[:, oQ1:oQ1 + qw], projB[:, oK1:oK1 + kw], projB[:, oV1:oV1 + vw]),
        (projB[:, oQ1:oQ1 + qw], projA[:, oK1:oK1 + kw], projA[:, oV1:oV1 + vw]),
    )

    wo_mats = [wo_ref[0, v] for v in range(4)]
    band_mat = band_ref[0]
    conv_mat = conv_ref[0]
    pool_row = jnp.full((1, Lf), 1.0 / Lf, F32)

    batch_cols = []
    for b in range(B):
        rs = slice(b * L, (b + 1) * L)
        var_rows = []
        for v, (Qp, Kp, Vp) in enumerate(variants):
            Qb, Kb, Vb = Qp[rs], Kp[rs], Vp[rs]              # (L, 2*Hdk)
            ctx_r, ctx_i = [], []
            for h in range(H):
                qr = Qb[:, h * dk:(h + 1) * dk]
                qi = Qb[:, Hdk + h * dk:Hdk + (h + 1) * dk]
                kr = Kb[:, h * dk:(h + 1) * dk]
                ki = Kb[:, Hdk + h * dk:Hdk + (h + 1) * dk]
                vr = Vb[:, h * dv:(h + 1) * dv]
                vi = Vb[:, Hdv + h * dv:Hdv + (h + 1) * dv]
                # complex QK^T (1/sqrt(dk) pre-folded into the Q weights)
                sr = _dot_nt(qr, kr) - _dot_nt(qi, ki)
                si = _dot_nt(qr, ki) + _dot_nt(qi, kr)
                # MagMinMaxNorm over keys: normalize magnitude, keep phase
                mag = jnp.sqrt(sr * sr + si * si)
                mn = jnp.min(mag, axis=-1, keepdims=True)
                mx = jnp.max(mag, axis=-1, keepdims=True)
                fac = ((mag - mn) / (mx - mn + eps)) / (mag + eps)
                ar = sr * fac
                ai = si * fac
                ctx_r.append(_dot(ar, vr) - _dot(ai, vi))
                ctx_i.append(_dot(ar, vi) + _dot(ai, vr))
            ctx = jnp.concatenate(ctx_r + ctx_i, axis=-1)    # (L, 2*Hdv)
            var_rows.append(_dot(ctx, wo_mats[v]))           # (L, 2D)
        att = jnp.concatenate(var_rows, axis=0)              # (4L, 2D) cat over length
        # --- CVECA channel attention (global pool -> band conv -> split sigmoid) ---
        pool = _dot(pool_row, att)                           # (1, 2D)
        g = jax.nn.sigmoid(_dot(pool, band_mat))             # (1, 2D) = [gr|gi]
        gr, gi = g[:, :D], g[:, D:]
        xr, xi = att[:, :D], att[:, D:]
        u = jnp.concatenate([xr * gr - xi * gi, xr * gi + xi * gr], axis=-1)
        # --- complex conv1d over length ('same', no bias): shifted taps in regs ---
        taps = []
        for k in range(K):
            shift = k - pad
            if shift < 0:
                t = jnp.concatenate(
                    [jnp.zeros((-shift, D2), F32), u[:Lf + shift]], axis=0)
            elif shift > 0:
                t = jnp.concatenate(
                    [u[shift:], jnp.zeros((shift, D2), F32)], axis=0)
            else:
                t = u
            taps.append(t)
        slab = jnp.concatenate(taps, axis=-1)                # (4L, K*2D)
        batch_cols.append(_dot(slab, conv_mat))              # (4L, 2D)
    o_ref[0] = jnp.concatenate(batch_cols, axis=-1)          # (4L, B*2D) lane-dense


def ssca_fused(src, wab, wo, band, convw, *, H, dk, dv, K):
    # src: (2 ssca, 2 A/B, B, L, 2D); wab: (2, 2, 2D, WW); wo: (2, 4, 2*H*dv, 2D)
    _, _, B, L, D2 = src.shape
    D = D2 // 2
    WW = wab.shape[-1]
    Hdv2 = wo.shape[-2]
    kernel = functools.partial(_ssca_kernel, B=B, L=L, D=D, H=H, dk=dk, dv=dv, K=K)
    return pl.pallas_call(
        kernel,
        out_shape=jax.ShapeDtypeStruct((2, 4 * L, B * D2), F32),
        grid=(2,),
        in_specs=[
            pl.BlockSpec((1, 2, B, L, D2), lambda s: (s, 0, 0, 0, 0)),
            pl.BlockSpec((1, 2, D2, WW), lambda s: (s, 0, 0, 0)),
            pl.BlockSpec((1, 4, Hdv2, D2), lambda s: (s, 0, 0, 0)),
            pl.BlockSpec((1, D2, D2), lambda s: (s, 0, 0)),
            pl.BlockSpec((1, K * D2, D2), lambda s: (s, 0, 0)),
        ],
        out_specs=pl.BlockSpec((1, 4 * L, B * D2), lambda s: (s, 0, 0)),
        compiler_params=pltpu.CompilerParams(dimension_semantics=("parallel",)),
    )(src, wab, wo, band, convw)


# ----------------------------------------------------------------------------
# Kernel 3: the two final CVECAs (R_CVECA / k_CVECA), grid (2,), 128-lane I/O.
# ----------------------------------------------------------------------------
def _final_eca_kernel(x_ref, band_ref, o_ref, *, B, C, Lf):
    band_mat = band_ref[0]
    pool_row = jnp.full((1, Lf), 1.0 / Lf, F32)
    for b in range(B):
        x = x_ref[0, b]                                      # (Lf, 2C) packed
        pool = _dot(pool_row, x)                             # (1, 2C)
        g = jax.nn.sigmoid(_dot(pool, band_mat))             # (1, 2C) = [gr|gi]
        gr, gi = g[:, :C], g[:, C:]
        xr, xi = x[:, :C], x[:, C:]
        o_ref[0, b] = jnp.concatenate([xr * gr - xi * gi,
                                       xr * gi + xi * gr], axis=-1)


def final_eca(x, band):
    # x: (2, B, 4L, 2C); band: (2, 2C, 2C)
    _, B, Lf, C2 = x.shape
    C = C2 // 2
    kernel = functools.partial(_final_eca_kernel, B=B, C=C, Lf=Lf)
    return pl.pallas_call(
        kernel,
        out_shape=jax.ShapeDtypeStruct((2, B, Lf, C2), F32),
        grid=(2,),
        in_specs=[pl.BlockSpec((1, B, Lf, C2), lambda s: (s, 0, 0, 0)),
                  pl.BlockSpec((1, C2, C2), lambda s: (s, 0, 0))],
        out_specs=pl.BlockSpec((1, B, Lf, C2), lambda s: (s, 0, 0, 0)),
        compiler_params=pltpu.CompilerParams(dimension_semantics=("parallel",)),
    )(x, band)


# ----------------------------------------------------------------------------
# Parameter init / offline weight packing (real-embedding form).
# ----------------------------------------------------------------------------
def _rand(key, shape, scale):
    return scale * jax.random.normal(key, shape, F32)


def _embed(wr, wi):
    # packed [xr | xi] @ _embed(Wr, Wi)  ==  [Re(x@W) | Im(x@W)]
    top = jnp.concatenate([wr, wi], axis=-1)
    bot = jnp.concatenate([-wi, wr], axis=-1)
    return jnp.concatenate([top, bot], axis=0)               # (2*din, 2*dout)


def init_head_w(key, c_in, c_out, K):
    # (K*2*c_in + 1, 2*c_out): per-tap real-embedding blocks + complex bias row
    kwr, kwi, kbr, kbi = jax.random.split(key, 4)
    s = 1.0 / math.sqrt(c_in * K)
    wr = _rand(kwr, (K, c_out, c_in), s)
    wi = _rand(kwi, (K, c_out, c_in), s)
    br = _rand(kbr, (c_out,), s)
    bi = _rand(kbi, (c_out,), s)
    blocks = [_embed(wr[k].T, wi[k].T) for k in range(K)]
    bias_row = jnp.concatenate([br, bi])[None, :]
    return jnp.concatenate(blocks + [bias_row], axis=0)


def init_conv_flat(key, c_in, c_out, K):
    # bias-free conv: (K*2*c_in, 2*c_out)
    kwr, kwi = jax.random.split(key)
    s = 1.0 / math.sqrt(c_in * K)
    wr = _rand(kwr, (K, c_out, c_in), s)
    wi = _rand(kwi, (K, c_out, c_in), s)
    return jnp.concatenate([_embed(wr[k].T, wi[k].T) for k in range(K)], axis=0)


def _cplx_pair(key, d_in, d_out):
    kr, ki = jax.random.split(key)
    s = 1.0 / math.sqrt(d_in)
    return _rand(kr, (d_in, d_out), s), _rand(ki, (d_in, d_out), s)


def init_mha_packed(key, n_heads, d_model, d_k, d_v):
    # variant order matches cat((W, X, Y, Z)): AA, BB, AB, BA
    inv = 1.0 / math.sqrt(d_k)
    names = ("AA", "BB", "AB", "BA")
    p = {}
    for name, kv in zip(names, jax.random.split(key, 4)):
        k1, k2, k3, k4 = jax.random.split(kv, 4)
        p[name] = {"q": _cplx_pair(k1, d_model, n_heads * d_k),
                   "k": _cplx_pair(k2, d_model, n_heads * d_k),
                   "v": _cplx_pair(k3, d_model, n_heads * d_v),
                   "o": _cplx_pair(k4, n_heads * d_v, d_model)}

    def emb(pair, scale=1.0):
        wr, wi = pair
        return _embed(scale * wr, scale * wi)

    # merged per-source projections; 1/sqrt(d_k) folded into the Q weights.
    # source-A columns: [Q_AA | Q_AB | K_AA | K_BA | V_AA | V_BA]
    w_a = jnp.concatenate([emb(p["AA"]["q"], inv), emb(p["AB"]["q"], inv),
                           emb(p["AA"]["k"]), emb(p["BA"]["k"]),
                           emb(p["AA"]["v"]), emb(p["BA"]["v"])], axis=-1)
    # source-B columns: [Q_BB | Q_BA | K_BB | K_AB | V_BB | V_AB]
    w_b = jnp.concatenate([emb(p["BB"]["q"], inv), emb(p["BA"]["q"], inv),
                           emb(p["BB"]["k"]), emb(p["AB"]["k"]),
                           emb(p["BB"]["v"]), emb(p["AB"]["v"])], axis=-1)
    wo = jnp.stack([emb(p[n]["o"]) for n in names], axis=0)  # (4, 2*H*dv, 2D)
    return w_a, w_b, wo


def eca_kernel_size(channels, b=1, gamma=2):
    t = int(abs((math.log2(channels) + b) / gamma))
    k = t if t % 2 else t + 1
    return max(k, 1)


def make_band(w1d, C, k):
    # M[j, i] = w1d[j - i + pad]  so that  y @ M == 'same' 1D conv over channels
    pad = k // 2
    idx = jnp.arange(C)[:, None] - jnp.arange(C)[None, :] + pad
    mask = (idx >= 0) & (idx < k)
    return jnp.where(mask, w1d[jnp.clip(idx, 0, k - 1)], 0.0).astype(F32)


def init_eca_band(key, init_channels, applied_channels, b=1, gamma=2):
    # CVECA built with `init_channels` (sets kernel size) but applied to
    # `applied_channels`, matching how the reference module uses it.
    k = eca_kernel_size(init_channels, b, gamma)
    kr, ki = jax.random.split(key)
    s = 1.0 / math.sqrt(k)
    wr = s * jax.random.normal(kr, (k,), F32)
    wi = s * jax.random.normal(ki, (k,), F32)
    return _embed(make_band(wr, applied_channels, k),
                  make_band(wi, applied_channels, k))        # (2C, 2C)


def init_domain_fusion(key, in_channels, d_model, n_heads, d_k, d_v,
                       kernel_size, b, gamma):
    ks = jax.random.split(key, 10)
    wa_r, wb_r, wo_r = init_mha_packed(ks[2], n_heads, d_model, d_k, d_v)
    wa_k, wb_k, wo_k = init_mha_packed(ks[3], n_heads, d_model, d_k, d_v)
    return {
        "d_model": d_model, "n_heads": n_heads, "d_k": d_k, "d_v": d_v,
        "kernel_size": kernel_size,
        "head_w": jnp.stack(
            [init_head_w(ks[0], in_channels, d_model, kernel_size),
             init_head_w(ks[1], in_channels, d_model, kernel_size)], axis=0),
        "mha_wab": jnp.stack([jnp.stack([wa_r, wb_r], axis=0),
                              jnp.stack([wa_k, wb_k], axis=0)], axis=0),
        "mha_wo": jnp.stack([wo_r, wo_k], axis=0),
        # SSCA chan_attn: kernel size from 4*d_model channels, applied to d_model
        "chan_band": jnp.stack(
            [init_eca_band(ks[4], 4 * d_model, d_model, b, gamma),
             init_eca_band(ks[5], 4 * d_model, d_model, b, gamma)], axis=0),
        "ssca_conv_w": jnp.stack(
            [init_conv_flat(ks[6], d_model, d_model, kernel_size),
             init_conv_flat(ks[7], d_model, d_model, kernel_size)], axis=0),
        # R_CVECA / k_CVECA: kernel size from d_model, applied to 2*d_model
        "final_band": jnp.stack(
            [init_eca_band(ks[8], d_model, 2 * d_model, b, gamma),
             init_eca_band(ks[9], d_model, 2 * d_model, b, gamma)], axis=0),
    }


# ----------------------------------------------------------------------------
# Forward pass (DomainFusion.forward).  FFT/IFFT are XLA glue between kernels.
# ----------------------------------------------------------------------------
def domain_fusion_forward(p, X1, X2):
    D = p["d_model"]
    H, dk, dv, K = p["n_heads"], p["d_k"], p["d_v"], p["kernel_size"]
    pad = K // 2
    B, _, L = X1[0].shape

    def to_packed_lm(x):   # (real, imag) NCL -> length-major packed (B, L, 2*Cin)
        r, i = x
        return jnp.concatenate([jnp.swapaxes(r, -1, -2),
                                jnp.swapaxes(i, -1, -2)], axis=-1)

    # heads (both in one single-step pallas_call); 'same' pad done here
    xh = jnp.stack([to_packed_lm(X1), to_packed_lm(X2)], axis=0)
    xh = jnp.pad(xh, ((0, 0), (0, 0), (pad, pad), (0, 0)))
    hout = head_convs(xh, p["head_w"], L=L)                  # (B, L, 4D)
    X1c = hout[..., :D] + 1j * hout[..., D:2 * D]            # (B, L, D) complex
    X2c = hout[..., 2 * D:3 * D] + 1j * hout[..., 3 * D:]

    # R_SSCA(X1, X2.fft()); k_SSCA(X1.ifft(), X2)
    A_R, B_R = X1c, jnp.fft.fft(X2c, axis=-2)
    A_k, B_k = jnp.fft.ifft(X1c, axis=-2), X2c

    def pack_c(c):
        return jnp.concatenate([jnp.real(c).astype(F32),
                                jnp.imag(c).astype(F32)], axis=-1)

    src = jnp.stack([jnp.stack([pack_c(A_R), pack_c(B_R)], axis=0),
                     jnp.stack([pack_c(A_k), pack_c(B_k)], axis=0)], axis=0)

    # both SSCA blocks fused (MHA x4 + cat + CVECA + conv), grid (2,)
    ssca = ssca_fused(src, p["mha_wab"], p["mha_wo"], p["chan_band"],
                      p["ssca_conv_w"], H=H, dk=dk, dv=dv, K=K)   # (2, 4L, B*2D)
    ssca = ssca.reshape(2, 4 * L, B, 2 * D).transpose(0, 2, 1, 3)  # (2, B, 4L, 2D)
    R_c = ssca[0][..., :D] + 1j * ssca[0][..., D:]
    k_c = ssca[1][..., :D] + 1j * ssca[1][..., D:]

    # DomainFusion tail: channel concats with FFT/IFFT cross terms
    R_cat = jnp.concatenate([R_c, jnp.fft.fft(k_c, axis=-2)], axis=-1)
    k_cat = jnp.concatenate([k_c, jnp.fft.ifft(R_c, axis=-2)], axis=-1)

    xfin = jnp.stack([pack_c(R_cat), pack_c(k_cat)], axis=0)  # (2, B, 4L, 4D)
    fin = final_eca(xfin, p["final_band"])                    # (2, B, 4L, 4D)

    C2 = 2 * D
    R = (jnp.swapaxes(fin[0][..., :C2], -1, -2),              # back to NCL
         jnp.swapaxes(fin[0][..., C2:], -1, -2))
    k = (jnp.swapaxes(fin[1][..., :C2], -1, -2),
         jnp.swapaxes(fin[1][..., C2:], -1, -2))
    return R, k


# ----------------------------------------------------------------------------
# Main.
# ----------------------------------------------------------------------------
if __name__ == "__main__":
    B, Cin, L = 2, 4, 16
    d_model, n_heads, d_k, d_v, kernel_size = 32, 2, 16, 16, 3
    b_eca, gamma_eca = 1, 2

    key = jax.random.PRNGKey(0)
    kx1r, kx1i, kx2r, kx2i, kp = jax.random.split(key, 5)
    X1 = (jax.random.normal(kx1r, (B, Cin, L), F32),
          jax.random.normal(kx1i, (B, Cin, L), F32))
    X2 = (jax.random.normal(kx2r, (B, Cin, L), F32),
          jax.random.normal(kx2i, (B, Cin, L), F32))

    params = init_domain_fusion(kp, Cin, d_model, n_heads, d_k, d_v,
                                kernel_size, b_eca, gamma_eca)

    fwd = jax.jit(lambda x1r, x1i, x2r, x2i:
                  domain_fusion_forward(params, (x1r, x1i), (x2r, x2i)))

    R, k = fwd(X1[0], X1[1], X2[0], X2[1])
    jax.block_until_ready(R)
    jax.block_until_ready(k)

    assert R[0].shape == (B, 2 * d_model, 4 * L)
    assert k[0].shape == (B, 2 * d_model, 4 * L)
    for t in (R[0], R[1], k[0], k[1]):
        assert bool(jnp.all(jnp.isfinite(t)))
    print("KERNEL_OK")
</pallas_src>

<mosaic_0001>
module attributes {stable_mosaic.version = 11 : i64} {
  func.func @_head_conv_kernel(%arg0: i32, %arg1: memref<2x2x18x8xf32, #tpu.memory_space<vmem>>, %arg2: memref<2x25x64xf32, #tpu.memory_space<vmem>>, %arg3: memref<2x16x128xf32, #tpu.memory_space<vmem>>) attributes {dimension_semantics = [#tpu.dimension_semantics<arbitrary>], iteration_bounds = array<i64: 1>, scalar_prefetch = 0 : i64, scratch_operands = 0 : i64, tpu.core_type = #tpu.core_type<tc>, window_params = [{pipeline_mode = #tpu.pipeline_mode<synchronous>, transform_indices = @transform_0, window_bounds = array<i64: 2, 2, 18, 8>}, {pipeline_mode = #tpu.pipeline_mode<synchronous>, transform_indices = @transform_1, window_bounds = array<i64: 2, 25, 64>}, {pipeline_mode = #tpu.pipeline_mode<synchronous>, transform_indices = @transform_2, window_bounds = array<i64: 2, 16, 128>}]} {
    %c0 = arith.constant 0 : index
    %c0_0 = arith.constant 0 : index
    %c0_1 = arith.constant 0 : index
    %c0_2 = arith.constant 0 : index
    %0 = vector.load %arg1[%c0, %c0_0, %c0_1, %c0_2] : memref<2x2x18x8xf32, #tpu.memory_space<vmem>>, vector<1x2x18x8xf32>
    %1 = vector.shape_cast %0 : vector<1x2x18x8xf32> to vector<2x18x8xf32>
    %2 = vector.extract_strided_slice %1 {offsets = [0, 0, 0], sizes = [2, 16, 8], strides = [1, 1, 1]} : vector<2x18x8xf32> to vector<2x16x8xf32>
    %3 = vector.shape_cast %2 : vector<2x16x8xf32> to vector<32x8xf32>
    %4 = vector.extract_strided_slice %1 {offsets = [0, 1, 0], sizes = [2, 16, 8], strides = [1, 1, 1]} : vector<2x18x8xf32> to vector<2x16x8xf32>
    %5 = vector.shape_cast %4 : vector<2x16x8xf32> to vector<32x8xf32>
    %6 = vector.extract_strided_slice %1 {offsets = [0, 2, 0], sizes = [2, 16, 8], strides = [1, 1, 1]} : vector<2x18x8xf32> to vector<2x16x8xf32>
    %7 = vector.shape_cast %6 : vector<2x16x8xf32> to vector<32x8xf32>
    %cst = arith.constant 1.000000e+00 : f32
    %8 = vector.broadcast %cst : f32 to vector<32x1xf32>
    %9 = tpu.concatenate %3, %5, %7, %8 in 1 : vector<32x8xf32>, vector<32x8xf32>, vector<32x8xf32>, vector<32x1xf32> -> vector<32x25xf32>
    %c0_3 = arith.constant 0 : index
    %c0_4 = arith.constant 0 : index
    %c0_5 = arith.constant 0 : index
    %10 = vector.load %arg2[%c0_3, %c0_4, %c0_5] : memref<2x25x64xf32, #tpu.memory_space<vmem>>, vector<1x25x64xf32>
    %11 = vector.shape_cast %10 : vector<1x25x64xf32> to vector<25x64xf32>
    %cst_6 = arith.constant dense<0.000000e+00> : vector<32x64xf32>
    %12 = tpu.matmul %9, %11, %cst_6 {dimension_numbers = #tpu.dot_dimension_numbers<[1], [0], [0], [1], [0, 0, 1, 1], [], []>} : vector<32x25xf32>, vector<25x64xf32>, vector<32x64xf32> -> vector<32x64xf32>
    %c1 = arith.constant 1 : index
    %c0_7 = arith.constant 0 : index
    %c0_8 = arith.constant 0 : index
    %c0_9 = arith.constant 0 : index
    %13 = vector.load %arg1[%c1, %c0_7, %c0_8, %c0_9] : memref<2x2x18x8xf32, #tpu.memory_space<vmem>>, vector<1x2x18x8xf32>
    %14 = vector.shape_cast %13 : vector<1x2x18x8xf32> to vector<2x18x8xf32>
    %15 = vector.extract_strided_slice %14 {offsets = [0, 0, 0], sizes = [2, 16, 8], strides = [1, 1, 1]} : vector<2x18x8xf32> to vector<2x16x8xf32>
    %16 = vector.shape_cast %15 : vector<2x16x8xf32> to vector<32x8xf32>
    %17 = vector.extract_strided_slice %14 {offsets = [0, 1, 0], sizes = [2, 16, 8], strides = [1, 1, 1]} : vector<2x18x8xf32> to vector<2x16x8xf32>
    %18 = vector.shape_cast %17 : vector<2x16x8xf32> to vector<32x8xf32>
    %19 = vector.extract_strided_slice %14 {offsets = [0, 2, 0], sizes = [2, 16, 8], strides = [1, 1, 1]} : vector<2x18x8xf32> to vector<2x16x8xf32>
    %20 = vector.shape_cast %19 : vector<2x16x8xf32> to vector<32x8xf32>
    %cst_10 = arith.constant 1.000000e+00 : f32
    %21 = vector.broadcast %cst_10 : f32 to vector<32x1xf32>
    %22 = tpu.concatenate %16, %18, %20, %21 in 1 : vector<32x8xf32>, vector<32x8xf32>, vector<32x8xf32>, vector<32x1xf32> -> vector<32x25xf32>
    %c1_11 = arith.constant 1 : index
    %c0_12 = arith.constant 0 : index
    %c0_13 = arith.constant 0 : index
    %23 = vector.load %arg2[%c1_11, %c0_12, %c0_13] : memref<2x25x64xf32, #tpu.memory_space<vmem>>, vector<1x25x64xf32>
    %24 = vector.shape_cast %23 : vector<1x25x64xf32> to vector<25x64xf32>
    %cst_14 = arith.constant dense<0.000000e+00> : vector<32x64xf32>
    %25 = tpu.matmul %22, %24, %cst_14 {dimension_numbers = #tpu.dot_dimension_numbers<[1], [0], [0], [1], [0, 0, 1, 1], [], []>} : vector<32x25xf32>, vector<25x64xf32>, vector<32x64xf32> -> vector<32x64xf32>
    %26 = tpu.concatenate %12, %25 in 1 : vector<32x64xf32>, vector<32x64xf32> -> vector<32x128xf32>
    %27 = vector.shape_cast %26 : vector<32x128xf32> to vector<2x16x128xf32>
    %c0_15 = arith.constant 0 : index
    %c0_16 = arith.constant 0 : index
    %c0_17 = arith.constant 0 : index
    %28 = vector.load %arg3[%c0_15, %c0_16, %c0_17] : memref<2x16x128xf32, #tpu.memory_space<vmem>>, vector<2x16x128xf32>
    tpu.vector_store %arg3[%c0_15, %c0_16, %c0_17], %27 {strides = array<i32>} : memref<2x16x128xf32, #tpu.memory_space<vmem>>, vector<2x16x128xf32>,
    return
  }
  func.func @transform_0(%arg0: i32) -> (i32, i32, i32, i32) {
    %c0_i32 = arith.constant 0 : i32
    %c0_i32_0 = arith.constant 0 : i32
    %c0_i32_1 = arith.constant 0 : i32
    %c0_i32_2 = arith.constant 0 : i32
    %c0_i32_3 = arith.constant 0 : i32
    return %c0_i32, %c0_i32_0, %c0_i32_1, %c0_i32_2 : i32, i32, i32, i32
  }
  func.func @transform_1(%arg0: i32) -> (i32, i32, i32) {
    %c0_i32 = arith.constant 0 : i32
    %c0_i32_0 = arith.constant 0 : i32
    %c0_i32_1 = arith.constant 0 : i32
    %c0_i32_2 = arith.constant 0 : i32
    return %c0_i32, %c0_i32_0, %c0_i32_1 : i32, i32, i32
  }
  func.func @transform_2(%arg0: i32) -> (i32, i32, i32) {
    %c0_i32 = arith.constant 0 : i32
    %c0_i32_0 = arith.constant 0 : i32
    %c0_i32_1 = arith.constant 0 : i32
    %c0_i32_2 = arith.constant 0 : i32
    return %c0_i32, %c0_i32_0, %c0_i32_1 : i32, i32, i32
  }
}

module attributes {stable_mosaic.version = 11 : i64} {
  func.func @_ssca_kernel(%arg0: i32, %arg1: memref<1x2x2x16x64xf32, #tpu.memory_space<vmem>>, %arg2: memref<1x2x64x384xf32, #tpu.memory_space<vmem>>, %arg3: memref<1x4x64x64xf32, #tpu.memory_space<vmem>>, %arg4: memref<1x64x64xf32, #tpu.memory_space<vmem>>, %arg5: memref<1x192x64xf32, #tpu.memory_space<vmem>>, %arg6: memref<1x64x128xf32, #tpu.memory_space<vmem>>) attributes {dimension_semantics = [#tpu.dimension_semantics<parallel>], iteration_bounds = array<i64: 2>, scalar_prefetch = 0 : i64, scratch_operands = 0 : i64, tpu.core_type = #tpu.core_type<tc>, window_params = [{transform_indices = @transform_0, window_bounds = array<i64: 1, 2, 2, 16, 64>}, {transform_indices = @transform_1, window_bounds = array<i64: 1, 2, 64, 384>}, {transform_indices = @transform_2, window_bounds = array<i64: 1, 4, 64, 64>}, {transform_indices = @transform_3, window_bounds = array<i64: 1, 64, 64>}, {transform_indices = @transform_4, window_bounds = array<i64: 1, 192, 64>}, {transform_indices = @transform_5, window_bounds = array<i64: 1, 64, 128>}]} {
    %c0 = arith.constant 0 : index
    %c0_0 = arith.constant 0 : index
    %c0_1 = arith.constant 0 : index
    %c0_2 = arith.constant 0 : index
    %c0_3 = arith.constant 0 : index
    %0 = vector.load %arg1[%c0, %c0_0, %c0_1, %c0_2, %c0_3] : memref<1x2x2x16x64xf32, #tpu.memory_space<vmem>>, vector<1x1x2x16x64xf32>
    %1 = vector.shape_cast %0 : vector<1x1x2x16x64xf32> to vector<2x16x64xf32>
    %2 = vector.shape_cast %1 : vector<2x16x64xf32> to vector<32x64xf32>
    %c0_4 = arith.constant 0 : index
    %c1 = arith.constant 1 : index
    %c0_5 = arith.constant 0 : index
    %c0_6 = arith.constant 0 : index
    %c0_7 = arith.constant 0 : index
    %3 = vector.load %arg1[%c0_4, %c1, %c0_5, %c0_6, %c0_7] : memref<1x2x2x16x64xf32, #tpu.memory_space<vmem>>, vector<1x1x2x16x64xf32>
    %4 = vector.shape_cast %3 : vector<1x1x2x16x64xf32> to vector<2x16x64xf32>
    %5 = vector.shape_cast %4 : vector<2x16x64xf32> to vector<32x64xf32>
    %c0_8 = arith.constant 0 : index
    %c0_9 = arith.constant 0 : index
    %c0_10 = arith.constant 0 : index
    %c0_11 = arith.constant 0 : index
    %6 = vector.load %arg2[%c0_8, %c0_9, %c0_10, %c0_11] : memref<1x2x64x384xf32, #tpu.memory_space<vmem>>, vector<1x1x64x384xf32>
    %7 = vector.shape_cast %6 : vector<1x1x64x384xf32> to vector<64x384xf32>
    %cst = arith.constant dense<0.000000e+00> : vector<32x384xf32>
    %8 = tpu.matmul %2, %7, %cst {dimension_numbers = #tpu.dot_dimension_numbers<[1], [0], [0], [1], [0, 0, 1, 1], [], []>} : vector<32x64xf32>, vector<64x384xf32>, vector<32x384xf32> -> vector<32x384xf32>
    %c0_12 = arith.constant 0 : index
    %c1_13 = arith.constant 1 : index
    %c0_14 = arith.constant 0 : index
    %c0_15 = arith.constant 0 : index
    %9 = vector.load %arg2[%c0_12, %c1_13, %c0_14, %c0_15] : memref<1x2x64x384xf32, #tpu.memory_space<vmem>>, vector<1x1x64x384xf32>
    %10 = vector.shape_cast %9 : vector<1x1x64x384xf32> to vector<64x384xf32>
    %cst_16 = arith.constant dense<0.000000e+00> : vector<32x384xf32>
    %11 = tpu.matmul %5, %10, %cst_16 {dimension_numbers = #tpu.dot_dimension_numbers<[1], [0], [0], [1], [0, 0, 1, 1], [], []>} : vector<32x64xf32>, vector<64x384xf32>, vector<32x384xf32> -> vector<32x384xf32>
    %12 = vector.extract_strided_slice %8 {offsets = [0, 0], sizes = [32, 64], strides = [1, 1]} : vector<32x384xf32> to vector<32x64xf32>
    %13 = vector.extract_strided_slice %8 {offsets = [0, 128], sizes = [32, 64], strides = [1, 1]} : vector<32x384xf32> to vector<32x64xf32>
    %14 = vector.extract_strided_slice %8 {offsets = [0, 256], sizes = [32, 64], strides = [1, 1]} : vector<32x384xf32> to vector<32x64xf32>
    %15 = vector.extract_strided_slice %11 {offsets = [0, 0], sizes = [32, 64], strides = [1, 1]} : vector<32x384xf32> to vector<32x64xf32>
    %16 = vector.extract_strided_slice %11 {offsets = [0, 128], sizes = [32, 64], strides = [1, 1]} : vector<32x384xf32> to vector<32x64xf32>
    %17 = vector.extract_strided_slice %11 {offsets = [0, 256], sizes = [32, 64], strides = [1, 1]} : vector<32x384xf32> to vector<32x64xf32>
    %18 = vector.extract_strided_slice %8 {offsets = [0, 64], sizes = [32, 64], strides = [1, 1]} : vector<32x384xf32> to vector<32x64xf32>
    %19 = vector.extract_strided_slice %11 {offsets = [0, 192], sizes = [32, 64], strides = [1, 1]} : vector<32x384xf32> to vector<32x64xf32>
    %20 = vector.extract_strided_slice %11 {offsets = [0, 320], sizes = [32, 64], strides = [1, 1]} : vector<32x384xf32> to vector<32x64xf32>
    %21 = vector.extract_strided_slice %11 {offsets = [0, 64], sizes = [32, 64], strides = [1, 1]} : vector<32x384xf32> to vector<32x64xf32>
    %22 = vector.extract_strided_slice %8 {offsets = [0, 192], sizes = [32, 64], strides = [1, 1]} : vector<32x384xf32> to vector<32x64xf32>
    %23 = vector.extract_strided_slice %8 {offsets = [0, 320], sizes = [32, 64], strides = [1, 1]} : vector<32x384xf32> to vector<32x64xf32>
    %c0_17 = arith.constant 0 : index
    %c0_18 = arith.constant 0 : index
    %c0_19 = arith.constant 0 : index
    %c0_20 = arith.constant 0 : index
    %24 = vector.load %arg3[%c0_17, %c0_18, %c0_19, %c0_20] : memref<1x4x64x64xf32, #tpu.memory_space<vmem>>, vector<1x1x64x64xf32>
    %25 = vector.shape_cast %24 : vector<1x1x64x64xf32> to vector<64x64xf32>
    %c0_21 = arith.constant 0 : index
    %c1_22 = arith.constant 1 : index
    %c0_23 = arith.constant 0 : index
    %c0_24 = arith.constant 0 : index
    %26 = vector.load %arg3[%c0_21, %c1_22, %c0_23, %c0_24] : memref<1x4x64x64xf32, #tpu.memory_space<vmem>>, vector<1x1x64x64xf32>
    %27 = vector.shape_cast %26 : vector<1x1x64x64xf32> to vector<64x64xf32>
    %c0_25 = arith.constant 0 : index
    %c2 = arith.constant 2 : index
    %c0_26 = arith.constant 0 : index
    %c0_27 = arith.constant 0 : index
    %28 = vector.load %arg3[%c0_25, %c2, %c0_26, %c0_27] : memref<1x4x64x64xf32, #tpu.memory_space<vmem>>, vector<1x1x64x64xf32>
    %29 = vector.shape_cast %28 : vector<1x1x64x64xf32> to vector<64x64xf32>
    %c0_28 = arith.constant 0 : index
    %c3 = arith.constant 3 : index
    %c0_29 = arith.constant 0 : index
    %c0_30 = arith.constant 0 : index
    %30 = vector.load %arg3[%c0_28, %c3, %c0_29, %c0_30] : memref<1x4x64x64xf32, #tpu.memory_space<vmem>>, vector<1x1x64x64xf32>
    %31 = vector.shape_cast %30 : vector<1x1x64x64xf32> to vector<64x64xf32>
    %c0_31 = arith.constant 0 : index
    %c0_32 = arith.constant 0 : index
    %c0_33 = arith.constant 0 : index
    %32 = vector.load %arg4[%c0_31, %c0_32, %c0_33] : memref<1x64x64xf32, #tpu.memory_space<vmem>>, vector<1x64x64xf32>
    %33 = vector.shape_cast %32 : vector<1x64x64xf32> to vector<64x64xf32>
    %c0_34 = arith.constant 0 : index
    %c0_35 = arith.constant 0 : index
    %c0_36 = arith.constant 0 : index
    %34 = vector.load %arg5[%c0_34, %c0_35, %c0_36] : memref<1x192x64xf32, #tpu.memory_space<vmem>>, vector<1x192x64xf32>
    %35 = vector.shape_cast %34 : vector<1x192x64xf32> to vector<192x64xf32>
    %cst_37 = arith.constant 1.562500e-02 : f32
    %36 = vector.broadcast %cst_37 : f32 to vector<1x64xf32>
    %37 = vector.extract_strided_slice %12 {offsets = [0, 0], sizes = [16, 64], strides = [1, 1]} : vector<32x64xf32> to vector<16x64xf32>
    %38 = vector.extract_strided_slice %13 {offsets = [0, 0], sizes = [16, 64], strides = [1, 1]} : vector<32x64xf32> to vector<16x64xf32>
    %39 = vector.extract_strided_slice %14 {offsets = [0, 0], sizes = [16, 64], strides = [1, 1]} : vector<32x64xf32> to vector<16x64xf32>
    %40 = vector.extract_strided_slice %37 {offsets = [0, 0], sizes = [16, 16], strides = [1, 1]} : vector<16x64xf32> to vector<16x16xf32>
    %41 = vector.extract_strided_slice %37 {offsets = [0, 32], sizes = [16, 16], strides = [1, 1]} : vector<16x64xf32> to vector<16x16xf32>
    %42 = vector.extract_strided_slice %38 {offsets = [0, 0], sizes = [16, 16], strides = [1, 1]} : vector<16x64xf32> to vector<16x16xf32>
    %43 = vector.extract_strided_slice %38 {offsets = [0, 32], sizes = [16, 16], strides = [1, 1]} : vector<16x64xf32> to vector<16x16xf32>
    %44 = vector.extract_strided_slice %39 {offsets = [0, 0], sizes = [16, 16], strides = [1, 1]} : vector<16x64xf32> to vector<16x16xf32>
    %45 = vector.extract_strided_slice %39 {offsets = [0, 32], sizes = [16, 16], strides = [1, 1]} : vector<16x64xf32> to vector<16x16xf32>
    %cst_38 = arith.constant dense<0.000000e+00> : vector<16x16xf32>
    %46 = tpu.matmul %40, %42, %cst_38 {dimension_numbers = #tpu.dot_dimension_numbers<[1], [1], [0], [0], [0, 0, 1, 0], [], []>} : vector<16x16xf32>, vector<16x16xf32>, vector<16x16xf32> -> vector<16x16xf32>
    %cst_39 = arith.constant dense<0.000000e+00> : vector<16x16xf32>
    %47 = tpu.matmul %41, %43, %cst_39 {dimension_numbers = #tpu.dot_dimension_numbers<[1], [1], [0], [0], [0, 0, 1, 0], [], []>} : vector<16x16xf32>, vector<16x16xf32>, vector<16x16xf32> -> vector<16x16xf32>
    %48 = arith.subf %46, %47 : vector<16x16xf32>
    %cst_40 = arith.constant dense<0.000000e+00> : vector<16x16xf32>
    %49 = tpu.matmul %40, %43, %cst_40 {dimension_numbers = #tpu.dot_dimension_numbers<[1], [1], [0], [0], [0, 0, 1, 0], [], []>} : vector<16x16xf32>, vector<16x16xf32>, vector<16x16xf32> -> vector<16x16xf32>
    %cst_41 = arith.constant dense<0.000000e+00> : vector<16x16xf32>
    %50 = tpu.matmul %41, %42, %cst_41 {dimension_numbers = #tpu.dot_dimension_numbers<[1], [1], [0], [0], [0, 0, 1, 0], [], []>} : vector<16x16xf32>, vector<16x16xf32>, vector<16x16xf32> -> vector<16x16xf32>
    %51 = arith.addf %49, %50 : vector<16x16xf32>
    %52 = arith.mulf %48, %48 : vector<16x16xf32>
    %53 = arith.mulf %51, %51 : vector<16x16xf32>
    %54 = arith.addf %52, %53 : vector<16x16xf32>
    %55 = math.sqrt %54 : vector<16x16xf32>
    %cst_42 = arith.constant dense<0x7F800000> : vector<16xf32>
    %56 = vector.multi_reduction <minimumf>, %55, %cst_42 [1] : vector<16x16xf32> to vector<16xf32>
    %57 = vector.shape_cast %56 : vector<16xf32> to vector<16x1xf32>
    %cst_43 = arith.constant dense<0xFF800000> : vector<16xf32>
    %58 = vector.multi_reduction <maximumf>, %55, %cst_43 [1] : vector<16x16xf32> to vector<16xf32>
    %59 = vector.shape_cast %58 : vector<16xf32> to vector<16x1xf32>
    %60 = vector.broadcast %57 : vector<16x1xf32> to vector<16x16xf32>
    %61 = arith.subf %55, %60 : vector<16x16xf32>
    %62 = arith.subf %59, %57 : vector<16x1xf32>
    %cst_44 = arith.constant 9.99999971E-10 : f32
    %63 = vector.broadcast %cst_44 : f32 to vector<16x1xf32>
    %64 = arith.addf %62, %63 : vector<16x1xf32>
    %65 = vector.broadcast %64 : vector<16x1xf32> to vector<16x16xf32>
    %66 = arith.divf %61, %65 : vector<16x16xf32>
    %cst_45 = arith.constant 9.99999971E-10 : f32
    %67 = vector.broadcast %cst_45 : f32 to vector<16x16xf32>
    %68 = arith.addf %55, %67 : vector<16x16xf32>
    %69 = arith.divf %66, %68 : vector<16x16xf32>
    %70 = arith.mulf %48, %69 : vector<16x16xf32>
    %71 = arith.mulf %51, %69 : vector<16x16xf32>
    %cst_46 = arith.constant dense<0.000000e+00> : vector<16x16xf32>
    %72 = tpu.matmul %70, %44, %cst_46 {dimension_numbers = #tpu.dot_dimension_numbers<[1], [0], [0], [1], [0, 0, 1, 1], [], []>} : vector<16x16xf32>, vector<16x16xf32>, vector<16x16xf32> -> vector<16x16xf32>
    %cst_47 = arith.constant dense<0.000000e+00> : vector<16x16xf32>
    %73 = tpu.matmul %71, %45, %cst_47 {dimension_numbers = #tpu.dot_dimension_numbers<[1], [0], [0], [1], [0, 0, 1, 1], [], []>} : vector<16x16xf32>, vector<16x16xf32>, vector<16x16xf32> -> vector<16x16xf32>
    %74 = arith.subf %72, %73 : vector<16x16xf32>
    %cst_48 = arith.constant dense<0.000000e+00> : vector<16x16xf32>
    %75 = tpu.matmul %70, %45, %cst_48 {dimension_numbers = #tpu.dot_dimension_numbers<[1], [0], [0], [1], [0, 0, 1, 1], [], []>} : vector<16x16xf32>, vector<16x16xf32>, vector<16x16xf32> -> vector<16x16xf32>
    %cst_49 = arith.constant dense<0.000000e+00> : vector<16x16xf32>
    %76 = tpu.matmul %71, %44, %cst_49 {dimension_numbers = #tpu.dot_dimension_numbers<[1], [0], [0], [1], [0, 0, 1, 1], [], []>} : vector<16x16xf32>, vector<16x16xf32>, vector<16x16xf32> -> vector<16x16xf32>
    %77 = arith.addf %75, %76 : vector<16x16xf32>
    %78 = vector.extract_strided_slice %37 {offsets = [0, 16], sizes = [16, 16], strides = [1, 1]} : vector<16x64xf32> to vector<16x16xf32>
    %79 = vector.extract_strided_slice %37 {offsets = [0, 48], sizes = [16, 16], strides = [1, 1]} : vector<16x64xf32> to vector<16x16xf32>
    %80 = vector.extract_strided_slice %38 {offsets = [0, 16], sizes = [16, 16], strides = [1, 1]} : vector<16x64xf32> to vector<16x16xf32>
    %81 = vector.extract_strided_slice %38 {offsets = [0, 48], sizes = [16, 16], strides = [1, 1]} : vector<16x64xf32> to vector<16x16xf32>
    %82 = vector.extract_strided_slice %39 {offsets = [0, 16], sizes = [16, 16], strides = [1, 1]} : vector<16x64xf32> to vector<16x16xf32>
    %83 = vector.extract_strided_slice %39 {offsets = [0, 48], sizes = [16, 16], strides = [1, 1]} : vector<16x64xf32> to vector<16x16xf32>
    %cst_50 = arith.constant dense<0.000000e+00> : vector<16x16xf32>
    %84 = tpu.matmul %78, %80, %cst_50 {dimension_numbers = #tpu.dot_dimension_numbers<[1], [1], [0], [0], [0, 0, 1, 0], [], []>} : vector<16x16xf32>, vector<16x16xf32>, vector<16x16xf32> -> vector<16x16xf32>
    %cst_51 = arith.constant dense<0.000000e+00> : vector<16x16xf32>
    %85 = tpu.matmul %79, %81, %cst_51 {dimension_numbers = #tpu.dot_dimension_numbers<[1], [1], [0], [0], [0, 0, 1, 0], [], []>} : vector<16x16xf32>, vector<16x16xf32>, vector<16x16xf32> -> vector<16x16xf32>
    %86 = arith.subf %84, %85 : vector<16x16xf32>
    %cst_52 = arith.constant dense<0.000000e+00> : vector<16x16xf32>
    %87 = tpu.matmul %78, %81, %cst_52 {dimension_numbers = #tpu.dot_dimension_numbers<[1], [1], [0], [0], [0, 0, 1, 0], [], []>} : vector<16x16xf32>, vector<16x16xf32>, vector<16x16xf32> -> vector<16x16xf32>
    %cst_53 = arith.constant dense<0.000000e+00> : vector<16x16xf32>
    %88 = tpu.matmul %79, %80, %cst_53 {dimension_numbers = #tpu.dot_dimension_numbers<[1], [1], [0], [0], [0, 0, 1, 0], [], []>} : vector<16x16xf32>, vector<16x16xf32>, vector<16x16xf32> -> vector<16x16xf32>
    %89 = arith.addf %87, %88 : vector<16x16xf32>
    %90 = arith.mulf %86, %86 : vector<16x16xf32>
    %91 = arith.mulf %89, %89 : vector<16x16xf32>
    %92 = arith.addf %90, %91 : vector<16x16xf32>
    %93 = math.sqrt %92 : vector<16x16xf32>
    %cst_54 = arith.constant dense<0x7F800000> : vector<16xf32>
    %94 = vector.multi_reduction <minimumf>, %93, %cst_54 [1] : vector<16x16xf32> to vector<16xf32>
    %95 = vector.shape_cast %94 : vector<16xf32> to vector<16x1xf32>
    %cst_55 = arith.constant dense<0xFF800000> : vector<16xf32>
    %96 = vector.multi_reduction <maximumf>, %93, %cst_55 [1] : vector<16x16xf32> to vector<16xf32>
    %97 = vector.shape_cast %96 : vector<16xf32> to vector<16x1xf32>
    %98 = vector.broadcast %95 : vector<16x1xf32> to vector<16x16xf32>
    %99 = arith.subf %93, %98 : vector<16x16xf32>
    %100 = arith.subf %97, %95 : vector<16x1xf32>
    %cst_56 = arith.constant 9.99999971E-10 : f32
    %101 = vector.broadcast %cst_56 : f32 to vector<16x1xf32>
    %102 = arith.addf %100, %101 : vector<16x1xf32>
    %103 = vector.broadcast %102 : vector<16x1xf32> to vector<16x16xf32>
    %104 = arith.divf %99, %103 : vector<16x16xf32>
    %cst_57 = arith.constant 9.99999971E-10 : f32
    %105 = vector.broadcast %cst_57 : f32 to vector<16x16xf32>
    %106 = arith.addf %93, %105 : vector<16x16xf32>
    %107 = arith.divf %104, %106 : vector<16x16xf32>
    %108 = arith.mulf %86, %107 : vector<16x16xf32>
    %109 = arith.mulf %89, %107 : vector<16x16xf32>
    %cst_58 = arith.constant dense<0.000000e+00> : vector<16x16xf32>
    %110 = tpu.matmul %108, %82, %cst_58 {dimension_numbers = #tpu.dot_dimension_numbers<[1], [0], [0], [1], [0, 0, 1, 1], [], []>} : vector<16x16xf32>, vector<16x16xf32>, vector<16x16xf32> -> vector<16x16xf32>
    %cst_59 = arith.constant dense<0.000000e+00> : vector<16x16xf32>
    %111 = tpu.matmul %109, %83, %cst_59 {dimension_numbers = #tpu.dot_dimension_numbers<[1], [0], [0], [1], [0, 0, 1, 1], [], []>} : vector<16x16xf32>, vector<16x16xf32>, vector<16x16xf32> -> vector<16x16xf32>
    %112 = arith.subf %110, %111 : vector<16x16xf32>
    %cst_60 = arith.constant dense<0.000000e+00> : vector<16x16xf32>
    %113 = tpu.matmul %108, %83, %cst_60 {dimension_numbers = #tpu.dot_dimension_numbers<[1], [0], [0], [1], [0, 0, 1, 1], [], []>} : vector<16x16xf32>, vector<16x16xf32>, vector<16x16xf32> -> vector<16x16xf32>
    %cst_61 = arith.constant dense<0.000000e+00> : vector<16x16xf32>
    %114 = tpu.matmul %109, %82, %cst_61 {dimension_numbers = #tpu.dot_dimension_numbers<[1], [0], [0], [1], [0, 0, 1, 1], [], []>} : vector<16x16xf32>, vector<16x16xf32>, vector<16x16xf32> -> vector<16x16xf32>
    %115 = arith.addf %113, %114 : vector<16x16xf32>
    %116 = tpu.concatenate %74, %112, %77, %115 in 1 : vector<16x16xf32>, vector<16x16xf32>, vector<16x16xf32>, vector<16x16xf32> -> vector<16x64xf32>
    %cst_62 = arith.constant dense<0.000000e+00> : vector<16x64xf32>
    %117 = tpu.matmul %116, %25, %cst_62 {dimension_numbers = #tpu.dot_dimension_numbers<[1], [0], [0], [1], [0, 0, 1, 1], [], []>} : vector<16x64xf32>, vector<64x64xf32>, vector<16x64xf32> -> vector<16x64xf32>
    %118 = vector.extract_strided_slice %15 {offsets = [0, 0], sizes = [16, 64], strides = [1, 1]} : vector<32x64xf32> to vector<16x64xf32>
    %119 = vector.extract_strided_slice %16 {offsets = [0, 0], sizes = [16, 64], strides = [1, 1]} : vector<32x64xf32> to vector<16x64xf32>
    %120 = vector.extract_strided_slice %17 {offsets = [0, 0], sizes = [16, 64], strides = [1, 1]} : vector<32x64xf32> to vector<16x64xf32>
    %121 = vector.extract_strided_slice %118 {offsets = [0, 0], sizes = [16, 16], strides = [1, 1]} : vector<16x64xf32> to vector<16x16xf32>
    %122 = vector.extract_strided_slice %118 {offsets = [0, 32], sizes = [16, 16], strides = [1, 1]} : vector<16x64xf32> to vector<16x16xf32>
    %123 = vector.extract_strided_slice %119 {offsets = [0, 0], sizes = [16, 16], strides = [1, 1]} : vector<16x64xf32> to vector<16x16xf32>
    %124 = vector.extract_strided_slice %119 {offsets = [0, 32], sizes = [16, 16], strides = [1, 1]} : vector<16x64xf32> to vector<16x16xf32>
    %125 = vector.extract_strided_slice %120 {offsets = [0, 0], sizes = [16, 16], strides = [1, 1]} : vector<16x64xf32> to vector<16x16xf32>
    %126 = vector.extract_strided_slice %120 {offsets = [0, 32], sizes = [16, 16], strides = [1, 1]} : vector<16x64xf32> to vector<16x16xf32>
    %cst_63 = arith.constant dense<0.000000e+00> : vector<16x16xf32>
    %127 = tpu.matmul %121, %123, %cst_63 {dimension_numbers = #tpu.dot_dimension_numbers<[1], [1], [0], [0], [0, 0, 1, 0], [], []>} : vector<16x16xf32>, vector<16x16xf32>, vector<16x16xf32> -> vector<16x16xf32>
    %cst_64 = arith.constant dense<0.000000e+00> : vector<16x16xf32>
    %128 = tpu.matmul %122, %124, %cst_64 {dimension_numbers = #tpu.dot_dimension_numbers<[1], [1], [0], [0], [0, 0, 1, 0], [], []>} : vector<16x16xf32>, vector<16x16xf32>, vector<16x16xf32> -> vector<16x16xf32>
    %129 = arith.subf %127, %128 : vector<16x16xf32>
    %cst_65 = arith.constant dense<0.000000e+00> : vector<16x16xf32>
    %130 = tpu.matmul %121, %124, %cst_65 {dimension_numbers = #tpu.dot_dimension_numbers<[1], [1], [0], [0], [0, 0, 1, 0], [], []>} : vector<16x16xf32>, vector<16x16xf32>, vector<16x16xf32> -> vector<16x16xf32>
    %cst_66 = arith.constant dense<0.000000e+00> : vector<16x16xf32>
    %131 = tpu.matmul %122, %123, %cst_66 {dimension_numbers = #tpu.dot_dimension_numbers<[1], [1], [0], [0], [0, 0, 1, 0], [], []>} : vector<16x16xf32>, vector<16x16xf32>, vector<16x16xf32> -> vector<16x16xf32>
    %132 = arith.addf %130, %131 : vector<16x16xf32>
    %133 = arith.mulf %129, %129 : vector<16x16xf32>
    %134 = arith.mulf %132, %132 : vector<16x16xf32>
    %135 = arith.addf %133, %134 : vector<16x16xf32>
    %136 = math.sqrt %135 : vector<16x16xf32>
    %cst_67 = arith.constant dense<0x7F800000> : vector<16xf32>
    %137 = vector.multi_reduction <minimumf>, %136, %cst_67 [1] : vector<16x16xf32> to vector<16xf32>
    %138 = vector.shape_cast %137 : vector<16xf32> to vector<16x1xf32>
    %cst_68 = arith.constant dense<0xFF800000> : vector<16xf32>
    %139 = vector.multi_reduction <maximumf>, %136, %cst_68 [1] : vector<16x16xf32> to vector<16xf32>
    %140 = vector.shape_cast %139 : vector<16xf32> to vector<16x1xf32>
    %141 = vector.broadcast %138 : vector<16x1xf32> to vector<16x16xf32>
    %142 = arith.subf %136, %141 : vector<16x16xf32>
    %143 = arith.subf %140, %138 : vector<16x1xf32>
    %cst_69 = arith.constant 9.99999971E-10 : f32
    %144 = vector.broadcast %cst_69 : f32 to vector<16x1xf32>
    %145 = arith.addf %143, %144 : vector<16x1xf32>
    %146 = vector.broadcast %145 : vector<16x1xf32> to vector<16x16xf32>
    %147 = arith.divf %142, %146 : vector<16x16xf32>
    %cst_70 = arith.constant 9.99999971E-10 : f32
    %148 = vector.broadcast %cst_70 : f32 to vector<16x16xf32>
    %149 = arith.addf %136, %148 : vector<16x16xf32>
    %150 = arith.divf %147, %149 : vector<16x16xf32>
    %151 = arith.mulf %129, %150 : vector<16x16xf32>
    %152 = arith.mulf %132, %150 : vector<16x16xf32>
    %cst_71 = arith.constant dense<0.000000e+00> : vector<16x16xf32>
    %153 = tpu.matmul %151, %125, %cst_71 {dimension_numbers = #tpu.dot_dimension_numbers<[1], [0], [0], [1], [0, 0, 1, 1], [], []>} : vector<16x16xf32>, vector<16x16xf32>, vector<16x16xf32> -> vector<16x16xf32>
    %cst_72 = arith.constant dense<0.000000e+00> : vector<16x16xf32>
    %154 = tpu.matmul %152, %126, %cst_72 {dimension_numbers = #tpu.dot_dimension_numbers<[1], [0], [0], [1], [0, 0, 1, 1], [], []>} : vector<16x16xf32>, vector<16x16xf32>, vector<16x16xf32> -> vector<16x16xf32>
    %155 = arith.subf %153, %154 : vector<16x16xf32>
    %cst_73 = arith.constant dense<0.000000e+00> : vector<16x16xf32>
    %156 = tpu.matmul %151, %126, %cst_73 {dimension_numbers = #tpu.dot_dimension_numbers<[1], [0], [0], [1], [0, 0, 1, 1], [], []>} : vector<16x16xf32>, vector<16x16xf32>, vector<16x16xf32> -> vector<16x16xf32>
    %cst_74 = arith.constant dense<0.000000e+00> : vector<16x16xf32>
    %157 = tpu.matmul %152, %125, %cst_74 {dimension_numbers = #tpu.dot_dimension_numbers<[1], [0], [0], [1], [0, 0, 1, 1], [], []>} : vector<16x16xf32>, vector<16x16xf32>, vector<16x16xf32> -> vector<16x16xf32>
    %158 = arith.addf %156, %157 : vector<16x16xf32>
    %159 = vector.extract_strided_slice %118 {offsets = [0, 16], sizes = [16, 16], strides = [1, 1]} : vector<16x64xf32> to vector<16x16xf32>
    %160 = vector.extract_strided_slice %118 {offsets = [0, 48], sizes = [16, 16], strides = [1, 1]} : vector<16x64xf32> to vector<16x16xf32>
    %161 = vector.extract_strided_slice %119 {offsets = [0, 16], sizes = [16, 16], strides = [1, 1]} : vector<16x64xf32> to vector<16x16xf32>
    %162 = vector.extract_strided_slice %119 {offsets = [0, 48], sizes = [16, 16], strides = [1, 1]} : vector<16x64xf32> to vector<16x16xf32>
    %163 = vector.extract_strided_slice %120 {offsets = [0, 16], sizes = [16, 16], strides = [1, 1]} : vector<16x64xf32> to vector<16x16xf32>
    %164 = vector.extract_strided_slice %120 {offsets = [0, 48], sizes = [16, 16], strides = [1, 1]} : vector<16x64xf32> to vector<16x16xf32>
    %cst_75 = arith.constant dense<0.000000e+00> : vector<16x16xf32>
    %165 = tpu.matmul %159, %161, %cst_75 {dimension_numbers = #tpu.dot_dimension_numbers<[1], [1], [0], [0], [0, 0, 1, 0], [], []>} : vector<16x16xf32>, vector<16x16xf32>, vector<16x16xf32> -> vector<16x16xf32>
    %cst_76 = arith.constant dense<0.000000e+00> : vector<16x16xf32>
    %166 = tpu.matmul %160, %162, %cst_76 {dimension_numbers = #tpu.dot_dimension_numbers<[1], [1], [0], [0], [0, 0, 1, 0], [], []>} : vector<16x16xf32>, vector<16x16xf32>, vector<16x16xf32> -> vector<16x16xf32>
    %167 = arith.subf %165, %166 : vector<16x16xf32>
    %cst_77 = arith.constant dense<0.000000e+00> : vector<16x16xf32>
    %168 = tpu.matmul %159, %162, %cst_77 {dimension_numbers = #tpu.dot_dimension_numbers<[1], [1], [0], [0], [0, 0, 1, 0], [], []>} : vector<16x16xf32>, vector<16x16xf32>, vector<16x16xf32> -> vector<16x16xf32>
    %cst_78 = arith.constant dense<0.000000e+00> : vector<16x16xf32>
    %169 = tpu.matmul %160, %161, %cst_78 {dimension_numbers = #tpu.dot_dimension_numbers<[1], [1], [0], [0], [0, 0, 1, 0], [], []>} : vector<16x16xf32>, vector<16x16xf32>, vector<16x16xf32> -> vector<16x16xf32>
    %170 = arith.addf %168, %169 : vector<16x16xf32>
    %171 = arith.mulf %167, %167 : vector<16x16xf32>
    %172 = arith.mulf %170, %170 : vector<16x16xf32>
    %173 = arith.addf %171, %172 : vector<16x16xf32>
    %174 = math.sqrt %173 : vector<16x16xf32>
    %cst_79 = arith.constant dense<0x7F800000> : vector<16xf32>
    %175 = vector.multi_reduction <minimumf>, %174, %cst_79 [1] : vector<16x16xf32> to vector<16xf32>
    %176 = vector.shape_cast %175 : vector<16xf32> to vector<16x1xf32>
    %cst_80 = arith.constant dense<0xFF800000> : vector<16xf32>
    %177 = vector.multi_reduction <maximumf>, %174, %cst_80 [1] : vector<16x16xf32> to vector<16xf32>
    %178 = vector.shape_cast %177 : vector<16xf32> to vector<16x1xf32>
    %179 = vector.broadcast %176 : vector<16x1xf32> to vector<16x16xf32>
    %180 = arith.subf %174, %179 : vector<16x16xf32>
    %181 = arith.subf %178, %176 : vector<16x1xf32>
    %cst_81 = arith.constant 9.99999971E-10 : f32
    %182 = vector.broadcast %cst_81 : f32 to vector<16x1xf32>
    %183 = arith.addf %181, %182 : vector<16x1xf32>
    %184 = vector.broadcast %183 : vector<16x1xf32> to vector<16x16xf32>
    %185 = arith.divf %180, %184 : vector<16x16xf32>
    %cst_82 = arith.constant 9.99999971E-10 : f32
    %186 = vector.broadcast %cst_82 : f32 to vector<16x16xf32>
    %187 = arith.addf %174, %186 : vector<16x16xf32>
    %188 = arith.divf %185, %187 : vector<16x16xf32>
    %189 = arith.mulf %167, %188 : vector<16x16xf32>
    %190 = arith.mulf %170, %188 : vector<16x16xf32>
    %cst_83 = arith.constant dense<0.000000e+00> : vector<16x16xf32>
    %191 = tpu.matmul %189, %163, %cst_83 {dimension_numbers = #tpu.dot_dimension_numbers<[1], [0], [0], [1], [0, 0, 1, 1], [], []>} : vector<16x16xf32>, vector<16x16xf32>, vector<16x16xf32> -> vector<16x16xf32>
    %cst_84 = arith.constant dense<0.000000e+00> : vector<16x16xf32>
    %192 = tpu.matmul %190, %164, %cst_84 {dimension_numbers = #tpu.dot_dimension_numbers<[1], [0], [0], [1], [0, 0, 1, 1], [], []>} : vector<16x16xf32>, vector<16x16xf32>, vector<16x16xf32> -> vector<16x16xf32>
    %193 = arith.subf %191, %192 : vector<16x16xf32>
    %cst_85 = arith.constant dense<0.000000e+00> : vector<16x16xf32>
    %194 = tpu.matmul %189, %164, %cst_85 {dimension_numbers = #tpu.dot_dimension_numbers<[1], [0], [0], [1], [0, 0, 1, 1], [], []>} : vector<16x16xf32>, vector<16x16xf32>, vector<16x16xf32> -> vector<16x16xf32>
    %cst_86 = arith.constant dense<0.000000e+00> : vector<16x16xf32>
    %195 = tpu.matmul %190, %163, %cst_86 {dimension_numbers = #tpu.dot_dimension_numbers<[1], [0], [0], [1], [0, 0, 1, 1], [], []>} : vector<16x16xf32>, vector<16x16xf32>, vector<16x16xf32> -> vector<16x16xf32>
    %196 = arith.addf %194, %195 : vector<16x16xf32>
    %197 = tpu.concatenate %155, %193, %158, %196 in 1 : vector<16x16xf32>, vector<16x16xf32>, vector<16x16xf32>, vector<16x16xf32> -> vector<16x64xf32>
    %cst_87 = arith.constant dense<0.000000e+00> : vector<16x64xf32>
    %198 = tpu.matmul %197, %27, %cst_87 {dimension_numbers = #tpu.dot_dimension_numbers<[1], [0], [0], [1], [0, 0, 1, 1], [], []>} : vector<16x64xf32>, vector<64x64xf32>, vector<16x64xf32> -> vector<16x64xf32>
    %199 = vector.extract_strided_slice %18 {offsets = [0, 0], sizes = [16, 64], strides = [1, 1]} : vector<32x64xf32> to vector<16x64xf32>
    %200 = vector.extract_strided_slice %19 {offsets = [0, 0], sizes = [16, 64], strides = [1, 1]} : vector<32x64xf32> to vector<16x64xf32>
    %201 = vector.extract_strided_slice %20 {offsets = [0, 0], sizes = [16, 64], strides = [1, 1]} : vector<32x64xf32> to vector<16x64xf32>
    %202 = vector.extract_strided_slice %199 {offsets = [0, 0], sizes = [16, 16], strides = [1, 1]} : vector<16x64xf32> to vector<16x16xf32>
    %203 = vector.extract_strided_slice %199 {offsets = [0, 32], sizes = [16, 16], strides = [1, 1]} : vector<16x64xf32> to vector<16x16xf32>
    %204 = vector.extract_strided_slice %200 {offsets = [0, 0], sizes = [16, 16], strides = [1, 1]} : vector<16x64xf32> to vector<16x16xf32>
    %205 = vector.extract_strided_slice %200 {offsets = [0, 32], sizes = [16, 16], strides = [1, 1]} : vector<16x64xf32> to vector<16x16xf32>
    %206 = vector.extract_strided_slice %201 {offsets = [0, 0], sizes = [16, 16], strides = [1, 1]} : vector<16x64xf32> to vector<16x16xf32>
    %207 = vector.extract_strided_slice %201 {offsets = [0, 32], sizes = [16, 16], strides = [1, 1]} : vector<16x64xf32> to vector<16x16xf32>
    %cst_88 = arith.constant dense<0.000000e+00> : vector<16x16xf32>
    %208 = tpu.matmul %202, %204, %cst_88 {dimension_numbers = #tpu.dot_dimension_numbers<[1], [1], [0], [0], [0, 0, 1, 0], [], []>} : vector<16x16xf32>, vector<16x16xf32>, vector<16x16xf32> -> vector<16x16xf32>
    %cst_89 = arith.constant dense<0.000000e+00> : vector<16x16xf32>
    %209 = tpu.matmul %203, %205, %cst_89 {dimension_numbers = #tpu.dot_dimension_numbers<[1], [1], [0], [0], [0, 0, 1, 0], [], []>} : vector<16x16xf32>, vector<16x16xf32>, vector<16x16xf32> -> vector<16x16xf32>
    %210 = arith.subf %208, %209 : vector<16x16xf32>
    %cst_90 = arith.constant dense<0.000000e+00> : vector<16x16xf32>
    %211 = tpu.matmul %202, %205, %cst_90 {dimension_numbers = #tpu.dot_dimension_numbers<[1], [1], [0], [0], [0, 0, 1, 0], [], []>} : vector<16x16xf32>, vector<16x16xf32>, vector<16x16xf32> -> vector<16x16xf32>
    %cst_91 = arith.constant dense<0.000000e+00> : vector<16x16xf32>
    %212 = tpu.matmul %203, %204, %cst_91 {dimension_numbers = #tpu.dot_dimension_numbers<[1], [1], [0], [0], [0, 0, 1, 0], [], []>} : vector<16x16xf32>, vector<16x16xf32>, vector<16x16xf32> -> vector<16x16xf32>
    %213 = arith.addf %211, %212 : vector<16x16xf32>
    %214 = arith.mulf %210, %210 : vector<16x16xf32>
    %215 = arith.mulf %213, %213 : vector<16x16xf32>
    %216 = arith.addf %214, %215 : vector<16x16xf32>
    %217 = math.sqrt %216 : vector<16x16xf32>
    %cst_92 = arith.constant dense<0x7F800000> : vector<16xf32>
    %218 = vector.multi_reduction <minimumf>, %217, %cst_92 [1] : vector<16x16xf32> to vector<16xf32>
    %219 = vector.shape_cast %218 : vector<16xf32> to vector<16x1xf32>
    %cst_93 = arith.constant dense<0xFF800000> : vector<16xf32>
    %220 = vector.multi_reduction <maximumf>, %217, %cst_93 [1] : vector<16x16xf32> to vector<16xf32>
    %221 = vector.shape_cast %220 : vector<16xf32> to vector<16x1xf32>
    %222 = vector.broadcast %219 : vector<16x1xf32> to vector<16x16xf32>
    %223 = arith.subf %217, %222 : vector<16x16xf32>
    %224 = arith.subf %221, %219 : vector<16x1xf32>
    %cst_94 = arith.constant 9.99999971E-10 : f32
    %225 = vector.broadcast %cst_94 : f32 to vector<16x1xf32>
    %226 = arith.addf %224, %225 : vector<16x1xf32>
    %227 = vector.broadcast %226 : vector<16x1xf32> to vector<16x16xf32>
    %228 = arith.divf %223, %227 : vector<16x16xf32>
    %cst_95 = arith.constant 9.99999971E-10 : f32
    %229 = vector.broadcast %cst_95 : f32 to vector<16x16xf32>
    %230 = arith.addf %217, %229 : vector<16x16xf32>
    %231 = arith.divf %228, %230 : vector<16x16xf32>
    %232 = arith.mulf %210, %231 : vector<16x16xf32>
    %233 = arith.mulf %213, %231 : vector<16x16xf32>
    %cst_96 = arith.constant dense<0.000000e+00> : vector<16x16xf32>
    %234 = tpu.matmul %232, %206, %cst_96 {dimension_numbers = #tpu.dot_dimension_numbers<[1], [0], [0], [1], [0, 0, 1, 1], [], []>} : vector<16x16xf32>, vector<16x16xf32>, vector<16x16xf32> -> vector<16x16xf32>
    %cst_97 = arith.constant dense<0.000000e+00> : vector<16x16xf32>
    %235 = tpu.matmul %233, %207, %cst_97 {dimension_numbers = #tpu.dot_dimension_numbers<[1], [0], [0], [1], [0, 0, 1, 1], [], []>} : vector<16x16xf32>, vector<16x16xf32>, vector<16x16xf32> -> vector<16x16xf32>
    %236 = arith.subf %234, %235 : vector<16x16xf32>
    %cst_98 = arith.constant dense<0.000000e+00> : vector<16x16xf32>
    %237 = tpu.matmul %232, %207, %cst_98 {dimension_numbers = #tpu.dot_dimension_numbers<[1], [0], [0], [1], [0, 0, 1, 1], [], []>} : vector<16x16xf32>, vector<16x16xf32>, vector<16x16xf32> -> vector<16x16xf32>
    %cst_99 = arith.constant dense<0.000000e+00> : vector<16x16xf32>
    %238 = tpu.matmul %233, %206, %cst_99 {dimension_numbers = #tpu.dot_dimension_numbers<[1], [0], [0], [1], [0, 0, 1, 1], [], []>} : vector<16x16xf32>, vector<16x16xf32>, vector<16x16xf32> -> vector<16x16xf32>
    %239 = arith.addf %237, %238 : vector<16x16xf32>
    %240 = vector.extract_strided_slice %199 {offsets = [0, 16], sizes = [16, 16], strides = [1, 1]} : vector<16x64xf32> to vector<16x16xf32>
    %241 = vector.extract_strided_slice %199 {offsets = [0, 48], sizes = [16, 16], strides = [1, 1]} : vector<16x64xf32> to vector<16x16xf32>
    %242 = vector.extract_strided_slice %200 {offsets = [0, 16], sizes = [16, 16], strides = [1, 1]} : vector<16x64xf32> to vector<16x16xf32>
    %243 = vector.extract_strided_slice %200 {offsets = [0, 48], sizes = [16, 16], strides = [1, 1]} : vector<16x64xf32> to vector<16x16xf32>
    %244 = vector.extract_strided_slice %201 {offsets = [0, 16], sizes = [16, 16], strides = [1, 1]} : vector<16x64xf32> to vector<16x16xf32>
    %245 = vector.extract_strided_slice %201 {offsets = [0, 48], sizes = [16, 16], strides = [1, 1]} : vector<16x64xf32> to vector<16x16xf32>
    %cst_100 = arith.constant dense<0.000000e+00> : vector<16x16xf32>
    %246 = tpu.matmul %240, %242, %cst_100 {dimension_numbers = #tpu.dot_dimension_numbers<[1], [1], [0], [0], [0, 0, 1, 0], [], []>} : vector<16x16xf32>, vector<16x16xf32>, vector<16x16xf32> -> vector<16x16xf32>
    %cst_101 = arith.constant dense<0.000000e+00> : vector<16x16xf32>
    %247 = tpu.matmul %241, %243, %cst_101 {dimension_numbers = #tpu.dot_dimension_numbers<[1], [1], [0], [0], [0, 0, 1, 0], [], []>} : vector<16x16xf32>, vector<16x16xf32>, vector<16x16xf32> -> vector<16x16xf32>
    %248 = arith.subf %246, %247 : vector<16x16xf32>
    %cst_102 = arith.constant dense<0.000000e+00> : vector<16x16xf32>
    %249 = tpu.matmul %240, %243, %cst_102 {dimension_numbers = #tpu.dot_dimension_numbers<[1], [1], [0], [0], [0, 0, 1, 0], [], []>} : vector<16x16xf32>, vector<16x16xf32>, vector<16x16xf32> -> vector<16x16xf32>
    %cst_103 = arith.constant dense<0.000000e+00> : vector<16x16xf32>
    %250 = tpu.matmul %241, %242, %cst_103 {dimension_numbers = #tpu.dot_dimension_numbers<[1], [1], [0], [0], [0, 0, 1, 0], [], []>} : vector<16x16xf32>, vector<16x16xf32>, vector<16x16xf32> -> vector<16x16xf32>
    %251 = arith.addf %249, %250 : vector<16x16xf32>
    %252 = arith.mulf %248, %248 : vector<16x16xf32>
    %253 = arith.mulf %251, %251 : vector<16x16xf32>
    %254 = arith.addf %252, %253 : vector<16x16xf32>
    %255 = math.sqrt %254 : vector<16x16xf32>
    %cst_104 = arith.constant dense<0x7F800000> : vector<16xf32>
    %256 = vector.multi_reduction <minimumf>, %255, %cst_104 [1] : vector<16x16xf32> to vector<16xf32>
    %257 = vector.shape_cast %256 : vector<16xf32> to vector<16x1xf32>
    %cst_105 = arith.constant dense<0xFF800000> : vector<16xf32>
    %258 = vector.multi_reduction <maximumf>, %255, %cst_105 [1] : vector<16x16xf32> to vector<16xf32>
    %259 = vector.shape_cast %258 : vector<16xf32> to vector<16x1xf32>
    %260 = vector.broadcast %257 : vector<16x1xf32> to vector<16x16xf32>
    %261 = arith.subf %255, %260 : vector<16x16xf32>
    %262 = arith.subf %259, %257 : vector<16x1xf32>
    %cst_106 = arith.constant 9.99999971E-10 : f32
    %263 = vector.broadcast %cst_106 : f32 to vector<16x1xf32>
    %264 = arith.addf %262, %263 : vector<16x1xf32>
    %265 = vector.broadcast %264 : vector<16x1xf32> to vector<16x16xf32>
    %266 = arith.divf %261, %265 : vector<16x16xf32>
    %cst_107 = arith.constant 9.99999971E-10 : f32
    %267 = vector.broadcast %cst_107 : f32 to vector<16x16xf32>
    %268 = arith.addf %255, %267 : vector<16x16xf32>
    %269 = arith.divf %266, %268 : vector<16x16xf32>
    %270 = arith.mulf %248, %269 : vector<16x16xf32>
    %271 = arith.mulf %251, %269 : vector<16x16xf32>
    %cst_108 = arith.constant dense<0.000000e+00> : vector<16x16xf32>
    %272 = tpu.matmul %270, %244, %cst_108 {dimension_numbers = #tpu.dot_dimension_numbers<[1], [0], [0], [1], [0, 0, 1, 1], [], []>} : vector<16x16xf32>, vector<16x16xf32>, vector<16x16xf32> -> vector<16x16xf32>
    %cst_109 = arith.constant dense<0.000000e+00> : vector<16x16xf32>
    %273 = tpu.matmul %271, %245, %cst_109 {dimension_numbers = #tpu.dot_dimension_numbers<[1], [0], [0], [1], [0, 0, 1, 1], [], []>} : vector<16x16xf32>, vector<16x16xf32>, vector<16x16xf32> -> vector<16x16xf32>
    %274 = arith.subf %272, %273 : vector<16x16xf32>
    %cst_110 = arith.constant dense<0.000000e+00> : vector<16x16xf32>
    %275 = tpu.matmul %270, %245, %cst_110 {dimension_numbers = #tpu.dot_dimension_numbers<[1], [0], [0], [1], [0, 0, 1, 1], [], []>} : vector<16x16xf32>, vector<16x16xf32>, vector<16x16xf32> -> vector<16x16xf32>
    %cst_111 = arith.constant dense<0.000000e+00> : vector<16x16xf32>
    %276 = tpu.matmul %271, %244, %cst_111 {dimension_numbers = #tpu.dot_dimension_numbers<[1], [0], [0], [1], [0, 0, 1, 1], [], []>} : vector<16x16xf32>, vector<16x16xf32>, vector<16x16xf32> -> vector<16x16xf32>
    %277 = arith.addf %275, %276 : vector<16x16xf32>
    %278 = tpu.concatenate %236, %274, %239, %277 in 1 : vector<16x16xf32>, vector<16x16xf32>, vector<16x16xf32>, vector<16x16xf32> -> vector<16x64xf32>
    %cst_112 = arith.constant dense<0.000000e+00> : vector<16x64xf32>
    %279 = tpu.matmul %278, %29, %cst_112 {dimension_numbers = #tpu.dot_dimension_numbers<[1], [0], [0], [1], [0, 0, 1, 1], [], []>} : vector<16x64xf32>, vector<64x64xf32>, vector<16x64xf32> -> vector<16x64xf32>
    %280 = vector.extract_strided_slice %21 {offsets = [0, 0], sizes = [16, 64], strides = [1, 1]} : vector<32x64xf32> to vector<16x64xf32>
    %281 = vector.extract_strided_slice %22 {offsets = [0, 0], sizes = [16, 64], strides = [1, 1]} : vector<32x64xf32> to vector<16x64xf32>
    %282 = vector.extract_strided_slice %23 {offsets = [0, 0], sizes = [16, 64], strides = [1, 1]} : vector<32x64xf32> to vector<16x64xf32>
    %283 = vector.extract_strided_slice %280 {offsets = [0, 0], sizes = [16, 16], strides = [1, 1]} : vector<16x64xf32> to vector<16x16xf32>
    %284 = vector.extract_strided_slice %280 {offsets = [0, 32], sizes = [16, 16], strides = [1, 1]} : vector<16x64xf32> to vector<16x16xf32>
    %285 = vector.extract_strided_slice %281 {offsets = [0, 0], sizes = [16, 16], strides = [1, 1]} : vector<16x64xf32> to vector<16x16xf32>
    %286 = vector.extract_strided_slice %281 {offsets = [0, 32], sizes = [16, 16], strides = [1, 1]} : vector<16x64xf32> to vector<16x16xf32>
    %287 = vector.extract_strided_slice %282 {offsets = [0, 0], sizes = [16, 16], strides = [1, 1]} : vector<16x64xf32> to vector<16x16xf32>
    %288 = vector.extract_strided_slice %282 {offsets = [0, 32], sizes = [16, 16], strides = [1, 1]} : vector<16x64xf32> to vector<16x16xf32>
    %cst_113 = arith.constant dense<0.000000e+00> : vector<16x16xf32>
    %289 = tpu.matmul %283, %285, %cst_113 {dimension_numbers = #tpu.dot_dimension_numbers<[1], [1], [0], [0], [0, 0, 1, 0], [], []>} : vector<16x16xf32>, vector<16x16xf32>, vector<16x16xf32> -> vector<16x16xf32>
    %cst_114 = arith.constant dense<0.000000e+00> : vector<16x16xf32>
    %290 = tpu.matmul %284, %286, %cst_114 {dimension_numbers = #tpu.dot_dimension_numbers<[1], [1], [0], [0], [0, 0, 1, 0], [], []>} : vector<16x16xf32>, vector<16x16xf32>, vector<16x16xf32> -> vector<16x16xf32>
    %291 = arith.subf %289, %290 : vector<16x16xf32>
    %cst_115 = arith.constant dense<0.000000e+00> : vector<16x16xf32>
    %292 = tpu.matmul %283, %286, %cst_115 {dimension_numbers = #tpu.dot_dimension_numbers<[1], [1], [0], [0], [0, 0, 1, 0], [], []>} : vector<16x16xf32>, vector<16x16xf32>, vector<16x16xf32> -> vector<16x16xf32>
    %cst_116 = arith.constant dense<0.000000e+00> : vector<16x16xf32>
    %293 = tpu.matmul %284, %285, %cst_116 {dimension_numbers = #tpu.dot_dimension_numbers<[1], [1], [0], [0], [0, 0, 1, 0], [], []>} : vector<16x16xf32>, vector<16x16xf32>, vector<16x16xf32> -> vector<16x16xf32>
    %294 = arith.addf %292, %293 : vector<16x16xf32>
    %295 = arith.mulf %291, %291 : vector<16x16xf32>
    %296 = arith.mulf %294, %294 : vector<16x16xf32>
    %297 = arith.addf %295, %296 : vector<16x16xf32>
    %298 = math.sqrt %297 : vector<16x16xf32>
    %cst_117 = arith.constant dense<0x7F800000> : vector<16xf32>
    %299 = vector.multi_reduction <minimumf>, %298, %cst_117 [1] : vector<16x16xf32> to vector<16xf32>
    %300 = vector.shape_cast %299 : vector<16xf32> to vector<16x1xf32>
    %cst_118 = arith.constant dense<0xFF800000> : vector<16xf32>
    %301 = vector.multi_reduction <maximumf>, %298, %cst_118 [1] : vector<16x16xf32> to vector<16xf32>
    %302 = vector.shape_cast %301 : vector<16xf32> to vector<16x1xf32>
    %303 = vector.broadcast %300 : vector<16x1xf32> to vector<16x16xf32>
    %304 = arith.subf %298, %303 : vector<16x16xf32>
    %305 = arith.subf %302, %300 : vector<16x1xf32>
    %cst_119 = arith.constant 9.99999971E-10 : f32
    %306 = vector.broadcast %cst_119 : f32 to vector<16x1xf32>
    %307 = arith.addf %305, %306 : vector<16x1xf32>
    %308 = vector.broadcast %307 : vector<16x1xf32> to vector<16x16xf32>
    %309 = arith.divf %304, %308 : vector<16x16xf32>
    %cst_120 = arith.constant 9.99999971E-10 : f32
    %310 = vector.broadcast %cst_120 : f32 to vector<16x16xf32>
    %311 = arith.addf %298, %310 : vector<16x16xf32>
    %312 = arith.divf %309, %311 : vector<16x16xf32>
    %313 = arith.mulf %291, %312 : vector<16x16xf32>
    %314 = arith.mulf %294, %312 : vector<16x16xf32>
    %cst_121 = arith.constant dense<0.000000e+00> : vector<16x16xf32>
    %315 = tpu.matmul %313, %287, %cst_121 {dimension_numbers = #tpu.dot_dimension_numbers<[1], [0], [0], [1], [0, 0, 1, 1], [], []>} : vector<16x16xf32>, vector<16x16xf32>, vector<16x16xf32> -> vector<16x16xf32>
    %cst_122 = arith.constant dense<0.000000e+00> : vector<16x16xf32>
    %316 = tpu.matmul %314, %288, %cst_122 {dimension_numbers = #tpu.dot_dimension_numbers<[1], [0], [0], [1], [0, 0, 1, 1], [], []>} : vector<16x16xf32>, vector<16x16xf32>, vector<16x16xf32> -> vector<16x16xf32>
    %317 = arith.subf %315, %316 : vector<16x16xf32>
    %cst_123 = arith.constant dense<0.000000e+00> : vector<16x16xf32>
    %318 = tpu.matmul %313, %288, %cst_123 {dimension_numbers = #tpu.dot_dimension_numbers<[1], [0], [0], [1], [0, 0, 1, 1], [], []>} : vector<16x16xf32>, vector<16x16xf32>, vector<16x16xf32> -> vector<16x16xf32>
    %cst_124 = arith.constant dense<0.000000e+00> : vector<16x16xf32>
    %319 = tpu.matmul %314, %287, %cst_124 {dimension_numbers = #tpu.dot_dimension_numbers<[1], [0], [0], [1], [0, 0, 1, 1], [], []>} : vector<16x16xf32>, vector<16x16xf32>, vector<16x16xf32> -> vector<16x16xf32>
    %320 = arith.addf %318, %319 : vector<16x16xf32>
    %321 = vector.extract_strided_slice %280 {offsets = [0, 16], sizes = [16, 16], strides = [1, 1]} : vector<16x64xf32> to vector<16x16xf32>
    %322 = vector.extract_strided_slice %280 {offsets = [0, 48], sizes = [16, 16], strides = [1, 1]} : vector<16x64xf32> to vector<16x16xf32>
    %323 = vector.extract_strided_slice %281 {offsets = [0, 16], sizes = [16, 16], strides = [1, 1]} : vector<16x64xf32> to vector<16x16xf32>
    %324 = vector.extract_strided_slice %281 {offsets = [0, 48], sizes = [16, 16], strides = [1, 1]} : vector<16x64xf32> to vector<16x16xf32>
    %325 = vector.extract_strided_slice %282 {offsets = [0, 16], sizes = [16, 16], strides = [1, 1]} : vector<16x64xf32> to vector<16x16xf32>
    %326 = vector.extract_strided_slice %282 {offsets = [0, 48], sizes = [16, 16], strides = [1, 1]} : vector<16x64xf32> to vector<16x16xf32>
    %cst_125 = arith.constant dense<0.000000e+00> : vector<16x16xf32>
    %327 = tpu.matmul %321, %323, %cst_125 {dimension_numbers = #tpu.dot_dimension_numbers<[1], [1], [0], [0], [0, 0, 1, 0], [], []>} : vector<16x16xf32>, vector<16x16xf32>, vector<16x16xf32> -> vector<16x16xf32>
    %cst_126 = arith.constant dense<0.000000e+00> : vector<16x16xf32>
    %328 = tpu.matmul %322, %324, %cst_126 {dimension_numbers = #tpu.dot_dimension_numbers<[1], [1], [0], [0], [0, 0, 1, 0], [], []>} : vector<16x16xf32>, vector<16x16xf32>, vector<16x16xf32> -> vector<16x16xf32>
    %329 = arith.subf %327, %328 : vector<16x16xf32>
    %cst_127 = arith.constant dense<0.000000e+00> : vector<16x16xf32>
    %330 = tpu.matmul %321, %324, %cst_127 {dimension_numbers = #tpu.dot_dimension_numbers<[1], [1], [0], [0], [0, 0, 1, 0], [], []>} : vector<16x16xf32>, vector<16x16xf32>, vector<16x16xf32> -> vector<16x16xf32>
    %cst_128 = arith.constant dense<0.000000e+00> : vector<16x16xf32>
    %331 = tpu.matmul %322, %323, %cst_128 {dimension_numbers = #tpu.dot_dimension_numbers<[1], [1], [0], [0], [0, 0, 1, 0], [], []>} : vector<16x16xf32>, vector<16x16xf32>, vector<16x16xf32> -> vector<16x16xf32>
    %332 = arith.addf %330, %331 : vector<16x16xf32>
    %333 = arith.mulf %329, %329 : vector<16x16xf32>
    %334 = arith.mulf %332, %332 : vector<16x16xf32>
    %335 = arith.addf %333, %334 : vector<16x16xf32>
    %336 = math.sqrt %335 : vector<16x16xf32>
    %cst_129 = arith.constant dense<0x7F800000> : vector<16xf32>
    %337 = vector.multi_reduction <minimumf>, %336, %cst_129 [1] : vector<16x16xf32> to vector<16xf32>
    %338 = vector.shape_cast %337 : vector<16xf32> to vector<16x1xf32>
    %cst_130 = arith.constant dense<0xFF800000> : vector<16xf32>
    %339 = vector.multi_reduction <maximumf>, %336, %cst_130 [1] : vector<16x16xf32> to vector<16xf32>
    %340 = vector.shape_cast %339 : vector<16xf32> to vector<16x1xf32>
    %341 = vector.broadcast %338 : vector<16x1xf32> to vector<16x16xf32>
    %342 = arith.subf %336, %341 : vector<16x16xf32>
    %343 = arith.subf %340, %338 : vector<16x1xf32>
    %cst_131 = arith.constant 9.99999971E-10 : f32
    %344 = vector.broadcast %cst_131 : f32 to vector<16x1xf32>
    %345 = arith.addf %343, %344 : vector<16x1xf32>
    %346 = vector.broadcast %345 : vector<16x1xf32> to vector<16x16xf32>
    %347 = arith.divf %342, %346 : vector<16x16xf32>
    %cst_132 = arith.constant 9.99999971E-10 : f32
    %348 = vector.broadcast %cst_132 : f32 to vector<16x16xf32>
    %349 = arith.addf %336, %348 : vector<16x16xf32>
    %350 = arith.divf %347, %349 : vector<16x16xf32>
    %351 = arith.mulf %329, %350 : vector<16x16xf32>
    %352 = arith.mulf %332, %350 : vector<16x16xf32>
    %cst_133 = arith.constant dense<0.000000e+00> : vector<16x16xf32>
    %353 = tpu.matmul %351, %325, %cst_133 {dimension_numbers = #tpu.dot_dimension_numbers<[1], [0], [0], [1], [0, 0, 1, 1], [], []>} : vector<16x16xf32>, vector<16x16xf32>, vector<16x16xf32> -> vector<16x16xf32>
    %cst_134 = arith.constant dense<0.000000e+00> : vector<16x16xf32>
    %354 = tpu.matmul %352, %326, %cst_134 {dimension_numbers = #tpu.dot_dimension_numbers<[1], [0], [0], [1], [0, 0, 1, 1], [], []>} : vector<16x16xf32>, vector<16x16xf32>, vector<16x16xf32> -> vector<16x16xf32>
    %355 = arith.subf %353, %354 : vector<16x16xf32>
    %cst_135 = arith.constant dense<0.000000e+00> : vector<16x16xf32>
    %356 = tpu.matmul %351, %326, %cst_135 {dimension_numbers = #tpu.dot_dimension_numbers<[1], [0], [0], [1], [0, 0, 1, 1], [], []>} : vector<16x16xf32>, vector<16x16xf32>, vector<16x16xf32> -> vector<16x16xf32>
    %cst_136 = arith.constant dense<0.000000e+00> : vector<16x16xf32>
    %357 = tpu.matmul %352, %325, %cst_136 {dimension_numbers = #tpu.dot_dimension_numbers<[1], [0], [0], [1], [0, 0, 1, 1], [], []>} : vector<16x16xf32>, vector<16x16xf32>, vector<16x16xf32> -> vector<16x16xf32>
    %358 = arith.addf %356, %357 : vector<16x16xf32>
    %359 = tpu.concatenate %317, %355, %320, %358 in 1 : vector<16x16xf32>, vector<16x16xf32>, vector<16x16xf32>, vector<16x16xf32> -> vector<16x64xf32>
    %cst_137 = arith.constant dense<0.000000e+00> : vector<16x64xf32>
    %360 = tpu.matmul %359, %31, %cst_137 {dimension_numbers = #tpu.dot_dimension_numbers<[1], [0], [0], [1], [0, 0, 1, 1], [], []>} : vector<16x64xf32>, vector<64x64xf32>, vector<16x64xf32> -> vector<16x64xf32>
    %361 = tpu.concatenate %117, %198, %279, %360 in 0 : vector<16x64xf32>, vector<16x64xf32>, vector<16x64xf32>, vector<16x64xf32> -> vector<64x64xf32>
    %cst_138 = arith.constant dense<0.000000e+00> : vector<1x64xf32>
    %362 = tpu.matmul %36, %361, %cst_138 {dimension_numbers = #tpu.dot_dimension_numbers<[1], [0], [0], [1], [0, 0, 1, 1], [], []>} : vector<1x64xf32>, vector<64x64xf32>, vector<1x64xf32> -> vector<1x64xf32>
    %cst_139 = arith.constant dense<0.000000e+00> : vector<1x64xf32>
    %363 = tpu.matmul %362, %33, %cst_139 {dimension_numbers = #tpu.dot_dimension_numbers<[1], [0], [0], [1], [0, 0, 1, 1], [], []>} : vector<1x64xf32>, vector<64x64xf32>, vector<1x64xf32> -> vector<1x64xf32>
    %364 = arith.negf %363 : vector<1x64xf32>
    %365 = math.exp %364 : vector<1x64xf32>
    %cst_140 = arith.constant 1.000000e+00 : f32
    %366 = vector.broadcast %cst_140 : f32 to vector<1x64xf32>
    %367 = arith.addf %366, %365 : vector<1x64xf32>
    %368 = arith.divf %366, %367 : vector<1x64xf32>
    %369 = vector.extract_strided_slice %368 {offsets = [0, 0], sizes = [1, 32], strides = [1, 1]} : vector<1x64xf32> to vector<1x32xf32>
    %370 = vector.extract_strided_slice %368 {offsets = [0, 32], sizes = [1, 32], strides = [1, 1]} : vector<1x64xf32> to vector<1x32xf32>
    %371 = vector.extract_strided_slice %361 {offsets = [0, 0], sizes = [64, 32], strides = [1, 1]} : vector<64x64xf32> to vector<64x32xf32>
    %372 = vector.extract_strided_slice %361 {offsets = [0, 32], sizes = [64, 32], strides = [1, 1]} : vector<64x64xf32> to vector<64x32xf32>
    %373 = vector.broadcast %369 : vector<1x32xf32> to vector<64x32xf32>
    %374 = arith.mulf %371, %373 : vector<64x32xf32>
    %375 = vector.broadcast %370 : vector<1x32xf32> to vector<64x32xf32>
    %376 = arith.mulf %372, %375 : vector<64x32xf32>
    %377 = arith.subf %374, %376 : vector<64x32xf32>
    %378 = vector.broadcast %370 : vector<1x32xf32> to vector<64x32xf32>
    %379 = arith.mulf %371, %378 : vector<64x32xf32>
    %380 = vector.broadcast %369 : vector<1x32xf32> to vector<64x32xf32>
    %381 = arith.mulf %372, %380 : vector<64x32xf32>
    %382 = arith.addf %379, %381 : vector<64x32xf32>
    %383 = tpu.concatenate %377, %382 in 1 : vector<64x32xf32>, vector<64x32xf32> -> vector<64x64xf32>
    %cst_141 = arith.constant 0.000000e+00 : f32
    %384 = vector.broadcast %cst_141 : f32 to vector<1x64xf32>
    %385 = vector.extract_strided_slice %383 {offsets = [0, 0], sizes = [63, 64], strides = [1, 1]} : vector<64x64xf32> to vector<63x64xf32>
    %386 = tpu.concatenate %384, %385 in 0 : vector<1x64xf32>, vector<63x64xf32> -> vector<64x64xf32>
    %387 = vector.extract_strided_slice %383 {offsets = [1, 0], sizes = [63, 64], strides = [1, 1]} : vector<64x64xf32> to vector<63x64xf32>
    %cst_142 = arith.constant 0.000000e+00 : f32
    %388 = vector.broadcast %cst_142 : f32 to vector<1x64xf32>
    %389 = tpu.concatenate %387, %388 in 0 : vector<63x64xf32>, vector<1x64xf32> -> vector<64x64xf32>
    %390 = tpu.concatenate %386, %383, %389 in 1 : vector<64x64xf32>, vector<64x64xf32>, vector<64x64xf32> -> vector<64x192xf32>
    %cst_143 = arith.constant dense<0.000000e+00> : vector<64x64xf32>
    %391 = tpu.matmul %390, %35, %cst_143 {dimension_numbers = #tpu.dot_dimension_numbers<[1], [0], [0], [1], [0, 0, 1, 1], [], []>} : vector<64x192xf32>, vector<192x64xf32>, vector<64x64xf32> -> vector<64x64xf32>
    %392 = vector.extract_strided_slice %12 {offsets = [16, 0], sizes = [16, 64], strides = [1, 1]} : vector<32x64xf32> to vector<16x64xf32>
    %393 = vector.extract_strided_slice %13 {offsets = [16, 0], sizes = [16, 64], strides = [1, 1]} : vector<32x64xf32> to vector<16x64xf32>
    %394 = vector.extract_strided_slice %14 {offsets = [16, 0], sizes = [16, 64], strides = [1, 1]} : vector<32x64xf32> to vector<16x64xf32>
    %395 = vector.extract_strided_slice %392 {offsets = [0, 0], sizes = [16, 16], strides = [1, 1]} : vector<16x64xf32> to vector<16x16xf32>
    %396 = vector.extract_strided_slice %392 {offsets = [0, 32], sizes = [16, 16], strides = [1, 1]} : vector<16x64xf32> to vector<16x16xf32>
    %397 = vector.extract_strided_slice %393 {offsets = [0, 0], sizes = [16, 16], strides = [1, 1]} : vector<16x64xf32> to vector<16x16xf32>
    %398 = vector.extract_strided_slice %393 {offsets = [0, 32], sizes = [16, 16], strides = [1, 1]} : vector<16x64xf32> to vector<16x16xf32>
    %399 = vector.extract_strided_slice %394 {offsets = [0, 0], sizes = [16, 16], strides = [1, 1]} : vector<16x64xf32> to vector<16x16xf32>
    %400 = vector.extract_strided_slice %394 {offsets = [0, 32], sizes = [16, 16], strides = [1, 1]} : vector<16x64xf32> to vector<16x16xf32>
    %cst_144 = arith.constant dense<0.000000e+00> : vector<16x16xf32>
    %401 = tpu.matmul %395, %397, %cst_144 {dimension_numbers = #tpu.dot_dimension_numbers<[1], [1], [0], [0], [0, 0, 1, 0], [], []>} : vector<16x16xf32>, vector<16x16xf32>, vector<16x16xf32> -> vector<16x16xf32>
    %cst_145 = arith.constant dense<0.000000e+00> : vector<16x16xf32>
    %402 = tpu.matmul %396, %398, %cst_145 {dimension_numbers = #tpu.dot_dimension_numbers<[1], [1], [0], [0], [0, 0, 1, 0], [], []>} : vector<16x16xf32>, vector<16x16xf32>, vector<16x16xf32> -> vector<16x16xf32>
    %403 = arith.subf %401, %402 : vector<16x16xf32>
    %cst_146 = arith.constant dense<0.000000e+00> : vector<16x16xf32>
    %404 = tpu.matmul %395, %398, %cst_146 {dimension_numbers = #tpu.dot_dimension_numbers<[1], [1], [0], [0], [0, 0, 1, 0], [], []>} : vector<16x16xf32>, vector<16x16xf32>, vector<16x16xf32> -> vector<16x16xf32>
    %cst_147 = arith.constant dense<0.000000e+00> : vector<16x16xf32>
    %405 = tpu.matmul %396, %397, %cst_147 {dimension_numbers = #tpu.dot_dimension_numbers<[1], [1], [0], [0], [0, 0, 1, 0], [], []>} : vector<16x16xf32>, vector<16x16xf32>, vector<16x16xf32> -> vector<16x16xf32>
    %406 = arith.addf %404, %405 : vector<16x16xf32>
    %407 = arith.mulf %403, %403 : vector<16x16xf32>
    %408 = arith.mulf %406, %406 : vector<16x16xf32>
    %409 = arith.addf %407, %408 : vector<16x16xf32>
    %410 = math.sqrt %409 : vector<16x16xf32>
    %cst_148 = arith.constant dense<0x7F800000> : vector<16xf32>
    %411 = vector.multi_reduction <minimumf>, %410, %cst_148 [1] : vector<16x16xf32> to vector<16xf32>
    %412 = vector.shape_cast %411 : vector<16xf32> to vector<16x1xf32>
    %cst_149 = arith.constant dense<0xFF800000> : vector<16xf32>
    %413 = vector.multi_reduction <maximumf>, %410, %cst_149 [1] : vector<16x16xf32> to vector<16xf32>
    %414 = vector.shape_cast %413 : vector<16xf32> to vector<16x1xf32>
    %415 = vector.broadcast %412 : vector<16x1xf32> to vector<16x16xf32>
    %416 = arith.subf %410, %415 : vector<16x16xf32>
    %417 = arith.subf %414, %412 : vector<16x1xf32>
    %cst_150 = arith.constant 9.99999971E-10 : f32
    %418 = vector.broadcast %cst_150 : f32 to vector<16x1xf32>
    %419 = arith.addf %417, %418 : vector<16x1xf32>
    %420 = vector.broadcast %419 : vector<16x1xf32> to vector<16x16xf32>
    %421 = arith.divf %416, %420 : vector<16x16xf32>
    %cst_151 = arith.constant 9.99999971E-10 : f32
    %422 = vector.broadcast %cst_151 : f32 to vector<16x16xf32>
    %423 = arith.addf %410, %422 : vector<16x16xf32>
    %424 = arith.divf %421, %423 : vector<16x16xf32>
    %425 = arith.mulf %403, %424 : vector<16x16xf32>
    %426 = arith.mulf %406, %424 : vector<16x16xf32>
    %cst_152 = arith.constant dense<0.000000e+00> : vector<16x16xf32>
    %427 = tpu.matmul %425, %399, %cst_152 {dimension_numbers = #tpu.dot_dimension_numbers<[1], [0], [0], [1], [0, 0, 1, 1], [], []>} : vector<16x16xf32>, vector<16x16xf32>, vector<16x16xf32> -> vector<16x16xf32>
    %cst_153 = arith.constant dense<0.000000e+00> : vector<16x16xf32>
    %428 = tpu.matmul %426, %400, %cst_153 {dimension_numbers = #tpu.dot_dimension_numbers<[1], [0], [0], [1], [0, 0, 1, 1], [], []>} : vector<16x16xf32>, vector<16x16xf32>, vector<16x16xf32> -> vector<16x16xf32>
    %429 = arith.subf %427, %428 : vector<16x16xf32>
    %cst_154 = arith.constant dense<0.000000e+00> : vector<16x16xf32>
    %430 = tpu.matmul %425, %400, %cst_154 {dimension_numbers = #tpu.dot_dimension_numbers<[1], [0], [0], [1], [0, 0, 1, 1], [], []>} : vector<16x16xf32>, vector<16x16xf32>, vector<16x16xf32> -> vector<16x16xf32>
    %cst_155 = arith.constant dense<0.000000e+00> : vector<16x16xf32>
    %431 = tpu.matmul %426, %399, %cst_155 {dimension_numbers = #tpu.dot_dimension_numbers<[1], [0], [0], [1], [0, 0, 1, 1], [], []>} : vector<16x16xf32>, vector<16x16xf32>, vector<16x16xf32> -> vector<16x16xf32>
    %432 = arith.addf %430, %431 : vector<16x16xf32>
    %433 = vector.extract_strided_slice %392 {offsets = [0, 16], sizes = [16, 16], strides = [1, 1]} : vector<16x64xf32> to vector<16x16xf32>
    %434 = vector.extract_strided_slice %392 {offsets = [0, 48], sizes = [16, 16], strides = [1, 1]} : vector<16x64xf32> to vector<16x16xf32>
    %435 = vector.extract_strided_slice %393 {offsets = [0, 16], sizes = [16, 16], strides = [1, 1]} : vector<16x64xf32> to vector<16x16xf32>
    %436 = vector.extract_strided_slice %393 {offsets = [0, 48], sizes = [16, 16], strides = [1, 1]} : vector<16x64xf32> to vector<16x16xf32>
    %437 = vector.extract_strided_slice %394 {offsets = [0, 16], sizes = [16, 16], strides = [1, 1]} : vector<16x64xf32> to vector<16x16xf32>
    %438 = vector.extract_strided_slice %394 {offsets = [0, 48], sizes = [16, 16], strides = [1, 1]} : vector<16x64xf32> to vector<16x16xf32>
    %cst_156 = arith.constant dense<0.000000e+00> : vector<16x16xf32>
    %439 = tpu.matmul %433, %435, %cst_156 {dimension_numbers = #tpu.dot_dimension_numbers<[1], [1], [0], [0], [0, 0, 1, 0], [], []>} : vector<16x16xf32>, vector<16x16xf32>, vector<16x16xf32> -> vector<16x16xf32>
    %cst_157 = arith.constant dense<0.000000e+00> : vector<16x16xf32>
    %440 = tpu.matmul %434, %436, %cst_157 {dimension_numbers = #tpu.dot_dimension_numbers<[1], [1], [0], [0], [0, 0, 1, 0], [], []>} : vector<16x16xf32>, vector<16x16xf32>, vector<16x16xf32> -> vector<16x16xf32>
    %441 = arith.subf %439, %440 : vector<16x16xf32>
    %cst_158 = arith.constant dense<0.000000e+00> : vector<16x16xf32>
    %442 = tpu.matmul %433, %436, %cst_158 {dimension_numbers = #tpu.dot_dimension_numbers<[1], [1], [0], [0], [0, 0, 1, 0], [], []>} : vector<16x16xf32>, vector<16x16xf32>, vector<16x16xf32> -> vector<16x16xf32>
    %cst_159 = arith.constant dense<0.000000e+00> : vector<16x16xf32>
    %443 = tpu.matmul %434, %435, %cst_159 {dimension_numbers = #tpu.dot_dimension_numbers<[1], [1], [0], [0], [0, 0, 1, 0], [], []>} : vector<16x16xf32>, vector<16x16xf32>, vector<16x16xf32> -> vector<16x16xf32>
    %444 = arith.addf %442, %443 : vector<16x16xf32>
    %445 = arith.mulf %441, %441 : vector<16x16xf32>
    %446 = arith.mulf %444, %444 : vector<16x16xf32>
    %447 = arith.addf %445, %446 : vector<16x16xf32>
    %448 = math.sqrt %447 : vector<16x16xf32>
    %cst_160 = arith.constant dense<0x7F800000> : vector<16xf32>
    %449 = vector.multi_reduction <minimumf>, %448, %cst_160 [1] : vector<16x16xf32> to vector<16xf32>
    %450 = vector.shape_cast %449 : vector<16xf32> to vector<16x1xf32>
    %cst_161 = arith.constant dense<0xFF800000> : vector<16xf32>
    %451 = vector.multi_reduction <maximumf>, %448, %cst_161 [1] : vector<16x16xf32> to vector<16xf32>
    %452 = vector.shape_cast %451 : vector<16xf32> to vector<16x1xf32>
    %453 = vector.broadcast %450 : vector<16x1xf32> to vector<16x16xf32>
    %454 = arith.subf %448, %453 : vector<16x16xf32>
    %455 = arith.subf %452, %450 : vector<16x1xf32>
    %cst_162 = arith.constant 9.99999971E-10 : f32
    %456 = vector.broadcast %cst_162 : f32 to vector<16x1xf32>
    %457 = arith.addf %455, %456 : vector<16x1xf32>
    %458 = vector.broadcast %457 : vector<16x1xf32> to vector<16x16xf32>
    %459 = arith.divf %454, %458 : vector<16x16xf32>
    %cst_163 = arith.constant 9.99999971E-10 : f32
    %460 = vector.broadcast %cst_163 : f32 to vector<16x16xf32>
    %461 = arith.addf %448, %460 : vector<16x16xf32>
    %462 = arith.divf %459, %461 : vector<16x16xf32>
    %463 = arith.mulf %441, %462 : vector<16x16xf32>
    %464 = arith.mulf %444, %462 : vector<16x16xf32>
    %cst_164 = arith.constant dense<0.000000e+00> : vector<16x16xf32>
    %465 = tpu.matmul %463, %437, %cst_164 {dimension_numbers = #tpu.dot_dimension_numbers<[1], [0], [0], [1], [0, 0, 1, 1], [], []>} : vector<16x16xf32>, vector<16x16xf32>, vector<16x16xf32> -> vector<16x16xf32>
    %cst_165 = arith.constant dense<0.000000e+00> : vector<16x16xf32>
    %466 = tpu.matmul %464, %438, %cst_165 {dimension_numbers = #tpu.dot_dimension_numbers<[1], [0], [0], [1], [0, 0, 1, 1], [], []>} : vector<16x16xf32>, vector<16x16xf32>, vector<16x16xf32> -> vector<16x16xf32>
    %467 = arith.subf %465, %466 : vector<16x16xf32>
    %cst_166 = arith.constant dense<0.000000e+00> : vector<16x16xf32>
    %468 = tpu.matmul %463, %438, %cst_166 {dimension_numbers = #tpu.dot_dimension_numbers<[1], [0], [0], [1], [0, 0, 1, 1], [], []>} : vector<16x16xf32>, vector<16x16xf32>, vector<16x16xf32> -> vector<16x16xf32>
    %cst_167 = arith.constant dense<0.000000e+00> : vector<16x16xf32>
    %469 = tpu.matmul %464, %437, %cst_167 {dimension_numbers = #tpu.dot_dimension_numbers<[1], [0], [0], [1], [0, 0, 1, 1], [], []>} : vector<16x16xf32>, vector<16x16xf32>, vector<16x16xf32> -> vector<16x16xf32>
    %470 = arith.addf %468, %469 : vector<16x16xf32>
    %471 = tpu.concatenate %429, %467, %432, %470 in 1 : vector<16x16xf32>, vector<16x16xf32>, vector<16x16xf32>, vector<16x16xf32> -> vector<16x64xf32>
    %cst_168 = arith.constant dense<0.000000e+00> : vector<16x64xf32>
    %472 = tpu.matmul %471, %25, %cst_168 {dimension_numbers = #tpu.dot_dimension_numbers<[1], [0], [0], [1], [0, 0, 1, 1], [], []>} : vector<16x64xf32>, vector<64x64xf32>, vector<16x64xf32> -> vector<16x64xf32>
    %473 = vector.extract_strided_slice %15 {offsets = [16, 0], sizes = [16, 64], strides = [1, 1]} : vector<32x64xf32> to vector<16x64xf32>
    %474 = vector.extract_strided_slice %16 {offsets = [16, 0], sizes = [16, 64], strides = [1, 1]} : vector<32x64xf32> to vector<16x64xf32>
    %475 = vector.extract_strided_slice %17 {offsets = [16, 0], sizes = [16, 64], strides = [1, 1]} : vector<32x64xf32> to vector<16x64xf32>
    %476 = vector.extract_strided_slice %473 {offsets = [0, 0], sizes = [16, 16], strides = [1, 1]} : vector<16x64xf32> to vector<16x16xf32>
    %477 = vector.extract_strided_slice %473 {offsets = [0, 32], sizes = [16, 16], strides = [1, 1]} : vector<16x64xf32> to vector<16x16xf32>
    %478 = vector.extract_strided_slice %474 {offsets = [0, 0], sizes = [16, 16], strides = [1, 1]} : vector<16x64xf32> to vector<16x16xf32>
    %479 = vector.extract_strided_slice %474 {offsets = [0, 32], sizes = [16, 16], strides = [1, 1]} : vector<16x64xf32> to vector<16x16xf32>
    %480 = vector.extract_strided_slice %475 {offsets = [0, 0], sizes = [16, 16], strides = [1, 1]} : vector<16x64xf32> to vector<16x16xf32>
    %481 = vector.extract_strided_slice %475 {offsets = [0, 32], sizes = [16, 16], strides = [1, 1]} : vector<16x64xf32> to vector<16x16xf32>
    %cst_169 = arith.constant dense<0.000000e+00> : vector<16x16xf32>
    %482 = tpu.matmul %476, %478, %cst_169 {dimension_numbers = #tpu.dot_dimension_numbers<[1], [1], [0], [0], [0, 0, 1, 0], [], []>} : vector<16x16xf32>, vector<16x16xf32>, vector<16x16xf32> -> vector<16x16xf32>
    %cst_170 = arith.constant dense<0.000000e+00> : vector<16x16xf32>
    %483 = tpu.matmul %477, %479, %cst_170 {dimension_numbers = #tpu.dot_dimension_numbers<[1], [1], [0], [0], [0, 0, 1, 0], [], []>} : vector<16x16xf32>, vector<16x16xf32>, vector<16x16xf32> -> vector<16x16xf32>
    %484 = arith.subf %482, %483 : vector<16x16xf32>
    %cst_171 = arith.constant dense<0.000000e+00> : vector<16x16xf32>
    %485 = tpu.matmul %476, %479, %cst_171 {dimension_numbers = #tpu.dot_dimension_numbers<[1], [1], [0], [0], [0, 0, 1, 0], [], []>} : vector<16x16xf32>, vector<16x16xf32>, vector<16x16xf32> -> vector<16x16xf32>
    %cst_172 = arith.constant dense<0.000000e+00> : vector<16x16xf32>
    %486 = tpu.matmul %477, %478, %cst_172 {dimension_numbers = #tpu.dot_dimension_numbers<[1], [1], [0], [0], [0, 0, 1, 0], [], []>} : vector<16x16xf32>, vector<16x16xf32>, vector<16x16xf32> -> vector<16x16xf32>
    %487 = arith.addf %485, %486 : vector<16x16xf32>
    %488 = arith.mulf %484, %484 : vector<16x16xf32>
    %489 = arith.mulf %487, %487 : vector<16x16xf32>
    %490 = arith.addf %488, %489 : vector<16x16xf32>
    %491 = math.sqrt %490 : vector<16x16xf32>
    %cst_173 = arith.constant dense<0x7F800000> : vector<16xf32>
    %492 = vector.multi_reduction <minimumf>, %491, %cst_173 [1] : vector<16x16xf32> to vector<16xf32>
    %493 = vector.shape_cast %492 : vector<16xf32> to vector<16x1xf32>
    %cst_174 = arith.constant dense<0xFF800000> : vector<16xf32>
    %494 = vector.multi_reduction <maximumf>, %491, %cst_174 [1] : vector<16x16xf32> to vector<16xf32>
    %495 = vector.shape_cast %494 : vector<16xf32> to vector<16x1xf32>
    %496 = vector.broadcast %493 : vector<16x1xf32> to vector<16x16xf32>
    %497 = arith.subf %491, %496 : vector<16x16xf32>
    %498 = arith.subf %495, %493 : vector<16x1xf32>
    %cst_175 = arith.constant 9.99999971E-10 : f32
    %499 = vector.broadcast %cst_175 : f32 to vector<16x1xf32>
    %500 = arith.addf %498, %499 : vector<16x1xf32>
    %501 = vector.broadcast %500 : vector<16x1xf32> to vector<16x16xf32>
    %502 = arith.divf %497, %501 : vector<16x16xf32>
    %cst_176 = arith.constant 9.99999971E-10 : f32
    %503 = vector.broadcast %cst_176 : f32 to vector<16x16xf32>
    %504 = arith.addf %491, %503 : vector<16x16xf32>
    %505 = arith.divf %502, %504 : vector<16x16xf32>
    %506 = arith.mulf %484, %505 : vector<16x16xf32>
    %507 = arith.mulf %487, %505 : vector<16x16xf32>
    %cst_177 = arith.constant dense<0.000000e+00> : vector<16x16xf32>
    %508 = tpu.matmul %506, %480, %cst_177 {dimension_numbers = #tpu.dot_dimension_numbers<[1], [0], [0], [1], [0, 0, 1, 1], [], []>} : vector<16x16xf32>, vector<16x16xf32>, vector<16x16xf32> -> vector<16x16xf32>
    %cst_178 = arith.constant dense<0.000000e+00> : vector<16x16xf32>
    %509 = tpu.matmul %507, %481, %cst_178 {dimension_numbers = #tpu.dot_dimension_numbers<[1], [0], [0], [1], [0, 0, 1, 1], [], []>} : vector<16x16xf32>, vector<16x16xf32>, vector<16x16xf32> -> vector<16x16xf32>
    %510 = arith.subf %508, %509 : vector<16x16xf32>
    %cst_179 = arith.constant dense<0.000000e+00> : vector<16x16xf32>
    %511 = tpu.matmul %506, %481, %cst_179 {dimension_numbers = #tpu.dot_dimension_numbers<[1], [0], [0], [1], [0, 0, 1, 1], [], []>} : vector<16x16xf32>, vector<16x16xf32>, vector<16x16xf32> -> vector<16x16xf32>
    %cst_180 = arith.constant dense<0.000000e+00> : vector<16x16xf32>
    %512 = tpu.matmul %507, %480, %cst_180 {dimension_numbers = #tpu.dot_dimension_numbers<[1], [0], [0], [1], [0, 0, 1, 1], [], []>} : vector<16x16xf32>, vector<16x16xf32>, vector<16x16xf32> -> vector<16x16xf32>
    %513 = arith.addf %511, %512 : vector<16x16xf32>
    %514 = vector.extract_strided_slice %473 {offsets = [0, 16], sizes = [16, 16], strides = [1, 1]} : vector<16x64xf32> to vector<16x16xf32>
    %515 = vector.extract_strided_slice %473 {offsets = [0, 48], sizes = [16, 16], strides = [1, 1]} : vector<16x64xf32> to vector<16x16xf32>
    %516 = vector.extract_strided_slice %474 {offsets = [0, 16], sizes = [16, 16], strides = [1, 1]} : vector<16x64xf32> to vector<16x16xf32>
    %517 = vector.extract_strided_slice %474 {offsets = [0, 48], sizes = [16, 16], strides = [1, 1]} : vector<16x64xf32> to vector<16x16xf32>
    %518 = vector.extract_strided_slice %475 {offsets = [0, 16], sizes = [16, 16], strides = [1, 1]} : vector<16x64xf32> to vector<16x16xf32>
    %519 = vector.extract_strided_slice %475 {offsets = [0, 48], sizes = [16, 16], strides = [1, 1]} : vector<16x64xf32> to vector<16x16xf32>
    %cst_181 = arith.constant dense<0.000000e+00> : vector<16x16xf32>
    %520 = tpu.matmul %514, %516, %cst_181 {dimension_numbers = #tpu.dot_dimension_numbers<[1], [1], [0], [0], [0, 0, 1, 0], [], []>} : vector<16x16xf32>, vector<16x16xf32>, vector<16x16xf32> -> vector<16x16xf32>
    %cst_182 = arith.constant dense<0.000000e+00> : vector<16x16xf32>
    %521 = tpu.matmul %515, %517, %cst_182 {dimension_numbers = #tpu.dot_dimension_numbers<[1], [1], [0], [0], [0, 0, 1, 0], [], []>} : vector<16x16xf32>, vector<16x16xf32>, vector<16x16xf32> -> vector<16x16xf32>
    %522 = arith.subf %520, %521 : vector<16x16xf32>
    %cst_183 = arith.constant dense<0.000000e+00> : vector<16x16xf32>
    %523 = tpu.matmul %514, %517, %cst_183 {dimension_numbers = #tpu.dot_dimension_numbers<[1], [1], [0], [0], [0, 0, 1, 0], [], []>} : vector<16x16xf32>, vector<16x16xf32>, vector<16x16xf32> -> vector<16x16xf32>
    %cst_184 = arith.constant dense<0.000000e+00> : vector<16x16xf32>
    %524 = tpu.matmul %515, %516, %cst_184 {dimension_numbers = #tpu.dot_dimension_numbers<[1], [1], [0], [0], [0, 0, 1, 0], [], []>} : vector<16x16xf32>, vector<16x16xf32>, vector<16x16xf32> -> vector<16x16xf32>
    %525 = arith.addf %523, %524 : vector<16x16xf32>
    %526 = arith.mulf %522, %522 : vector<16x16xf32>
    %527 = arith.mulf %525, %525 : vector<16x16xf32>
    %528 = arith.addf %526, %527 : vector<16x16xf32>
    %529 = math.sqrt %528 : vector<16x16xf32>
    %cst_185 = arith.constant dense<0x7F800000> : vector<16xf32>
    %530 = vector.multi_reduction <minimumf>, %529, %cst_185 [1] : vector<16x16xf32> to vector<16xf32>
    %531 = vector.shape_cast %530 : vector<16xf32> to vector<16x1xf32>
    %cst_186 = arith.constant dense<0xFF800000> : vector<16xf32>
    %532 = vector.multi_reduction <maximumf>, %529, %cst_186 [1] : vector<16x16xf32> to vector<16xf32>
    %533 = vector.shape_cast %532 : vector<16xf32> to vector<16x1xf32>
    %534 = vector.broadcast %531 : vector<16x1xf32> to vector<16x16xf32>
    %535 = arith.subf %529, %534 : vector<16x16xf32>
    %536 = arith.subf %533, %531 : vector<16x1xf32>
    %cst_187 = arith.constant 9.99999971E-10 : f32
    %537 = vector.broadcast %cst_187 : f32 to vector<16x1xf32>
    %538 = arith.addf %536, %537 : vector<16x1xf32>
    %539 = vector.broadcast %538 : vector<16x1xf32> to vector<16x16xf32>
    %540 = arith.divf %535, %539 : vector<16x16xf32>
    %cst_188 = arith.constant 9.99999971E-10 : f32
    %541 = vector.broadcast %cst_188 : f32 to vector<16x16xf32>
    %542 = arith.addf %529, %541 : vector<16x16xf32>
    %543 = arith.divf %540, %542 : vector<16x16xf32>
    %544 = arith.mulf %522, %543 : vector<16x16xf32>
    %545 = arith.mulf %525, %543 : vector<16x16xf32>
    %cst_189 = arith.constant dense<0.000000e+00> : vector<16x16xf32>
    %546 = tpu.matmul %544, %518, %cst_189 {dimension_numbers = #tpu.dot_dimension_numbers<[1], [0], [0], [1], [0, 0, 1, 1], [], []>} : vector<16x16xf32>, vector<16x16xf32>, vector<16x16xf32> -> vector<16x16xf32>
    %cst_190 = arith.constant dense<0.000000e+00> : vector<16x16xf32>
    %547 = tpu.matmul %545, %519, %cst_190 {dimension_numbers = #tpu.dot_dimension_numbers<[1], [0], [0], [1], [0, 0, 1, 1], [], []>} : vector<16x16xf32>, vector<16x16xf32>, vector<16x16xf32> -> vector<16x16xf32>
    %548 = arith.subf %546, %547 : vector<16x16xf32>
    %cst_191 = arith.constant dense<0.000000e+00> : vector<16x16xf32>
    %549 = tpu.matmul %544, %519, %cst_191 {dimension_numbers = #tpu.dot_dimension_numbers<[1], [0], [0], [1], [0, 0, 1, 1], [], []>} : vector<16x16xf32>, vector<16x16xf32>, vector<16x16xf32> -> vector<16x16xf32>
    %cst_192 = arith.constant dense<0.000000e+00> : vector<16x16xf32>
    %550 = tpu.matmul %545, %518, %cst_192 {dimension_numbers = #tpu.dot_dimension_numbers<[1], [0], [0], [1], [0, 0, 1, 1], [], []>} : vector<16x16xf32>, vector<16x16xf32>, vector<16x16xf32> -> vector<16x16xf32>
    %551 = arith.addf %549, %550 : vector<16x16xf32>
    %552 = tpu.concatenate %510, %548, %513, %551 in 1 : vector<16x16xf32>, vector<16x16xf32>, vector<16x16xf32>, vector<16x16xf32> -> vector<16x64xf32>
    %cst_193 = arith.constant dense<0.000000e+00> : vector<16x64xf32>
    %553 = tpu.matmul %552, %27, %cst_193 {dimension_numbers = #tpu.dot_dimension_numbers<[1], [0], [0], [1], [0, 0, 1, 1], [], []>} : vector<16x64xf32>, vector<64x64xf32>, vector<16x64xf32> -> vector<16x64xf32>
    %554 = vector.extract_strided_slice %18 {offsets = [16, 0], sizes = [16, 64], strides = [1, 1]} : vector<32x64xf32> to vector<16x64xf32>
    %555 = vector.extract_strided_slice %19 {offsets = [16, 0], sizes = [16, 64], strides = [1, 1]} : vector<32x64xf32> to vector<16x64xf32>
    %556 = vector.extract_strided_slice %20 {offsets = [16, 0], sizes = [16, 64], strides = [1, 1]} : vector<32x64xf32> to vector<16x64xf32>
    %557 = vector.extract_strided_slice %554 {offsets = [0, 0], sizes = [16, 16], strides = [1, 1]} : vector<16x64xf32> to vector<16x16xf32>
    %558 = vector.extract_strided_slice %554 {offsets = [0, 32], sizes = [16, 16], strides = [1, 1]} : vector<16x64xf32> to vector<16x16xf32>
    %559 = vector.extract_strided_slice %555 {offsets = [0, 0], sizes = [16, 16], strides = [1, 1]} : vector<16x64xf32> to vector<16x16xf32>
    %560 = vector.extract_strided_slice %555 {offsets = [0, 32], sizes = [16, 16], strides = [1, 1]} : vector<16x64xf32> to vector<16x16xf32>
    %561 = vector.extract_strided_slice %556 {offsets = [0, 0], sizes = [16, 16], strides = [1, 1]} : vector<16x64xf32> to vector<16x16xf32>
    %562 = vector.extract_strided_slice %556 {offsets = [0, 32], sizes = [16, 16], strides = [1, 1]} : vector<16x64xf32> to vector<16x16xf32>
    %cst_194 = arith.constant dense<0.000000e+00> : vector<16x16xf32>
    %563 = tpu.matmul %557, %559, %cst_194 {dimension_numbers = #tpu.dot_dimension_numbers<[1], [1], [0], [0], [0, 0, 1, 0], [], []>} : vector<16x16xf32>, vector<16x16xf32>, vector<16x16xf32> -> vector<16x16xf32>
    %cst_195 = arith.constant dense<0.000000e+00> : vector<16x16xf32>
    %564 = tpu.matmul %558, %560, %cst_195 {dimension_numbers = #tpu.dot_dimension_numbers<[1], [1], [0], [0], [0, 0, 1, 0], [], []>} : vector<16x16xf32>, vector<16x16xf32>, vector<16x16xf32> -> vector<16x16xf32>
    %565 = arith.subf %563, %564 : vector<16x16xf32>
    %cst_196 = arith.constant dense<0.000000e+00> : vector<16x16xf32>
    %566 = tpu.matmul %557, %560, %cst_196 {dimension_numbers = #tpu.dot_dimension_numbers<[1], [1], [0], [0], [0, 0, 1, 0], [], []>} : vector<16x16xf32>, vector<16x16xf32>, vector<16x16xf32> -> vector<16x16xf32>
    %cst_197 = arith.constant dense<0.000000e+00> : vector<16x16xf32>
    %567 = tpu.matmul %558, %559, %cst_197 {dimension_numbers = #tpu.dot_dimension_numbers<[1], [1], [0], [0], [0, 0, 1, 0], [], []>} : vector<16x16xf32>, vector<16x16xf32>, vector<16x16xf32> -> vector<16x16xf32>
    %568 = arith.addf %566, %567 : vector<16x16xf32>
    %569 = arith.mulf %565, %565 : vector<16x16xf32>
    %570 = arith.mulf %568, %568 : vector<16x16xf32>
    %571 = arith.addf %569, %570 : vector<16x16xf32>
    %572 = math.sqrt %571 : vector<16x16xf32>
    %cst_198 = arith.constant dense<0x7F800000> : vector<16xf32>
    %573 = vector.multi_reduction <minimumf>, %572, %cst_198 [1] : vector<16x16xf32> to vector<16xf32>
    %574 = vector.shape_cast %573 : vector<16xf32> to vector<16x1xf32>
    %cst_199 = arith.constant dense<0xFF800000> : vector<16xf32>
    %575 = vector.multi_reduction <maximumf>, %572, %cst_199 [1] : vector<16x16xf32> to vector<16xf32>
    %576 = vector.shape_cast %575 : vector<16xf32> to vector<16x1xf32>
    %577 = vector.broadcast %574 : vector<16x1xf32> to vector<16x16xf32>
    %578 = arith.subf %572, %577 : vector<16x16xf32>
    %579 = arith.subf %576, %574 : vector<16x1xf32>
    %cst_200 = arith.constant 9.99999971E-10 : f32
    %580 = vector.broadcast %cst_200 : f32 to vector<16x1xf32>
    %581 = arith.addf %579, %580 : vector<16x1xf32>
    %582 = vector.broadcast %581 : vector<16x1xf32> to vector<16x16xf32>
    %583 = arith.divf %578, %582 : vector<16x16xf32>
    %cst_201 = arith.constant 9.99999971E-10 : f32
    %584 = vector.broadcast %cst_201 : f32 to vector<16x16xf32>
    %585 = arith.addf %572, %584 : vector<16x16xf32>
    %586 = arith.divf %583, %585 : vector<16x16xf32>
    %587 = arith.mulf %565, %586 : vector<16x16xf32>
    %588 = arith.mulf %568, %586 : vector<16x16xf32>
    %cst_202 = arith.constant dense<0.000000e+00> : vector<16x16xf32>
    %589 = tpu.matmul %587, %561, %cst_202 {dimension_numbers = #tpu.dot_dimension_numbers<[1], [0], [0], [1], [0, 0, 1, 1], [], []>} : vector<16x16xf32>, vector<16x16xf32>, vector<16x16xf32> -> vector<16x16xf32>
    %cst_203 = arith.constant dense<0.000000e+00> : vector<16x16xf32>
    %590 = tpu.matmul %588, %562, %cst_203 {dimension_numbers = #tpu.dot_dimension_numbers<[1], [0], [0], [1], [0, 0, 1, 1], [], []>} : vector<16x16xf32>, vector<16x16xf32>, vector<16x16xf32> -> vector<16x16xf32>
    %591 = arith.subf %589, %590 : vector<16x16xf32>
    %cst_204 = arith.constant dense<0.000000e+00> : vector<16x16xf32>
    %592 = tpu.matmul %587, %562, %cst_204 {dimension_numbers = #tpu.dot_dimension_numbers<[1], [0], [0], [1], [0, 0, 1, 1], [], []>} : vector<16x16xf32>, vector<16x16xf32>, vector<16x16xf32> -> vector<16x16xf32>
    %cst_205 = arith.constant dense<0.000000e+00> : vector<16x16xf32>
    %593 = tpu.matmul %588, %561, %cst_205 {dimension_numbers = #tpu.dot_dimension_numbers<[1], [0], [0], [1], [0, 0, 1, 1], [], []>} : vector<16x16xf32>, vector<16x16xf32>, vector<16x16xf32> -> vector<16x16xf32>
    %594 = arith.addf %592, %593 : vector<16x16xf32>
    %595 = vector.extract_strided_slice %554 {offsets = [0, 16], sizes = [16, 16], strides = [1, 1]} : vector<16x64xf32> to vector<16x16xf32>
    %596 = vector.extract_strided_slice %554 {offsets = [0, 48], sizes = [16, 16], strides = [1, 1]} : vector<16x64xf32> to vector<16x16xf32>
    %597 = vector.extract_strided_slice %555 {offsets = [0, 16], sizes = [16, 16], strides = [1, 1]} : vector<16x64xf32> to vector<16x16xf32>
    %598 = vector.extract_strided_slice %555 {offsets = [0, 48], sizes = [16, 16], strides = [1, 1]} : vector<16x64xf32> to vector<16x16xf32>
    %599 = vector.extract_strided_slice %556 {offsets = [0, 16], sizes = [16, 16], strides = [1, 1]} : vector<16x64xf32> to vector<16x16xf32>
    %600 = vector.extract_strided_slice %556 {offsets = [0, 48], sizes = [16, 16], strides = [1, 1]} : vector<16x64xf32> to vector<16x16xf32>
    %cst_206 = arith.constant dense<0.000000e+00> : vector<16x16xf32>
    %601 = tpu.matmul %595, %597, %cst_206 {dimension_numbers = #tpu.dot_dimension_numbers<[1], [1], [0], [0], [0, 0, 1, 0], [], []>} : vector<16x16xf32>, vector<16x16xf32>, vector<16x16xf32> -> vector<16x16xf32>
    %cst_207 = arith.constant dense<0.000000e+00> : vector<16x16xf32>
    %602 = tpu.matmul %596, %598, %cst_207 {dimension_numbers = #tpu.dot_dimension_numbers<[1], [1], [0], [0], [0, 0, 1, 0], [], []>} : vector<16x16xf32>, vector<16x16xf32>, vector<16x16xf32> -> vector<16x16xf32>
    %603 = arith.subf %601, %602 : vector<16x16xf32>
    %cst_208 = arith.constant dense<0.000000e+00> : vector<16x16xf32>
    %604 = tpu.matmul %595, %598, %cst_208 {dimension_numbers = #tpu.dot_dimension_numbers<[1], [1], [0], [0], [0, 0, 1, 0], [], []>} : vector<16x16xf32>, vector<16x16xf32>, vector<16x16xf32> -> vector<16x16xf32>
    %cst_209 = arith.constant dense<0.000000e+00> : vector<16x16xf32>
    %605 = tpu.matmul %596, %597, %cst_209 {dimension_numbers = #tpu.dot_dimension_numbers<[1], [1], [0], [0], [0, 0, 1, 0], [], []>} : vector<16x16xf32>, vector<16x16xf32>, vector<16x16xf32> -> vector<16x16xf32>
    %606 = arith.addf %604, %605 : vector<16x16xf32>
    %607 = arith.mulf %603, %603 : vector<16x16xf32>
    %608 = arith.mulf %606, %606 : vector<16x16xf32>
    %609 = arith.addf %607, %608 : vector<16x16xf32>
    %610 = math.sqrt %609 : vector<16x16xf32>
    %cst_210 = arith.constant dense<0x7F800000> : vector<16xf32>
    %611 = vector.multi_reduction <minimumf>, %610, %cst_210 [1] : vector<16x16xf32> to vector<16xf32>
    %612 = vector.shape_cast %611 : vector<16xf32> to vector<16x1xf32>
    %cst_211 = arith.constant dense<0xFF800000> : vector<16xf32>
    %613 = vector.multi_reduction <maximumf>, %610, %cst_211 [1] : vector<16x16xf32> to vector<16xf32>
    %614 = vector.shape_cast %613 : vector<16xf32> to vector<16x1xf32>
    %615 = vector.broadcast %612 : vector<16x1xf32> to vector<16x16xf32>
    %616 = arith.subf %610, %615 : vector<16x16xf32>
    %617 = arith.subf %614, %612 : vector<16x1xf32>
    %cst_212 = arith.constant 9.99999971E-10 : f32
    %618 = vector.broadcast %cst_212 : f32 to vector<16x1xf32>
    %619 = arith.addf %617, %618 : vector<16x1xf32>
    %620 = vector.broadcast %619 : vector<16x1xf32> to vector<16x16xf32>
    %621 = arith.divf %616, %620 : vector<16x16xf32>
    %cst_213 = arith.constant 9.99999971E-10 : f32
    %622 = vector.broadcast %cst_213 : f32 to vector<16x16xf32>
    %623 = arith.addf %610, %622 : vector<16x16xf32>
    %624 = arith.divf %621, %623 : vector<16x16xf32>
    %625 = arith.mulf %603, %624 : vector<16x16xf32>
    %626 = arith.mulf %606, %624 : vector<16x16xf32>
    %cst_214 = arith.constant dense<0.000000e+00> : vector<16x16xf32>
    %627 = tpu.matmul %625, %599, %cst_214 {dimension_numbers = #tpu.dot_dimension_numbers<[1], [0], [0], [1], [0, 0, 1, 1], [], []>} : vector<16x16xf32>, vector<16x16xf32>, vector<16x16xf32> -> vector<16x16xf32>
    %cst_215 = arith.constant dense<0.000000e+00> : vector<16x16xf32>
    %628 = tpu.matmul %626, %600, %cst_215 {dimension_numbers = #tpu.dot_dimension_numbers<[1], [0], [0], [1], [0, 0, 1, 1], [], []>} : vector<16x16xf32>, vector<16x16xf32>, vector<16x16xf32> -> vector<16x16xf32>
    %629 = arith.subf %627, %628 : vector<16x16xf32>
    %cst_216 = arith.constant dense<0.000000e+00> : vector<16x16xf32>
    %630 = tpu.matmul %625, %600, %cst_216 {dimension_numbers = #tpu.dot_dimension_numbers<[1], [0], [0], [1], [0, 0, 1, 1], [], []>} : vector<16x16xf32>, vector<16x16xf32>, vector<16x16xf32> -> vector<16x16xf32>
    %cst_217 = arith.constant dense<0.000000e+00> : vector<16x16xf32>
    %631 = tpu.matmul %626, %599, %cst_217 {dimension_numbers = #tpu.dot_dimension_numbers<[1], [0], [0], [1], [0, 0, 1, 1], [], []>} : vector<16x16xf32>, vector<16x16xf32>, vector<16x16xf32> -> vector<16x16xf32>
    %632 = arith.addf %630, %631 : vector<16x16xf32>
    %633 = tpu.concatenate %591, %629, %594, %632 in 1 : vector<16x16xf32>, vector<16x16xf32>, vector<16x16xf32>, vector<16x16xf32> -> vector<16x64xf32>
    %cst_218 = arith.constant dense<0.000000e+00> : vector<16x64xf32>
    %634 = tpu.matmul %633, %29, %cst_218 {dimension_numbers = #tpu.dot_dimension_numbers<[1], [0], [0], [1], [0, 0, 1, 1], [], []>} : vector<16x64xf32>, vector<64x64xf32>, vector<16x64xf32> -> vector<16x64xf32>
    %635 = vector.extract_strided_slice %21 {offsets = [16, 0], sizes = [16, 64], strides = [1, 1]} : vector<32x64xf32> to vector<16x64xf32>
    %636 = vector.extract_strided_slice %22 {offsets = [16, 0], sizes = [16, 64], strides = [1, 1]} : vector<32x64xf32> to vector<16x64xf32>
    %637 = vector.extract_strided_slice %23 {offsets = [16, 0], sizes = [16, 64], strides = [1, 1]} : vector<32x64xf32> to vector<16x64xf32>
    %638 = vector.extract_strided_slice %635 {offsets = [0, 0], sizes = [16, 16], strides = [1, 1]} : vector<16x64xf32> to vector<16x16xf32>
    %639 = vector.extract_strided_slice %635 {offsets = [0, 32], sizes = [16, 16], strides = [1, 1]} : vector<16x64xf32> to vector<16x16xf32>
    %640 = vector.extract_strided_slice %636 {offsets = [0, 0], sizes = [16, 16], strides = [1, 1]} : vector<16x64xf32> to vector<16x16xf32>
    %641 = vector.extract_strided_slice %636 {offsets = [0, 32], sizes = [16, 16], strides = [1, 1]} : vector<16x64xf32> to vector<16x16xf32>
    %642 = vector.extract_strided_slice %637 {offsets = [0, 0], sizes = [16, 16], strides = [1, 1]} : vector<16x64xf32> to vector<16x16xf32>
    %643 = vector.extract_strided_slice %637 {offsets = [0, 32], sizes = [16, 16], strides = [1, 1]} : vector<16x64xf32> to vector<16x16xf32>
    %cst_219 = arith.constant dense<0.000000e+00> : vector<16x16xf32>
    %644 = tpu.matmul %638, %640, %cst_219 {dimension_numbers = #tpu.dot_dimension_numbers<[1], [1], [0], [0], [0, 0, 1, 0], [], []>} : vector<16x16xf32>, vector<16x16xf32>, vector<16x16xf32> -> vector<16x16xf32>
    %cst_220 = arith.constant dense<0.000000e+00> : vector<16x16xf32>
    %645 = tpu.matmul %639, %641, %cst_220 {dimension_numbers = #tpu.dot_dimension_numbers<[1], [1], [0], [0], [0, 0, 1, 0], [], []>} : vector<16x16xf32>, vector<16x16xf32>, vector<16x16xf32> -> vector<16x16xf32>
    %646 = arith.subf %644, %645 : vector<16x16xf32>
    %cst_221 = arith.constant dense<0.000000e+00> : vector<16x16xf32>
    %647 = tpu.matmul %638, %641, %cst_221 {dimension_numbers = #tpu.dot_dimension_numbers<[1], [1], [0], [0], [0, 0, 1, 0], [], []>} : vector<16x16xf32>, vector<16x16xf32>, vector<16x16xf32> -> vector<16x16xf32>
    %cst_222 = arith.constant dense<0.000000e+00> : vector<16x16xf32>
    %648 = tpu.matmul %639, %640, %cst_222 {dimension_numbers = #tpu.dot_dimension_numbers<[1], [1], [0], [0], [0, 0, 1, 0], [], []>} : vector<16x16xf32>, vector<16x16xf32>, vector<16x16xf32> -> vector<16x16xf32>
    %649 = arith.addf %647, %648 : vector<16x16xf32>
    %650 = arith.mulf %646, %646 : vector<16x16xf32>
    %651 = arith.mulf %649, %649 : vector<16x16xf32>
    %652 = arith.addf %650, %651 : vector<16x16xf32>
    %653 = math.sqrt %652 : vector<16x16xf32>
    %cst_223 = arith.constant dense<0x7F800000> : vector<16xf32>
    %654 = vector.multi_reduction <minimumf>, %653, %cst_223 [1] : vector<16x16xf32> to vector<16xf32>
    %655 = vector.shape_cast %654 : vector<16xf32> to vector<16x1xf32>
    %cst_224 = arith.constant dense<0xFF800000> : vector<16xf32>
    %656 = vector.multi_reduction <maximumf>, %653, %cst_224 [1] : vector<16x16xf32> to vector<16xf32>
    %657 = vector.shape_cast %656 : vector<16xf32> to vector<16x1xf32>
    %658 = vector.broadcast %655 : vector<16x1xf32> to vector<16x16xf32>
    %659 = arith.subf %653, %658 : vector<16x16xf32>
    %660 = arith.subf %657, %655 : vector<16x1xf32>
    %cst_225 = arith.constant 9.99999971E-10 : f32
    %661 = vector.broadcast %cst_225 : f32 to vector<16x1xf32>
    %662 = arith.addf %660, %661 : vector<16x1xf32>
    %663 = vector.broadcast %662 : vector<16x1xf32> to vector<16x16xf32>
    %664 = arith.divf %659, %663 : vector<16x16xf32>
    %cst_226 = arith.constant 9.99999971E-10 : f32
    %665 = vector.broadcast %cst_226 : f32 to vector<16x16xf32>
    %666 = arith.addf %653, %665 : vector<16x16xf32>
    %667 = arith.divf %664, %666 : vector<16x16xf32>
    %668 = arith.mulf %646, %667 : vector<16x16xf32>
    %669 = arith.mulf %649, %667 : vector<16x16xf32>
    %cst_227 = arith.constant dense<0.000000e+00> : vector<16x16xf32>
    %670 = tpu.matmul %668, %642, %cst_227 {dimension_numbers = #tpu.dot_dimension_numbers<[1], [0], [0], [1], [0, 0, 1, 1], [], []>} : vector<16x16xf32>, vector<16x16xf32>, vector<16x16xf32> -> vector<16x16xf32>
    %cst_228 = arith.constant dense<0.000000e+00> : vector<16x16xf32>
    %671 = tpu.matmul %669, %643, %cst_228 {dimension_numbers = #tpu.dot_dimension_numbers<[1], [0], [0], [1], [0, 0, 1, 1], [], []>} : vector<16x16xf32>, vector<16x16xf32>, vector<16x16xf32> -> vector<16x16xf32>
    %672 = arith.subf %670, %671 : vector<16x16xf32>
    %cst_229 = arith.constant dense<0.000000e+00> : vector<16x16xf32>
    %673 = tpu.matmul %668, %643, %cst_229 {dimension_numbers = #tpu.dot_dimension_numbers<[1], [0], [0], [1], [0, 0, 1, 1], [], []>} : vector<16x16xf32>, vector<16x16xf32>, vector<16x16xf32> -> vector<16x16xf32>
    %cst_230 = arith.constant dense<0.000000e+00> : vector<16x16xf32>
    %674 = tpu.matmul %669, %642, %cst_230 {dimension_numbers = #tpu.dot_dimension_numbers<[1], [0], [0], [1], [0, 0, 1, 1], [], []>} : vector<16x16xf32>, vector<16x16xf32>, vector<16x16xf32> -> vector<16x16xf32>
    %675 = arith.addf %673, %674 : vector<16x16xf32>
    %676 = vector.extract_strided_slice %635 {offsets = [0, 16], sizes = [16, 16], strides = [1, 1]} : vector<16x64xf32> to vector<16x16xf32>
    %677 = vector.extract_strided_slice %635 {offsets = [0, 48], sizes = [16, 16], strides = [1, 1]} : vector<16x64xf32> to vector<16x16xf32>
    %678 = vector.extract_strided_slice %636 {offsets = [0, 16], sizes = [16, 16], strides = [1, 1]} : vector<16x64xf32> to vector<16x16xf32>
    %679 = vector.extract_strided_slice %636 {offsets = [0, 48], sizes = [16, 16], strides = [1, 1]} : vector<16x64xf32> to vector<16x16xf32>
    %680 = vector.extract_strided_slice %637 {offsets = [0, 16], sizes = [16, 16], strides = [1, 1]} : vector<16x64xf32> to vector<16x16xf32>
    %681 = vector.extract_strided_slice %637 {offsets = [0, 48], sizes = [16, 16], strides = [1, 1]} : vector<16x64xf32> to vector<16x16xf32>
    %cst_231 = arith.constant dense<0.000000e+00> : vector<16x16xf32>
    %682 = tpu.matmul %676, %678, %cst_231 {dimension_numbers = #tpu.dot_dimension_numbers<[1], [1], [0], [0], [0, 0, 1, 0], [], []>} : vector<16x16xf32>, vector<16x16xf32>, vector<16x16xf32> -> vector<16x16xf32>
    %cst_232 = arith.constant dense<0.000000e+00> : vector<16x16xf32>
    %683 = tpu.matmul %677, %679, %cst_232 {dimension_numbers = #tpu.dot_dimension_numbers<[1], [1], [0], [0], [0, 0, 1, 0], [], []>} : vector<16x16xf32>, vector<16x16xf32>, vector<16x16xf32> -> vector<16x16xf32>
    %684 = arith.subf %682, %683 : vector<16x16xf32>
    %cst_233 = arith.constant dense<0.000000e+00> : vector<16x16xf32>
    %685 = tpu.matmul %676, %679, %cst_233 {dimension_numbers = #tpu.dot_dimension_numbers<[1], [1], [0], [0], [0, 0, 1, 0], [], []>} : vector<16x16xf32>, vector<16x16xf32>, vector<16x16xf32> -> vector<16x16xf32>
    %cst_234 = arith.constant dense<0.000000e+00> : vector<16x16xf32>
    %686 = tpu.matmul %677, %678, %cst_234 {dimension_numbers = #tpu.dot_dimension_numbers<[1], [1], [0], [0], [0, 0, 1, 0], [], []>} : vector<16x16xf32>, vector<16x16xf32>, vector<16x16xf32> -> vector<16x16xf32>
    %687 = arith.addf %685, %686 : vector<16x16xf32>
    %688 = arith.mulf %684, %684 : vector<16x16xf32>
    %689 = arith.mulf %687, %687 : vector<16x16xf32>
    %690 = arith.addf %688, %689 : vector<16x16xf32>
    %691 = math.sqrt %690 : vector<16x16xf32>
    %cst_235 = arith.constant dense<0x7F800000> : vector<16xf32>
    %692 = vector.multi_reduction <minimumf>, %691, %cst_235 [1] : vector<16x16xf32> to vector<16xf32>
    %693 = vector.shape_cast %692 : vector<16xf32> to vector<16x1xf32>
    %cst_236 = arith.constant dense<0xFF800000> : vector<16xf32>
    %694 = vector.multi_reduction <maximumf>, %691, %cst_236 [1] : vector<16x16xf32> to vector<16xf32>
    %695 = vector.shape_cast %694 : vector<16xf32> to vector<16x1xf32>
    %696 = vector.broadcast %693 : vector<16x1xf32> to vector<16x16xf32>
    %697 = arith.subf %691, %696 : vector<16x16xf32>
    %698 = arith.subf %695, %693 : vector<16x1xf32>
    %cst_237 = arith.constant 9.99999971E-10 : f32
    %699 = vector.broadcast %cst_237 : f32 to vector<16x1xf32>
    %700 = arith.addf %698, %699 : vector<16x1xf32>
    %701 = vector.broadcast %700 : vector<16x1xf32> to vector<16x16xf32>
    %702 = arith.divf %697, %701 : vector<16x16xf32>
    %cst_238 = arith.constant 9.99999971E-10 : f32
    %703 = vector.broadcast %cst_238 : f32 to vector<16x16xf32>
    %704 = arith.addf %691, %703 : vector<16x16xf32>
    %705 = arith.divf %702, %704 : vector<16x16xf32>
    %706 = arith.mulf %684, %705 : vector<16x16xf32>
    %707 = arith.mulf %687, %705 : vector<16x16xf32>
    %cst_239 = arith.constant dense<0.000000e+00> : vector<16x16xf32>
    %708 = tpu.matmul %706, %680, %cst_239 {dimension_numbers = #tpu.dot_dimension_numbers<[1], [0], [0], [1], [0, 0, 1, 1], [], []>} : vector<16x16xf32>, vector<16x16xf32>, vector<16x16xf32> -> vector<16x16xf32>
    %cst_240 = arith.constant dense<0.000000e+00> : vector<16x16xf32>
    %709 = tpu.matmul %707, %681, %cst_240 {dimension_numbers = #tpu.dot_dimension_numbers<[1], [0], [0], [1], [0, 0, 1, 1], [], []>} : vector<16x16xf32>, vector<16x16xf32>, vector<16x16xf32> -> vector<16x16xf32>
    %710 = arith.subf %708, %709 : vector<16x16xf32>
    %cst_241 = arith.constant dense<0.000000e+00> : vector<16x16xf32>
    %711 = tpu.matmul %706, %681, %cst_241 {dimension_numbers = #tpu.dot_dimension_numbers<[1], [0], [0], [1], [0, 0, 1, 1], [], []>} : vector<16x16xf32>, vector<16x16xf32>, vector<16x16xf32> -> vector<16x16xf32>
    %cst_242 = arith.constant dense<0.000000e+00> : vector<16x16xf32>
    %712 = tpu.matmul %707, %680, %cst_242 {dimension_numbers = #tpu.dot_dimension_numbers<[1], [0], [0], [1], [0, 0, 1, 1], [], []>} : vector<16x16xf32>, vector<16x16xf32>, vector<16x16xf32> -> vector<16x16xf32>
    %713 = arith.addf %711, %712 : vector<16x16xf32>
    %714 = tpu.concatenate %672, %710, %675, %713 in 1 : vector<16x16xf32>, vector<16x16xf32>, vector<16x16xf32>, vector<16x16xf32> -> vector<16x64xf32>
    %cst_243 = arith.constant dense<0.000000e+00> : vector<16x64xf32>
    %715 = tpu.matmul %714, %31, %cst_243 {dimension_numbers = #tpu.dot_dimension_numbers<[1], [0], [0], [1], [0, 0, 1, 1], [], []>} : vector<16x64xf32>, vector<64x64xf32>, vector<16x64xf32> -> vector<16x64xf32>
    %716 = tpu.concatenate %472, %553, %634, %715 in 0 : vector<16x64xf32>, vector<16x64xf32>, vector<16x64xf32>, vector<16x64xf32> -> vector<64x64xf32>
    %cst_244 = arith.constant dense<0.000000e+00> : vector<1x64xf32>
    %717 = tpu.matmul %36, %716, %cst_244 {dimension_numbers = #tpu.dot_dimension_numbers<[1], [0], [0], [1], [0, 0, 1, 1], [], []>} : vector<1x64xf32>, vector<64x64xf32>, vector<1x64xf32> -> vector<1x64xf32>
    %cst_245 = arith.constant dense<0.000000e+00> : vector<1x64xf32>
    %718 = tpu.matmul %717, %33, %cst_245 {dimension_numbers = #tpu.dot_dimension_numbers<[1], [0], [0], [1], [0, 0, 1, 1], [], []>} : vector<1x64xf32>, vector<64x64xf32>, vector<1x64xf32> -> vector<1x64xf32>
    %719 = arith.negf %718 : vector<1x64xf32>
    %720 = math.exp %719 : vector<1x64xf32>
    %cst_246 = arith.constant 1.000000e+00 : f32
    %721 = vector.broadcast %cst_246 : f32 to vector<1x64xf32>
    %722 = arith.addf %721, %720 : vector<1x64xf32>
    %723 = arith.divf %721, %722 : vector<1x64xf32>
    %724 = vector.extract_strided_slice %723 {offsets = [0, 0], sizes = [1, 32], strides = [1, 1]} : vector<1x64xf32> to vector<1x32xf32>
    %725 = vector.extract_strided_slice %723 {offsets = [0, 32], sizes = [1, 32], strides = [1, 1]} : vector<1x64xf32> to vector<1x32xf32>
    %726 = vector.extract_strided_slice %716 {offsets = [0, 0], sizes = [64, 32], strides = [1, 1]} : vector<64x64xf32> to vector<64x32xf32>
    %727 = vector.extract_strided_slice %716 {offsets = [0, 32], sizes = [64, 32], strides = [1, 1]} : vector<64x64xf32> to vector<64x32xf32>
    %728 = vector.broadcast %724 : vector<1x32xf32> to vector<64x32xf32>
    %729 = arith.mulf %726, %728 : vector<64x32xf32>
    %730 = vector.broadcast %725 : vector<1x32xf32> to vector<64x32xf32>
    %731 = arith.mulf %727, %730 : vector<64x32xf32>
    %732 = arith.subf %729, %731 : vector<64x32xf32>
    %733 = vector.broadcast %725 : vector<1x32xf32> to vector<64x32xf32>
    %734 = arith.mulf %726, %733 : vector<64x32xf32>
    %735 = vector.broadcast %724 : vector<1x32xf32> to vector<64x32xf32>
    %736 = arith.mulf %727, %735 : vector<64x32xf32>
    %737 = arith.addf %734, %736 : vector<64x32xf32>
    %738 = tpu.concatenate %732, %737 in 1 : vector<64x32xf32>, vector<64x32xf32> -> vector<64x64xf32>
    %cst_247 = arith.constant 0.000000e+00 : f32
    %739 = vector.broadcast %cst_247 : f32 to vector<1x64xf32>
    %740 = vector.extract_strided_slice %738 {offsets = [0, 0], sizes = [63, 64], strides = [1, 1]} : vector<64x64xf32> to vector<63x64xf32>
    %741 = tpu.concatenate %739, %740 in 0 : vector<1x64xf32>, vector<63x64xf32> -> vector<64x64xf32>
    %742 = vector.extract_strided_slice %738 {offsets = [1, 0], sizes = [63, 64], strides = [1, 1]} : vector<64x64xf32> to vector<63x64xf32>
    %cst_248 = arith.constant 0.000000e+00 : f32
    %743 = vector.broadcast %cst_248 : f32 to vector<1x64xf32>
    %744 = tpu.concatenate %742, %743 in 0 : vector<63x64xf32>, vector<1x64xf32> -> vector<64x64xf32>
    %745 = tpu.concatenate %741, %738, %744 in 1 : vector<64x64xf32>, vector<64x64xf32>, vector<64x64xf32> -> vector<64x192xf32>
    %cst_249 = arith.constant dense<0.000000e+00> : vector<64x64xf32>
    %746 = tpu.matmul %745, %35, %cst_249 {dimension_numbers = #tpu.dot_dimension_numbers<[1], [0], [0], [1], [0, 0, 1, 1], [], []>} : vector<64x192xf32>, vector<192x64xf32>, vector<64x64xf32> -> vector<64x64xf32>
    %747 = tpu.concatenate %391, %746 in 1 : vector<64x64xf32>, vector<64x64xf32> -> vector<64x128xf32>
    %c0_250 = arith.constant 0 : index
    %c0_251 = arith.constant 0 : index
    %c0_252 = arith.constant 0 : index
    %748 = vector.load %arg6[%c0_250, %c0_251, %c0_252] : memref<1x64x128xf32, #tpu.memory_space<vmem>>, vector<1x64x128xf32>
    %749 = vector.shape_cast %748 : vector<1x64x128xf32> to vector<64x128xf32>
    %750 = vector.shape_cast %747 : vector<64x128xf32> to vector<1x64x128xf32>
    tpu.vector_store %arg6[%c0_250, %c0_251, %c0_252], %750 {strides = array<i32>} : memref<1x64x128xf32, #tpu.memory_space<vmem>>, vector<1x64x128xf32>,
    return
  }
  func.func @transform_0(%arg0: i32) -> (i32, i32, i32, i32, i32) {
    %c0_i32 = arith.constant 0 : i32
    %c0_i32_0 = arith.constant 0 : i32
    %c0_i32_1 = arith.constant 0 : i32
    %c0_i32_2 = arith.constant 0 : i32
    %c0_i32_3 = arith.constant 0 : i32
    return %arg0, %c0_i32, %c0_i32_0, %c0_i32_1, %c0_i32_2 : i32, i32, i32, i32, i32
  }
  func.func @transform_1(%arg0: i32) -> (i32, i32, i32, i32) {
    %c0_i32 = arith.constant 0 : i32
    %c0_i32_0 = arith.constant 0 : i32
    %c0_i32_1 = arith.constant 0 : i32
    %c0_i32_2 = arith.constant 0 : i32
    return %arg0, %c0_i32, %c0_i32_0, %c0_i32_1 : i32, i32, i32, i32
  }
  func.func @transform_2(%arg0: i32) -> (i32, i32, i32, i32) {
    %c0_i32 = arith.constant 0 : i32
    %c0_i32_0 = arith.constant 0 : i32
    %c0_i32_1 = arith.constant 0 : i32
    %c0_i32_2 = arith.constant 0 : i32
    return %arg0, %c0_i32, %c0_i32_0, %c0_i32_1 : i32, i32, i32, i32
  }
  func.func @transform_3(%arg0: i32) -> (i32, i32, i32) {
    %c0_i32 = arith.constant 0 : i32
    %c0_i32_0 = arith.constant 0 : i32
    %c0_i32_1 = arith.constant 0 : i32
    return %arg0, %c0_i32, %c0_i32_0 : i32, i32, i32
  }
  func.func @transform_4(%arg0: i32) -> (i32, i32, i32) {
    %c0_i32 = arith.constant 0 : i32
    %c0_i32_0 = arith.constant 0 : i32
    %c0_i32_1 = arith.constant 0 : i32
    return %arg0, %c0_i32, %c0_i32_0 : i32, i32, i32
  }
  func.func @transform_5(%arg0: i32) -> (i32, i32, i32) {
    %c0_i32 = arith.constant 0 : i32
    %c0_i32_0 = arith.constant 0 : i32
    %c0_i32_1 = arith.constant 0 : i32
    return %arg0, %c0_i32, %c0_i32_0 : i32, i32, i32
  }
}

module attributes {stable_mosaic.version = 11 : i64} {
  func.func @_final_eca_kernel(%arg0: i32, %arg1: memref<1x2x64x128xf32, #tpu.memory_space<vmem>>, %arg2: memref<1x128x128xf32, #tpu.memory_space<vmem>>, %arg3: memref<1x2x64x128xf32, #tpu.memory_space<vmem>>) attributes {dimension_semantics = [#tpu.dimension_semantics<parallel>], iteration_bounds = array<i64: 2>, scalar_prefetch = 0 : i64, scratch_operands = 0 : i64, tpu.core_type = #tpu.core_type<tc>, window_params = [{transform_indices = @transform_0, window_bounds = array<i64: 1, 2, 64, 128>}, {transform_indices = @transform_1, window_bounds = array<i64: 1, 128, 128>}, {transform_indices = @transform_2, window_bounds = array<i64: 1, 2, 64, 128>}]} {
    %c0 = arith.constant 0 : index
    %c0_0 = arith.constant 0 : index
    %c0_1 = arith.constant 0 : index
    %0 = vector.load %arg2[%c0, %c0_0, %c0_1] : memref<1x128x128xf32, #tpu.memory_space<vmem>>, vector<1x128x128xf32>
    %1 = vector.shape_cast %0 : vector<1x128x128xf32> to vector<128x128xf32>
    %cst = arith.constant 1.562500e-02 : f32
    %2 = vector.broadcast %cst : f32 to vector<1x64xf32>
    %c0_2 = arith.constant 0 : index
    %c0_3 = arith.constant 0 : index
    %c0_4 = arith.constant 0 : index
    %c0_5 = arith.constant 0 : index
    %3 = vector.load %arg1[%c0_2, %c0_3, %c0_4, %c0_5] : memref<1x2x64x128xf32, #tpu.memory_space<vmem>>, vector<1x1x64x128xf32>
    %4 = vector.shape_cast %3 : vector<1x1x64x128xf32> to vector<64x128xf32>
    %cst_6 = arith.constant dense<0.000000e+00> : vector<1x128xf32>
    %5 = tpu.matmul %2, %4, %cst_6 {dimension_numbers = #tpu.dot_dimension_numbers<[1], [0], [0], [1], [0, 0, 1, 1], [], []>} : vector<1x64xf32>, vector<64x128xf32>, vector<1x128xf32> -> vector<1x128xf32>
    %cst_7 = arith.constant dense<0.000000e+00> : vector<1x128xf32>
    %6 = tpu.matmul %5, %1, %cst_7 {dimension_numbers = #tpu.dot_dimension_numbers<[1], [0], [0], [1], [0, 0, 1, 1], [], []>} : vector<1x128xf32>, vector<128x128xf32>, vector<1x128xf32> -> vector<1x128xf32>
    %7 = arith.negf %6 : vector<1x128xf32>
    %8 = math.exp %7 : vector<1x128xf32>
    %cst_8 = arith.constant 1.000000e+00 : f32
    %9 = vector.broadcast %cst_8 : f32 to vector<1x128xf32>
    %10 = arith.addf %9, %8 : vector<1x128xf32>
    %11 = arith.divf %9, %10 : vector<1x128xf32>
    %12 = vector.extract_strided_slice %11 {offsets = [0, 0], sizes = [1, 64], strides = [1, 1]} : vector<1x128xf32> to vector<1x64xf32>
    %13 = vector.extract_strided_slice %11 {offsets = [0, 64], sizes = [1, 64], strides = [1, 1]} : vector<1x128xf32> to vector<1x64xf32>
    %14 = vector.extract_strided_slice %4 {offsets = [0, 0], sizes = [64, 64], strides = [1, 1]} : vector<64x128xf32> to vector<64x64xf32>
    %15 = vector.extract_strided_slice %4 {offsets = [0, 64], sizes = [64, 64], strides = [1, 1]} : vector<64x128xf32> to vector<64x64xf32>
    %16 = vector.broadcast %12 : vector<1x64xf32> to vector<64x64xf32>
    %17 = arith.mulf %14, %16 : vector<64x64xf32>
    %18 = vector.broadcast %13 : vector<1x64xf32> to vector<64x64xf32>
    %19 = arith.mulf %15, %18 : vector<64x64xf32>
    %20 = arith.subf %17, %19 : vector<64x64xf32>
    %21 = vector.broadcast %13 : vector<1x64xf32> to vector<64x64xf32>
    %22 = arith.mulf %14, %21 : vector<64x64xf32>
    %23 = vector.broadcast %12 : vector<1x64xf32> to vector<64x64xf32>
    %24 = arith.mulf %15, %23 : vector<64x64xf32>
    %25 = arith.addf %22, %24 : vector<64x64xf32>
    %26 = tpu.concatenate %20, %25 in 1 : vector<64x64xf32>, vector<64x64xf32> -> vector<64x128xf32>
    %c0_9 = arith.constant 0 : index
    %c0_10 = arith.constant 0 : index
    %c0_11 = arith.constant 0 : index
    %c0_12 = arith.constant 0 : index
    %27 = vector.load %arg3[%c0_9, %c0_10, %c0_11, %c0_12] : memref<1x2x64x128xf32, #tpu.memory_space<vmem>>, vector<1x1x64x128xf32>
    %28 = vector.shape_cast %27 : vector<1x1x64x128xf32> to vector<64x128xf32>
    %29 = vector.shape_cast %26 : vector<64x128xf32> to vector<1x1x64x128xf32>
    tpu.vector_store %arg3[%c0_9, %c0_10, %c0_11, %c0_12], %29 {strides = array<i32>} : memref<1x2x64x128xf32, #tpu.memory_space<vmem>>, vector<1x1x64x128xf32>,
    %c0_13 = arith.constant 0 : index
    %c1 = arith.constant 1 : index
    %c0_14 = arith.constant 0 : index
    %c0_15 = arith.constant 0 : index
    %30 = vector.load %arg1[%c0_13, %c1, %c0_14, %c0_15] : memref<1x2x64x128xf32, #tpu.memory_space<vmem>>, vector<1x1x64x128xf32>
    %31 = vector.shape_cast %30 : vector<1x1x64x128xf32> to vector<64x128xf32>
    %cst_16 = arith.constant dense<0.000000e+00> : vector<1x128xf32>
    %32 = tpu.matmul %2, %31, %cst_16 {dimension_numbers = #tpu.dot_dimension_numbers<[1], [0], [0], [1], [0, 0, 1, 1], [], []>} : vector<1x64xf32>, vector<64x128xf32>, vector<1x128xf32> -> vector<1x128xf32>
    %cst_17 = arith.constant dense<0.000000e+00> : vector<1x128xf32>
    %33 = tpu.matmul %32, %1, %cst_17 {dimension_numbers = #tpu.dot_dimension_numbers<[1], [0], [0], [1], [0, 0, 1, 1], [], []>} : vector<1x128xf32>, vector<128x128xf32>, vector<1x128xf32> -> vector<1x128xf32>
    %34 = arith.negf %33 : vector<1x128xf32>
    %35 = math.exp %34 : vector<1x128xf32>
    %cst_18 = arith.constant 1.000000e+00 : f32
    %36 = vector.broadcast %cst_18 : f32 to vector<1x128xf32>
    %37 = arith.addf %36, %35 : vector<1x128xf32>
    %38 = arith.divf %36, %37 : vector<1x128xf32>
    %39 = vector.extract_strided_slice %38 {offsets = [0, 0], sizes = [1, 64], strides = [1, 1]} : vector<1x128xf32> to vector<1x64xf32>
    %40 = vector.extract_strided_slice %38 {offsets = [0, 64], sizes = [1, 64], strides = [1, 1]} : vector<1x128xf32> to vector<1x64xf32>
    %41 = vector.extract_strided_slice %31 {offsets = [0, 0], sizes = [64, 64], strides = [1, 1]} : vector<64x128xf32> to vector<64x64xf32>
    %42 = vector.extract_strided_slice %31 {offsets = [0, 64], sizes = [64, 64], strides = [1, 1]} : vector<64x128xf32> to vector<64x64xf32>
    %43 = vector.broadcast %39 : vector<1x64xf32> to vector<64x64xf32>
    %44 = arith.mulf %41, %43 : vector<64x64xf32>
    %45 = vector.broadcast %40 : vector<1x64xf32> to vector<64x64xf32>
    %46 = arith.mulf %42, %45 : vector<64x64xf32>
    %47 = arith.subf %44, %46 : vector<64x64xf32>
    %48 = vector.broadcast %40 : vector<1x64xf32> to vector<64x64xf32>
    %49 = arith.mulf %41, %48 : vector<64x64xf32>
    %50 = vector.broadcast %39 : vector<1x64xf32> to vector<64x64xf32>
    %51 = arith.mulf %42, %50 : vector<64x64xf32>
    %52 = arith.addf %49, %51 : vector<64x64xf32>
    %53 = tpu.concatenate %47, %52 in 1 : vector<64x64xf32>, vector<64x64xf32> -> vector<64x128xf32>
    %c0_19 = arith.constant 0 : index
    %c1_20 = arith.constant 1 : index
    %c0_21 = arith.constant 0 : index
    %c0_22 = arith.constant 0 : index
    %54 = vector.load %arg3[%c0_19, %c1_20, %c0_21, %c0_22] : memref<1x2x64x128xf32, #tpu.memory_space<vmem>>, vector<1x1x64x128xf32>
    %55 = vector.shape_cast %54 : vector<1x1x64x128xf32> to vector<64x128xf32>
    %56 = vector.shape_cast %53 : vector<64x128xf32> to vector<1x1x64x128xf32>
    tpu.vector_store %arg3[%c0_19, %c1_20, %c0_21, %c0_22], %56 {strides = array<i32>} : memref<1x2x64x128xf32, #tpu.memory_space<vmem>>, vector<1x1x64x128xf32>,
    return
  }
  func.func @transform_0(%arg0: i32) -> (i32, i32, i32, i32) {
    %c0_i32 = arith.constant 0 : i32
    %c0_i32_0 = arith.constant 0 : i32
    %c0_i32_1 = arith.constant 0 : i32
    %c0_i32_2 = arith.constant 0 : i32
    return %arg0, %c0_i32, %c0_i32_0, %c0_i32_1 : i32, i32, i32, i32
  }
  func.func @transform_1(%arg0: i32) -> (i32, i32, i32) {
    %c0_i32 = arith.constant 0 : i32
    %c0_i32_0 = arith.constant 0 : i32
    %c0_i32_1 = arith.constant 0 : i32
    return %arg0, %c0_i32, %c0_i32_0 : i32, i32, i32
  }
  func.func @transform_2(%arg0: i32) -> (i32, i32, i32, i32) {
    %c0_i32 = arith.constant 0 : i32
    %c0_i32_0 = arith.constant 0 : i32
    %c0_i32_1 = arith.constant 0 : i32
    %c0_i32_2 = arith.constant 0 : i32
    return %arg0, %c0_i32, %c0_i32_0, %c0_i32_1 : i32, i32, i32, i32
  }
}

</mosaic_0001>

<bundles_post_ra>
// kernel: _lambda_.3
= control target key start
LH: loop header
LB: loop body
LE: loop exit
PB: predicated region body
PF: predicated region fallthrough
CT: control target
= control target key end

     0   :  { %vm34_vm0 = vcmask 1045504   ;;  %vm23_vm1 = vcmask 1046528   ;;  %vm101_vm2 = vcmask 1040384   ;;  %s460_s21 = smov 16   ;;  %s461_s22 = smov 8   ;;  %vm69_vm3 = vcmask 64512   ;;  %s658_s0 = inlined_call_operand.vmem [shape: f32[2,2,18,8], index: 0, kind: input, shape index: {}]   ;;  %s659_s1 = inlined_call_operand.vmem [shape: f32[2,25,64], index: 1, kind: input, shape index: {}]   ;;  %s660_s2 = inlined_call_operand.vmem [shape: f32[2,16,128], index: 2, kind: output, shape index: {}]  }
   0x1   :  { %v481_v0 = vld [vmem:[%s658_s0 + $0x30] sm:$0xff]  ;;  %v486_v1 = vld [vmem:[%s658_s0 + $0x38] sm:$0xff]  ;;  %v400_v2 = vld [vmem:[%s658_s0 + $0x40] sm:$0x3]  ;;  %vm74_vm4 = vcmask 130048   ;;  %vm79_vm5 = vcmask 195584  }
   0x2   :  { %v213_v3 = vrot.slane %v481_v0, 2  ;;  %v214_v4 = vrot.slane %v486_v1, 2  ;;  %v203_v5 = vrot.slane %v481_v0, 1  ;;  %v204_v6 = vrot.slane %v486_v1, 1  ;;  %v498_v7 = vld [vmem:[%s658_s0 + $0x50] sm:$0xff]  ;;  %v506_v11 = vld [vmem:[%s658_s0 + $0x48] sm:$0xff] }
   0x3   :  { %v216_v8 = vrot.slane %v400_v2, 2  ;;  %v206_v9 = vrot.slane %v400_v2, 1  ;;  %v403_v10 = vld [vmem:[%s658_s0 + $0x58] sm:$0x3]  ;;  %v209_v14 = vrot.slane %v498_v7, 1  ;;  %v406_v16 = vld [vmem:[%s659_s1 + $0x30] sm:$0xff] }
   0x4   :  { %v215_v12 = vsel %vm34_vm0, %v213_v3, %v214_v4  ;;  %v205_v13 = vsel %vm23_vm1, %v203_v5, %v204_v6  ;;  %v407_v15 = vld [vmem:[%s659_s1 + $0x38] sm:$0x1]  ;;  %v211_v19 = vrot.slane %v403_v10, 1  ;;  %v208_v20 = vrot.slane %v506_v11, 1  ;;  %v405_v21 = vld [vmem:[%s659_s1 + $0x28] sm:$0xff]  ;;  %v86_v24 = vld [vmem:[%s659_s1 + $0x10] sm:$0xff] }
   0x5   :  { %235 = vrot.lane.b32.xlu1 %v215_v12, %s460_s21  ;;  %223 = vrot.lane.b32.xlu0 %v205_v13, %s461_s22  ;;  %v217_v17 = vsel %vm34_vm0, %v214_v4, %v216_v8  ;;  %v207_v18 = vsel %vm23_vm1, %v204_v6, %v206_v9  ;;  %v87_v22 = vld [vmem:[%s659_s1 + $0x18] sm:$0x1]  ;;  %v219_v23 = vrot.slane %v498_v7, 2  ;;  %v221_v27 = vrot.slane %v403_v10, 2  ;;  %v542_v29 = vld [vmem:[%s658_s0] sm:$0xff] }
   0x6   :  { %443 = vmatprep.subr.msk.mxu1 %vm101_vm2, %v407_v15  ;;  %v212_v25 = vsel %vm23_vm1, %v209_v14, %v211_v19  ;;  %v210_v26 = vsel %vm23_vm1, %v208_v20, %v209_v14  ;;  %v218_v28 = vrot.slane %v506_v11, 2  ;;  %429 = vmatprep.subr.msk.mxu0 %vm101_vm2, %v87_v22  ;;  %v548_v30 = vld [vmem:[%s658_s0 + $0x8] sm:$0xff]  ;;  %v13_v31 = vld [vmem:[%s658_s0 + $0x10] sm:$0x3]  ;;  %v404_v32 = vld [vmem:[%s659_s1 + $0x20] sm:$0xff]  ;;  %v24_v34 = vrot.slane %v542_v29, 1 }
   0x7   :  { %444 = vmatpush3.msk.msra.mxu1 %vm101_vm2, %v407_v15  ;;  %430 = vmatpush3.msk.msra.mxu0 %vm101_vm2, %v87_v22  ;;  %v85_v33 = vld [vmem:[%s659_s1 + $0x8] sm:$0xff]  ;;  %v222_v35 = vsel %vm34_vm0, %v219_v23, %v221_v27  ;;  %v25_v37 = vrot.slane %v548_v30, 1  ;;  %v27_v38 = vrot.slane %v13_v31, 1  ;;  %v84_v39 = vld [vmem:[%s659_s1] sm:$0xff]  ;;  %v35_v40 = vrot.slane %v542_v29, 2  ;;  %v578_v45 = vld [vmem:[%s658_s0 + $0x18] sm:$0xff] }
   0x8   :  { %445 = vmatprep.subr.mxu1 %v406_v16  ;;  %431 = vmatprep.subr.mxu0 %v86_v24  ;;  %v220_v36 = vsel %vm34_vm0, %v218_v28, %v219_v23  ;;  %v36_v41 = vrot.slane %v548_v30, 2  ;;  %v38_v44 = vrot.slane %v13_v31, 2  ;;  %v583_v46 = vld [vmem:[%s658_s0 + $0x20] sm:$0xff]  ;;  %v16_v47 = vld [vmem:[%s658_s0 + $0x28] sm:$0x3]  ;;  %v29_v50 = vrot.slane %v578_v45, 1 }
   0x9   :  { %237 = vrot.lane.b32.xlu1 %v217_v17, %s460_s21  ;;  %225 = vrot.lane.b32.xlu0 %v207_v18, %s461_s22  ;;  %v26_v42 = vsel %vm23_vm1, %v24_v34, %v25_v37  ;;  %v28_v43 = vsel %vm23_vm1, %v25_v37, %v27_v38  ;;  %v30_v51 = vrot.slane %v583_v46, 1  ;;  %v32_v52 = vrot.slane %v16_v47, 1  ;;  %s462_s0 = smov 64  }
   0xa   :  { %446 = vmatpush3.msra.mxu1 %v406_v16  ;;  %432 = vmatpush3.msra.mxu0 %v86_v24  ;;  %v37_v48 = vsel %vm34_vm0, %v35_v40, %v36_v41  ;;  %v39_v49 = vsel %vm34_vm0, %v36_v41, %v38_v44  ;;  %v40_v53 = vrot.slane %v578_v45, 2  ;;  %v41_v56 = vrot.slane %v583_v46, 2 }
   0xb   :  { %447 = vmatprep.subr.mxu1 %v405_v21  ;;  %433 = vmatprep.subr.mxu0 %v85_v33  ;;  %v31_v54 = vsel %vm23_vm1, %v29_v50, %v30_v51  ;;  %v33_v55 = vsel %vm23_vm1, %v30_v51, %v32_v52  ;;  %v43_v57 = vrot.slane %v16_v47, 2  ;;  %vm88_vm6 = vcmask 203776  }
   0xc   :  { %448 = vmatpush3.msra.mxu1 %v405_v21  ;;  %434 = vmatpush3.msra.mxu0 %v85_v33  ;;  %v42_v58 = vsel %vm34_vm0, %v40_v53, %v41_v56  ;;  %vm380_vm7 = vcmask 523264  }
   0xd   :  { %229 = vrot.lane.b32.xlu1 %v212_v25, %s461_s22  ;;  %227 = vrot.lane.b32.xlu0 %v210_v26, %s461_s22  ;;  %v44_v59 = vsel %vm34_vm0, %v41_v56, %v43_v57 }
   0xe   :  { %449 = vmatprep.subr.mxu1 %v404_v32  ;;  %435 = vmatprep.subr.mxu0 %v84_v39 }
   0xf   :  { %450 = vmatpush3.msra.mxu1 %v404_v32  ;;  %436 = vmatpush3.msra.mxu0 %v84_v39 }
  0x11   :  { %241 = vrot.lane.b32.xlu1 %v222_v35, %s460_s21  ;;  %239 = vrot.lane.b32.xlu0 %v220_v36, %s460_s21 }
  0x15   :  { %45 = vrot.lane.b32.xlu0 %v26_v42, %s461_s22  ;;  %47 = vrot.lane.b32.xlu1 %v28_v43, %s461_s22 }
  0x19   :  { %57 = vrot.lane.b32.xlu0 %v37_v48, %s460_s21  ;;  %59 = vrot.lane.b32.xlu1 %v39_v49, %s460_s21 }
  0x1d   :  { %49 = vrot.lane.b32.xlu0 %v31_v54, %s461_s22  ;;  %51 = vrot.lane.b32.xlu1 %v33_v55, %s461_s22 }
  0x21   :  { %61 = vrot.lane.b32.xlu0 %v42_v58, %s460_s21  ;;  %63 = vrot.lane.b32.xlu1 %v44_v59, %s460_s21 }
  0x77   :  { %v236_v60 = vpop.permute.xlu1 %235  ;;  %v224_v61 = vpop.permute.xlu0 %223 }
  0x78   :  { %v247_v62 = vsel %vm69_vm3, %v481_v0, %v224_v61 }
  0x79   :  { %v251_v63 = vsel %vm74_vm4, %v247_v62, %v236_v60 }
  0x7a   :  { %v255_v2 = vsel %vm79_vm5, %v251_v63, 1.0 }
  0x7b   :  { %v238_v3 = vpop.permute.xlu1 %237  ;;  %451 = vmatprep.mubr.msk.f32.mxu1 %vm88_vm6, %v255_v2  ;;  %v226_v4 = vpop.permute.xlu0 %225 }
  0x7c   :  { %v248_v5 = vsel %vm69_vm3, %v486_v1, %v226_v4 }
  0x7d   :  { %v252_v6 = vsel %vm74_vm4, %v248_v5, %v238_v3 }
  0x7e   :  { %v256_v8 = vsel %vm79_vm5, %v252_v6, 1.0 }
  0x7f   :  { %v230_v9 = vpop.permute.xlu1 %229  ;;  %452 = vmatmul.mubr.msk.f32.vlgmr.msra.gmra.mxu1 %vm88_vm6, %v256_v8  ;;  %v228_v0 = vpop.permute.xlu0 %227 }
  0x80   :  { %v250_v10 = vsel %vm69_vm3, %v498_v7, %v230_v9  ;;  %v249_v12 = vsel %vm69_vm3, %v506_v11, %v228_v0 }
  0x83   :  { %v242_v13 = vpop.permute.xlu1 %241  ;;  %v240_v14 = vpop.permute.xlu0 %239 }
  0x84   :  { %v254_v15 = vsel %vm74_vm4, %v250_v10, %v242_v13  ;;  %v253_v1 = vsel %vm74_vm4, %v249_v12, %v240_v14 }
  0x85   :  { %v258_v16 = vsel %vm79_vm5, %v254_v15, 1.0  ;;  %v257_v17 = vsel %vm79_vm5, %v253_v1, 1.0 }
  0x86   :  { %454 = vmatprep.mubr.msk.f32.mxu1 %vm88_vm6, %v257_v17 }
  0x87   :  { %455 = vmatmul.mubr.msk.f32.gmra.mxu1 %vm88_vm6, %v258_v16  ;;  %v46_v18 = vpop.permute.xlu0 %45  ;;  %v48_v19 = vpop.permute.xlu1 %47 }
  0x88   :  { %v70_v7 = vsel %vm69_vm3, %v542_v29, %v46_v18  ;;  %v71_v11 = vsel %vm69_vm3, %v548_v30, %v48_v19 }
  0x8b   :  { %v58_v20 = vpop.permute.xlu0 %57  ;;  %v60_v21 = vpop.permute.xlu1 %59 }
  0x8c   :  { %v76_v22 = vsel %vm74_vm4, %v71_v11, %v60_v21  ;;  %v75_v23 = vsel %vm74_vm4, %v70_v7, %v58_v20 }
  0x8d   :  { %v81_v24 = vsel %vm79_vm5, %v76_v22, 1.0  ;;  %v80_v25 = vsel %vm79_vm5, %v75_v23, 1.0 }
  0x8e   :  { %437 = vmatprep.mubr.msk.f32.mxu0 %vm88_vm6, %v80_v25 }
  0x8f   :  { %438 = vmatmul.mubr.msk.f32.vlgmr.msra.gmra.mxu0 %vm88_vm6, %v81_v24  ;;  %v50_v26 = vpop.permute.xlu0 %49  ;;  %v52_v27 = vpop.permute.xlu1 %51 }
  0x90   :  { %v72_v28 = vsel %vm69_vm3, %v578_v45, %v50_v26  ;;  %v73_v29 = vsel %vm69_vm3, %v583_v46, %v52_v27 }
  0x93   :  { %v62_v30 = vpop.permute.xlu0 %61  ;;  %v64_v31 = vpop.permute.xlu1 %63 }
  0x94   :  { %v77_v32 = vsel %vm74_vm4, %v72_v28, %v62_v30  ;;  %v78_v33 = vsel %vm74_vm4, %v73_v29, %v64_v31 }
  0x95   :  { %v82_v34 = vsel %vm79_vm5, %v77_v32, 1.0  ;;  %v83_v35 = vsel %vm79_vm5, %v78_v33, 1.0 }
  0x96   :  { %440 = vmatprep.mubr.msk.f32.mxu0 %vm88_vm6, %v82_v34 }
  0x97   :  { %441 = vmatmul.mubr.msk.f32.gmra.mxu0 %vm88_vm6, %v83_v35 }
 0x13f   :  { %v453_v36 = vpop.f32.mrf.mxu1 }
 0x140   :  { %370 = vrot.lane.b32.xlu1 %v453_v36, %s462_s0 }
 0x141   :  { %v345_v37 = vpop.f32.mrf.mxu1 }
 0x142   :  { %368 = vrot.lane.b32.xlu0 %v345_v37, %s462_s0 }
 0x147   :  { %v456_v38 = vpop.f32.mrf.mxu1 }
 0x148   :  { %374 = vrot.lane.b32.xlu1 %v456_v38, %s462_s0 }
 0x149   :  { %v355_v39 = vpop.f32.mrf.mxu1 }
 0x14a   :  { %372 = vrot.lane.b32.xlu0 %v355_v39, %s462_s0 }
 0x14f   :  { %v439_v40 = vpop.f32.mrf.mxu0 }
 0x151   :  { %v171_v43 = vpop.f32.mrf.mxu0 }
 0x157   :  { %v442_v46 = vpop.f32.mrf.mxu0 }
 0x159   :  { %v181_v49 = vpop.f32.mrf.mxu0 }
 0x1b2   :  { %v371_v41 = vpop.permute.xlu1 %370 }
 0x1b3   :  { %v382_v42 = vsel %vm380_vm7, %v439_v40, %v371_v41 }
 0x1b4   :  { %386 = vst [vmem:[%s660_s2 + $0x8] sm:$0xff] %v382_v42  ;;  %v369_v44 = vpop.permute.xlu0 %368 }
 0x1b5   :  { %v381_v45 = vsel %vm380_vm7, %v171_v43, %v369_v44 }
 0x1b6   :  { %385 = vst [vmem:[%s660_s2] sm:$0xff] %v381_v45 }
 0x1ba   :  { %v375_v47 = vpop.permute.xlu1 %374 }
 0x1bb   :  { %v384_v48 = vsel %vm380_vm7, %v442_v46, %v375_v47 }
 0x1bc   :  { %388 = vst [vmem:[%s660_s2 + $0x18] sm:$0xff] %v384_v48  ;;  %v373_v50 = vpop.permute.xlu0 %372 }
 0x1bd   :  { %v383_v51 = vsel %vm380_vm7, %v181_v49, %v373_v50 }
 0x1be   :  { %387 = vst [vmem:[%s660_s2 + $0x10] sm:$0xff] %v383_v51 }

// kernel: _lambda_.5
= control target key start
LH: loop header
LB: loop body
LE: loop exit
PB: predicated region body
PF: predicated region fallthrough
CT: control target
= control target key end

     0   :  { %s1108_s9 = smov 0   ;;  %s1539_s0 = inlined_call_operand.vmem [shape: f32[2,2,64,128], index: 0, kind: input, shape index: {}]   ;;  %s1540_s1 = inlined_call_operand.vmem [shape: f32[2,128,128], index: 1, kind: input, shape index: {}]   ;;  %s1541_s2 = inlined_call_operand.vmem [shape: f32[2,2,64,128], index: 2, kind: output, shape index: {}]  }
   0x1 LB: > { %s865_s10 = sadd.s32 4294967295, %s1087_s9   ;;  %p869_p0 = scmp.ge.s32.totalorder %s1087_s9, 1  ;;  %s1087_s9 = sphi %s1108_s9, %s12_s9  }
   0x2   : > { %p122_p1 = scmp.lt.s32.totalorder %s1087_s9, 3 }
   0x4   : > { %p123_p2 = pnand %p869_p0, %p122_p1 }
   0x5   : > { %p149_p3 = scmp.lt.s32.totalorder (!%p123_p2), %s865_s10, 1  ;;  %s1092_s18 = smov (!%p123_p2), 64  }
   0x6   : > { %126 = sbr.rel (%p123_p2) target bundleno = 833 (0x341), region = 28 }
   0xb   : > { %v1089_v0 = vmov 0.0   ;;  %s1543_s10 = smov (!%p149_p3, %s865_s10), 1  ;;  %vm1090_vm0 = vmmov 0   ;;  %vm188_vm1 = vcmask 523264   ;;  %v1091_v18 = vmov 0.015625  }
   0xc   : > { %953 = vmatprep.subr.mxu1 %v1089_v0  ;;  %1007 = vmatprep.subr.mxu0 %v1089_v0  ;;  %s1122_s11 = sshll.u32 %s1543_s10, 7  ;;  %v338_v48 = vlaneseq }
   0xd   : > { %969 = vmatprep.mubr.msk.f32.mxu1 %vm1090_vm0, %v1089_v0  ;;  %1023 = vmatprep.mubr.msk.f32.mxu0 %vm1090_vm0, %v1089_v0  ;;  %s1128_s14 = scalar_lea.vmem %s1539_s0, %s1122_s11  ;;  %s1202_s17 = scalar_lea.vmem %s1540_s1, %s1122_s11 }
   0xe   : > { %v1131_v1 = vld [vmem:[%s1128_s14 + $0x38] sm:$0xff]  ;;  %v1134_v2 = vld [vmem:[%s1128_s14 + $0x30] sm:$0xff]  ;;  %v1145_v5 = vld [vmem:[%s1128_s14 + $0x28] sm:$0xff]  ;;  %v339_v49 = vshrl.u32 %v338_v48, 7  ;;  %s1483_s21 = scalar_lea.vmem %s1541_s2, %s1122_s11 }
   0xf   : > { %954 = vmatpush3.msra.mxu1 %v1131_v1  ;;  %v1138_v3 = vld [vmem:[%s1128_s14 + $0x78] sm:$0xff]  ;;  %v1141_v4 = vld [vmem:[%s1128_s14 + $0x70] sm:$0xff]  ;;  %v1151_v6 = vld [vmem:[%s1128_s14 + $0x68] sm:$0xff] }
  0x10   : > { %955 = vmatprep.subr.mxu1 %v1089_v0  ;;  %1008 = vmatpush3.msra.mxu0 %v1138_v3  ;;  %v1155_v7 = vld [vmem:[%s1128_s14 + $0x20] sm:$0xff]  ;;  %v1165_v9 = vld [vmem:[%s1128_s14 + $0x18] sm:$0xff]  ;;  %v1175_v11 = vld [vmem:[%s1128_s14 + $0x10] sm:$0xff]  ;;  %v340_v50 = vsub.s32 0, %v339_v49 }
  0x11   : > { %956 = vmatpush3.msra.mxu1 %v1134_v2  ;;  %1009 = vmatprep.subr.mxu0 %v1089_v0  ;;  %v1161_v8 = vld [vmem:[%s1128_s14 + $0x60] sm:$0xff]  ;;  %v1171_v10 = vld [vmem:[%s1128_s14 + $0x58] sm:$0xff]  ;;  %v1181_v12 = vld [vmem:[%s1128_s14 + $0x50] sm:$0xff] }
  0x12   : > { %957 = vmatprep.subr.mxu1 %v1089_v0  ;;  %1010 = vmatpush3.msra.mxu0 %v1141_v4  ;;  %v1185_v13 = vld [vmem:[%s1128_s14 + $0x8] sm:$0xff]  ;;  %v1195_v15 = vld [vmem:[%s1128_s14] sm:$0xff]  ;;  %v179_v17 = vld [vmem:[%s1202_s17 + $0x78] sm:$0xff] }
  0x13   : > { %958 = vmatpush3.msra.mxu1 %v1145_v5  ;;  %1011 = vmatprep.subr.mxu0 %v1089_v0  ;;  %v1191_v14 = vld [vmem:[%s1128_s14 + $0x48] sm:$0xff]  ;;  %v1207_v16 = vld [vmem:[%s1128_s14 + $0x40] sm:$0xff]  ;;  %v178_v19 = vld [vmem:[%s1202_s17 + $0x70] sm:$0xff] }
  0x14   : > { %959 = vmatprep.subr.mxu1 %v1089_v0  ;;  %1012 = vmatpush3.msra.mxu0 %v1151_v6  ;;  %v177_v20 = vld [vmem:[%s1202_s17 + $0x68] sm:$0xff]  ;;  %v176_v21 = vld [vmem:[%s1202_s17 + $0x60] sm:$0xff]  ;;  %v175_v22 = vld [vmem:[%s1202_s17 + $0x58] sm:$0xff] }
  0x15   : > { %960 = vmatpush3.msra.mxu1 %v1155_v7  ;;  %1013 = vmatprep.subr.mxu0 %v1089_v0  ;;  %v174_v23 = vld [vmem:[%s1202_s17 + $0x50] sm:$0xff]  ;;  %v173_v24 = vld [vmem:[%s1202_s17 + $0x48] sm:$0xff]  ;;  %v172_v25 = vld [vmem:[%s1202_s17 + $0x40] sm:$0xff] }
  0x16   : > { %961 = vmatprep.subr.mxu1 %v1089_v0  ;;  %1014 = vmatpush3.msra.mxu0 %v1161_v8  ;;  %v171_v26 = vld [vmem:[%s1202_s17 + $0x38] sm:$0xff]  ;;  %v170_v27 = vld [vmem:[%s1202_s17 + $0x30] sm:$0xff]  ;;  %v169_v28 = vld [vmem:[%s1202_s17 + $0x28] sm:$0xff] }
  0x17   : > { %962 = vmatpush3.msra.mxu1 %v1165_v9  ;;  %1015 = vmatprep.subr.mxu0 %v1089_v0  ;;  %v168_v29 = vld [vmem:[%s1202_s17 + $0x20] sm:$0xff]  ;;  %v167_v30 = vld [vmem:[%s1202_s17 + $0x18] sm:$0xff]  ;;  %v166_v31 = vld [vmem:[%s1202_s17 + $0x10] sm:$0xff] }
  0x18   : > { %963 = vmatprep.subr.mxu1 %v1089_v0  ;;  %1016 = vmatpush3.msra.mxu0 %v1171_v10  ;;  %v165_v32 = vld [vmem:[%s1202_s17 + $0x8] sm:$0xff]  ;;  %v164_v33 = vld [vmem:[%s1202_s17] sm:$0xff] }
  0x19   : > { %964 = vmatpush3.msra.mxu1 %v1175_v11  ;;  %1017 = vmatprep.subr.mxu0 %v1089_v0 }
  0x1a   : > { %965 = vmatprep.subr.mxu1 %v1089_v0  ;;  %1018 = vmatpush3.msra.mxu0 %v1181_v12 }
  0x1b   : > { %966 = vmatpush3.msra.mxu1 %v1185_v13  ;;  %1019 = vmatprep.subr.mxu0 %v1089_v0 }
  0x1c   : > { %967 = vmatprep.subr.mxu1 %v1089_v0  ;;  %1020 = vmatpush3.msra.mxu0 %v1191_v14 }
  0x1d   : > { %968 = vmatpush3.msra.mxu1 %v1195_v15  ;;  %1021 = vmatprep.subr.mxu0 %v1089_v0 }
  0x1e   : > { %970 = vmatmul.mubr.msk.f32.vlgmr.msra.gmra.mxu1 %vm188_vm1, %v1091_v18  ;;  %1022 = vmatpush3.msra.mxu0 %v1207_v16 }
  0x1f   : > { %1024 = vmatmul.mubr.msk.f32.vlgmr.msra.gmra.mxu0 %vm188_vm1, %v1091_v18  ;;  %972 = vmatprep.subr.mxu1 %v1089_v0 }
  0x20   : > { %973 = vmatpush3.msra.mxu1 %v179_v17  ;;  %1026 = vmatprep.subr.mxu0 %v1089_v0 }
  0x21   : > { %974 = vmatprep.subr.mxu1 %v1089_v0  ;;  %1027 = vmatpush3.msra.mxu0 %v179_v17 }
  0x22   : > { %975 = vmatpush3.msra.mxu1 %v178_v19  ;;  %1028 = vmatprep.subr.mxu0 %v1089_v0 }
  0x23   : > { %976 = vmatprep.subr.mxu1 %v1089_v0  ;;  %1029 = vmatpush3.msra.mxu0 %v178_v19 }
  0x24   : > { %977 = vmatpush3.msra.mxu1 %v177_v20  ;;  %1030 = vmatprep.subr.mxu0 %v1089_v0 }
  0x25   : > { %978 = vmatprep.subr.mxu1 %v1089_v0  ;;  %1031 = vmatpush3.msra.mxu0 %v177_v20 }
  0x26   : > { %979 = vmatpush3.msra.mxu1 %v176_v21  ;;  %1032 = vmatprep.subr.mxu0 %v1089_v0 }
  0x27   : > { %980 = vmatprep.subr.mxu1 %v1089_v0  ;;  %1033 = vmatpush3.msra.mxu0 %v176_v21 }
  0x28   : > { %981 = vmatpush3.msra.mxu1 %v175_v22  ;;  %1034 = vmatprep.subr.mxu0 %v1089_v0 }
  0x29   : > { %982 = vmatprep.subr.mxu1 %v1089_v0  ;;  %1035 = vmatpush3.msra.mxu0 %v175_v22 }
  0x2a   : > { %983 = vmatpush3.msra.mxu1 %v174_v23  ;;  %1036 = vmatprep.subr.mxu0 %v1089_v0 }
  0x2b   : > { %984 = vmatprep.subr.mxu1 %v1089_v0  ;;  %1037 = vmatpush3.msra.mxu0 %v174_v23 }
  0x2c   : > { %985 = vmatpush3.msra.mxu1 %v173_v24  ;;  %1038 = vmatprep.subr.mxu0 %v1089_v0 }
  0x2d   : > { %986 = vmatprep.subr.mxu1 %v1089_v0  ;;  %1039 = vmatpush3.msra.mxu0 %v173_v24 }
  0x2e   : > { %987 = vmatpush3.msra.mxu1 %v172_v25  ;;  %1040 = vmatprep.subr.mxu0 %v1089_v0 }
  0x2f   : > { %988 = vmatprep.subr.mxu1 %v1089_v0  ;;  %1041 = vmatpush3.msra.mxu0 %v172_v25 }
  0x30   : > { %989 = vmatpush3.msra.mxu1 %v171_v26  ;;  %1042 = vmatprep.subr.mxu0 %v1089_v0 }
  0x31   : > { %990 = vmatprep.subr.mxu1 %v1089_v0  ;;  %1043 = vmatpush3.msra.mxu0 %v171_v26 }
  0x32   : > { %991 = vmatpush3.msra.mxu1 %v170_v27  ;;  %1044 = vmatprep.subr.mxu0 %v1089_v0 }
  0x33   : > { %992 = vmatprep.subr.mxu1 %v1089_v0  ;;  %1045 = vmatpush3.msra.mxu0 %v170_v27 }
  0x34   : > { %993 = vmatpush3.msra.mxu1 %v169_v28  ;;  %1046 = vmatprep.subr.mxu0 %v1089_v0 }
  0x35   : > { %994 = vmatprep.subr.mxu1 %v1089_v0  ;;  %1047 = vmatpush3.msra.mxu0 %v169_v28 }
  0x36   : > { %995 = vmatpush3.msra.mxu1 %v168_v29  ;;  %1048 = vmatprep.subr.mxu0 %v1089_v0 }
  0x37   : > { %996 = vmatprep.subr.mxu1 %v1089_v0  ;;  %1049 = vmatpush3.msra.mxu0 %v168_v29 }
  0x38   : > { %997 = vmatpush3.msra.mxu1 %v167_v30  ;;  %1050 = vmatprep.subr.mxu0 %v1089_v0 }
  0x39   : > { %998 = vmatprep.subr.mxu1 %v1089_v0  ;;  %1051 = vmatpush3.msra.mxu0 %v167_v30 }
  0x3a   : > { %999 = vmatpush3.msra.mxu1 %v166_v31  ;;  %1052 = vmatprep.subr.mxu0 %v1089_v0 }
  0x3b   : > { %1000 = vmatprep.subr.mxu1 %v1089_v0  ;;  %1004 = vmatprep.mubr.msk.f32.mxu1 %vm1090_vm0, %v1089_v0 }
  0x3c   : > { %1001 = vmatpush3.msra.mxu1 %v165_v32  ;;  %1053 = vmatpush3.msra.mxu0 %v166_v31 }
  0x3d   : > { %1002 = vmatprep.subr.mxu1 %v1089_v0  ;;  %1054 = vmatprep.subr.mxu0 %v1089_v0 }
  0x3e   : > { %1055 = vmatpush3.msra.mxu0 %v165_v32  ;;  %1058 = vmatprep.mubr.msk.f32.mxu0 %vm1090_vm0, %v1089_v0 }
  0x3f   : > { %1056 = vmatprep.subr.mxu0 %v1089_v0  ;;  %1003 = vmatpush3.msra.mxu1 %v164_v33 }
  0x40   : > { %1057 = vmatpush3.msra.mxu0 %v164_v33 }
  0xde   : > { %v258_v34 = vpop.f32.mrf.mxu1 }
  0xdf   : > { %1005 = vmatmul.mubr.f32.vlgmr.msra.gmra.mxu1 %v258_v34  ;;  %v565_v35 = vpop.f32.mrf.mxu0 }
  0xe0   : > { %v971_v36 = vpop.f32.mrf.mxu1  ;;  %1059 = vmatmul.mubr.f32.vlgmr.msra.gmra.mxu0 %v565_v35 }
  0xe1   : > { %v1025_v37 = vpop.f32.mrf.mxu0 }
 0x19f   : > { %v328_v38 = vpop.f32.mrf.mxu1 }
 0x1a0   : > { %v877_v39 = vmul.f32 -1.442695, %v328_v38  ;;  %v635_v40 = vpop.f32.mrf.mxu0 }
 0x1a1   : > { %v1006_v41 = vpop.f32.mrf.mxu1  ;;  %v887_v42 = vmul.f32 -1.442695, %v635_v40 }
 0x1a2   : > { %1073 = vpow2.f32 %v877_v39  ;;  %v1060_v43 = vpop.f32.mrf.mxu0 }
 0x1a3   : > { %1075 = vpow2.f32 %v887_v42 }
 0x1af   : > { %v1074_v44 = vpop.eup %1073 }
 0x1b0   : > { %v1076_v45 = vpop.eup %1075  ;;  %v335_v46 = vadd.f32 1.0, %v1074_v44 }
 0x1b1   : > { %v642_v47 = vadd.f32 1.0, %v1076_v45 }
 0x1b2   : > { %1077 = vrcp.f32 %v335_v46 }
 0x1b3   : > { %1079 = vrcp.f32 %v642_v47 }
 0x1bf   : > { %v1078_v51 = vpop.eup %1077 }
 0x1c0   : > { %v1080_v52 = vpop.eup %1079  ;;  %v341_v53 = vrot.slane %v1078_v51, %v340_v50 }
 0x1c1   : > { %v1268_v54 = vrot.slane %v1080_v52, %v340_v50 }
 0x1c2   : > { %391 = vrot.lane.b32.xlu0 %v341_v53, %s1092_s18  ;;  %v1272_v55 = vmul.f32 %v341_v53, %v1185_v13  ;;  %v1279_v56 = vmul.f32 %v341_v53, %v1195_v15  ;;  %v1357_v24 = vmul.f32 %v341_v53, %v1175_v11  ;;  %v1367_v26 = vmul.f32 %v341_v53, %v1155_v7 }
 0x1c3   : > { %v1377_v27 = vmul.f32 %v341_v53, %v1134_v2  ;;  %v1388_v28 = vmul.f32 %v1207_v16, %v1268_v54 }
 0x1c4   : > { %360 = vrot.lane.b32.xlu1 %v1272_v55, %s1092_s18 }
 0x1c6   : > { %698 = vrot.lane.b32.xlu0 %v1268_v54, %s1092_s18 }
 0x1ca   : > { %358 = vrot.lane.b32.xlu0 %v1279_v56, %s1092_s18 }
 0x234   : > { %v392_v57 = vpop.permute.xlu0 %391 }
 0x235   : > { %v1284_v58 = vmul.f32 %v392_v57, %v1195_v15  ;;  %v1287_v59 = vmul.f32 %v392_v57, %v1175_v11  ;;  %v1294_v60 = vmul.f32 %v392_v57, %v1185_v13  ;;  %v1297_v61 = vmul.f32 %v392_v57, %v1155_v7 }
 0x236   : > { %v1304_v62 = vmul.f32 %v392_v57, %v1165_v9  ;;  %v1307_v63 = vmul.f32 %v392_v57, %v1134_v2  ;;  %v1317_v15 = vmul.f32 %v392_v57, %v1145_v5  ;;  %v1327_v18 = vmul.f32 %v392_v57, %v1131_v1 }
 0x237   : > { %410 = vrot.lane.b32.xlu1 %v1284_v58, %s1092_s18  ;;  %414 = vrot.lane.b32.xlu0 %v1287_v59, %s1092_s18  ;;  %v1374_v11 = vmul.f32 %v341_v53, %v1165_v9  ;;  %v1384_v7 = vmul.f32 %v341_v53, %v1145_v5  ;;  %v1395_v2 = vmul.f32 %v341_v53, %v1131_v1 }
 0x238   : > { %v699_v0 = vpop.permute.xlu0 %698  ;;  %v1399_v9 = vmul.f32 %v1181_v12, %v1268_v54  ;;  %v1407_v5 = vmul.f32 %v1191_v14, %v1268_v54  ;;  %v1419_v1 = vmul.f32 %v1171_v10, %v1268_v54 }
 0x239   : > { %v1314_v13 = vmul.f32 %v1207_v16, %v699_v0  ;;  %v1324_v17 = vmul.f32 %v1181_v12, %v699_v0  ;;  %v1334_v19 = vmul.f32 %v1191_v14, %v699_v0  ;;  %v1337_v20 = vmul.f32 %v1161_v8, %v699_v0 }
 0x23a   : > { %v1344_v21 = vmul.f32 %v1171_v10, %v699_v0  ;;  %v1347_v22 = vmul.f32 %v1141_v4, %v699_v0  ;;  %v1354_v23 = vmul.f32 %v1151_v6, %v699_v0  ;;  %v1364_v25 = vmul.f32 %v1138_v3, %v699_v0 }
 0x23b   : > { %412 = vrot.lane.b32.xlu1 %v1294_v60, %s1092_s18  ;;  %418 = vrot.lane.b32.xlu0 %v1297_v61, %s1092_s18  ;;  %v1411_v16 = vmul.f32 %v1161_v8, %v1268_v54  ;;  %v1423_v12 = vmul.f32 %v1141_v4, %v1268_v54  ;;  %v1431_v8 = vmul.f32 %v1151_v6, %v1268_v54  ;;  %v1441_v4 = vpop.permute.xlu1 %360 }
 0x23c   : > { %v1437_v10 = vmul.f32 %v1138_v3, %v1268_v54  ;;  %v1443_v14 = vpop.permute.xlu0 %358 }
 0x23f   : > { %416 = vrot.lane.b32.xlu1 %v1304_v62, %s1092_s18  ;;  %422 = vrot.lane.b32.xlu0 %v1307_v63, %s1092_s18 }
 0x243   : > { %420 = vrot.lane.b32.xlu1 %v1317_v15, %s1092_s18  ;;  %717 = vrot.lane.b32.xlu0 %v1314_v13, %s1092_s18 }
 0x247   : > { %424 = vrot.lane.b32.xlu1 %v1327_v18, %s1092_s18  ;;  %721 = vrot.lane.b32.xlu0 %v1324_v17, %s1092_s18 }
 0x24b   : > { %719 = vrot.lane.b32.xlu1 %v1334_v19, %s1092_s18  ;;  %725 = vrot.lane.b32.xlu0 %v1337_v20, %s1092_s18 }
 0x24f   : > { %723 = vrot.lane.b32.xlu1 %v1344_v21, %s1092_s18  ;;  %729 = vrot.lane.b32.xlu0 %v1347_v22, %s1092_s18 }
 0x253   : > { %727 = vrot.lane.b32.xlu1 %v1354_v23, %s1092_s18  ;;  %362 = vrot.lane.b32.xlu0 %v1357_v24, %s1092_s18 }
 0x257   : > { %731 = vrot.lane.b32.xlu1 %v1364_v25, %s1092_s18  ;;  %366 = vrot.lane.b32.xlu0 %v1367_v26, %s1092_s18 }
 0x25b   : > { %364 = vrot.lane.b32.xlu1 %v1374_v11, %s1092_s18  ;;  %370 = vrot.lane.b32.xlu0 %v1377_v27, %s1092_s18 }
 0x25f   : > { %368 = vrot.lane.b32.xlu1 %v1384_v7, %s1092_s18  ;;  %665 = vrot.lane.b32.xlu0 %v1388_v28, %s1092_s18 }
 0x263   : > { %372 = vrot.lane.b32.xlu1 %v1395_v2, %s1092_s18  ;;  %669 = vrot.lane.b32.xlu0 %v1399_v9, %s1092_s18 }
 0x267   : > { %667 = vrot.lane.b32.xlu1 %v1407_v5, %s1092_s18  ;;  %673 = vrot.lane.b32.xlu0 %v1411_v16, %s1092_s18 }
 0x26b   : > { %671 = vrot.lane.b32.xlu1 %v1419_v1, %s1092_s18  ;;  %677 = vrot.lane.b32.xlu0 %v1423_v12, %s1092_s18 }
 0x26f   : > { %675 = vrot.lane.b32.xlu1 %v1431_v8, %s1092_s18 }
 0x273   : > { %679 = vrot.lane.b32.xlu1 %v1437_v10, %s1092_s18 }
 0x2a9   : > { %v411_v29 = vpop.permute.xlu1 %410  ;;  %v415_v30 = vpop.permute.xlu0 %414 }
 0x2aa   : > { %v434_v31 = vadd.f32 %v411_v29, %v1284_v58  ;;  %v436_v33 = vadd.f32 %v415_v30, %v1287_v59  ;;  %v382_v29 = vsub.f32 %v1279_v56, %v1443_v14 }
 0x2ac   : > { %450 = vrot.lane.b32.xlu0 %v434_v31, %s1092_s18 }
 0x2ad   : > { %v413_v6 = vpop.permute.xlu1 %412  ;;  %v419_v32 = vpop.permute.xlu0 %418 }
 0x2ae   : > { %v435_v3 = vadd.f32 %v413_v6, %v1294_v60  ;;  %v438_v36 = vadd.f32 %v419_v32, %v1297_v61  ;;  %v383_v6 = vsub.f32 %v1272_v55, %v1441_v4 }
 0x2b0   : > { %452 = vrot.lane.b32.xlu1 %v435_v3, %s1092_s18  ;;  %454 = vrot.lane.b32.xlu0 %v436_v33, %s1092_s18 }
 0x2b1   : > { %v417_v34 = vpop.permute.xlu1 %416  ;;  %v423_v35 = vpop.permute.xlu0 %422 }
 0x2b2   : > { %v437_v37 = vadd.f32 %v417_v34, %v1304_v62  ;;  %v440_v40 = vadd.f32 %v423_v35, %v1307_v63 }
 0x2b4   : > { %456 = vrot.lane.b32.xlu1 %v437_v37, %s1092_s18  ;;  %458 = vrot.lane.b32.xlu0 %v438_v36, %s1092_s18 }
 0x2b5   : > { %v421_v38 = vpop.permute.xlu1 %420  ;;  %v718_v39 = vpop.permute.xlu0 %717 }
 0x2b6   : > { %v439_v41 = vadd.f32 %v421_v38, %v1317_v15  ;;  %v741_v44 = vadd.f32 %v718_v39, %v1314_v13 }
 0x2b8   : > { %460 = vrot.lane.b32.xlu1 %v439_v41, %s1092_s18  ;;  %462 = vrot.lane.b32.xlu0 %v440_v40, %s1092_s18 }
 0x2b9   : > { %v425_v42 = vpop.permute.xlu1 %424  ;;  %v722_v43 = vpop.permute.xlu0 %721 }
 0x2ba   : > { %v441_v45 = vadd.f32 %v425_v42, %v1327_v18  ;;  %v743_v48 = vadd.f32 %v722_v43, %v1324_v17 }
 0x2bc   : > { %464 = vrot.lane.b32.xlu1 %v441_v45, %s1092_s18  ;;  %757 = vrot.lane.b32.xlu0 %v741_v44, %s1092_s18 }
 0x2bd   : > { %v720_v46 = vpop.permute.xlu1 %719  ;;  %v726_v47 = vpop.permute.xlu0 %725 }
 0x2be   : > { %v742_v49 = vadd.f32 %v720_v46, %v1334_v19  ;;  %v745_v51 = vadd.f32 %v726_v47, %v1337_v20 }
 0x2c0   : > { %759 = vrot.lane.b32.xlu1 %v742_v49, %s1092_s18  ;;  %761 = vrot.lane.b32.xlu0 %v743_v48, %s1092_s18 }
 0x2c1   : > { %v724_v50 = vpop.permute.xlu1 %723  ;;  %v730_v53 = vpop.permute.xlu0 %729 }
 0x2c2   : > { %v744_v52 = vadd.f32 %v724_v50, %v1344_v21  ;;  %v747_v57 = vadd.f32 %v730_v53, %v1347_v22 }
 0x2c4   : > { %763 = vrot.lane.b32.xlu1 %v744_v52, %s1092_s18  ;;  %765 = vrot.lane.b32.xlu0 %v745_v51, %s1092_s18 }
 0x2c5   : > { %v728_v54 = vpop.permute.xlu1 %727  ;;  %v363_v61 = vpop.permute.xlu0 %362 }
 0x2c6   : > { %v746_v58 = vadd.f32 %v728_v54, %v1354_v23  ;;  %v384_v56 = vsub.f32 %v1357_v24, %v363_v61 }
 0x2c8   : > { %767 = vrot.lane.b32.xlu1 %v746_v58, %s1092_s18  ;;  %769 = vrot.lane.b32.xlu0 %v747_v57, %s1092_s18 }
 0x2c9   : > { %v732_v59 = vpop.permute.xlu1 %731  ;;  %v367_v63 = vpop.permute.xlu0 %366 }
 0x2ca   : > { %v748_v60 = vadd.f32 %v732_v59, %v1364_v25  ;;  %v386_v34 = vsub.f32 %v1367_v26, %v367_v63 }
 0x2cc   : > { %771 = vrot.lane.b32.xlu1 %v748_v60, %s1092_s18 }
 0x2cd   : > { %v365_v62 = vpop.permute.xlu1 %364  ;;  %v371_v13 = vpop.permute.xlu0 %370 }
 0x2ce   : > { %v385_v35 = vsub.f32 %v1374_v11, %v365_v62  ;;  %v388_v4 = vsub.f32 %v1377_v27, %v371_v13 }
 0x2d1   : > { %v369_v0 = vpop.permute.xlu1 %368  ;;  %v666_v17 = vpop.permute.xlu0 %665 }
 0x2d2   : > { %v387_v38 = vsub.f32 %v1384_v7, %v369_v0  ;;  %v689_v41 = vsub.f32 %v1388_v28, %v666_v17 }
 0x2d5   : > { %v373_v15 = vpop.permute.xlu1 %372  ;;  %v670_v19 = vpop.permute.xlu0 %669 }
 0x2d6   : > { %v389_v42 = vsub.f32 %v1395_v2, %v373_v15  ;;  %v691_v45 = vsub.f32 %v1399_v9, %v670_v19 }
 0x2d9   : > { %v668_v18 = vpop.permute.xlu1 %667  ;;  %v674_v21 = vpop.permute.xlu0 %673 }
 0x2da   : > { %v690_v46 = vsub.f32 %v1407_v5, %v668_v18  ;;  %v693_v49 = vsub.f32 %v1411_v16, %v674_v21 }
 0x2dd   : > { %v672_v20 = vpop.permute.xlu1 %671  ;;  %v678_v23 = vpop.permute.xlu0 %677 }
 0x2de   : > { %v692_v50 = vsub.f32 %v1419_v1, %v672_v20  ;;  %v695_v53 = vsub.f32 %v1423_v12, %v678_v23 }
 0x2e1   : > { %v676_v22 = vpop.permute.xlu1 %675 }
 0x2e2   : > { %v694_v54 = vsub.f32 %v1431_v8, %v676_v22 }
 0x2e5   : > { %v1485_v25 = vpop.permute.xlu1 %679 }
 0x2e6   : > { %v696_v1 = vsub.f32 %v1437_v10, %v1485_v25 }
 0x31e   : > { %v451_v30 = vpop.permute.xlu0 %450 }
 0x31f   : > { %v474_v31 = vsel %vm188_vm1, %v382_v29, %v451_v30 }
 0x320   : > { %482 = vst [vmem:[%s1483_s21] sm:$0xff] %v474_v31 }
 0x322   : > { %v453_v14 = vpop.permute.xlu1 %452  ;;  %v455_v32 = vpop.permute.xlu0 %454 }
 0x323   : > { %v475_v33 = vsel %vm188_vm1, %v383_v6, %v453_v14  ;;  %v476_v3 = vsel %vm188_vm1, %v384_v56, %v455_v32 }
 0x324   : > { %483 = vst [vmem:[%s1483_s21 + $0x8] sm:$0xff] %v475_v33  ;;  %484 = vst [vmem:[%s1483_s21 + $0x10] sm:$0xff] %v476_v3 }
 0x326   : > { %v457_v36 = vpop.permute.xlu1 %456  ;;  %v459_v37 = vpop.permute.xlu0 %458 }
 0x327   : > { %v477_v55 = vsel %vm188_vm1, %v385_v35, %v457_v36  ;;  %v478_v24 = vsel %vm188_vm1, %v386_v34, %v459_v37 }
 0x328   : > { %485 = vst [vmem:[%s1483_s21 + $0x18] sm:$0xff] %v477_v55  ;;  %486 = vst [vmem:[%s1483_s21 + $0x20] sm:$0xff] %v478_v24 }
 0x32a   : > { %v461_v39 = vpop.permute.xlu1 %460  ;;  %v463_v40 = vpop.permute.xlu0 %462 }
 0x32b   : > { %v479_v26 = vsel %vm188_vm1, %v387_v38, %v461_v39  ;;  %v480_v11 = vsel %vm188_vm1, %v388_v4, %v463_v40 }
 0x32c   : > { %487 = vst [vmem:[%s1483_s21 + $0x28] sm:$0xff] %v479_v26  ;;  %488 = vst [vmem:[%s1483_s21 + $0x30] sm:$0xff] %v480_v11 }
 0x32e   : > { %v465_v43 = vpop.permute.xlu1 %464  ;;  %v758_v44 = vpop.permute.xlu0 %757 }
 0x32f   : > { %v481_v27 = vsel %vm188_vm1, %v389_v42, %v465_v43  ;;  %v781_v7 = vsel %vm188_vm1, %v689_v41, %v758_v44 }
 0x330   : > { %489 = vst [vmem:[%s1483_s21 + $0x38] sm:$0xff] %v481_v27  ;;  %888 = vst [vmem:[%s1483_s21 + $0x40] sm:$0xff] %v781_v7 }
 0x332   : > { %v760_v47 = vpop.permute.xlu1 %759  ;;  %v762_v48 = vpop.permute.xlu0 %761 }
 0x333   : > { %v782_v28 = vsel %vm188_vm1, %v690_v46, %v760_v47  ;;  %v783_v2 = vsel %vm188_vm1, %v691_v45, %v762_v48 }
 0x334   : > { %889 = vst [vmem:[%s1483_s21 + $0x48] sm:$0xff] %v782_v28  ;;  %890 = vst [vmem:[%s1483_s21 + $0x50] sm:$0xff] %v783_v2 }
 0x336   : > { %v764_v51 = vpop.permute.xlu1 %763  ;;  %v766_v52 = vpop.permute.xlu0 %765 }
 0x337   : > { %v784_v9 = vsel %vm188_vm1, %v692_v50, %v764_v51  ;;  %v785_v5 = vsel %vm188_vm1, %v693_v49, %v766_v52 }
 0x338   : > { %891 = vst [vmem:[%s1483_s21 + $0x58] sm:$0xff] %v784_v9  ;;  %892 = vst [vmem:[%s1483_s21 + $0x60] sm:$0xff] %v785_v5 }
 0x33a   : > { %v768_v57 = vpop.permute.xlu1 %767  ;;  %v770_v58 = vpop.permute.xlu0 %769 }
 0x33b   : > { %v786_v59 = vsel %vm188_vm1, %v694_v54, %v768_v57  ;;  %v787_v16 = vsel %vm188_vm1, %v695_v53, %v770_v58 }
 0x33c   : > { %893 = vst [vmem:[%s1483_s21 + $0x68] sm:$0xff] %v786_v59  ;;  %894 = vst [vmem:[%s1483_s21 + $0x70] sm:$0xff] %v787_v16 }
 0x33e   : > { %v772_v60 = vpop.permute.xlu1 %771 }
 0x33f   : > { %v788_v61 = vsel %vm188_vm1, %v696_v1, %v772_v60 }
 0x340   : > { %895 = vst [vmem:[%s1483_s21 + $0x78] sm:$0xff] %v788_v61 }
 0x341 PF: > { %s12_s9 = sadd.s32 1, %s1087_s9  }
 0x342   : > { %p9_p4 = scmp.ge.s32.totalorder %s12_s9, 4  }
 0x344   :  { %11 = sbr.rel (!%p9_p4) target bundleno = 1 (0x1), region = 63 }

// kernel: _lambda_.4
= control target key start
LH: loop header
LB: loop body
LE: loop exit
PB: predicated region body
PF: predicated region fallthrough
CT: control target
= control target key end

     0   :  { %s16897_s18 = smov 0   ;;  %s19611_s0 = inlined_call_operand.vmem [shape: f32[2,2,2,16,64], index: 0, kind: input, shape index: {}]   ;;  %s19612_s1 = inlined_call_operand.vmem [shape: f32[2,2,64,384], index: 1, kind: input, shape index: {}]   ;;  %s19613_s2 = inlined_call_operand.vmem [shape: f32[2,4,64,64], index: 2, kind: input, shape index: {}]   ;;  %s19614_s3 = inlined_call_operand.vmem [shape: f32[2,64,64], index: 3, kind: input, shape index: {}]   ;;  %s19615_s4 = inlined_call_operand.vmem [shape: f32[2,192,64], index: 4, kind: input, shape index: {}]   ;;  %s19616_s5 = inlined_call_operand.vmem [shape: f32[2,64,128], index: 5, kind: output, shape index: {}]  }
   0x1 LB: > { %s14224_s19 = sadd.s32 4294967295, %s16855_s18   ;;  %p14228_p0 = scmp.ge.s32.totalorder %s16855_s18, 1  ;;  %s16855_s18 = sphi %s16897_s18, %s15_s18  }
   0x2   : > { %p227_p1 = scmp.lt.s32.totalorder %s16855_s18, 3 }
   0x4   : > { %p228_p2 = pnand %p14228_p0, %p227_p1 }
   0x5   : > { %p275_p3 = scmp.lt.s32.totalorder (!%p228_p2), %s14224_s19, 1  ;;  %s16858_s28 = smov (!%p228_p2), 96  }
   0x6   : > { %231 = sbr.rel (%p228_p2) target bundleno = 11540 (0x2d14), region = 40  ;;  %s16859_s29 = smov (!%p228_p2), 112  }
   0x7   : > { %s16860_s30 = smov (!%p228_p2), 80   ;;  %s16861_s6 = smov (!%p228_p2), 32  }
   0x8   : > { %s16862_s11 = smov (!%p228_p2), 16   ;;  %s16863_s12 = smov (!%p228_p2), 48  }
   0x9   : > { %s16864_s13 = smov (!%p228_p2), 64  }
   0xb   : > { %v16857_v0 = vmov 0.0   ;;  %s19618_s19 = smov (!%p275_p3, %s14224_s19), 1  ;;  %vm338_vm0 = vcmask 523264   ;;  %vm803_vm1 = vcmask 130048   ;;  %vm2246_vm10 = vcmask 261120  }
   0xc   : > { %415 = vmatprep.mubr.f32.mxu0 %v16857_v0  ;;  %s16555_s20 = smul.u32 384, %s19618_s19  ;;  %s16926_s24 = sshll.u32 %s19618_s19, 6  ;;  %vm2249_vm11 = vcmask 392192  }
   0xd   : > { %s16935_s27 = scalar_lea.vmem %s19611_s0, %s16926_s24  ;;  %s14732_s7 = sshll.u32 %s19618_s19, 8 }
   0xe   : > { %s16912_s23 = scalar_lea.vmem %s19612_s1, %s16555_s20  ;;  %v305_v17 = vld [vmem:[%s16935_s27] sm:$0xff]  ;;  %v306_v18 = vld [vmem:[%s16935_s27 + $0x8] sm:$0xff]  ;;  %v307_v21 = vld [vmem:[%s16935_s27 + $0x10] sm:$0xff]  ;;  %s17241_s10 = scalar_lea.vmem %s19613_s2, %s14732_s7 }
   0xf   : > { %v336_v1 = vld [vmem:[%s16912_s23 + $0xb0] sm:$0xff]  ;;  %v335_v2 = vld [vmem:[%s16912_s23 + $0xa8] sm:$0xff]  ;;  %v333_v3 = vld [vmem:[%s16912_s23 + $0x98] sm:$0xff]  ;;  %s18037_s16 = scalar_lea.vmem %s19614_s3, %s16926_s24  ;;  %s16556_s17 = smul.u32 192, %s19618_s19 }
  0x10   : > { %367 = vmatprep.subr.mxu0 %v336_v1  ;;  %v332_v4 = vld [vmem:[%s16912_s23 + $0x90] sm:$0xff]  ;;  %v330_v5 = vld [vmem:[%s16912_s23 + $0x80] sm:$0xff]  ;;  %v329_v6 = vld [vmem:[%s16912_s23 + $0x78] sm:$0xff]  ;;  %s304_s25 = scalar_lea.vmem %s19616_s5, %s16926_s24 }
  0x11   : > { %368 = vmatpush1.msra.mxu0 %v335_v2  ;;  %v327_v7 = vld [vmem:[%s16912_s23 + $0x68] sm:$0xff]  ;;  %v326_v8 = vld [vmem:[%s16912_s23 + $0x60] sm:$0xff]  ;;  %v324_v9 = vld [vmem:[%s16912_s23 + $0x50] sm:$0xff]  ;;  %s18264_s22 = scalar_lea.vmem %s19615_s4, %s16556_s17 }
  0x12   : > { %369 = vmatprep.subr.mxu0 %v333_v3  ;;  %v323_v10 = vld [vmem:[%s16912_s23 + $0x48] sm:$0xff]  ;;  %v321_v11 = vld [vmem:[%s16912_s23 + $0x38] sm:$0xff]  ;;  %v320_v12 = vld [vmem:[%s16912_s23 + $0x30] sm:$0xff] }
  0x13   : > { %370 = vmatpush1.msra.mxu0 %v332_v4  ;;  %v318_v13 = vld [vmem:[%s16912_s23 + $0x20] sm:$0xff]  ;;  %v317_v14 = vld [vmem:[%s16912_s23 + $0x18] sm:$0xff]  ;;  %v315_v15 = vld [vmem:[%s16912_s23 + $0x8] sm:$0xff] }
  0x14   : > { %371 = vmatprep.subr.mxu0 %v330_v5  ;;  %v314_v16 = vld [vmem:[%s16912_s23] sm:$0xff]  ;;  %v337_v19 = vld [vmem:[%s16912_s23 + $0xb8] sm:$0xff]  ;;  %v331_v22 = vld [vmem:[%s16912_s23 + $0x88] sm:$0xff] }
  0x15   : > { %372 = vmatpush1.msra.mxu0 %v329_v6  ;;  %v334_v20 = vld [vmem:[%s16912_s23 + $0xa0] sm:$0xff]  ;;  %v328_v23 = vld [vmem:[%s16912_s23 + $0x70] sm:$0xff]  ;;  %v308_v24 = vld [vmem:[%s16935_s27 + $0x18] sm:$0xff] }
  0x16   : > { %373 = vmatprep.subr.mxu0 %v327_v7  ;;  %v325_v25 = vld [vmem:[%s16912_s23 + $0x58] sm:$0xff]  ;;  %v322_v26 = vld [vmem:[%s16912_s23 + $0x40] sm:$0xff]  ;;  %v319_v27 = vld [vmem:[%s16912_s23 + $0x28] sm:$0xff] }
  0x17   : > { %374 = vmatpush1.msra.mxu0 %v326_v8  ;;  %v316_v28 = vld [vmem:[%s16912_s23 + $0x10] sm:$0xff]  ;;  %v14272_v30 = vld [vmem:[%s16912_s23 + $0x168] sm:$0xff]  ;;  %v14270_v31 = vld [vmem:[%s16912_s23 + $0x158] sm:$0xff] }
  0x18   : > { %375 = vmatprep.subr.mxu0 %v324_v9  ;;  %v14273_v29 = vld [vmem:[%s16912_s23 + $0x170] sm:$0xff]  ;;  %v14267_v33 = vld [vmem:[%s16912_s23 + $0x140] sm:$0xff]  ;;  %v14266_v34 = vld [vmem:[%s16912_s23 + $0x138] sm:$0xff] }
  0x19   : > { %376 = vmatpush1.msra.mxu0 %v323_v10  ;;  %v14269_v32 = vld [vmem:[%s16912_s23 + $0x150] sm:$0xff]  ;;  %v14264_v35 = vld [vmem:[%s16912_s23 + $0x128] sm:$0xff]  ;;  %v14263_v36 = vld [vmem:[%s16912_s23 + $0x120] sm:$0xff] }
  0x1a   : > { %377 = vmatprep.subr.mxu0 %v321_v11  ;;  %v14261_v37 = vld [vmem:[%s16912_s23 + $0x110] sm:$0xff]  ;;  %v14260_v38 = vld [vmem:[%s16912_s23 + $0x108] sm:$0xff]  ;;  %v14258_v39 = vld [vmem:[%s16912_s23 + $0xf8] sm:$0xff] }
  0x1b   : > { %378 = vmatpush1.msra.mxu0 %v320_v12  ;;  %v14257_v40 = vld [vmem:[%s16912_s23 + $0xf0] sm:$0xff]  ;;  %v14255_v41 = vld [vmem:[%s16912_s23 + $0xe0] sm:$0xff]  ;;  %v14254_v42 = vld [vmem:[%s16912_s23 + $0xd8] sm:$0xff] }
  0x1c   : > { %379 = vmatprep.subr.mxu0 %v318_v13  ;;  %v14252_v43 = vld [vmem:[%s16912_s23 + $0xc8] sm:$0xff]  ;;  %v14251_v44 = vld [vmem:[%s16912_s23 + $0xc0] sm:$0xff]  ;;  %v14274_v46 = vld [vmem:[%s16912_s23 + $0x178] sm:$0xff] }
  0x1d   : > { %380 = vmatpush1.msra.mxu0 %v317_v14  ;;  %v14239_v45 = vld [vmem:[%s16935_s27 + $0x20] sm:$0xff]  ;;  %v14240_v48 = vld [vmem:[%s16935_s27 + $0x28] sm:$0xff]  ;;  %v14265_v50 = vld [vmem:[%s16912_s23 + $0x130] sm:$0xff] }
  0x1e   : > { %381 = vmatprep.subr.mxu0 %v315_v15  ;;  %v14271_v47 = vld [vmem:[%s16912_s23 + $0x160] sm:$0xff]  ;;  %v14268_v49 = vld [vmem:[%s16912_s23 + $0x148] sm:$0xff]  ;;  %v14241_v51 = vld [vmem:[%s16935_s27 + $0x30] sm:$0xff] }
  0x1f   : > { %382 = vmatpush1.msra.mxu0 %v314_v16  ;;  %v14262_v52 = vld [vmem:[%s16912_s23 + $0x118] sm:$0xff]  ;;  %v14259_v53 = vld [vmem:[%s16912_s23 + $0x100] sm:$0xff]  ;;  %v14256_v55 = vld [vmem:[%s16912_s23 + $0xe8] sm:$0xff] }
  0x20   : > { %14243 = vmatmul.mubr.msk.f32.vlgmr.msra.gmra.mxu0 %vm338_vm0, %v305_v17  ;;  %15387 = vmatprep.subr.mxu0 %v337_v19  ;;  %v14242_v54 = vld [vmem:[%s16935_s27 + $0x38] sm:$0xff]  ;;  %v14253_v56 = vld [vmem:[%s16912_s23 + $0xd0] sm:$0xff] }
  0x21   : > { %421 = vmatprep.mubr.f32.mxu0 %v16857_v0  ;;  %15388 = vmatpush3.msra.mxu0 %v337_v19 }
  0x22   : > { %15389 = vmatprep.subr.mxu0 %v334_v20 }
  0x23   : > { %15390 = vmatpush3.msra.mxu0 %v334_v20 }
  0x24   : > { %14244 = vmatmul.mubr.msk.f32.gmra.mxu0 %vm338_vm0, %v306_v18  ;;  %15391 = vmatprep.subr.mxu0 %v331_v22 }
  0x25   : > { %427 = vmatprep.mubr.f32.mxu0 %v16857_v0  ;;  %15392 = vmatpush3.msra.mxu0 %v331_v22 }
  0x26   : > { %15393 = vmatprep.subr.mxu0 %v328_v23 }
  0x27   : > { %15394 = vmatpush3.msra.mxu0 %v328_v23 }
  0x28   : > { %14245 = vmatmul.mubr.msk.f32.gmra.mxu0 %vm338_vm0, %v307_v21  ;;  %15395 = vmatprep.subr.mxu0 %v325_v25 }
  0x29   : > { %433 = vmatprep.mubr.f32.mxu0 %v16857_v0  ;;  %15396 = vmatpush3.msra.mxu0 %v325_v25 }
  0x2a   : > { %15397 = vmatprep.subr.mxu0 %v322_v26 }
  0x2b   : > { %15398 = vmatpush3.msra.mxu0 %v322_v26 }
  0x2c   : > { %14246 = vmatmul.mubr.msk.f32.gmra.mxu0 %vm338_vm0, %v308_v24  ;;  %15399 = vmatprep.subr.mxu0 %v319_v27 }
  0x2d   : > { %15403 = vmatprep.mubr.msk.f32.mxu0 %vm338_vm0, %v305_v17  ;;  %15400 = vmatpush3.msra.mxu0 %v319_v27 }
  0x2e   : > { %15401 = vmatprep.subr.mxu0 %v316_v28 }
  0x2f   : > { %15402 = vmatpush3.msra.mxu0 %v316_v28 }
  0x30   : > { %578 = vmatprep.subr.mxu0 %v14273_v29  ;;  %15404 = vmatmul.mubr.msk.f32.vlgmr.msra.gmra.mxu0 %vm338_vm0, %v306_v18 }
  0x31   : > { %579 = vmatpush1.msra.mxu0 %v14272_v30  ;;  %15406 = vmatprep.mubr.msk.f32.mxu0 %vm338_vm0, %v307_v21 }
  0x32   : > { %580 = vmatprep.subr.mxu0 %v14270_v31 }
  0x33   : > { %581 = vmatpush1.msra.mxu0 %v14269_v32 }
  0x34   : > { %582 = vmatprep.subr.mxu0 %v14267_v33  ;;  %15407 = vmatmul.mubr.msk.f32.gmra.mxu0 %vm338_vm0, %v308_v24 }
  0x35   : > { %583 = vmatpush1.msra.mxu0 %v14266_v34  ;;  %626 = vmatprep.mubr.f32.mxu0 %v16857_v0 }
  0x36   : > { %584 = vmatprep.subr.mxu0 %v14264_v35 }
  0x37   : > { %585 = vmatpush1.msra.mxu0 %v14263_v36 }
  0x38   : > { %586 = vmatprep.subr.mxu0 %v14261_v37 }
  0x39   : > { %587 = vmatpush1.msra.mxu0 %v14260_v38 }
  0x3a   : > { %588 = vmatprep.subr.mxu0 %v14258_v39 }
  0x3b   : > { %589 = vmatpush1.msra.mxu0 %v14257_v40 }
  0x3c   : > { %590 = vmatprep.subr.mxu0 %v14255_v41 }
  0x3d   : > { %591 = vmatpush1.msra.mxu0 %v14254_v42 }
  0x3e   : > { %592 = vmatprep.subr.mxu0 %v14252_v43 }
  0x3f   : > { %593 = vmatpush1.msra.mxu0 %v14251_v44 }
  0x40   : > { %14275 = vmatmul.mubr.msk.f32.vlgmr.msra.gmra.mxu0 %vm338_vm0, %v14239_v45  ;;  %15409 = vmatprep.subr.mxu0 %v14274_v46 }
  0x41   : > { %15410 = vmatpush3.msra.mxu0 %v14274_v46  ;;  %632 = vmatprep.mubr.f32.mxu0 %v16857_v0 }
  0x42   : > { %15411 = vmatprep.subr.mxu0 %v14271_v47 }
  0x43   : > { %15412 = vmatpush3.msra.mxu0 %v14271_v47 }
  0x44   : > { %14276 = vmatmul.mubr.msk.f32.gmra.mxu0 %vm338_vm0, %v14240_v48  ;;  %15413 = vmatprep.subr.mxu0 %v14268_v49 }
  0x45   : > { %15414 = vmatpush3.msra.mxu0 %v14268_v49  ;;  %638 = vmatprep.mubr.f32.mxu0 %v16857_v0 }
  0x46   : > { %15415 = vmatprep.subr.mxu0 %v14265_v50 }
  0x47   : > { %15416 = vmatpush3.msra.mxu0 %v14265_v50 }
  0x48   : > { %14277 = vmatmul.mubr.msk.f32.gmra.mxu0 %vm338_vm0, %v14241_v51  ;;  %15417 = vmatprep.subr.mxu0 %v14262_v52 }
  0x49   : > { %15418 = vmatpush3.msra.mxu0 %v14262_v52  ;;  %644 = vmatprep.mubr.f32.mxu0 %v16857_v0 }
  0x4a   : > { %15419 = vmatprep.subr.mxu0 %v14259_v53 }
  0x4b   : > { %15420 = vmatpush3.msra.mxu0 %v14259_v53 }
  0x4c   : > { %14278 = vmatmul.mubr.msk.f32.gmra.mxu0 %vm338_vm0, %v14242_v54  ;;  %15421 = vmatprep.subr.mxu0 %v14256_v55 }
  0x4d   : > { %15422 = vmatpush3.msra.mxu0 %v14256_v55  ;;  %15425 = vmatprep.mubr.msk.f32.mxu0 %vm338_vm0, %v14239_v45 }
  0x4e   : > { %15423 = vmatprep.subr.mxu0 %v14253_v56 }
  0x4f   : > { %15424 = vmatpush3.msra.mxu0 %v14253_v56 }
  0x50   : > { %15426 = vmatmul.mubr.msk.f32.vlgmr.msra.gmra.mxu0 %vm338_vm0, %v14240_v48 }
  0x51   : > { %15428 = vmatprep.mubr.msk.f32.mxu0 %vm338_vm0, %v14241_v51 }
  0x54   : > { %15429 = vmatmul.mubr.msk.f32.gmra.mxu0 %vm338_vm0, %v14242_v54 }
  0xe0   : > { %v17002_v57 = vpop.f32.mrf.mxu0 }
  0xe1   : > { %891 = vrot.lane.b32.xlu1 %v17002_v57, %s16858_s28  ;;  %15435 = vmatprep.mubr.msk.f32.mxu1 %vm803_vm1, %v17002_v57 }
  0xe2   : > { %v17008_v58 = vpop.f32.mrf.mxu0 }
  0xe4   : > { %v17010_v59 = vpop.f32.mrf.mxu0 }
  0xe5   : > { %893 = vrot.lane.b32.xlu1 %v17010_v59, %s16858_s28 }
  0xe6   : > { %v17014_v60 = vpop.f32.mrf.mxu0 }
  0xe7   : > { %897 = vrot.lane.b32.xlu0 %v17014_v60, %s16858_s28  ;;  %15431 = vmatprep.subr.msk.mxu1 %vm803_vm1, %v17014_v60 }
  0xe8   : > { %15432 = vmatpush3.xpose.msk.msra.mxu1 %vm803_vm1, %v17014_v60  ;;  %v17038_v61 = vpop.f32.mrf.mxu0 }
  0xe9   : > { %15433 = vmatprep.subr.msk.mxu1 %vm803_vm1, %v17008_v58 }
  0xea   : > { %v17040_v62 = vpop.f32.mrf.mxu0 }
  0xeb   : > { %895 = vrot.lane.b32.xlu0 %v17008_v58, %s16858_s28 }
  0xec   : > { %15434 = vmatpush3.xpose.msk.msra.mxu1 %vm803_vm1, %v17008_v58  ;;  %v17042_v63 = vpop.f32.mrf.mxu0 }
  0xed   : > { %15445 = vmatprep.subr.msk.mxu1 %vm803_vm1, %v17014_v60 }
  0xee   : > { %v17044_v1 = vpop.f32.mrf.mxu0 }
  0xef   : > { %15436 = vmatmul.mubr.msk.f32.vlgmr.msra.gmra.mxu1 %vm803_vm1, %v17010_v59 }
  0xf0   : > { %15446 = vmatpush3.xpose.msk.msra.mxu1 %vm803_vm1, %v17014_v60  ;;  %v17046_v2 = vpop.f32.mrf.mxu0 }
  0xf1   : > { %15447 = vmatprep.subr.msk.mxu1 %vm803_vm1, %v17008_v58 }
  0xf2   : > { %v17051_v5 = vpop.f32.mrf.mxu0 }
  0xf4   : > { %15448 = vmatpush3.xpose.msk.msra.mxu1 %vm803_vm1, %v17008_v58  ;;  %v17074_v8 = vpop.f32.mrf.mxu0 }
  0xf5   : > { %15459 = vmatprep.subr.mxu1 %v17046_v2 }
  0xf6   : > { %v17076_v9 = vpop.f32.mrf.mxu0 }
 0x100   : > { %v17078_v10 = vpop.f32.mrf.mxu0 }
 0x102   : > { %v17080_v11 = vpop.f32.mrf.mxu0 }
 0x104   : > { %v17082_v12 = vpop.f32.mrf.mxu0 }
 0x106   : > { %v17084_v13 = vpop.f32.mrf.mxu0 }
 0x108   : > { %v17086_v14 = vpop.f32.mrf.mxu0 }
 0x10a   : > { %v17088_v15 = vpop.f32.mrf.mxu0 }
 0x10c   : > { %v17090_v16 = vpop.f32.mrf.mxu0 }
 0x10e   : > { %v17092_v17 = vpop.f32.mrf.mxu0 }
 0x110   : > { %v17094_v18 = vpop.f32.mrf.mxu0 }
 0x112   : > { %v17096_v19 = vpop.f32.mrf.mxu0 }
 0x114   : > { %v17098_v20 = vpop.f32.mrf.mxu0 }
 0x116   : > { %v17100_v21 = vpop.f32.mrf.mxu0 }
 0x153   : > { %v892_v3 = vpop.permute.xlu1 %891 }
 0x154   : > { %15442 = vmatprep.mubr.msk.f32.mxu0 %vm803_vm1, %v892_v3  ;;  %15449 = vmatprep.mubr.msk.f32.mxu1 %vm803_vm1, %v892_v3 }
 0x157   : > { %v894_v4 = vpop.permute.xlu1 %893 }
 0x158   : > { %15450 = vmatmul.mubr.msk.f32.vlgmr.msra.gmra.mxu1 %vm803_vm1, %v894_v4 }
 0x159   : > { %v898_v6 = vpop.permute.xlu0 %897  ;;  %15460 = vmatpush3.msra.mxu1 %v17046_v2 }
 0x15a   : > { %15438 = vmatprep.subr.msk.mxu0 %vm803_vm1, %v898_v6  ;;  %15461 = vmatprep.subr.mxu1 %v17051_v5 }
 0x15b   : > { %15439 = vmatpush3.xpose.msk.msra.mxu0 %vm803_vm1, %v898_v6  ;;  %15462 = vmatpush3.msra.mxu1 %v17051_v5 }
 0x15d   : > { %v896_v7 = vpop.permute.xlu0 %895 }
 0x15e   : > { %15440 = vmatprep.subr.msk.mxu0 %vm803_vm1, %v896_v7 }
 0x15f   : > { %15441 = vmatpush3.xpose.msk.msra.mxu0 %vm803_vm1, %v896_v7 }
 0x160   : > { %15452 = vmatprep.subr.msk.mxu0 %vm803_vm1, %v898_v6 }
 0x162   : > { %15443 = vmatmul.mubr.msk.f32.vlgmr.msra.gmra.mxu0 %vm803_vm1, %v894_v4 }
 0x163   : > { %15453 = vmatpush3.xpose.msk.msra.mxu0 %vm803_vm1, %v898_v6  ;;  %15456 = vmatprep.mubr.msk.f32.mxu0 %vm803_vm1, %v17002_v57 }
 0x164   : > { %15454 = vmatprep.subr.msk.mxu0 %vm803_vm1, %v896_v7 }
 0x167   : > { %15455 = vmatpush3.xpose.msk.msra.mxu0 %vm803_vm1, %v896_v7 }
 0x168   : > { %15473 = vmatprep.subr.mxu0 %v17046_v2 }
 0x16a   : > { %15457 = vmatmul.mubr.msk.f32.vlgmr.msra.gmra.mxu0 %vm803_vm1, %v17010_v59 }
 0x16b   : > { %15474 = vmatpush3.msra.mxu0 %v17046_v2 }
 0x16c   : > { %15475 = vmatprep.subr.mxu0 %v17051_v5 }
 0x16d   : > { %15476 = vmatpush3.msra.mxu0 %v17051_v5 }
 0x1af   : > { %v15437_v22 = vpop.f32.mrf.mxu1 }
 0x1b1   : > { %v882_v24 = vpop.f32.mrf.mxu1 }
 0x218   : > { %v15451_v25 = vpop.f32.mrf.mxu1 }
 0x21a   : > { %v1050_v31 = vpop.f32.mrf.mxu1 }
 0x222   : > { %v15444_v23 = vpop.f32.mrf.mxu0 }
 0x223   : > { %v17102_v27 = vsub.f32 %v15437_v22, %v15444_v23 }
 0x224   : > { %v973_v26 = vpop.f32.mrf.mxu0 }
 0x225   : > { %v17104_v29 = vsub.f32 %v882_v24, %v973_v26  ;;  %v1135_v33 = vmul.f32 %v17102_v27, %v17102_v27 }
 0x227   : > { %v1134_v36 = vmul.f32 %v17104_v29, %v17104_v29 }
 0x22a   : > { %v15458_v28 = vpop.f32.mrf.mxu0 }
 0x22b   : > { %v17106_v30 = vadd.f32 %v15458_v28, %v15451_v25 }
 0x22c   : > { %v1125_v32 = vpop.f32.mrf.mxu0 }
 0x22d   : > { %v1137_v34 = vmul.f32 %v17106_v30, %v17106_v30  ;;  %v17112_v35 = vadd.f32 %v1125_v32, %v1050_v31 }
 0x22f   : > { %v1139_v37 = vadd.f32 %v1137_v34, %v1135_v33  ;;  %v1136_v38 = vmul.f32 %v17112_v35, %v17112_v35 }
 0x231   : > { %16585 = vrsqrt.f32 %v1139_v37  ;;  %v1138_v39 = vadd.f32 %v1136_v38, %v1134_v36  ;;  %vm1149_vm2 = vcmp.eq.f32.partialorder %v1139_v37, inf  ;;  %v1152_v43 = vand.u32 2147483648, %v1139_v37 }
 0x232   : > { %vm1151_vm3 = vcmp.eq.f32.partialorder %v1139_v37, 0.0 }
 0x233   : > { %16587 = vrsqrt.f32 %v1138_v39  ;;  %vm1142_vm4 = vcmp.eq.f32.partialorder %v1138_v39, inf  ;;  %v1145_v47 = vand.u32 2147483648, %v1138_v39  ;;  %vm1144_vm5 = vcmp.eq.f32.partialorder %v1138_v39, 0.0 }
 0x23e   : > { %v16586_v40 = vpop.eup %16585 }
 0x23f   : > { %v1148_v41 = vmul.f32 %v16586_v40, %v1139_v37 }
 0x240   : > { %v16588_v42 = vpop.eup %16587 }
 0x241   : > { %v1150_v44 = vsel %vm1149_vm2, %v1139_v37, %v1148_v41  ;;  %v1141_v45 = vmul.f32 %v16588_v42, %v1138_v39 }
 0x242   : > { %v1153_v46 = vsel %vm1151_vm3, %v1152_v43, %v1150_v44 }
 0x243   : > { %v1157_v48 = vsel %vm803_vm1, %v1153_v46, inf  ;;  %v1143_v49 = vsel %vm1142_vm4, %v1138_v39, %v1141_v45  ;;  %v1163_v53 = vsel %vm803_vm1, %v1153_v46, -inf  ;;  %v1177_v25 = vadd.f32 1e-09, %v1153_v46 }
 0x244   : > { %1158 = vmin.xlane.f32.xlu0 %v1157_v48  ;;  %v1146_v50 = vsel %vm1144_vm5, %v1145_v47, %v1143_v49 }
 0x245   : > { %v1160_v51 = vsel %vm803_vm1, %v1146_v50, -inf  ;;  %v1154_v52 = vsel %vm803_vm1, %v1146_v50, inf  ;;  %v1176_v6 = vadd.f32 1e-09, %v1146_v50 }
 0x246   : > { %1161 = vmax.xlane.f32.xlu1 %v1160_v51 }
 0x248   : > { %1155 = vmin.xlane.f32.xlu0 %v1154_v52 }
 0x24c   : > { %1164 = vmax.xlane.f32.xlu0 %v1163_v53 }
 0x257   : > { %1271 = vrot.lane.b32.xlu1 %v17046_v2, %s16858_s28 }
 0x25b   : > { %1514 = vrot.lane.b32.xlu1 %v17014_v60, %s16859_s29 }
 0x25f   : > { %1605 = vrot.lane.b32.xlu1 %v17014_v60, %s16860_s30 }
 0x262   : > { %1269 = vrot.lane.b32.xlu0 %v17051_v5, %s16858_s28 }
 0x263   : > { %1603 = vrot.lane.b32.xlu1 %v17008_v58, %s16860_s30 }
 0x266   : > { %1512 = vrot.lane.b32.xlu0 %v17008_v58, %s16859_s29 }
 0x267   : > { %1599 = vrot.lane.b32.xlu1 %v17002_v57, %s16860_s30 }
 0x26a   : > { %1508 = vrot.lane.b32.xlu0 %v17002_v57, %s16859_s29 }
 0x26b   : > { %1601 = vrot.lane.b32.xlu1 %v17010_v59, %s16860_s30 }
 0x26e   : > { %1510 = vrot.lane.b32.xlu0 %v17010_v59, %s16859_s29 }
 0x26f   : > { %1896 = vrot.lane.b32.xlu1 %v17046_v2, %s16859_s29 }
 0x273   : > { %1894 = vrot.lane.b32.xlu1 %v17051_v5, %s16859_s29 }
 0x2cd   : > { %v1159_v54 = vpop.xlane.xlu0 %1158 }
 0x2ce   : > { %v1167_v37 = vsub.f32 %v1153_v46, %v1159_v54 }
 0x2cf   : > { %v1162_v55 = vpop.xlane.xlu1 %1161 }
 0x2d1   : > { %v1156_v56 = vpop.xlane.xlu0 %1155 }
 0x2d2   : > { %v1168_v3 = vsub.f32 %v1162_v55, %v1156_v56  ;;  %v1166_v28 = vsub.f32 %v1146_v50, %v1156_v56 }
 0x2d3   : > { %v1272_v4 = vpop.permute.xlu1 %1271 }
 0x2d4   : > { %v1170_v7 = vadd.f32 1e-09, %v1168_v3  ;;  %15466 = vmatprep.subr.mxu1 %v1272_v4 }
 0x2d5   : > { %v1165_v22 = vpop.xlane.xlu0 %1164 }
 0x2d6   : > { %16589 = vrcp.f32 %v1170_v7  ;;  %v1169_v23 = vsub.f32 %v1165_v22, %v1159_v54 }
 0x2d7   : > { %v1515_v24 = vpop.permute.xlu1 %1514  ;;  %16591 = vrcp.f32 %v1176_v6 }
 0x2d8   : > { %v1171_v26 = vadd.f32 1e-09, %v1169_v23  ;;  %15487 = vmatprep.subr.msk.mxu0 %vm803_vm1, %v1515_v24 }
 0x2d9   : > { %v1270_v34 = vpop.permute.xlu0 %1269 }
 0x2da   : > { %16593 = vrcp.f32 %v1171_v26 }
 0x2db   : > { %16595 = vrcp.f32 %v1177_v25  ;;  %v1606_v32 = vpop.permute.xlu1 %1605 }
 0x2dd   : > { %v1513_v45 = vpop.permute.xlu0 %1512 }
 0x2df   : > { %v1604_v44 = vpop.permute.xlu1 %1603 }
 0x2e3   : > { %v16590_v31 = vpop.eup %16589 }
 0x2e4   : > { %v1173_v33 = vmul.f32 %v16590_v31, %v1166_v28  ;;  %v16592_v36 = vpop.eup %16591 }
 0x2e6   : > { %v1179_v38 = vmul.f32 %v16592_v36, %v1173_v33 }
 0x2e7   : > { %v16594_v39 = vpop.eup %16593 }
 0x2e8   : > { %v1182_v40 = vmul.f32 %v1179_v38, %v17104_v29  ;;  %v1184_v41 = vmul.f32 %v1179_v38, %v17112_v35  ;;  %v1175_v42 = vmul.f32 %v16594_v39, %v1167_v37  ;;  %v16596_v43 = vpop.eup %16595  ;;  %v1600_v29 = vpop.permute.xlu1 %1599 }
 0x2e9   : > { %v1509_v35 = vpop.permute.xlu0 %1508 }
 0x2ea   : > { %15463 = vmatprep.mubr.msk.f32.mxu1 %vm803_vm1, %v1182_v40  ;;  %15477 = vmatprep.mubr.msk.f32.mxu0 %vm803_vm1, %v1184_v41  ;;  %v1181_v47 = vmul.f32 %v16596_v43, %v1175_v42 }
 0x2ec   : > { %v1183_v48 = vmul.f32 %v1181_v47, %v17102_v27  ;;  %v1185_v49 = vmul.f32 %v1181_v47, %v17106_v30  ;;  %v1602_v27 = vpop.permute.xlu1 %1601 }
 0x2ed   : > { %v1511_v30 = vpop.permute.xlu0 %1510 }
 0x2ee   : > { %15464 = vmatmul.mubr.msk.f32.vlgmr.msra.gmra.mxu1 %vm803_vm1, %v1183_v48  ;;  %15478 = vmatmul.mubr.msk.f32.vlgmr.msra.gmra.mxu0 %vm803_vm1, %v1185_v49 }
 0x2ef   : > { %15467 = vmatpush3.msra.mxu1 %v1272_v4  ;;  %15488 = vmatpush3.xpose.msk.msra.mxu0 %vm803_vm1, %v1515_v24 }
 0x2f0   : > { %15468 = vmatprep.subr.mxu1 %v1270_v34  ;;  %15470 = vmatprep.mubr.msk.f32.mxu1 %vm803_vm1, %v1184_v41  ;;  %v17171_v46 = vpop.permute.xlu1 %1896 }
 0x2f1   : > { %15489 = vmatprep.subr.msk.mxu0 %vm803_vm1, %v1513_v45  ;;  %15491 = vmatprep.mubr.msk.f32.mxu0 %vm803_vm1, %v1509_v35 }
 0x2f2   : > { %15469 = vmatpush3.msra.mxu1 %v1270_v34 }
 0x2f3   : > { %15480 = vmatprep.subr.mxu1 %v1272_v4  ;;  %15471 = vmatmul.mubr.msk.f32.vlgmr.msra.gmra.mxu1 %vm803_vm1, %v1185_v49 }
 0x2f4   : > { %15481 = vmatpush3.msra.mxu1 %v1272_v4  ;;  %15490 = vmatpush3.xpose.msk.msra.mxu0 %vm803_vm1, %v1513_v45  ;;  %v17181_v50 = vpop.permute.xlu1 %1894 }
 0x2f5   : > { %15482 = vmatprep.subr.mxu1 %v1270_v34  ;;  %15484 = vmatprep.mubr.msk.f32.mxu1 %vm803_vm1, %v1182_v40 }
 0x2f6   : > { %15501 = vmatprep.subr.msk.mxu0 %vm803_vm1, %v1515_v24  ;;  %15483 = vmatpush3.msra.mxu1 %v1270_v34 }
 0x2f7   : > { %15492 = vmatmul.mubr.msk.f32.vlgmr.msra.gmra.mxu0 %vm803_vm1, %v1511_v30  ;;  %15494 = vmatprep.subr.msk.mxu1 %vm803_vm1, %v1606_v32 }
 0x2f8   : > { %15485 = vmatmul.mubr.msk.f32.vlgmr.msra.gmra.mxu1 %vm803_vm1, %v1183_v48  ;;  %15502 = vmatpush3.xpose.msk.msra.mxu0 %vm803_vm1, %v1515_v24 }
 0x2f9   : > { %15495 = vmatpush3.xpose.msk.msra.mxu1 %vm803_vm1, %v1606_v32  ;;  %15505 = vmatprep.mubr.msk.f32.mxu0 %vm803_vm1, %v1600_v29 }
 0x2fa   : > { %15496 = vmatprep.subr.msk.mxu1 %vm803_vm1, %v1604_v44  ;;  %15498 = vmatprep.mubr.msk.f32.mxu1 %vm803_vm1, %v1600_v29 }
 0x2fb   : > { %15503 = vmatprep.subr.msk.mxu0 %vm803_vm1, %v1513_v45 }
 0x2fc   : > { %15504 = vmatpush3.xpose.msk.msra.mxu0 %vm803_vm1, %v1513_v45 }
 0x2fd   : > { %15497 = vmatpush3.xpose.msk.msra.mxu1 %vm803_vm1, %v1604_v44  ;;  %15515 = vmatprep.subr.mxu0 %v17171_v46 }
 0x2fe   : > { %15508 = vmatprep.subr.msk.mxu1 %vm803_vm1, %v1606_v32 }
 0x2ff   : > { %15506 = vmatmul.mubr.msk.f32.vlgmr.msra.gmra.mxu0 %vm803_vm1, %v1602_v27 }
 0x300   : > { %15499 = vmatmul.mubr.msk.f32.vlgmr.msra.gmra.mxu1 %vm803_vm1, %v1602_v27  ;;  %15516 = vmatpush3.msra.mxu0 %v17171_v46 }
 0x301   : > { %15509 = vmatpush3.xpose.msk.msra.mxu1 %vm803_vm1, %v1606_v32  ;;  %15512 = vmatprep.mubr.msk.f32.mxu1 %vm803_vm1, %v1509_v35 }
 0x302   : > { %15510 = vmatprep.subr.msk.mxu1 %vm803_vm1, %v1604_v44  ;;  %15517 = vmatprep.subr.mxu0 %v17181_v50 }
 0x303   : > { %15518 = vmatpush3.msra.mxu0 %v17181_v50 }
 0x304   : > { %15529 = vmatprep.subr.mxu0 %v17171_v46 }
 0x305   : > { %15511 = vmatpush3.xpose.msk.msra.mxu1 %vm803_vm1, %v1604_v44 }
 0x308   : > { %15513 = vmatmul.mubr.msk.f32.vlgmr.msra.gmra.mxu1 %vm803_vm1, %v1511_v30 }
 0x3ae   : > { %v17191_v51 = vpop.f32.mrf.mxu1  ;;  %v15479_v56 = vpop.f32.mrf.mxu0 }
 0x3b0   : > { %v17193_v52 = vpop.f32.mrf.mxu1  ;;  %v1424_v4 = vpop.f32.mrf.mxu0 }
 0x3b3   : > { %v17195_v53 = vpop.f32.mrf.mxu1 }
 0x3b4   : > { %v1357_v54 = vsub.f32 %v17191_v51, %v17195_v53 }
 0x3b5   : > { %v17199_v55 = vpop.f32.mrf.mxu1 }
 0x3b7   : > { %v15493_v6 = vpop.f32.mrf.mxu0 }
 0x3b8   : > { %v15486_v3 = vpop.f32.mrf.mxu1 }
 0x3b9   : > { %v1590_v23 = vpop.f32.mrf.mxu0 }
 0x3ba   : > { %v1499_v7 = vpop.f32.mrf.mxu1 }
 0x3bf   : > { %v15507_v24 = vpop.f32.mrf.mxu0 }
 0x3c0   : > { %v15500_v22 = vpop.f32.mrf.mxu1 }
 0x3c1   : > { %v17201_v26 = vsub.f32 %v15493_v6, %v15500_v22  ;;  %v1758_v33 = vpop.f32.mrf.mxu0 }
 0x3c2   : > { %v1681_v25 = vpop.f32.mrf.mxu1 }
 0x3c3   : > { %v17203_v31 = vsub.f32 %v1590_v23, %v1681_v25  ;;  %v1843_v36 = vmul.f32 %v17201_v26, %v17201_v26  ;;  %v1505_v25 = vadd.f32 %v15486_v3, %v15479_v56 }
 0x3c5   : > { %v1842_v39 = vmul.f32 %v17203_v31, %v17203_v31 }
 0x3c8   : > { %v15514_v28 = vpop.f32.mrf.mxu1 }
 0x3c9   : > { %v17205_v32 = vadd.f32 %v15514_v28, %v15507_v24  ;;  %v1500_v28 = vadd.f32 %v1499_v7, %v1424_v4 }
 0x3ca   : > { %v1833_v34 = vpop.f32.mrf.mxu1 }
 0x3cb   : > { %v1845_v37 = vmul.f32 %v17205_v32, %v17205_v32  ;;  %v17211_v38 = vadd.f32 %v1833_v34, %v1758_v33 }
 0x3cd   : > { %v1847_v40 = vadd.f32 %v1845_v37, %v1843_v36  ;;  %v1844_v41 = vmul.f32 %v17211_v38, %v17211_v38 }
 0x3cf   : > { %16597 = vrsqrt.f32 %v1847_v40  ;;  %v1846_v42 = vadd.f32 %v1844_v41, %v1842_v39  ;;  %vm1857_vm6 = vcmp.eq.f32.partialorder %v1847_v40, inf  ;;  %v1860_v47 = vand.u32 2147483648, %v1847_v40 }
 0x3d0   : > { %vm1859_vm7 = vcmp.eq.f32.partialorder %v1847_v40, 0.0 }
 0x3d1   : > { %16599 = vrsqrt.f32 %v1846_v42  ;;  %vm1850_vm8 = vcmp.eq.f32.partialorder %v1846_v42, inf  ;;  %v1853_v35 = vand.u32 2147483648, %v1846_v42  ;;  %vm1852_vm9 = vcmp.eq.f32.partialorder %v1846_v42, 0.0 }
 0x3dc   : > { %v16598_v43 = vpop.eup %16597 }
 0x3dd   : > { %v1856_v44 = vmul.f32 %v16598_v43, %v1847_v40 }
 0x3de   : > { %v16600_v45 = vpop.eup %16599 }
 0x3df   : > { %v1858_v48 = vsel %vm1857_vm6, %v1847_v40, %v1856_v44  ;;  %v1849_v49 = vmul.f32 %v16600_v45, %v1846_v42 }
 0x3e0   : > { %v1861_v29 = vsel %vm1859_vm7, %v1860_v47, %v1858_v48 }
 0x3e1   : > { %v1865_v27 = vsel %vm803_vm1, %v1861_v29, inf  ;;  %v1851_v30 = vsel %vm1850_vm8, %v1846_v42, %v1849_v49  ;;  %v1871_v24 = vsel %vm803_vm1, %v1861_v29, -inf  ;;  %v1885_v3 = vadd.f32 1e-09, %v1861_v29 }
 0x3e2   : > { %1866 = vmin.xlane.f32.xlu0 %v1865_v27  ;;  %v1854_v6 = vsel %vm1852_vm9, %v1853_v35, %v1851_v30 }
 0x3e3   : > { %v1868_v22 = vsel %vm803_vm1, %v1854_v6, -inf  ;;  %v1862_v23 = vsel %vm803_vm1, %v1854_v6, inf  ;;  %v1884_v39 = vadd.f32 1e-09, %v1854_v6 }
 0x3e4   : > { %1869 = vmax.xlane.f32.xlu1 %v1868_v22 }
 0x3e6   : > { %1863 = vmin.xlane.f32.xlu0 %v1862_v23 }
 0x3ea   : > { %1872 = vmax.xlane.f32.xlu0 %v1871_v24 }
 0x3f5   : > { %1981 = vrot.lane.b32.xlu1 %v17051_v5, %s16860_s30 }
 0x3f9   : > { %2424 = vrot.lane.b32.xlu1 %v17080_v11, %s16858_s28 }
 0x3fd   : > { %2232 = vrot.lane.b32.xlu1 %v1505_v25, %s16861_s6 }
 0x400   : > { %1983 = vrot.lane.b32.xlu0 %v17046_v2, %s16860_s30 }
 0x404   : > { %2426 = vrot.lane.b32.xlu0 %v17084_v13, %s16858_s28 }
 0x408   : > { %2230 = vrot.lane.b32.xlu0 %v1500_v28, %s16861_s6 }
 0x46b   : > { %v1867_v33 = vpop.xlane.xlu0 %1866 }
 0x46c   : > { %v1875_v48 = vsub.f32 %v1861_v29, %v1867_v33  ;;  %v738_v29 = vld [vmem:[%s17241_s10 + $0x10] sm:$0xff] }
 0x46d   : > { %v1870_v34 = vpop.xlane.xlu1 %1869 }
 0x46f   : > { %v1864_v36 = vpop.xlane.xlu0 %1863 }
 0x470   : > { %v1876_v37 = vsub.f32 %v1870_v34, %v1864_v36  ;;  %v1874_v4 = vsub.f32 %v1854_v6, %v1864_v36  ;;  %v736_v34 = vld [vmem:[%s17241_s10] sm:$0xff] }
 0x471   : > { %v1982_v44 = vpop.permute.xlu1 %1981 }
 0x472   : > { %v1878_v40 = vadd.f32 1e-09, %v1876_v37 }
 0x473   : > { %v1873_v41 = vpop.xlane.xlu0 %1872 }
 0x474   : > { %16601 = vrcp.f32 %v1878_v40  ;;  %v1877_v56 = vsub.f32 %v1873_v41, %v1867_v33  ;;  %v737_v33 = vld [vmem:[%s17241_s10 + $0x8] sm:$0xff] }
 0x475   : > { %16603 = vrcp.f32 %v1884_v39  ;;  %v17274_v28 = vpop.permute.xlu1 %2424 }
 0x476   : > { %v1879_v42 = vadd.f32 1e-09, %v1877_v56 }
 0x477   : > { %v1984_v43 = vpop.permute.xlu0 %1983 }
 0x478   : > { %16605 = vrcp.f32 %v1879_v42  ;;  %15522 = vmatprep.subr.mxu1 %v1984_v43 }
 0x479   : > { %15523 = vmatpush3.msra.mxu1 %v1984_v43  ;;  %16607 = vrcp.f32 %v1885_v3 }
 0x47a   : > { %15524 = vmatprep.subr.mxu1 %v1982_v44 }
 0x47b   : > { %15525 = vmatpush3.msra.mxu1 %v1982_v44 }
 0x47c   : > { %15536 = vmatprep.subr.mxu1 %v1984_v43 }
 0x481   : > { %v16602_v7 = vpop.eup %16601 }
 0x482   : > { %v1881_v45 = vmul.f32 %v16602_v7, %v1874_v4  ;;  %v16604_v47 = vpop.eup %16603 }
 0x484   : > { %v1887_v49 = vmul.f32 %v16604_v47, %v1881_v45  ;;  %v2233_v45 = vpop.permute.xlu1 %2232 }
 0x485   : > { %v16606_v35 = vpop.eup %16605 }
 0x486   : > { %v1890_v27 = vmul.f32 %v1887_v49, %v17203_v31  ;;  %v1892_v30 = vmul.f32 %v1887_v49, %v17211_v38  ;;  %v1883_v22 = vmul.f32 %v16606_v35, %v1875_v48  ;;  %v16608_v23 = vpop.eup %16607  ;;  %v741_v31 = vld [vmem:[%s17241_s10 + $0x28] sm:$0xff]  ;;  %v739_v38 = vld [vmem:[%s17241_s10 + $0x18] sm:$0xff]  ;;  %v1356_v35 = vsub.f32 %v17193_v52, %v17199_v55 }
 0x488   : > { %15519 = vmatprep.mubr.msk.f32.mxu0 %vm803_vm1, %v1890_v27  ;;  %15526 = vmatprep.mubr.msk.f32.mxu1 %vm803_vm1, %v1892_v30  ;;  %v1889_v24 = vmul.f32 %v16608_v23, %v1883_v22 }
 0x48a   : > { %v1891_v6 = vmul.f32 %v1889_v24, %v17201_v26  ;;  %v1893_v25 = vmul.f32 %v1889_v24, %v17205_v32  ;;  %v743_v26 = vld [vmem:[%s17241_s10 + $0x38] sm:$0xff]  ;;  %v17264_v32 = vpop.permute.xlu0 %2426 }
 0x48c   : > { %15520 = vmatmul.mubr.msk.f32.vlgmr.msra.gmra.mxu0 %vm803_vm1, %v1891_v6  ;;  %15527 = vmatmul.mubr.msk.f32.vlgmr.msra.gmra.mxu1 %vm803_vm1, %v1893_v25 }
 0x48d   : > { %15530 = vmatpush3.msra.mxu0 %v17171_v46  ;;  %15537 = vmatpush3.msra.mxu1 %v1984_v43  ;;  %v742_v46 = vld [vmem:[%s17241_s10 + $0x30] sm:$0xff] }
 0x48e   : > { %15531 = vmatprep.subr.mxu0 %v17181_v50  ;;  %15533 = vmatprep.mubr.msk.f32.mxu0 %vm803_vm1, %v1892_v30  ;;  %v2231_v47 = vpop.permute.xlu0 %2230 }
 0x48f   : > { %15538 = vmatprep.subr.mxu1 %v1982_v44  ;;  %15540 = vmatprep.mubr.msk.f32.mxu1 %vm803_vm1, %v1890_v27 }
 0x490   : > { %15532 = vmatpush3.msra.mxu0 %v17181_v50  ;;  %15539 = vmatpush3.msra.mxu1 %v1982_v44  ;;  %v740_v50 = vld [vmem:[%s17241_s10 + $0x20] sm:$0xff] }
 0x491   : > { %15543 = vmatprep.subr.mxu0 %v743_v26  ;;  %15562 = vmatprep.subr.msk.mxu1 %vm803_vm1, %v17084_v13 }
 0x492   : > { %15534 = vmatmul.mubr.msk.f32.vlgmr.msra.gmra.mxu0 %vm803_vm1, %v1893_v25  ;;  %15541 = vmatmul.mubr.msk.f32.vlgmr.msra.gmra.mxu1 %vm803_vm1, %v1891_v6 }
 0x493   : > { %15544 = vmatpush3.msra.mxu0 %v743_v26  ;;  %15563 = vmatpush3.xpose.msk.msra.mxu1 %vm803_vm1, %v17084_v13 }
 0x494   : > { %15545 = vmatprep.subr.mxu0 %v742_v46  ;;  %15564 = vmatprep.subr.msk.mxu1 %vm803_vm1, %v17080_v11 }
 0x495   : > { %15566 = vmatprep.mubr.msk.f32.mxu1 %vm803_vm1, %v17078_v10  ;;  %15546 = vmatpush3.msra.mxu0 %v742_v46 }
 0x496   : > { %15547 = vmatprep.subr.mxu0 %v741_v31 }
 0x497   : > { %15548 = vmatpush3.msra.mxu0 %v741_v31  ;;  %15565 = vmatpush3.xpose.msk.msra.mxu1 %vm803_vm1, %v17080_v11 }
 0x498   : > { %15549 = vmatprep.subr.mxu0 %v740_v50  ;;  %15569 = vmatprep.subr.msk.mxu1 %vm803_vm1, %v17264_v32 }
 0x499   : > { %15550 = vmatpush3.msra.mxu0 %v740_v50 }
 0x49a   : > { %15551 = vmatprep.subr.mxu0 %v739_v38  ;;  %15567 = vmatmul.mubr.msk.f32.vlgmr.msra.gmra.mxu1 %vm803_vm1, %v17082_v12 }
 0x49b   : > { %15552 = vmatpush3.msra.mxu0 %v739_v38  ;;  %15570 = vmatpush3.xpose.msk.msra.mxu1 %vm803_vm1, %v17264_v32 }
 0x49c   : > { %15553 = vmatprep.subr.mxu0 %v738_v29  ;;  %15571 = vmatprep.subr.msk.mxu1 %vm803_vm1, %v17274_v28 }
 0x49d   : > { %15554 = vmatpush3.msra.mxu0 %v738_v29 }
 0x49e   : > { %15555 = vmatprep.subr.mxu0 %v737_v33 }
 0x49f   : > { %15556 = vmatpush3.msra.mxu0 %v737_v33  ;;  %15572 = vmatpush3.xpose.msk.msra.mxu1 %vm803_vm1, %v17274_v28 }
 0x4a0   : > { %15557 = vmatprep.subr.mxu0 %v736_v34  ;;  %15583 = vmatprep.subr.msk.mxu1 %vm803_vm1, %v17264_v32 }
 0x4a1   : > { %15558 = vmatpush3.msra.mxu0 %v736_v34 }
 0x4a2   : > { %15576 = vmatprep.subr.msk.mxu0 %vm803_vm1, %v17084_v13 }
 0x54c   : > { %v15521_v36 = vpop.f32.mrf.mxu0  ;;  %v15528_v37 = vpop.f32.mrf.mxu1 }
 0x54d   : > { %v2069_v39 = vsub.f32 %v15521_v36, %v15528_v37 }
 0x54e   : > { %v1972_v40 = vpop.f32.mrf.mxu0  ;;  %v2059_v41 = vpop.f32.mrf.mxu1 }
 0x54f   : > { %v2068_v56 = vsub.f32 %v1972_v40, %v2059_v41  ;;  %2224 = vrot.lane.b32.xlu1 %v2069_v39, %s16862_s11 }
 0x551   : > { %2222 = vrot.lane.b32.xlu0 %v2068_v56, %s16862_s11 }
 0x552   : > { %v15535_v3 = vpop.f32.mrf.mxu0  ;;  %v15542_v42 = vpop.f32.mrf.mxu1 }
 0x553   : > { %v2217_v43 = vadd.f32 %v15542_v42, %v15535_v3 }
 0x554   : > { %v2136_v44 = vpop.f32.mrf.mxu0  ;;  %v2211_v4 = vpop.f32.mrf.mxu1 }
 0x555   : > { %v2212_v7 = vadd.f32 %v2211_v4, %v2136_v44  ;;  %2240 = vrot.lane.b32.xlu1 %v2217_v43, %s16863_s12 }
 0x557   : > { %2238 = vrot.lane.b32.xlu0 %v2212_v7, %s16863_s12 }
 0x559   : > { %2422 = vrot.lane.b32.xlu1 %v17082_v12, %s16858_s28 }
 0x55b   : > { %2420 = vrot.lane.b32.xlu0 %v17078_v10, %s16858_s28 }
 0x55d   : > { %2800 = vrot.lane.b32.xlu1 %v17094_v18, %s16858_s28 }
 0x5c1   : > { %v2225_v48 = vpop.permute.xlu1 %2224 }
 0x5c2   : > { %v2245_v30 = vsel %vm803_vm1, %v1357_v54, %v2225_v48  ;;  %v15568_v54 = vpop.f32.mrf.mxu1 }
 0x5c3   : > { %v2223_v49 = vpop.permute.xlu0 %2222  ;;  %v2248_v6 = vsel %vm2246_vm10, %v2245_v30, %v2233_v45 }
 0x5c4   : > { %v2244_v27 = vsel %vm803_vm1, %v1356_v35, %v2223_v49  ;;  %v2411_v55 = vpop.f32.mrf.mxu1 }
 0x5c5   : > { %v2247_v23 = vsel %vm2246_vm10, %v2244_v27, %v2231_v47 }
 0x5c7   : > { %v2241_v22 = vpop.permute.xlu1 %2240 }
 0x5c8   : > { %v2251_v26 = vsel %vm2249_vm11, %v2248_v6, %v2241_v22 }
 0x5c9   : > { %v2239_v24 = vpop.permute.xlu0 %2238 }
 0x5ca   : > { %v2250_v25 = vsel %vm2249_vm11, %v2247_v23, %v2239_v24 }
 0x5cb   : > { %15559 = vmatprep.mubr.msk.f32.mxu0 %vm338_vm0, %v2250_v25  ;;  %v2423_v52 = vpop.permute.xlu1 %2422 }
 0x5cc   : > { %15560 = vmatmul.mubr.msk.f32.vlgmr.msra.gmra.mxu0 %vm338_vm0, %v2251_v26 }
 0x5cd   : > { %15577 = vmatpush3.xpose.msk.msra.mxu0 %vm803_vm1, %v17084_v13  ;;  %v2421_v51 = vpop.permute.xlu0 %2420 }
 0x5ce   : > { %15578 = vmatprep.subr.msk.mxu0 %vm803_vm1, %v17080_v11  ;;  %15573 = vmatprep.mubr.msk.f32.mxu1 %vm803_vm1, %v2421_v51 }
 0x5cf   : > { %15580 = vmatprep.mubr.msk.f32.mxu0 %vm803_vm1, %v2421_v51  ;;  %15574 = vmatmul.mubr.msk.f32.vlgmr.msra.gmra.mxu1 %vm803_vm1, %v2423_v52  ;;  %v17327_v53 = vpop.permute.xlu1 %2800 }
 0x5d0   : > { %15584 = vmatpush3.xpose.msk.msra.mxu1 %vm803_vm1, %v17264_v32  ;;  %15587 = vmatprep.mubr.msk.f32.mxu1 %vm803_vm1, %v17078_v10 }
 0x5d1   : > { %15579 = vmatpush3.xpose.msk.msra.mxu0 %vm803_vm1, %v17080_v11  ;;  %15585 = vmatprep.subr.msk.mxu1 %vm803_vm1, %v17274_v28 }
 0x5d2   : > { %15590 = vmatprep.subr.mxu0 %v17094_v18 }
 0x5d4   : > { %15581 = vmatmul.mubr.msk.f32.vlgmr.msra.gmra.mxu0 %vm803_vm1, %v2423_v52  ;;  %15586 = vmatpush3.xpose.msk.msra.mxu1 %vm803_vm1, %v17274_v28 }
 0x5d5   : > { %15591 = vmatpush3.msra.mxu0 %v17094_v18  ;;  %15597 = vmatprep.subr.mxu1 %v17327_v53 }
 0x5d6   : > { %15592 = vmatprep.subr.mxu0 %v17096_v19 }
 0x5d7   : > { %15588 = vmatmul.mubr.msk.f32.vlgmr.msra.gmra.mxu1 %vm803_vm1, %v17082_v12  ;;  %15593 = vmatpush3.msra.mxu0 %v17096_v19 }
 0x5d8   : > { %15598 = vmatpush3.msra.mxu1 %v17327_v53  ;;  %15604 = vmatprep.subr.mxu0 %v17094_v18 }
 0x68c   : > { %v17340_v46 = vpop.f32.mrf.mxu0 }
 0x68e   : > { %v17342_v50 = vpop.f32.mrf.mxu0 }
 0x68f   : > { %v15575_v31 = vpop.f32.mrf.mxu1 }
 0x690   : > { %v17344_v29 = vsub.f32 %v15568_v54, %v15575_v31 }
 0x691   : > { %v2502_v32 = vpop.f32.mrf.mxu1 }
 0x692   : > { %v17346_v33 = vsub.f32 %v2411_v55, %v2502_v32  ;;  %v2664_v39 = vmul.f32 %v17344_v29, %v17344_v29 }
 0x694   : > { %v15582_v38 = vpop.f32.mrf.mxu0  ;;  %v2663_v56 = vmul.f32 %v17346_v33, %v17346_v33 }
 0x696   : > { %v2579_v36 = vpop.f32.mrf.mxu0 }
 0x697   : > { %v15589_v28 = vpop.f32.mrf.mxu1 }
 0x698   : > { %v17348_v34 = vadd.f32 %v15589_v28, %v15582_v38 }
 0x699   : > { %v2654_v37 = vpop.f32.mrf.mxu1 }
 0x69a   : > { %v2666_v40 = vmul.f32 %v17348_v34, %v17348_v34  ;;  %v17354_v41 = vadd.f32 %v2654_v37, %v2579_v36 }
 0x69c   : > { %v2668_v3 = vadd.f32 %v2666_v40, %v2664_v39  ;;  %v2665_v42 = vmul.f32 %v17354_v41, %v17354_v41 }
 0x69e   : > { %16609 = vrsqrt.f32 %v2668_v3  ;;  %v2667_v43 = vadd.f32 %v2665_v42, %v2663_v56  ;;  %vm2678_vm12 = vcmp.eq.f32.partialorder %v2668_v3, inf  ;;  %v2681_v45 = vand.u32 2147483648, %v2668_v3 }
 0x69f   : > { %vm2680_vm13 = vcmp.eq.f32.partialorder %v2668_v3, 0.0 }
 0x6a0   : > { %16611 = vrsqrt.f32 %v2667_v43  ;;  %vm2671_vm14 = vcmp.eq.f32.partialorder %v2667_v43, inf  ;;  %v2674_v35 = vand.u32 2147483648, %v2667_v43  ;;  %vm2673_vm15 = vcmp.eq.f32.partialorder %v2667_v43, 0.0 }
 0x6ab   : > { %v16610_v44 = vpop.eup %16609 }
 0x6ac   : > { %v2677_v4 = vmul.f32 %v16610_v44, %v2668_v3 }
 0x6ad   : > { %v16612_v7 = vpop.eup %16611 }
 0x6ae   : > { %v2679_v47 = vsel %vm2678_vm12, %v2668_v3, %v2677_v4  ;;  %v2670_v48 = vmul.f32 %v16612_v7, %v2667_v43 }
 0x6af   : > { %v2682_v49 = vsel %vm2680_vm13, %v2681_v45, %v2679_v47 }
 0x6b0   : > { %v2686_v27 = vsel %vm803_vm1, %v2682_v49, inf  ;;  %v2672_v30 = vsel %vm2671_vm14, %v2667_v43, %v2670_v48  ;;  %v2692_v6 = vsel %vm803_vm1, %v2682_v49, -inf  ;;  %v2706_v38 = vadd.f32 1e-09, %v2682_v49 }
 0x6b1   : > { %2687 = vmin.xlane.f32.xlu0 %v2686_v27  ;;  %v2675_v22 = vsel %vm2673_vm15, %v2674_v35, %v2672_v30 }
 0x6b2   : > { %v2689_v23 = vsel %vm803_vm1, %v2675_v22, -inf  ;;  %v2683_v24 = vsel %vm803_vm1, %v2675_v22, inf  ;;  %v2705_v54 = vadd.f32 1e-09, %v2675_v22 }
 0x6b3   : > { %2690 = vmax.xlane.f32.xlu1 %v2689_v23 }
 0x6b5   : > { %2684 = vmin.xlane.f32.xlu0 %v2683_v24 }
 0x6b9   : > { %2693 = vmax.xlane.f32.xlu0 %v2692_v6 }
 0x6c4   : > { %3043 = vrot.lane.b32.xlu1 %v17084_v13, %s16859_s29 }
 0x6c8   : > { %3134 = vrot.lane.b32.xlu1 %v17084_v13, %s16860_s30 }
 0x6cc   : > { %3132 = vrot.lane.b32.xlu1 %v17080_v11, %s16860_s30 }
 0x6cf   : > { %2798 = vrot.lane.b32.xlu0 %v17096_v19, %s16858_s28 }
 0x6d0   : > { %3128 = vrot.lane.b32.xlu1 %v17078_v10, %s16860_s30 }
 0x6d3   : > { %3041 = vrot.lane.b32.xlu0 %v17080_v11, %s16859_s29 }
 0x6d4   : > { %3130 = vrot.lane.b32.xlu1 %v17082_v12, %s16860_s30 }
 0x6d7   : > { %3037 = vrot.lane.b32.xlu0 %v17078_v10, %s16859_s29 }
 0x6d8   : > { %3425 = vrot.lane.b32.xlu1 %v17094_v18, %s16859_s29 }
 0x6db   : > { %3039 = vrot.lane.b32.xlu0 %v17082_v12, %s16859_s29 }
 0x6dc   : > { %3423 = vrot.lane.b32.xlu1 %v17096_v19, %s16859_s29 }
 0x73a   : > { %v2688_v25 = vpop.xlane.xlu0 %2687 }
 0x73b   : > { %v2696_v42 = vsub.f32 %v2682_v49, %v2688_v25 }
 0x73c   : > { %v2691_v26 = vpop.xlane.xlu1 %2690 }
 0x73e   : > { %v2685_v51 = vpop.xlane.xlu0 %2684 }
 0x73f   : > { %v2697_v52 = vsub.f32 %v2691_v26, %v2685_v51  ;;  %v2695_v39 = vsub.f32 %v2675_v22, %v2685_v51 }
 0x740   : > { %v3044_v37 = vpop.permute.xlu1 %3043 }
 0x741   : > { %v2699_v55 = vadd.f32 1e-09, %v2697_v52 }
 0x742   : > { %v2694_v31 = vpop.xlane.xlu0 %2693 }
 0x743   : > { %16613 = vrcp.f32 %v2699_v55  ;;  %v2698_v32 = vsub.f32 %v2694_v31, %v2688_v25 }
 0x744   : > { %16615 = vrcp.f32 %v2705_v54  ;;  %v3135_v4 = vpop.permute.xlu1 %3134 }
 0x745   : > { %v2700_v28 = vadd.f32 1e-09, %v2698_v32 }
 0x746   : > { %v2799_v36 = vpop.permute.xlu0 %2798 }
 0x747   : > { %16617 = vrcp.f32 %v2700_v28  ;;  %15599 = vmatprep.subr.mxu1 %v2799_v36 }
 0x748   : > { %15600 = vmatpush3.msra.mxu1 %v2799_v36  ;;  %16619 = vrcp.f32 %v2706_v38  ;;  %v3133_v22 = vpop.permute.xlu1 %3132 }
 0x749   : > { %15611 = vmatprep.subr.mxu1 %v17327_v53 }
 0x74a   : > { %v3042_v49 = vpop.permute.xlu0 %3041 }
 0x750   : > { %v16614_v40 = vpop.eup %16613 }
 0x751   : > { %v2702_v56 = vmul.f32 %v16614_v40, %v2695_v39  ;;  %v16616_v3 = vpop.eup %16615 }
 0x753   : > { %v2708_v43 = vmul.f32 %v16616_v3, %v2702_v56 }
 0x754   : > { %v16618_v44 = vpop.eup %16617 }
 0x755   : > { %v2711_v7 = vmul.f32 %v2708_v43, %v17346_v33  ;;  %v2713_v45 = vmul.f32 %v2708_v43, %v17354_v41  ;;  %v2704_v47 = vmul.f32 %v16618_v44, %v2696_v42  ;;  %v16620_v48 = vpop.eup %16619 }
 0x757   : > { %15594 = vmatprep.mubr.msk.f32.mxu0 %vm803_vm1, %v2711_v7  ;;  %15601 = vmatprep.mubr.msk.f32.mxu1 %vm803_vm1, %v2713_v45  ;;  %v2710_v35 = vmul.f32 %v16620_v48, %v2704_v47 }
 0x759   : > { %v2712_v27 = vmul.f32 %v2710_v35, %v17344_v29  ;;  %v2714_v30 = vmul.f32 %v2710_v35, %v17348_v34  ;;  %v3129_v29 = vpop.permute.xlu1 %3128 }
 0x75b   : > { %15595 = vmatmul.mubr.msk.f32.vlgmr.msra.gmra.mxu0 %vm803_vm1, %v2712_v27  ;;  %15602 = vmatmul.mubr.msk.f32.vlgmr.msra.gmra.mxu1 %vm803_vm1, %v2714_v30 }
 0x75c   : > { %15605 = vmatpush3.msra.mxu0 %v17094_v18  ;;  %15612 = vmatpush3.msra.mxu1 %v17327_v53  ;;  %v3038_v53 = vpop.permute.xlu0 %3037 }
 0x75d   : > { %15606 = vmatprep.subr.mxu0 %v17096_v19  ;;  %15608 = vmatprep.mubr.msk.f32.mxu0 %vm803_vm1, %v2713_v45  ;;  %v3131_v33 = vpop.permute.xlu1 %3130 }
 0x75e   : > { %15613 = vmatprep.subr.mxu1 %v2799_v36  ;;  %15615 = vmatprep.mubr.msk.f32.mxu1 %vm803_vm1, %v2711_v7 }
 0x75f   : > { %15607 = vmatpush3.msra.mxu0 %v17096_v19  ;;  %15614 = vmatpush3.msra.mxu1 %v2799_v36 }
 0x760   : > { %15618 = vmatprep.subr.msk.mxu0 %vm803_vm1, %v3044_v37  ;;  %15625 = vmatprep.subr.msk.mxu1 %vm803_vm1, %v3135_v4  ;;  %v3040_v34 = vpop.permute.xlu0 %3039 }
 0x761   : > { %15609 = vmatmul.mubr.msk.f32.vlgmr.msra.gmra.mxu0 %vm803_vm1, %v2714_v30  ;;  %15616 = vmatmul.mubr.msk.f32.vlgmr.msra.gmra.mxu1 %vm803_vm1, %v2712_v27  ;;  %v17421_v41 = vpop.permute.xlu1 %3425 }
 0x762   : > { %15619 = vmatpush3.xpose.msk.msra.mxu0 %vm803_vm1, %v3044_v37  ;;  %15626 = vmatpush3.xpose.msk.msra.mxu1 %vm803_vm1, %v3135_v4 }
 0x763   : > { %15620 = vmatprep.subr.msk.mxu0 %vm803_vm1, %v3042_v49  ;;  %15622 = vmatprep.mubr.msk.f32.mxu0 %vm803_vm1, %v3038_v53 }
 0x764   : > { %15627 = vmatprep.subr.msk.mxu1 %vm803_vm1, %v3133_v22  ;;  %15629 = vmatprep.mubr.msk.f32.mxu1 %vm803_vm1, %v3129_v29 }
 0x765   : > { %v17429_v23 = vpop.permute.xlu1 %3423 }
 0x766   : > { %15621 = vmatpush3.xpose.msk.msra.mxu0 %vm803_vm1, %v3042_v49  ;;  %15628 = vmatpush3.xpose.msk.msra.mxu1 %vm803_vm1, %v3133_v22 }
 0x767   : > { %15632 = vmatprep.subr.msk.mxu0 %vm803_vm1, %v3044_v37  ;;  %15639 = vmatprep.subr.msk.mxu1 %vm803_vm1, %v3135_v4 }
 0x769   : > { %15623 = vmatmul.mubr.msk.f32.vlgmr.msra.gmra.mxu0 %vm803_vm1, %v3040_v34  ;;  %15630 = vmatmul.mubr.msk.f32.vlgmr.msra.gmra.mxu1 %vm803_vm1, %v3131_v33 }
 0x76a   : > { %15633 = vmatpush3.xpose.msk.msra.mxu0 %vm803_vm1, %v3044_v37  ;;  %15636 = vmatprep.mubr.msk.f32.mxu0 %vm803_vm1, %v3129_v29 }
 0x76b   : > { %15640 = vmatpush3.xpose.msk.msra.mxu1 %vm803_vm1, %v3135_v4  ;;  %15643 = vmatprep.mubr.msk.f32.mxu1 %vm803_vm1, %v3038_v53 }
 0x76c   : > { %15634 = vmatprep.subr.msk.mxu0 %vm803_vm1, %v3042_v49  ;;  %15641 = vmatprep.subr.msk.mxu1 %vm803_vm1, %v3133_v22 }
 0x76e   : > { %15635 = vmatpush3.xpose.msk.msra.mxu0 %vm803_vm1, %v3042_v49 }
 0x76f   : > { %15642 = vmatpush3.xpose.msk.msra.mxu1 %vm803_vm1, %v3133_v22  ;;  %15646 = vmatprep.subr.mxu0 %v17421_v41 }
 0x771   : > { %15637 = vmatmul.mubr.msk.f32.vlgmr.msra.gmra.mxu0 %vm803_vm1, %v3131_v33 }
 0x772   : > { %15644 = vmatmul.mubr.msk.f32.vlgmr.msra.gmra.mxu1 %vm803_vm1, %v3040_v34  ;;  %15647 = vmatpush3.msra.mxu0 %v17421_v41 }
 0x773   : > { %15648 = vmatprep.subr.mxu0 %v17429_v23 }
 0x774   : > { %15649 = vmatpush3.msra.mxu0 %v17429_v23 }
 0x775   : > { %15660 = vmatprep.subr.mxu0 %v17421_v41 }
 0x81b   : > { %v17436_v24 = vpop.f32.mrf.mxu0  ;;  %v17438_v6 = vpop.f32.mrf.mxu1 }
 0x81c   : > { %v2886_v25 = vsub.f32 %v17436_v24, %v17438_v6 }
 0x81d   : > { %v17442_v26 = vpop.f32.mrf.mxu0  ;;  %v17444_v51 = vpop.f32.mrf.mxu1 }
 0x821   : > { %v15610_v52 = vpop.f32.mrf.mxu0  ;;  %v15617_v54 = vpop.f32.mrf.mxu1 }
 0x822   : > { %v3034_v55 = vadd.f32 %v15617_v54, %v15610_v52 }
 0x823   : > { %v2953_v31 = vpop.f32.mrf.mxu0  ;;  %v3028_v32 = vpop.f32.mrf.mxu1 }
 0x829   : > { %v15624_v38 = vpop.f32.mrf.mxu0  ;;  %v15631_v28 = vpop.f32.mrf.mxu1 }
 0x82a   : > { %v17446_v39 = vsub.f32 %v15624_v38, %v15631_v28 }
 0x82b   : > { %v3119_v36 = vpop.f32.mrf.mxu0  ;;  %v3210_v37 = vpop.f32.mrf.mxu1 }
 0x82c   : > { %v17448_v3 = vsub.f32 %v3119_v36, %v3210_v37  ;;  %v3372_v4 = vmul.f32 %v17446_v39, %v17446_v39 }
 0x82e   : > { %v3371_v47 = vmul.f32 %v17448_v3, %v17448_v3 }
 0x831   : > { %v15638_v40 = vpop.f32.mrf.mxu0 }
 0x832   : > { %v15645_v56 = vpop.f32.mrf.mxu1 }
 0x833   : > { %v17450_v42 = vadd.f32 %v15645_v56, %v15638_v40  ;;  %v3287_v43 = vpop.f32.mrf.mxu0  ;;  %v3029_v56 = vadd.f32 %v3028_v32, %v2953_v31 }
 0x834   : > { %v3362_v44 = vpop.f32.mrf.mxu1 }
 0x835   : > { %v3374_v7 = vmul.f32 %v17450_v42, %v17450_v42  ;;  %v17456_v45 = vadd.f32 %v3362_v44, %v3287_v43 }
 0x837   : > { %v3376_v48 = vadd.f32 %v3374_v7, %v3372_v4  ;;  %v3373_v35 = vmul.f32 %v17456_v45, %v17456_v45 }
 0x839   : > { %16621 = vrsqrt.f32 %v3376_v48  ;;  %v3375_v27 = vadd.f32 %v3373_v35, %v3371_v47  ;;  %vm3386_vm2 = vcmp.eq.f32.partialorder %v3376_v48, inf  ;;  %v3389_v29 = vand.u32 2147483648, %v3376_v48 }
 0x83a   : > { %vm3388_vm3 = vcmp.eq.f32.partialorder %v3376_v48, 0.0 }
 0x83b   : > { %16623 = vrsqrt.f32 %v3375_v27  ;;  %vm3379_vm4 = vcmp.eq.f32.partialorder %v3375_v27, inf  ;;  %v3382_v52 = vand.u32 2147483648, %v3375_v27  ;;  %vm3381_vm5 = vcmp.eq.f32.partialorder %v3375_v27, 0.0 }
 0x846   : > { %v16622_v30 = vpop.eup %16621 }
 0x847   : > { %v3385_v22 = vmul.f32 %v16622_v30, %v3376_v48 }
 0x848   : > { %v16624_v49 = vpop.eup %16623 }
 0x849   : > { %v3387_v53 = vsel %vm3386_vm2, %v3376_v48, %v3385_v22  ;;  %v3378_v33 = vmul.f32 %v16624_v49, %v3375_v27 }
 0x84a   : > { %v3390_v34 = vsel %vm3388_vm3, %v3389_v29, %v3387_v53 }
 0x84b   : > { %v3394_v54 = vsel %vm803_vm1, %v3390_v34, inf  ;;  %v3380_v38 = vsel %vm3379_vm4, %v3375_v27, %v3378_v33  ;;  %v3400_v40 = vsel %vm803_vm1, %v3390_v34, -inf  ;;  %v3414_v30 = vadd.f32 1e-09, %v3390_v34 }
 0x84c   : > { %3395 = vmin.xlane.f32.xlu0 %v3394_v54  ;;  %v3383_v28 = vsel %vm3381_vm5, %v3382_v52, %v3380_v38 }
 0x84d   : > { %v3397_v36 = vsel %vm803_vm1, %v3383_v28, -inf  ;;  %v3391_v37 = vsel %vm803_vm1, %v3383_v28, inf  ;;  %v3413_v47 = vadd.f32 1e-09, %v3383_v28 }
 0x84e   : > { %3398 = vmax.xlane.f32.xlu1 %v3397_v36 }
 0x850   : > { %3392 = vmin.xlane.f32.xlu0 %v3391_v37 }
 0x854   : > { %3401 = vmax.xlane.f32.xlu0 %v3400_v40 }
 0x85f   : > { %3510 = vrot.lane.b32.xlu1 %v17096_v19, %s16860_s30 }
 0x863   : > { %3864 = vrot.lane.b32.xlu1 %v17080_v11, %s16864_s13 }
 0x867   : > { %3957 = vrot.lane.b32.xlu1 %v17084_v13, %s16861_s6 }
 0x86a   : > { %3512 = vrot.lane.b32.xlu0 %v17094_v18, %s16860_s30 }
 0x86b   : > { %3955 = vrot.lane.b32.xlu1 %v17080_v11, %s16861_s6 }
 0x86e   : > { %3866 = vrot.lane.b32.xlu0 %v17084_v13, %s16864_s13 }
 0x86f   : > { %3761 = vrot.lane.b32.xlu1 %v3034_v55, %s16861_s6 }
 0x872   : > { %3860 = vrot.lane.b32.xlu0 %v17002_v57, %s16864_s13 }
 0x876   : > { %3862 = vrot.lane.b32.xlu0 %v17010_v59, %s16864_s13 }
 0x87a   : > { %3759 = vrot.lane.b32.xlu0 %v3029_v56, %s16861_s6 }
 0x8d5   : > { %v3396_v43 = vpop.xlane.xlu0 %3395 }
 0x8d6   : > { %v3404_v33 = vsub.f32 %v3390_v34, %v3396_v43 }
 0x8d7   : > { %v3399_v44 = vpop.xlane.xlu1 %3398 }
 0x8d9   : > { %v3393_v4 = vpop.xlane.xlu0 %3392 }
 0x8da   : > { %v3405_v7 = vsub.f32 %v3399_v44, %v3393_v4  ;;  %v3403_v31 = vsub.f32 %v3383_v28, %v3393_v4  ;;  %v14286_v4 = vld [vmem:[%s17241_s10 + $0x58] sm:$0xff] }
 0x8db   : > { %v3511_v49 = vpop.permute.xlu1 %3510 }
 0x8dc   : > { %v3407_v48 = vadd.f32 1e-09, %v3405_v7 }
 0x8dd   : > { %v3402_v35 = vpop.xlane.xlu0 %3401 }
 0x8de   : > { %16625 = vrcp.f32 %v3407_v48  ;;  %v3406_v27 = vsub.f32 %v3402_v35, %v3396_v43  ;;  %v14287_v43 = vld [vmem:[%s17241_s10 + $0x60] sm:$0xff]  ;;  %v14284_v35 = vld [vmem:[%s17241_s10 + $0x48] sm:$0xff] }
 0x8df   : > { %16627 = vrcp.f32 %v3413_v47  ;;  %v17498_v34 = vpop.permute.xlu1 %3864  ;;  %v14285_v47 = vld [vmem:[%s17241_s10 + $0x50] sm:$0xff] }
 0x8e0   : > { %v3408_v55 = vadd.f32 1e-09, %v3406_v27  ;;  %v14283_v27 = vld [vmem:[%s17241_s10 + $0x40] sm:$0xff] }
 0x8e1   : > { %v3513_v22 = vpop.permute.xlu0 %3512 }
 0x8e2   : > { %16629 = vrcp.f32 %v3408_v55  ;;  %15653 = vmatprep.subr.mxu1 %v3513_v22 }
 0x8e3   : > { %15654 = vmatpush3.msra.mxu1 %v3513_v22  ;;  %16631 = vrcp.f32 %v3414_v30 }
 0x8e4   : > { %15655 = vmatprep.subr.mxu1 %v3511_v49 }
 0x8e5   : > { %15656 = vmatpush3.msra.mxu1 %v3511_v49 }
 0x8e6   : > { %15667 = vmatprep.subr.mxu1 %v3513_v22 }
 0x8eb   : > { %v16626_v32 = vpop.eup %16625 }
 0x8ec   : > { %v3410_v29 = vmul.f32 %v16626_v32, %v3403_v31  ;;  %v16628_v53 = vpop.eup %16627 }
 0x8ee   : > { %v3416_v52 = vmul.f32 %v16628_v53, %v3410_v29 }
 0x8ef   : > { %v16630_v54 = vpop.eup %16629 }
 0x8f0   : > { %v3419_v38 = vmul.f32 %v3416_v52, %v17448_v3  ;;  %v3421_v36 = vmul.f32 %v3416_v52, %v17456_v45  ;;  %v3412_v37 = vmul.f32 %v16630_v54, %v3404_v33  ;;  %v16632_v40 = vpop.eup %16631  ;;  %v17492_v3 = vpop.permute.xlu0 %3866  ;;  %v14290_v45 = vld [vmem:[%s17241_s10 + $0x78] sm:$0xff] }
 0x8f2   : > { %15650 = vmatprep.mubr.msk.f32.mxu0 %vm803_vm1, %v3419_v38  ;;  %15657 = vmatprep.mubr.msk.f32.mxu1 %vm803_vm1, %v3421_v36  ;;  %v3418_v56 = vmul.f32 %v16632_v40, %v3412_v37 }
 0x8f4   : > { %v3420_v28 = vmul.f32 %v3418_v56, %v17446_v39  ;;  %v3422_v44 = vmul.f32 %v3418_v56, %v17450_v42  ;;  %v17507_v39 = vpop.permute.xlu0 %3860  ;;  %v17514_v42 = vpop.permute.xlu1 %3957 }
 0x8f6   : > { %15651 = vmatmul.mubr.msk.f32.vlgmr.msra.gmra.mxu0 %vm803_vm1, %v3420_v28  ;;  %15658 = vmatmul.mubr.msk.f32.vlgmr.msra.gmra.mxu1 %vm803_vm1, %v3422_v44 }
 0x8f7   : > { %15661 = vmatpush3.msra.mxu0 %v17421_v41  ;;  %15668 = vmatpush3.msra.mxu1 %v3513_v22  ;;  %v14289_v41 = vld [vmem:[%s17241_s10 + $0x70] sm:$0xff] }
 0x8f8   : > { %15662 = vmatprep.subr.mxu0 %v17429_v23  ;;  %15664 = vmatprep.mubr.msk.f32.mxu0 %vm803_vm1, %v3421_v36  ;;  %v17524_v7 = vpop.permute.xlu0 %3862  ;;  %v17529_v48 = vpop.permute.xlu1 %3955 }
 0x8f9   : > { %15669 = vmatprep.subr.mxu1 %v3511_v49  ;;  %15671 = vmatprep.mubr.msk.f32.mxu1 %vm803_vm1, %v3419_v38 }
 0x8fa   : > { %15663 = vmatpush3.msra.mxu0 %v17429_v23  ;;  %15670 = vmatpush3.msra.mxu1 %v3511_v49  ;;  %v14288_v23 = vld [vmem:[%s17241_s10 + $0x68] sm:$0xff] }
 0x8fb   : > { %15674 = vmatprep.subr.mxu0 %v14290_v45  ;;  %15693 = vmatprep.subr.msk.mxu1 %vm803_vm1, %v17492_v3 }
 0x8fc   : > { %15665 = vmatmul.mubr.msk.f32.vlgmr.msra.gmra.mxu0 %vm803_vm1, %v3422_v44  ;;  %15672 = vmatmul.mubr.msk.f32.vlgmr.msra.gmra.mxu1 %vm803_vm1, %v3420_v28  ;;  %v3762_v36 = vpop.permute.xlu1 %3761  ;;  %v3760_v37 = vpop.permute.xlu0 %3759  ;;  %v2885_v28 = vsub.f32 %v17442_v26, %v17444_v51 }
 0x8fd   : > { %15675 = vmatpush3.msra.mxu0 %v14290_v45  ;;  %15694 = vmatpush3.xpose.msk.msra.mxu1 %vm803_vm1, %v17492_v3 }
 0x8fe   : > { %15676 = vmatprep.subr.mxu0 %v14289_v41  ;;  %15695 = vmatprep.subr.msk.mxu1 %vm803_vm1, %v17498_v34 }
 0x8ff   : > { %15697 = vmatprep.mubr.msk.f32.mxu1 %vm803_vm1, %v17507_v39  ;;  %15677 = vmatpush3.msra.mxu0 %v14289_v41 }
 0x900   : > { %15678 = vmatprep.subr.mxu0 %v14288_v23 }
 0x901   : > { %15679 = vmatpush3.msra.mxu0 %v14288_v23  ;;  %15696 = vmatpush3.xpose.msk.msra.mxu1 %vm803_vm1, %v17498_v34 }
 0x902   : > { %15680 = vmatprep.subr.mxu0 %v14287_v43  ;;  %15700 = vmatprep.subr.msk.mxu1 %vm803_vm1, %v17514_v42 }
 0x903   : > { %15681 = vmatpush3.msra.mxu0 %v14287_v43 }
 0x904   : > { %15682 = vmatprep.subr.mxu0 %v14286_v4  ;;  %15698 = vmatmul.mubr.msk.f32.vlgmr.msra.gmra.mxu1 %vm803_vm1, %v17524_v7 }
 0x905   : > { %15683 = vmatpush3.msra.mxu0 %v14286_v4  ;;  %15701 = vmatpush3.xpose.msk.msra.mxu1 %vm803_vm1, %v17514_v42 }
 0x906   : > { %15684 = vmatprep.subr.mxu0 %v14285_v47  ;;  %15702 = vmatprep.subr.msk.mxu1 %vm803_vm1, %v17529_v48 }
 0x907   : > { %15685 = vmatpush3.msra.mxu0 %v14285_v47 }
 0x908   : > { %15686 = vmatprep.subr.mxu0 %v14284_v35 }
 0x909   : > { %15687 = vmatpush3.msra.mxu0 %v14284_v35  ;;  %15703 = vmatpush3.xpose.msk.msra.mxu1 %vm803_vm1, %v17529_v48 }
 0x90a   : > { %15688 = vmatprep.subr.mxu0 %v14283_v27  ;;  %15714 = vmatprep.subr.msk.mxu1 %vm803_vm1, %v17514_v42 }
 0x90b   : > { %15689 = vmatpush3.msra.mxu0 %v14283_v27 }
 0x90c   : > { %15707 = vmatprep.subr.msk.mxu0 %vm803_vm1, %v17492_v3 }
 0x9b6   : > { %v15652_v30 = vpop.f32.mrf.mxu0  ;;  %v15659_v55 = vpop.f32.mrf.mxu1 }
 0x9b7   : > { %v3598_v22 = vsub.f32 %v15652_v30, %v15659_v55 }
 0x9b8   : > { %v3501_v49 = vpop.f32.mrf.mxu0  ;;  %v3588_v31 = vpop.f32.mrf.mxu1 }
 0x9b9   : > { %v3597_v32 = vsub.f32 %v3501_v49, %v3588_v31  ;;  %3753 = vrot.lane.b32.xlu1 %v3598_v22, %s16862_s11 }
 0x9bb   : > { %3751 = vrot.lane.b32.xlu0 %v3597_v32, %s16862_s11 }
 0x9bc   : > { %v15666_v29 = vpop.f32.mrf.mxu0  ;;  %v15673_v53 = vpop.f32.mrf.mxu1 }
 0x9bd   : > { %v3746_v33 = vadd.f32 %v15673_v53, %v15666_v29 }
 0x9be   : > { %v3665_v52 = vpop.f32.mrf.mxu0  ;;  %v3740_v54 = vpop.f32.mrf.mxu1 }
 0x9bf   : > { %v3741_v38 = vadd.f32 %v3740_v54, %v3665_v52  ;;  %3769 = vrot.lane.b32.xlu1 %v3746_v33, %s16863_s12 }
 0x9c1   : > { %3767 = vrot.lane.b32.xlu0 %v3741_v38, %s16863_s12 }
 0x9c3   : > { %3953 = vrot.lane.b32.xlu1 %v17010_v59, %s16861_s6 }
 0x9c4   : > { %v15699_v26 = vpop.f32.mrf.mxu1 }
 0x9c5   : > { %3951 = vrot.lane.b32.xlu0 %v17002_v57, %s16861_s6 }
 0x9c6   : > { %v3942_v51 = vpop.f32.mrf.mxu1 }
 0x9c7   : > { %4248 = vrot.lane.b32.xlu1 %v17094_v18, %s16864_s13 }
 0x9cb   : > { %4246 = vrot.lane.b32.xlu1 %v17096_v19, %s16864_s13 }
 0xa2b   : > { %v3754_v40 = vpop.permute.xlu1 %3753 }
 0xa2c   : > { %v3774_v45 = vsel %vm803_vm1, %v2886_v25, %v3754_v40 }
 0xa2d   : > { %v3752_v56 = vpop.permute.xlu0 %3751  ;;  %v3776_v4 = vsel %vm2246_vm10, %v3774_v45, %v3762_v36 }
 0xa2e   : > { %v3773_v44 = vsel %vm803_vm1, %v2885_v28, %v3752_v56 }
 0xa2f   : > { %v3775_v23 = vsel %vm2246_vm10, %v3773_v44, %v3760_v37 }
 0xa31   : > { %v3770_v41 = vpop.permute.xlu1 %3769 }
 0xa32   : > { %v3778_v35 = vsel %vm2249_vm11, %v3776_v4, %v3770_v41 }
 0xa33   : > { %v3768_v43 = vpop.permute.xlu0 %3767 }
 0xa34   : > { %v3777_v47 = vsel %vm2249_vm11, %v3775_v23, %v3768_v43 }
 0xa35   : > { %v3954_v27 = vpop.permute.xlu1 %3953  ;;  %15690 = vmatprep.mubr.msk.f32.mxu0 %vm338_vm0, %v3777_v47 }
 0xa36   : > { %15691 = vmatmul.mubr.msk.f32.vlgmr.msra.gmra.mxu0 %vm338_vm0, %v3778_v35 }
 0xa37   : > { %15708 = vmatpush3.xpose.msk.msra.mxu0 %vm803_vm1, %v17492_v3  ;;  %v3952_v24 = vpop.permute.xlu0 %3951 }
 0xa38   : > { %15709 = vmatprep.subr.msk.mxu0 %vm803_vm1, %v17498_v34  ;;  %15704 = vmatprep.mubr.msk.f32.mxu1 %vm803_vm1, %v3952_v24 }
 0xa39   : > { %15711 = vmatprep.mubr.msk.f32.mxu0 %vm803_vm1, %v3952_v24  ;;  %v17574_v6 = vpop.permute.xlu1 %4248  ;;  %15705 = vmatmul.mubr.msk.f32.vlgmr.msra.gmra.mxu1 %vm803_vm1, %v3954_v27 }
 0xa3a   : > { %15715 = vmatpush3.xpose.msk.msra.mxu1 %vm803_vm1, %v17514_v42  ;;  %15718 = vmatprep.mubr.msk.f32.mxu1 %vm803_vm1, %v17507_v39 }
 0xa3b   : > { %15710 = vmatpush3.xpose.msk.msra.mxu0 %vm803_vm1, %v17498_v34  ;;  %15716 = vmatprep.subr.msk.mxu1 %vm803_vm1, %v17529_v48 }
 0xa3c   : > { %15721 = vmatprep.subr.mxu0 %v17574_v6 }
 0xa3d   : > { %v17586_v25 = vpop.permute.xlu1 %4246 }
 0xa3e   : > { %15712 = vmatmul.mubr.msk.f32.vlgmr.msra.gmra.mxu0 %vm803_vm1, %v3954_v27  ;;  %15717 = vmatpush3.xpose.msk.msra.mxu1 %vm803_vm1, %v17529_v48 }
 0xa3f   : > { %15722 = vmatpush3.msra.mxu0 %v17574_v6 }
 0xa40   : > { %15723 = vmatprep.subr.mxu0 %v17586_v25 }
 0xa41   : > { %15719 = vmatmul.mubr.msk.f32.vlgmr.msra.gmra.mxu1 %vm803_vm1, %v17524_v7  ;;  %15724 = vmatpush3.msra.mxu0 %v17586_v25 }
 0xa42   : > { %15735 = vmatprep.subr.mxu0 %v17574_v6 }
 0xaf6   : > { %v17597_v3 = vpop.f32.mrf.mxu0 }
 0xaf8   : > { %v17599_v39 = vpop.f32.mrf.mxu0 }
 0xaf9   : > { %v15706_v34 = vpop.f32.mrf.mxu1 }
 0xafa   : > { %v17601_v30 = vsub.f32 %v15699_v26, %v15706_v34 }
 0xafb   : > { %v4033_v42 = vpop.f32.mrf.mxu1 }
 0xafc   : > { %v17603_v22 = vsub.f32 %v3942_v51, %v4033_v42  ;;  %v4195_v32 = vmul.f32 %v17601_v30, %v17601_v30 }
 0xafe   : > { %v15713_v48 = vpop.f32.mrf.mxu0  ;;  %v4194_v33 = vmul.f32 %v17603_v22, %v17603_v22 }
 0xb00   : > { %v4110_v7 = vpop.f32.mrf.mxu0 }
 0xb01   : > { %v15720_v55 = vpop.f32.mrf.mxu1 }
 0xb02   : > { %v17605_v49 = vadd.f32 %v15720_v55, %v15713_v48 }
 0xb03   : > { %v4185_v31 = vpop.f32.mrf.mxu1 }
 0xb04   : > { %v4197_v29 = vmul.f32 %v17605_v49, %v17605_v49  ;;  %v17611_v53 = vadd.f32 %v4185_v31, %v4110_v7 }
 0xb06   : > { %v4199_v52 = vadd.f32 %v4197_v29, %v4195_v32  ;;  %v4196_v54 = vmul.f32 %v17611_v53, %v17611_v53 }
 0xb08   : > { %16633 = vrsqrt.f32 %v4199_v52  ;;  %v4198_v38 = vadd.f32 %v4196_v54, %v4194_v33  ;;  %vm4209_vm6 = vcmp.eq.f32.partialorder %v4199_v52, inf  ;;  %v4212_v56 = vand.u32 2147483648, %v4199_v52 }
 0xb09   : > { %vm4211_vm7 = vcmp.eq.f32.partialorder %v4199_v52, 0.0 }
 0xb0a   : > { %16635 = vrsqrt.f32 %v4198_v38  ;;  %vm4202_vm8 = vcmp.eq.f32.partialorder %v4198_v38, inf  ;;  %v4205_v41 = vand.u32 2147483648, %v4198_v38  ;;  %vm4204_vm9 = vcmp.eq.f32.partialorder %v4198_v38, 0.0 }
 0xb15   : > { %v16634_v36 = vpop.eup %16633 }
 0xb16   : > { %v4208_v37 = vmul.f32 %v16634_v36, %v4199_v52 }
 0xb17   : > { %v16636_v40 = vpop.eup %16635 }
 0xb18   : > { %v4210_v28 = vsel %vm4209_vm6, %v4199_v52, %v4208_v37  ;;  %v4201_v44 = vmul.f32 %v16636_v40, %v4198_v38 }
 0xb19   : > { %v4213_v45 = vsel %vm4211_vm7, %v4212_v56, %v4210_v28 }
 0xb1a   : > { %v4217_v23 = vsel %vm803_vm1, %v4213_v45, inf  ;;  %v4203_v43 = vsel %vm4202_vm8, %v4198_v38, %v4201_v44  ;;  %v4223_v27 = vsel %vm803_vm1, %v4213_v45, -inf  ;;  %v4237_v55 = vadd.f32 1e-09, %v4213_v45 }
 0xb1b   : > { %4218 = vmin.xlane.f32.xlu0 %v4217_v23  ;;  %v4206_v4 = vsel %vm4204_vm9, %v4205_v41, %v4203_v43 }
 0xb1c   : > { %v4220_v47 = vsel %vm803_vm1, %v4206_v4, -inf  ;;  %v4214_v35 = vsel %vm803_vm1, %v4206_v4, inf  ;;  %v4236_v34 = vadd.f32 1e-09, %v4206_v4 }
 0xb1d   : > { %4221 = vmax.xlane.f32.xlu1 %v4220_v47 }
 0xb1f   : > { %4215 = vmin.xlane.f32.xlu0 %v4214_v35 }
 0xb23   : > { %4224 = vmax.xlane.f32.xlu0 %v4223_v27 }
 0xb2e   : > { %4333 = vrot.lane.b32.xlu1 %v17096_v19, %s16861_s6 }
 0xb32   : > { %4669 = vrot.lane.b32.xlu1 %v17084_v13, %s16862_s11 }
 0xb36   : > { %4667 = vrot.lane.b32.xlu1 %v17080_v11, %s16862_s11 }
 0xb39   : > { %4335 = vrot.lane.b32.xlu0 %v17094_v18, %s16861_s6 }
 0xb3a   : > { %4663 = vrot.lane.b32.xlu1 %v17002_v57, %s16862_s11 }
 0xb3d   : > { %4578 = vrot.lane.b32.xlu0 %v17084_v13, %s16863_s12 }
 0xb3e   : > { %4665 = vrot.lane.b32.xlu1 %v17010_v59, %s16862_s11 }
 0xb41   : > { %4576 = vrot.lane.b32.xlu0 %v17080_v11, %s16863_s12 }
 0xb42   : > { %4960 = vrot.lane.b32.xlu1 %v17094_v18, %s16863_s12 }
 0xb45   : > { %4572 = vrot.lane.b32.xlu0 %v17002_v57, %s16863_s12 }
 0xb46   : > { %4958 = vrot.lane.b32.xlu1 %v17096_v19, %s16863_s12 }
 0xb49   : > { %4574 = vrot.lane.b32.xlu0 %v17010_v59, %s16863_s12 }
 0xba4   : > { %v4219_v24 = vpop.xlane.xlu0 %4218 }
 0xba5   : > { %v4227_v52 = vsub.f32 %v4213_v45, %v4219_v24 }
 0xba6   : > { %v4222_v13 = vpop.xlane.xlu1 %4221 }
 0xba8   : > { %v4216_v26 = vpop.xlane.xlu0 %4215 }
 0xba9   : > { %v4228_v51 = vsub.f32 %v4222_v13, %v4216_v26  ;;  %v4226_v59 = vsub.f32 %v4206_v4, %v4216_v26 }
 0xbaa   : > { %v4334_v57 = vpop.permute.xlu1 %4333 }
 0xbab   : > { %v4230_v42 = vadd.f32 1e-09, %v4228_v51 }
 0xbac   : > { %v4225_v48 = vpop.xlane.xlu0 %4224 }
 0xbad   : > { %16637 = vrcp.f32 %v4230_v42  ;;  %v4229_v11 = vsub.f32 %v4225_v48, %v4219_v24 }
 0xbae   : > { %16639 = vrcp.f32 %v4236_v34  ;;  %v4670_v36 = vpop.permute.xlu1 %4669 }
 0xbaf   : > { %v4231_v7 = vadd.f32 1e-09, %v4229_v11 }
 0xbb0   : > { %v4336_v31 = vpop.permute.xlu0 %4335 }
 0xbb1   : > { %16641 = vrcp.f32 %v4231_v7  ;;  %15728 = vmatprep.subr.mxu1 %v4336_v31 }
 0xbb2   : > { %15729 = vmatpush3.msra.mxu1 %v4336_v31  ;;  %16643 = vrcp.f32 %v4237_v55  ;;  %v4668_v45 = vpop.permute.xlu1 %4667 }
 0xbb3   : > { %15730 = vmatprep.subr.mxu1 %v4334_v57 }
 0xbb4   : > { %15731 = vmatpush3.msra.mxu1 %v4334_v57  ;;  %v4579_v44 = vpop.permute.xlu0 %4578 }
 0xbb5   : > { %15742 = vmatprep.subr.mxu1 %v4336_v31 }
 0xbba   : > { %v16638_v32 = vpop.eup %16637 }
 0xbbb   : > { %v4233_v29 = vmul.f32 %v16638_v32, %v4226_v59  ;;  %v16640_v33 = vpop.eup %16639 }
 0xbbd   : > { %v4239_v54 = vmul.f32 %v16640_v33, %v4233_v29 }
 0xbbe   : > { %v16642_v38 = vpop.eup %16641 }
 0xbbf   : > { %v4242_v37 = vmul.f32 %v4239_v54, %v17603_v22  ;;  %v4244_v40 = vmul.f32 %v4239_v54, %v17611_v53  ;;  %v4235_v56 = vmul.f32 %v16642_v38, %v4227_v52  ;;  %v16644_v28 = vpop.eup %16643  ;;  %v4577_v22 = vpop.permute.xlu0 %4576 }
 0xbc1   : > { %15725 = vmatprep.mubr.msk.f32.mxu0 %vm803_vm1, %v4242_v37  ;;  %15732 = vmatprep.mubr.msk.f32.mxu1 %vm803_vm1, %v4244_v40  ;;  %v4241_v41 = vmul.f32 %v16644_v28, %v4235_v56 }
 0xbc3   : > { %v4243_v23 = vmul.f32 %v4241_v41, %v17601_v30  ;;  %v4245_v43 = vmul.f32 %v4241_v41, %v17605_v49  ;;  %v4664_v30 = vpop.permute.xlu1 %4663 }
 0xbc5   : > { %15726 = vmatmul.mubr.msk.f32.vlgmr.msra.gmra.mxu0 %vm803_vm1, %v4243_v23  ;;  %15733 = vmatmul.mubr.msk.f32.vlgmr.msra.gmra.mxu1 %vm803_vm1, %v4245_v43 }
 0xbc6   : > { %15736 = vmatpush3.msra.mxu0 %v17574_v6  ;;  %15743 = vmatpush3.msra.mxu1 %v4336_v31  ;;  %v4573_v6 = vpop.permute.xlu0 %4572 }
 0xbc7   : > { %15737 = vmatprep.subr.mxu0 %v17586_v25  ;;  %15739 = vmatprep.mubr.msk.f32.mxu0 %vm803_vm1, %v4244_v40 }
 0xbc8   : > { %15744 = vmatprep.subr.mxu1 %v4334_v57  ;;  %15746 = vmatprep.mubr.msk.f32.mxu1 %vm803_vm1, %v4242_v37 }
 0xbc9   : > { %15738 = vmatpush3.msra.mxu0 %v17586_v25  ;;  %15745 = vmatpush3.msra.mxu1 %v4334_v57  ;;  %v4666_v25 = vpop.permute.xlu1 %4665 }
 0xbca   : > { %15749 = vmatprep.subr.msk.mxu0 %vm803_vm1, %v4579_v44  ;;  %15756 = vmatprep.subr.msk.mxu1 %vm803_vm1, %v4670_v36  ;;  %v4575_v49 = vpop.permute.xlu0 %4574 }
 0xbcb   : > { %15740 = vmatmul.mubr.msk.f32.vlgmr.msra.gmra.mxu0 %vm803_vm1, %v4245_v43  ;;  %15747 = vmatmul.mubr.msk.f32.vlgmr.msra.gmra.mxu1 %vm803_vm1, %v4243_v23 }
 0xbcc   : > { %15750 = vmatpush3.xpose.msk.msra.mxu0 %vm803_vm1, %v4579_v44  ;;  %15757 = vmatpush3.xpose.msk.msra.mxu1 %vm803_vm1, %v4670_v36 }
 0xbcd   : > { %15751 = vmatprep.subr.msk.mxu0 %vm803_vm1, %v4577_v22  ;;  %15753 = vmatprep.mubr.msk.f32.mxu0 %vm803_vm1, %v4573_v6  ;;  %v17678_v53 = vpop.permute.xlu1 %4960 }
 0xbce   : > { %15758 = vmatprep.subr.msk.mxu1 %vm803_vm1, %v4668_v45  ;;  %15760 = vmatprep.mubr.msk.f32.mxu1 %vm803_vm1, %v4664_v30 }
 0xbd0   : > { %15752 = vmatpush3.xpose.msk.msra.mxu0 %vm803_vm1, %v4577_v22  ;;  %15759 = vmatpush3.xpose.msk.msra.mxu1 %vm803_vm1, %v4668_v45 }
 0xbd1   : > { %15763 = vmatprep.subr.msk.mxu0 %vm803_vm1, %v4579_v44  ;;  %15770 = vmatprep.subr.msk.mxu1 %vm803_vm1, %v4670_v36  ;;  %v17686_v4 = vpop.permute.xlu1 %4958 }
 0xbd3   : > { %15754 = vmatmul.mubr.msk.f32.vlgmr.msra.gmra.mxu0 %vm803_vm1, %v4575_v49  ;;  %15761 = vmatmul.mubr.msk.f32.vlgmr.msra.gmra.mxu1 %vm803_vm1, %v4666_v25 }
 0xbd4   : > { %15764 = vmatpush3.xpose.msk.msra.mxu0 %vm803_vm1, %v4579_v44  ;;  %15767 = vmatprep.mubr.msk.f32.mxu0 %vm803_vm1, %v4664_v30 }
 0xbd5   : > { %15771 = vmatpush3.xpose.msk.msra.mxu1 %vm803_vm1, %v4670_v36  ;;  %15774 = vmatprep.mubr.msk.f32.mxu1 %vm803_vm1, %v4573_v6 }
 0xbd6   : > { %15765 = vmatprep.subr.msk.mxu0 %vm803_vm1, %v4577_v22  ;;  %15772 = vmatprep.subr.msk.mxu1 %vm803_vm1, %v4668_v45 }
 0xbd8   : > { %15766 = vmatpush3.xpose.msk.msra.mxu0 %vm803_vm1, %v4577_v22 }
 0xbd9   : > { %15773 = vmatpush3.xpose.msk.msra.mxu1 %vm803_vm1, %v4668_v45  ;;  %15777 = vmatprep.subr.mxu0 %v17678_v53 }
 0xbdb   : > { %15768 = vmatmul.mubr.msk.f32.vlgmr.msra.gmra.mxu0 %vm803_vm1, %v4666_v25 }
 0xbdc   : > { %15775 = vmatmul.mubr.msk.f32.vlgmr.msra.gmra.mxu1 %vm803_vm1, %v4575_v49  ;;  %15778 = vmatpush3.msra.mxu0 %v17678_v53 }
 0xbdd   : > { %15779 = vmatprep.subr.mxu0 %v17686_v4 }
 0xbde   : > { %15780 = vmatpush3.msra.mxu0 %v17686_v4 }
 0xbdf   : > { %15791 = vmatprep.subr.mxu0 %v17678_v53 }
 0xc85   : > { %v17693_v47 = vpop.f32.mrf.mxu0  ;;  %v17695_v35 = vpop.f32.mrf.mxu1 }
 0xc86   : > { %v4421_v27 = vsub.f32 %v17693_v47, %v17695_v35 }
 0xc87   : > { %v17699_v24 = vpop.f32.mrf.mxu0  ;;  %v17701_v13 = vpop.f32.mrf.mxu1 }
 0xc8b   : > { %v15741_v26 = vpop.f32.mrf.mxu0  ;;  %v15748_v51 = vpop.f32.mrf.mxu1 }
 0xc8c   : > { %v4569_v34 = vadd.f32 %v15748_v51, %v15741_v26 }
 0xc8d   : > { %v4488_v42 = vpop.f32.mrf.mxu0  ;;  %v4563_v48 = vpop.f32.mrf.mxu1 }
 0xc93   : > { %v15755_v11 = vpop.f32.mrf.mxu0  ;;  %v15762_v55 = vpop.f32.mrf.mxu1 }
 0xc94   : > { %v17703_v57 = vsub.f32 %v15755_v11, %v15762_v55 }
 0xc95   : > { %v4654_v7 = vpop.f32.mrf.mxu0  ;;  %v4745_v31 = vpop.f32.mrf.mxu1 }
 0xc96   : > { %v17705_v29 = vsub.f32 %v4654_v7, %v4745_v31  ;;  %v4907_v38 = vmul.f32 %v17703_v57, %v17703_v57 }
 0xc98   : > { %v4906_v40 = vmul.f32 %v17705_v29, %v17705_v29 }
 0xc9b   : > { %v15769_v59 = vpop.f32.mrf.mxu0 }
 0xc9c   : > { %v15776_v32 = vpop.f32.mrf.mxu1 }
 0xc9d   : > { %v17707_v33 = vadd.f32 %v15776_v32, %v15769_v59  ;;  %v4822_v52 = vpop.f32.mrf.mxu0 }
 0xc9e   : > { %v4897_v54 = vpop.f32.mrf.mxu1 }
 0xc9f   : > { %v4909_v36 = vmul.f32 %v17707_v33, %v17707_v33  ;;  %v17713_v37 = vadd.f32 %v4897_v54, %v4822_v52 }
 0xca1   : > { %v4911_v56 = vadd.f32 %v4909_v36, %v4907_v38  ;;  %v4908_v28 = vmul.f32 %v17713_v37, %v17713_v37 }
 0xca3   : > { %16645 = vrsqrt.f32 %v4911_v56  ;;  %v4910_v44 = vadd.f32 %v4908_v28, %v4906_v40  ;;  %vm4921_vm12 = vcmp.eq.f32.partialorder %v4911_v56, inf  ;;  %v4924_v45 = vand.u32 2147483648, %v4911_v56 }
 0xca4   : > { %vm4923_vm13 = vcmp.eq.f32.partialorder %v4911_v56, 0.0 }
 0xca5   : > { %16647 = vrsqrt.f32 %v4910_v44  ;;  %vm4914_vm14 = vcmp.eq.f32.partialorder %v4910_v44, inf  ;;  %v4917_v25 = vand.u32 2147483648, %v4910_v44  ;;  %vm4916_vm15 = vcmp.eq.f32.partialorder %v4910_v44, 0.0 }
 0xcb0   : > { %v16646_v41 = vpop.eup %16645 }
 0xcb1   : > { %v4920_v23 = vmul.f32 %v16646_v41, %v4911_v56 }
 0xcb2   : > { %v16648_v43 = vpop.eup %16647 }
 0xcb3   : > { %v4922_v22 = vsel %vm4921_vm12, %v4911_v56, %v4920_v23  ;;  %v4913_v30 = vmul.f32 %v16648_v43, %v4910_v44  ;;  %vm16865_vm12 = vmmov 0  }
 0xcb4   : > { %v4925_v6 = vsel %vm4923_vm13, %v4924_v45, %v4922_v22 }
 0xcb5   : > { %v4929_v49 = vsel %vm803_vm1, %v4925_v6, inf  ;;  %v4915_v26 = vsel %vm4914_vm14, %v4910_v44, %v4913_v30  ;;  %v4935_v7 = vsel %vm803_vm1, %v4925_v6, -inf  ;;  %v4949_v40 = vadd.f32 1e-09, %v4925_v6 }
 0xcb6   : > { %4930 = vmin.xlane.f32.xlu0 %v4929_v49  ;;  %v4918_v51 = vsel %vm4916_vm15, %v4917_v25, %v4915_v26 }
 0xcb7   : > { %v4932_v11 = vsel %vm803_vm1, %v4918_v51, -inf  ;;  %v4926_v55 = vsel %vm803_vm1, %v4918_v51, inf  ;;  %v4948_v52 = vadd.f32 1e-09, %v4918_v51 }
 0xcb8   : > { %4933 = vmax.xlane.f32.xlu1 %v4932_v11 }
 0xcba   : > { %4927 = vmin.xlane.f32.xlu0 %v4926_v55  ;;  %v14295_v55 = vld [vmem:[%s17241_s10 + $0xa0] sm:$0xff] }
 0xcbe   : > { %4936 = vmax.xlane.f32.xlu0 %v4935_v7  ;;  %v14294_v7 = vld [vmem:[%s17241_s10 + $0x98] sm:$0xff] }
 0xcc9   : > { %5045 = vrot.lane.b32.xlu1 %v17096_v19, %s16862_s11  ;;  %v4564_v19 = vadd.f32 %v4563_v48, %v4488_v42 }
 0xccd   : > { %5399 = vrot.lane.b32.xlu1 %v17008_v58, %s16864_s13 }
 0xcd1   : > { %5492 = vrot.lane.b32.xlu1 %v17014_v60, %s16861_s6 }
 0xcd4   : > { %5047 = vrot.lane.b32.xlu0 %v17094_v18, %s16862_s11 }
 0xcd5   : > { %5490 = vrot.lane.b32.xlu1 %v17008_v58, %s16861_s6 }
 0xcd8   : > { %5401 = vrot.lane.b32.xlu0 %v17014_v60, %s16864_s13 }
 0xcd9   : > { %5296 = vrot.lane.b32.xlu1 %v4569_v34, %s16861_s6 }
 0xcdc   : > { %5395 = vrot.lane.b32.xlu0 %v17078_v10, %s16864_s13 }
 0xce0   : > { %5397 = vrot.lane.b32.xlu0 %v17082_v12, %s16864_s13 }
 0xce4   : > { %5294 = vrot.lane.b32.xlu0 %v4564_v19, %s16861_s6 }
 0xd3f   : > { %v4931_v31 = vpop.xlane.xlu0 %4930 }
 0xd40   : > { %v4939_v23 = vsub.f32 %v4925_v6, %v4931_v31 }
 0xd41   : > { %v4934_v59 = vpop.xlane.xlu1 %4933 }
 0xd43   : > { %v4928_v18 = vpop.xlane.xlu0 %4927 }
 0xd44   : > { %v4940_v32 = vsub.f32 %v4934_v59, %v4928_v18  ;;  %v4938_v42 = vsub.f32 %v4918_v51, %v4928_v18  ;;  %v14292_v18 = vld [vmem:[%s17241_s10 + $0x88] sm:$0xff] }
 0xd45   : > { %v5046_v28 = vpop.permute.xlu1 %5045 }
 0xd46   : > { %v4942_v54 = vadd.f32 1e-09, %v4940_v32  ;;  %v14291_v32 = vld [vmem:[%s17241_s10 + $0x80] sm:$0xff] }
 0xd47   : > { %v4937_v38 = vpop.xlane.xlu0 %4936 }
 0xd48   : > { %16649 = vrcp.f32 %v4942_v54  ;;  %v4941_v36 = vsub.f32 %v4937_v38, %v4931_v31  ;;  %v14293_v31 = vld [vmem:[%s17241_s10 + $0x90] sm:$0xff] }
 0xd49   : > { %16651 = vrcp.f32 %v4948_v52  ;;  %v17755_v6 = vpop.permute.xlu1 %5399 }
 0xd4a   : > { %v4943_v34 = vadd.f32 1e-09, %v4941_v36 }
 0xd4b   : > { %v5048_v56 = vpop.permute.xlu0 %5047 }
 0xd4c   : > { %16653 = vrcp.f32 %v4943_v34  ;;  %15784 = vmatprep.subr.mxu1 %v5048_v56 }
 0xd4d   : > { %15785 = vmatpush3.msra.mxu1 %v5048_v56  ;;  %16655 = vrcp.f32 %v4949_v40 }
 0xd4e   : > { %15786 = vmatprep.subr.mxu1 %v5046_v28 }
 0xd4f   : > { %15787 = vmatpush3.msra.mxu1 %v5046_v28 }
 0xd50   : > { %15798 = vmatprep.subr.mxu1 %v5048_v56 }
 0xd55   : > { %v16650_v48 = vpop.eup %16649 }
 0xd56   : > { %v4945_v44 = vmul.f32 %v16650_v48, %v4938_v42  ;;  %v16652_v41 = vpop.eup %16651 }
 0xd58   : > { %v4951_v43 = vmul.f32 %v16652_v41, %v4945_v44 }
 0xd59   : > { %v16654_v45 = vpop.eup %16653 }
 0xd5a   : > { %v4954_v22 = vmul.f32 %v4951_v43, %v17705_v29  ;;  %v4956_v30 = vmul.f32 %v4951_v43, %v17713_v37  ;;  %v4947_v25 = vmul.f32 %v16654_v45, %v4939_v23  ;;  %v16656_v49 = vpop.eup %16655  ;;  %v17749_v29 = vpop.permute.xlu0 %5401  ;;  %v14298_v37 = vld [vmem:[%s17241_s10 + $0xb8] sm:$0xff] }
 0xd5c   : > { %15781 = vmatprep.mubr.msk.f32.mxu0 %vm803_vm1, %v4954_v22  ;;  %15788 = vmatprep.mubr.msk.f32.mxu1 %vm803_vm1, %v4956_v30  ;;  %v4953_v26 = vmul.f32 %v16656_v49, %v4947_v25 }
 0xd5e   : > { %v4955_v51 = vmul.f32 %v4953_v26, %v17703_v57  ;;  %v4957_v11 = vmul.f32 %v4953_v26, %v17707_v33  ;;  %v17764_v57 = vpop.permute.xlu0 %5395  ;;  %v17771_v33 = vpop.permute.xlu1 %5492 }
 0xd60   : > { %15782 = vmatmul.mubr.msk.f32.vlgmr.msra.gmra.mxu0 %vm803_vm1, %v4955_v51  ;;  %15789 = vmatmul.mubr.msk.f32.vlgmr.msra.gmra.mxu1 %vm803_vm1, %v4957_v11 }
 0xd61   : > { %15792 = vmatpush3.msra.mxu0 %v17678_v53  ;;  %15799 = vmatpush3.msra.mxu1 %v5048_v56  ;;  %v14297_v53 = vld [vmem:[%s17241_s10 + $0xb0] sm:$0xff] }
 0xd62   : > { %15793 = vmatprep.subr.mxu0 %v17686_v4  ;;  %15795 = vmatprep.mubr.msk.f32.mxu0 %vm803_vm1, %v4956_v30  ;;  %v17781_v19 = vpop.permute.xlu0 %5397  ;;  %v17786_v59 = vpop.permute.xlu1 %5490  ;;  %v4420_v30 = vsub.f32 %v17699_v24, %v17701_v13 }
 0xd63   : > { %15800 = vmatprep.subr.mxu1 %v5046_v28  ;;  %15802 = vmatprep.mubr.msk.f32.mxu1 %vm803_vm1, %v4954_v22 }
 0xd64   : > { %15794 = vmatpush3.msra.mxu0 %v17686_v4  ;;  %15801 = vmatpush3.msra.mxu1 %v5046_v28  ;;  %v14296_v4 = vld [vmem:[%s17241_s10 + $0xa8] sm:$0xff] }
 0xd65   : > { %15805 = vmatprep.subr.mxu0 %v14298_v37  ;;  %15824 = vmatprep.subr.msk.mxu1 %vm803_vm1, %v17749_v29 }
 0xd66   : > { %15796 = vmatmul.mubr.msk.f32.vlgmr.msra.gmra.mxu0 %vm803_vm1, %v4957_v11  ;;  %15803 = vmatmul.mubr.msk.f32.vlgmr.msra.gmra.mxu1 %vm803_vm1, %v4955_v51  ;;  %v5297_v23 = vpop.permute.xlu1 %5296  ;;  %v5295_v43 = vpop.permute.xlu0 %5294 }
 0xd67   : > { %15806 = vmatpush3.msra.mxu0 %v14298_v37  ;;  %15825 = vmatpush3.xpose.msk.msra.mxu1 %vm803_vm1, %v17749_v29 }
 0xd68   : > { %15807 = vmatprep.subr.mxu0 %v14297_v53  ;;  %15826 = vmatprep.subr.msk.mxu1 %vm803_vm1, %v17755_v6 }
 0xd69   : > { %15828 = vmatprep.mubr.msk.f32.mxu1 %vm803_vm1, %v17764_v57  ;;  %15808 = vmatpush3.msra.mxu0 %v14297_v53 }
 0xd6a   : > { %15809 = vmatprep.subr.mxu0 %v14296_v4 }
 0xd6b   : > { %15810 = vmatpush3.msra.mxu0 %v14296_v4  ;;  %15827 = vmatpush3.xpose.msk.msra.mxu1 %vm803_vm1, %v17755_v6 }
 0xd6c   : > { %15811 = vmatprep.subr.mxu0 %v14295_v55  ;;  %15831 = vmatprep.subr.msk.mxu1 %vm803_vm1, %v17771_v33 }
 0xd6d   : > { %15812 = vmatpush3.msra.mxu0 %v14295_v55 }
 0xd6e   : > { %15813 = vmatprep.subr.mxu0 %v14294_v7  ;;  %15829 = vmatmul.mubr.msk.f32.vlgmr.msra.gmra.mxu1 %vm803_vm1, %v17781_v19 }
 0xd6f   : > { %15814 = vmatpush3.msra.mxu0 %v14294_v7  ;;  %15832 = vmatpush3.xpose.msk.msra.mxu1 %vm803_vm1, %v17771_v33 }
 0xd70   : > { %15815 = vmatprep.subr.mxu0 %v14293_v31  ;;  %15833 = vmatprep.subr.msk.mxu1 %vm803_vm1, %v17786_v59 }
 0xd71   : > { %15816 = vmatpush3.msra.mxu0 %v14293_v31 }
 0xd72   : > { %15817 = vmatprep.subr.mxu0 %v14292_v18 }
 0xd73   : > { %15818 = vmatpush3.msra.mxu0 %v14292_v18  ;;  %15834 = vmatpush3.xpose.msk.msra.mxu1 %vm803_vm1, %v17786_v59 }
 0xd74   : > { %15819 = vmatprep.subr.mxu0 %v14291_v32  ;;  %15845 = vmatprep.subr.msk.mxu1 %vm803_vm1, %v17771_v33 }
 0xd75   : > { %15820 = vmatpush3.msra.mxu0 %v14291_v32 }
 0xd76   : > { %15838 = vmatprep.subr.msk.mxu0 %vm803_vm1, %v17749_v29 }
 0xe20   : > { %v15783_v52 = vpop.f32.mrf.mxu0  ;;  %v15790_v54 = vpop.f32.mrf.mxu1 }
 0xe21   : > { %v5133_v38 = vsub.f32 %v15783_v52, %v15790_v54 }
 0xe22   : > { %v5036_v36 = vpop.f32.mrf.mxu0  ;;  %v5123_v40 = vpop.f32.mrf.mxu1 }
 0xe23   : > { %v5132_v34 = vsub.f32 %v5036_v36, %v5123_v40  ;;  %5288 = vrot.lane.b32.xlu1 %v5133_v38, %s16862_s11 }
 0xe25   : > { %5286 = vrot.lane.b32.xlu0 %v5132_v34, %s16862_s11 }
 0xe26   : > { %v15797_v56 = vpop.f32.mrf.mxu0  ;;  %v15804_v28 = vpop.f32.mrf.mxu1 }
 0xe27   : > { %v5281_v42 = vadd.f32 %v15804_v28, %v15797_v56 }
 0xe28   : > { %v5200_v48 = vpop.f32.mrf.mxu0  ;;  %v5275_v44 = vpop.f32.mrf.mxu1 }
 0xe29   : > { %v5276_v41 = vadd.f32 %v5275_v44, %v5200_v48  ;;  %5304 = vrot.lane.b32.xlu1 %v5281_v42, %s16863_s12 }
 0xe2b   : > { %5302 = vrot.lane.b32.xlu0 %v5276_v41, %s16863_s12 }
 0xe2d   : > { %5488 = vrot.lane.b32.xlu1 %v17082_v12, %s16861_s6 }
 0xe2e   : > { %v15830_v24 = vpop.f32.mrf.mxu1 }
 0xe2f   : > { %5486 = vrot.lane.b32.xlu0 %v17078_v10, %s16861_s6 }
 0xe30   : > { %v5477_v13 = vpop.f32.mrf.mxu1 }
 0xe31   : > { %5783 = vrot.lane.b32.xlu1 %v17046_v2, %s16864_s13 }
 0xe35   : > { %5781 = vrot.lane.b32.xlu1 %v17051_v5, %s16864_s13 }
 0xe95   : > { %v5289_v45 = vpop.permute.xlu1 %5288 }
 0xe96   : > { %v5309_v49 = vsel %vm803_vm1, %v4421_v27, %v5289_v45 }
 0xe97   : > { %v5287_v22 = vpop.permute.xlu0 %5286  ;;  %v5311_v37 = vsel %vm2246_vm10, %v5309_v49, %v5297_v23 }
 0xe98   : > { %v5308_v25 = vsel %vm803_vm1, %v4420_v30, %v5287_v22 }
 0xe99   : > { %v5310_v51 = vsel %vm2246_vm10, %v5308_v25, %v5295_v43 }
 0xe9b   : > { %v5305_v26 = vpop.permute.xlu1 %5304 }
 0xe9c   : > { %v5313_v4 = vsel %vm2249_vm11, %v5311_v37, %v5305_v26 }
 0xe9d   : > { %v5303_v11 = vpop.permute.xlu0 %5302 }
 0xe9e   : > { %v5312_v53 = vsel %vm2249_vm11, %v5310_v51, %v5303_v11 }
 0xe9f   : > { %v5489_v55 = vpop.permute.xlu1 %5488  ;;  %15821 = vmatprep.mubr.msk.f32.mxu0 %vm338_vm0, %v5312_v53 }
 0xea0   : > { %15822 = vmatmul.mubr.msk.f32.vlgmr.msra.gmra.mxu0 %vm338_vm0, %v5313_v4 }
 0xea1   : > { %15839 = vmatpush3.xpose.msk.msra.mxu0 %vm803_vm1, %v17749_v29  ;;  %v5487_v47 = vpop.permute.xlu0 %5486 }
 0xea2   : > { %15840 = vmatprep.subr.msk.mxu0 %vm803_vm1, %v17755_v6  ;;  %15835 = vmatprep.mubr.msk.f32.mxu1 %vm803_vm1, %v5487_v47 }
 0xea3   : > { %15842 = vmatprep.mubr.msk.f32.mxu0 %vm803_vm1, %v5487_v47  ;;  %v17831_v35 = vpop.permute.xlu1 %5783  ;;  %15836 = vmatmul.mubr.msk.f32.vlgmr.msra.gmra.mxu1 %vm803_vm1, %v5489_v55 }
 0xea4   : > { %15846 = vmatpush3.xpose.msk.msra.mxu1 %vm803_vm1, %v17771_v33  ;;  %15849 = vmatprep.mubr.msk.f32.mxu1 %vm803_vm1, %v17764_v57 }
 0xea5   : > { %15841 = vmatpush3.xpose.msk.msra.mxu0 %vm803_vm1, %v17755_v6  ;;  %15847 = vmatprep.subr.msk.mxu1 %vm803_vm1, %v17786_v59 }
 0xea6   : > { %15852 = vmatprep.subr.mxu0 %v17831_v35 }
 0xea7   : > { %v17843_v27 = vpop.permute.xlu1 %5781 }
 0xea8   : > { %15843 = vmatmul.mubr.msk.f32.vlgmr.msra.gmra.mxu0 %vm803_vm1, %v5489_v55  ;;  %15848 = vmatpush3.xpose.msk.msra.mxu1 %vm803_vm1, %v17786_v59 }
 0xea9   : > { %15853 = vmatpush3.msra.mxu0 %v17831_v35 }
 0xeaa   : > { %15854 = vmatprep.subr.mxu0 %v17843_v27 }
 0xeab   : > { %15850 = vmatmul.mubr.msk.f32.vlgmr.msra.gmra.mxu1 %vm803_vm1, %v17781_v19  ;;  %15855 = vmatpush3.msra.mxu0 %v17843_v27 }
 0xeac   : > { %15866 = vmatprep.subr.mxu0 %v17831_v35 }
 0xf60   : > { %v17854_v29 = vpop.f32.mrf.mxu0 }
 0xf62   : > { %v17856_v57 = vpop.f32.mrf.mxu0 }
 0xf63   : > { %v15837_v6 = vpop.f32.mrf.mxu1 }
 0xf64   : > { %v17858_v31 = vsub.f32 %v15830_v24, %v15837_v6 }
 0xf65   : > { %v5568_v33 = vpop.f32.mrf.mxu1 }
 0xf66   : > { %v17860_v18 = vsub.f32 %v5477_v13, %v5568_v33  ;;  %v5730_v54 = vmul.f32 %v17858_v31, %v17858_v31 }
 0xf68   : > { %v15844_v7 = vpop.f32.mrf.mxu0  ;;  %v5729_v40 = vmul.f32 %v17860_v18, %v17860_v18 }
 0xf6a   : > { %v5645_v19 = vpop.f32.mrf.mxu0 }
 0xf6b   : > { %v15851_v59 = vpop.f32.mrf.mxu1 }
 0xf6c   : > { %v17862_v32 = vadd.f32 %v15851_v59, %v15844_v7 }
 0xf6d   : > { %v5720_v52 = vpop.f32.mrf.mxu1 }
 0xf6e   : > { %v5732_v38 = vmul.f32 %v17862_v32, %v17862_v32  ;;  %v17868_v36 = vadd.f32 %v5720_v52, %v5645_v19 }
 0xf70   : > { %v5734_v34 = vadd.f32 %v5732_v38, %v5730_v54  ;;  %v5731_v56 = vmul.f32 %v17868_v36, %v17868_v36 }
 0xf72   : > { %16657 = vrsqrt.f32 %v5734_v34  ;;  %v5733_v28 = vadd.f32 %v5731_v56, %v5729_v40  ;;  %vm5744_vm2 = vcmp.eq.f32.partialorder %v5734_v34, inf  ;;  %v5747_v41 = vand.u32 2147483648, %v5734_v34 }
 0xf73   : > { %vm5746_vm3 = vcmp.eq.f32.partialorder %v5734_v34, 0.0 }
 0xf74   : > { %16659 = vrsqrt.f32 %v5733_v28  ;;  %vm5737_vm4 = vcmp.eq.f32.partialorder %v5733_v28, inf  ;;  %v5740_v22 = vand.u32 2147483648, %v5733_v28  ;;  %vm5739_vm5 = vcmp.eq.f32.partialorder %v5733_v28, 0.0 }
 0xf7f   : > { %v16658_v42 = vpop.eup %16657 }
 0xf80   : > { %v5743_v48 = vmul.f32 %v16658_v42, %v5734_v34 }
 0xf81   : > { %v16660_v44 = vpop.eup %16659 }
 0xf82   : > { %v5745_v23 = vsel %vm5744_vm2, %v5734_v34, %v5743_v48  ;;  %v5736_v43 = vmul.f32 %v16660_v44, %v5733_v28 }
 0xf83   : > { %v5748_v45 = vsel %vm5746_vm3, %v5747_v41, %v5745_v23  ;;  %vm7270_vm3 = vcmask 1046528  }
 0xf84   : > { %v5752_v30 = vsel %vm803_vm1, %v5748_v45, inf  ;;  %v5738_v25 = vsel %vm5737_vm4, %v5733_v28, %v5736_v43  ;;  %v5758_v11 = vsel %vm803_vm1, %v5748_v45, -inf  ;;  %v5772_v13 = vadd.f32 1e-09, %v5748_v45 }
 0xf85   : > { %5753 = vmin.xlane.f32.xlu0 %v5752_v30  ;;  %v5741_v49 = vsel %vm5739_vm5, %v5740_v22, %v5738_v25  ;;  %vm7245_vm4 = vcmask 1040384  }
 0xf86   : > { %v5755_v26 = vsel %vm803_vm1, %v5741_v49, -inf  ;;  %v5749_v51 = vsel %vm803_vm1, %v5741_v49, inf  ;;  %v5771_v55 = vadd.f32 1e-09, %v5741_v49 }
 0xf87   : > { %5756 = vmax.xlane.f32.xlu1 %v5755_v26 }
 0xf89   : > { %5750 = vmin.xlane.f32.xlu0 %v5749_v51 }
 0xf8d   : > { %5759 = vmax.xlane.f32.xlu0 %v5758_v11 }
 0xf98   : > { %5868 = vrot.lane.b32.xlu1 %v17051_v5, %s16861_s6 }
 0xf9c   : > { %6204 = vrot.lane.b32.xlu1 %v17014_v60, %s16862_s11 }
 0xfa0   : > { %6202 = vrot.lane.b32.xlu1 %v17008_v58, %s16862_s11 }
 0xfa3   : > { %5870 = vrot.lane.b32.xlu0 %v17046_v2, %s16861_s6 }
 0xfa4   : > { %6198 = vrot.lane.b32.xlu1 %v17078_v10, %s16862_s11 }
 0xfa7   : > { %6113 = vrot.lane.b32.xlu0 %v17014_v60, %s16863_s12 }
 0xfa8   : > { %6200 = vrot.lane.b32.xlu1 %v17082_v12, %s16862_s11 }
 0xfab   : > { %6111 = vrot.lane.b32.xlu0 %v17008_v58, %s16863_s12 }
 0xfac   : > { %6495 = vrot.lane.b32.xlu1 %v17046_v2, %s16863_s12 }
 0xfaf   : > { %6107 = vrot.lane.b32.xlu0 %v17078_v10, %s16863_s12 }
 0xfb0   : > { %6493 = vrot.lane.b32.xlu1 %v17051_v5, %s16863_s12 }
 0xfb3   : > { %6109 = vrot.lane.b32.xlu0 %v17082_v12, %s16863_s12 }
0x100e   : > { %v5754_v37 = vpop.xlane.xlu0 %5753 }
0x100f   : > { %v5762_v52 = vsub.f32 %v5748_v45, %v5754_v37 }
0x1010   : > { %v5757_v60 = vpop.xlane.xlu1 %5756 }
0x1012   : > { %v5751_v53 = vpop.xlane.xlu0 %5750 }
0x1013   : > { %v5763_v4 = vsub.f32 %v5757_v60, %v5751_v53  ;;  %v5761_v12 = vsub.f32 %v5741_v49, %v5751_v53 }
0x1014   : > { %v5869_v10 = vpop.permute.xlu1 %5868 }
0x1015   : > { %v5765_v47 = vadd.f32 1e-09, %v5763_v4 }
0x1016   : > { %v5760_v24 = vpop.xlane.xlu0 %5759 }
0x1017   : > { %16661 = vrcp.f32 %v5765_v47  ;;  %v5764_v58 = vsub.f32 %v5760_v24, %v5754_v37 }
0x1018   : > { %16663 = vrcp.f32 %v5771_v55  ;;  %v6205_v40 = vpop.permute.xlu1 %6204 }
0x1019   : > { %v5766_v6 = vadd.f32 1e-09, %v5764_v58 }
0x101a   : > { %v5871_v33 = vpop.permute.xlu0 %5870 }
0x101b   : > { %16665 = vrcp.f32 %v5766_v6  ;;  %15859 = vmatprep.subr.mxu1 %v5871_v33 }
0x101c   : > { %15860 = vmatpush3.msra.mxu1 %v5871_v33  ;;  %16667 = vrcp.f32 %v5772_v13  ;;  %v6203_v43 = vpop.permute.xlu1 %6202 }
0x101d   : > { %15861 = vmatprep.subr.mxu1 %v5869_v10 }
0x101e   : > { %15862 = vmatpush3.msra.mxu1 %v5869_v10  ;;  %v6114_v48 = vpop.permute.xlu0 %6113 }
0x101f   : > { %15873 = vmatprep.subr.mxu1 %v5871_v33 }
0x1024   : > { %v16662_v7 = vpop.eup %16661 }
0x1025   : > { %v5768_v59 = vmul.f32 %v16662_v7, %v5761_v12  ;;  %v16664_v19 = vpop.eup %16663 }
0x1027   : > { %v5774_v54 = vmul.f32 %v16664_v19, %v5768_v59 }
0x1028   : > { %v16666_v38 = vpop.eup %16665 }
0x1029   : > { %v5777_v34 = vmul.f32 %v5774_v54, %v17860_v18  ;;  %v5779_v56 = vmul.f32 %v5774_v54, %v17868_v36  ;;  %v5770_v28 = vmul.f32 %v16666_v38, %v5762_v52  ;;  %v16668_v42 = vpop.eup %16667  ;;  %v6112_v18 = vpop.permute.xlu0 %6111 }
0x102b   : > { %15856 = vmatprep.mubr.msk.f32.mxu0 %vm803_vm1, %v5777_v34  ;;  %15863 = vmatprep.mubr.msk.f32.mxu1 %vm803_vm1, %v5779_v56  ;;  %v5776_v44 = vmul.f32 %v16668_v42, %v5770_v28 }
0x102d   : > { %v5778_v41 = vmul.f32 %v5776_v44, %v17858_v31  ;;  %v5780_v23 = vmul.f32 %v5776_v44, %v17862_v32  ;;  %v6199_v31 = vpop.permute.xlu1 %6198 }
0x102f   : > { %15857 = vmatmul.mubr.msk.f32.vlgmr.msra.gmra.mxu0 %vm803_vm1, %v5778_v41  ;;  %15864 = vmatmul.mubr.msk.f32.vlgmr.msra.gmra.mxu1 %vm803_vm1, %v5780_v23 }
0x1030   : > { %15867 = vmatpush3.msra.mxu0 %v17831_v35  ;;  %15874 = vmatpush3.msra.mxu1 %v5871_v33  ;;  %v6108_v35 = vpop.permute.xlu0 %6107 }
0x1031   : > { %15868 = vmatprep.subr.mxu0 %v17843_v27  ;;  %15870 = vmatprep.mubr.msk.f32.mxu0 %vm803_vm1, %v5779_v56 }
0x1032   : > { %15875 = vmatprep.subr.mxu1 %v5869_v10  ;;  %15877 = vmatprep.mubr.msk.f32.mxu1 %vm803_vm1, %v5777_v34 }
0x1033   : > { %15869 = vmatpush3.msra.mxu0 %v17843_v27  ;;  %15876 = vmatpush3.msra.mxu1 %v5869_v10  ;;  %v6201_v27 = vpop.permute.xlu1 %6200 }
0x1034   : > { %15880 = vmatprep.subr.msk.mxu0 %vm803_vm1, %v6114_v48  ;;  %15887 = vmatprep.subr.msk.mxu1 %vm803_vm1, %v6205_v40  ;;  %v6110_v32 = vpop.permute.xlu0 %6109 }
0x1035   : > { %15871 = vmatmul.mubr.msk.f32.vlgmr.msra.gmra.mxu0 %vm803_vm1, %v5780_v23  ;;  %15878 = vmatmul.mubr.msk.f32.vlgmr.msra.gmra.mxu1 %vm803_vm1, %v5778_v41 }
0x1036   : > { %15881 = vmatpush3.xpose.msk.msra.mxu0 %vm803_vm1, %v6114_v48  ;;  %15888 = vmatpush3.xpose.msk.msra.mxu1 %vm803_vm1, %v6205_v40 }
0x1037   : > { %15882 = vmatprep.subr.msk.mxu0 %vm803_vm1, %v6112_v18  ;;  %15884 = vmatprep.mubr.msk.f32.mxu0 %vm803_vm1, %v6108_v35  ;;  %v17935_v36 = vpop.permute.xlu1 %6495 }
0x1038   : > { %15889 = vmatprep.subr.msk.mxu1 %vm803_vm1, %v6203_v43  ;;  %15891 = vmatprep.mubr.msk.f32.mxu1 %vm803_vm1, %v6199_v31 }
0x103a   : > { %15883 = vmatpush3.xpose.msk.msra.mxu0 %vm803_vm1, %v6112_v18  ;;  %15890 = vmatpush3.xpose.msk.msra.mxu1 %vm803_vm1, %v6203_v43 }
0x103b   : > { %15894 = vmatprep.subr.msk.mxu0 %vm803_vm1, %v6114_v48  ;;  %15901 = vmatprep.subr.msk.mxu1 %vm803_vm1, %v6205_v40  ;;  %v17943_v45 = vpop.permute.xlu1 %6493 }
0x103d   : > { %15885 = vmatmul.mubr.msk.f32.vlgmr.msra.gmra.mxu0 %vm803_vm1, %v6110_v32  ;;  %15892 = vmatmul.mubr.msk.f32.vlgmr.msra.gmra.mxu1 %vm803_vm1, %v6201_v27 }
0x103e   : > { %15895 = vmatpush3.xpose.msk.msra.mxu0 %vm803_vm1, %v6114_v48  ;;  %15898 = vmatprep.mubr.msk.f32.mxu0 %vm803_vm1, %v6199_v31 }
0x103f   : > { %15902 = vmatpush3.xpose.msk.msra.mxu1 %vm803_vm1, %v6205_v40  ;;  %15905 = vmatprep.mubr.msk.f32.mxu1 %vm803_vm1, %v6108_v35 }
0x1040   : > { %15896 = vmatprep.subr.msk.mxu0 %vm803_vm1, %v6112_v18  ;;  %15903 = vmatprep.subr.msk.mxu1 %vm803_vm1, %v6203_v43 }
0x1042   : > { %15897 = vmatpush3.xpose.msk.msra.mxu0 %vm803_vm1, %v6112_v18 }
0x1043   : > { %15904 = vmatpush3.xpose.msk.msra.mxu1 %vm803_vm1, %v6203_v43  ;;  %15908 = vmatprep.subr.mxu0 %v17935_v36 }
0x1045   : > { %15899 = vmatmul.mubr.msk.f32.vlgmr.msra.gmra.mxu0 %vm803_vm1, %v6201_v27 }
0x1046   : > { %15906 = vmatmul.mubr.msk.f32.vlgmr.msra.gmra.mxu1 %vm803_vm1, %v6110_v32  ;;  %15909 = vmatpush3.msra.mxu0 %v17935_v36 }
0x1047   : > { %15910 = vmatprep.subr.mxu0 %v17943_v45 }
0x1048   : > { %15911 = vmatpush3.msra.mxu0 %v17943_v45 }
0x1049   : > { %15922 = vmatprep.subr.mxu0 %v17935_v36 }
0x10ef   : > { %v17950_v22 = vpop.f32.mrf.mxu0  ;;  %v17952_v30 = vpop.f32.mrf.mxu1 }
0x10f0   : > { %v5956_v25 = vsub.f32 %v17950_v22, %v17952_v30  ;;  %v778_v30 = vld [vmem:[%s18037_s16 + $0x38] sm:$0xff] }
0x10f1   : > { %v17956_v49 = vpop.f32.mrf.mxu0  ;;  %v17958_v26 = vpop.f32.mrf.mxu1 }
0x10f2   : > { %v5955_v51 = vsub.f32 %v17956_v49, %v17958_v26 }
0x10f5   : > { %v15872_v11 = vpop.f32.mrf.mxu0  ;;  %v15879_v37 = vpop.f32.mrf.mxu1 }
0x10f7   : > { %v6023_v60 = vpop.f32.mrf.mxu0  ;;  %v6098_v53 = vpop.f32.mrf.mxu1 }
0x10fd   : > { %v15886_v4 = vpop.f32.mrf.mxu0  ;;  %v15893_v55 = vpop.f32.mrf.mxu1 }
0x10fe   : > { %v17962_v58 = vsub.f32 %v15886_v4, %v15893_v55  ;;  %v6104_v55 = vadd.f32 %v15879_v37, %v15872_v11 }
0x10ff   : > { %v6189_v47 = vpop.f32.mrf.mxu0  ;;  %v6280_v24 = vpop.f32.mrf.mxu1 }
0x1100   : > { %v17964_v33 = vsub.f32 %v6189_v47, %v6280_v24  ;;  %v6442_v59 = vmul.f32 %v17962_v58, %v17962_v58  ;;  %v6099_v47 = vadd.f32 %v6098_v53, %v6023_v60 }
0x1102   : > { %v6441_v54 = vmul.f32 %v17964_v33, %v17964_v33 }
0x1105   : > { %v15900_v13 = vpop.f32.mrf.mxu0 }
0x1106   : > { %v15907_v6 = vpop.f32.mrf.mxu1 }
0x1107   : > { %v17966_v10 = vadd.f32 %v15907_v6, %v15900_v13  ;;  %v6357_v12 = vpop.f32.mrf.mxu0 }
0x1108   : > { %v6432_v7 = vpop.f32.mrf.mxu1 }
0x1109   : > { %v6444_v19 = vmul.f32 %v17966_v10, %v17966_v10  ;;  %v17972_v52 = vadd.f32 %v6432_v7, %v6357_v12 }
0x110b   : > { %v6446_v38 = vadd.f32 %v6444_v19, %v6442_v59  ;;  %v6443_v40 = vmul.f32 %v17972_v52, %v17972_v52 }
0x110d   : > { %16669 = vrsqrt.f32 %v6446_v38  ;;  %v6445_v34 = vadd.f32 %v6443_v40, %v6441_v54  ;;  %vm6456_vm6 = vcmp.eq.f32.partialorder %v6446_v38, inf  ;;  %v6459_v48 = vand.u32 2147483648, %v6446_v38 }
0x110e   : > { %vm6458_vm7 = vcmp.eq.f32.partialorder %v6446_v38, 0.0 }
0x110f   : > { %16671 = vrsqrt.f32 %v6445_v34  ;;  %vm6449_vm8 = vcmp.eq.f32.partialorder %v6445_v34, inf  ;;  %v6452_v43 = vand.u32 2147483648, %v6445_v34  ;;  %vm6451_vm9 = vcmp.eq.f32.partialorder %v6445_v34, 0.0 }
0x111a   : > { %v16670_v56 = vpop.eup %16669 }
0x111b   : > { %v6455_v28 = vmul.f32 %v16670_v56, %v6446_v38 }
0x111c   : > { %v16672_v42 = vpop.eup %16671 }
0x111d   : > { %v6457_v44 = vsel %vm6456_vm6, %v6446_v38, %v6455_v28  ;;  %v6448_v41 = vmul.f32 %v16672_v42, %v6445_v34 }
0x111e   : > { %v6460_v23 = vsel %vm6458_vm7, %v6459_v48, %v6457_v44 }
0x111f   : > { %v6464_v18 = vsel %vm803_vm1, %v6460_v23, inf  ;;  %v6450_v31 = vsel %vm6449_vm8, %v6445_v34, %v6448_v41  ;;  %v6470_v4 = vsel %vm803_vm1, %v6460_v23, -inf  ;;  %v6484_v38 = vadd.f32 1e-09, %v6460_v23 }
0x1120   : > { %6465 = vmin.xlane.f32.xlu0 %v6464_v18  ;;  %v6453_v35 = vsel %vm6451_vm9, %v6452_v43, %v6450_v31 }
0x1121   : > { %v6467_v27 = vsel %vm803_vm1, %v6453_v35, -inf  ;;  %v6461_v32 = vsel %vm803_vm1, %v6453_v35, inf  ;;  %v6483_v7 = vadd.f32 1e-09, %v6453_v35 }
0x1122   : > { %6468 = vmax.xlane.f32.xlu1 %v6467_v27 }
0x1124   : > { %6462 = vmin.xlane.f32.xlu0 %v6461_v32 }
0x1128   : > { %6471 = vmax.xlane.f32.xlu0 %v6470_v4 }
0x1133   : > { %6580 = vrot.lane.b32.xlu1 %v17051_v5, %s16862_s11 }
0x1137   : > { %6831 = vrot.lane.b32.xlu1 %v6104_v55, %s16861_s6 }
0x113e   : > { %6582 = vrot.lane.b32.xlu0 %v17046_v2, %s16862_s11 }
0x1142   : > { %6829 = vrot.lane.b32.xlu0 %v6099_v47, %s16861_s6 }
0x11a9   : > { %v6466_v24 = vpop.xlane.xlu0 %6465 }
0x11aa   : > { %v6474_v34 = vsub.f32 %v6460_v23, %v6466_v24  ;;  %v14300_v23 = vld [vmem:[%s17241_s10 + $0xc8] sm:$0xff] }
0x11ab   : > { %v6469_v13 = vpop.xlane.xlu1 %6468 }
0x11ad   : > { %v6463_v6 = vpop.xlane.xlu0 %6462 }
0x11ae   : > { %v6475_v12 = vsub.f32 %v6469_v13, %v6463_v6  ;;  %v6473_v2 = vsub.f32 %v6453_v35, %v6463_v6  ;;  %v14299_v35 = vld [vmem:[%s17241_s10 + $0xc0] sm:$0xff] }
0x11af   : > { %v6581_v37 = vpop.permute.xlu1 %6580 }
0x11b0   : > { %v6477_v59 = vadd.f32 1e-09, %v6475_v12 }
0x11b1   : > { %v6472_v19 = vpop.xlane.xlu0 %6471 }
0x11b2   : > { %16673 = vrcp.f32 %v6477_v59  ;;  %v6476_v54 = vsub.f32 %v6472_v19, %v6466_v24 }
0x11b3   : > { %16675 = vrcp.f32 %v6483_v7 }
0x11b4   : > { %v6478_v5 = vadd.f32 1e-09, %v6476_v54  ;;  %v6832_v54 = vpop.permute.xlu1 %6831 }
0x11b5   : > { %v6583_v11 = vpop.permute.xlu0 %6582 }
0x11b6   : > { %16677 = vrcp.f32 %v6478_v5  ;;  %15915 = vmatprep.subr.mxu1 %v6583_v11 }
0x11b7   : > { %15916 = vmatpush3.msra.mxu1 %v6583_v11  ;;  %16679 = vrcp.f32 %v6484_v38 }
0x11b8   : > { %15917 = vmatprep.subr.mxu1 %v6581_v37 }
0x11b9   : > { %15918 = vmatpush3.msra.mxu1 %v6581_v37  ;;  %v6830_v38 = vpop.permute.xlu0 %6829 }
0x11ba   : > { %15929 = vmatprep.subr.mxu1 %v6583_v11 }
0x11bf   : > { %v16674_v60 = vpop.eup %16673 }
0x11c0   : > { %v6480_v53 = vmul.f32 %v16674_v60, %v6473_v2  ;;  %v16676_v40 = vpop.eup %16675 }
0x11c2   : > { %v6486_v56 = vmul.f32 %v16676_v40, %v6480_v53  ;;  %v776_v40 = vld [vmem:[%s18037_s16 + $0x28] sm:$0xff] }
0x11c3   : > { %v16678_v28 = vpop.eup %16677 }
0x11c4   : > { %v6489_v42 = vmul.f32 %v6486_v56, %v17964_v33  ;;  %v6491_v48 = vmul.f32 %v6486_v56, %v17972_v52  ;;  %v6482_v44 = vmul.f32 %v16678_v28, %v6474_v34  ;;  %v16680_v41 = vpop.eup %16679  ;;  %v14304_v33 = vld [vmem:[%s17241_s10 + $0xe8] sm:$0xff]  ;;  %v14301_v52 = vld [vmem:[%s17241_s10 + $0xd0] sm:$0xff]  ;;  %v775_v34 = vld [vmem:[%s18037_s16 + $0x20] sm:$0xff] }
0x11c5   : > { %v774_v56 = vld [vmem:[%s18037_s16 + $0x18] sm:$0xff]  ;;  %v773_v28 = vld [vmem:[%s18037_s16 + $0x10] sm:$0xff] }
0x11c6   : > { %15912 = vmatprep.mubr.msk.f32.mxu0 %vm803_vm1, %v6489_v42  ;;  %15919 = vmatprep.mubr.msk.f32.mxu1 %vm803_vm1, %v6491_v48  ;;  %v6488_v43 = vmul.f32 %v16680_v41, %v6482_v44 }
0x11c8   : > { %v6490_v18 = vmul.f32 %v6488_v43, %v17962_v58  ;;  %v6492_v31 = vmul.f32 %v6488_v43, %v17966_v10  ;;  %v14305_v58 = vld [vmem:[%s17241_s10 + $0xf0] sm:$0xff]  ;;  %v14303_v10 = vld [vmem:[%s17241_s10 + $0xe0] sm:$0xff]  ;;  %v16866_v43 = vmov 0.015625  }
0x11ca   : > { %15913 = vmatmul.mubr.msk.f32.vlgmr.msra.gmra.mxu0 %vm803_vm1, %v6490_v18  ;;  %15920 = vmatmul.mubr.msk.f32.vlgmr.msra.gmra.mxu1 %vm803_vm1, %v6492_v31 }
0x11cb   : > { %15923 = vmatpush3.msra.mxu0 %v17935_v36  ;;  %15930 = vmatpush3.msra.mxu1 %v6583_v11  ;;  %v14306_v36 = vld [vmem:[%s17241_s10 + $0xf8] sm:$0xff] }
0x11cc   : > { %15924 = vmatprep.subr.mxu0 %v17943_v45  ;;  %15926 = vmatprep.mubr.msk.f32.mxu0 %vm803_vm1, %v6491_v48  ;;  %v771_v48 = vld [vmem:[%s18037_s16] sm:$0xff] }
0x11cd   : > { %15931 = vmatprep.subr.mxu1 %v6581_v37  ;;  %15933 = vmatprep.mubr.msk.f32.mxu1 %vm803_vm1, %v6489_v42  ;;  %v772_v42 = vld [vmem:[%s18037_s16 + $0x8] sm:$0xff] }
0x11ce   : > { %15925 = vmatpush3.msra.mxu0 %v17943_v45  ;;  %15932 = vmatpush3.msra.mxu1 %v6581_v37  ;;  %v14302_v45 = vld [vmem:[%s17241_s10 + $0xd8] sm:$0xff] }
0x11cf   : > { %15927 = vmatmul.mubr.msk.f32.vlgmr.msra.gmra.mxu0 %vm803_vm1, %v6492_v31  ;;  %15934 = vmatmul.mubr.msk.f32.vlgmr.msra.gmra.mxu1 %vm803_vm1, %v6490_v18 }
0x11d0   : > { %15955 = vmatprep.subr.mxu1 %v16857_v0  ;;  %15936 = vmatprep.subr.mxu0 %v14306_v36 }
0x11d1   : > { %15937 = vmatpush3.msra.mxu0 %v14306_v36  ;;  %15971 = vmatprep.mubr.msk.f32.mxu1 %vm16865_vm12, %v16857_v0 }
0x11d2   : > { %15938 = vmatprep.subr.mxu0 %v14305_v58 }
0x11d3   : > { %15939 = vmatpush3.msra.mxu0 %v14305_v58 }
0x11d4   : > { %15940 = vmatprep.subr.mxu0 %v14304_v33 }
0x11d5   : > { %15941 = vmatpush3.msra.mxu0 %v14304_v33 }
0x11d6   : > { %15942 = vmatprep.subr.mxu0 %v14303_v10 }
0x11d7   : > { %15943 = vmatpush3.msra.mxu0 %v14303_v10 }
0x11d8   : > { %15944 = vmatprep.subr.mxu0 %v14302_v45 }
0x11d9   : > { %15945 = vmatpush3.msra.mxu0 %v14302_v45 }
0x11da   : > { %15946 = vmatprep.subr.mxu0 %v14301_v52 }
0x11db   : > { %15947 = vmatpush3.msra.mxu0 %v14301_v52 }
0x11dc   : > { %15948 = vmatprep.subr.mxu0 %v14300_v23 }
0x11dd   : > { %15949 = vmatpush3.msra.mxu0 %v14300_v23 }
0x11de   : > { %15950 = vmatprep.subr.mxu0 %v14299_v35 }
0x11df   : > { %15951 = vmatpush3.msra.mxu0 %v14299_v35 }
0x11e0   : > { %15974 = vmatprep.subr.mxu0 %v16857_v0 }
0x128a   : > { %v15914_v27 = vpop.f32.mrf.mxu0  ;;  %v15921_v32 = vpop.f32.mrf.mxu1 }
0x128b   : > { %v6668_v4 = vsub.f32 %v15914_v27, %v15921_v32  ;;  %v7082_v32 = vlaneseq }
0x128c   : > { %v6571_v55 = vpop.f32.mrf.mxu0  ;;  %v6658_v47 = vpop.f32.mrf.mxu1 }
0x128d   : > { %v6667_v24 = vsub.f32 %v6571_v55, %v6658_v47  ;;  %6823 = vrot.lane.b32.xlu1 %v6668_v4, %s16862_s11  ;;  %v18127_v4 = vshrl.u32 %v7082_v32, 7 }
0x128f   : > { %v15928_v13 = vpop.f32.mrf.mxu0  ;;  %v15935_v6 = vpop.f32.mrf.mxu1  ;;  %6821 = vrot.lane.b32.xlu0 %v6667_v24, %s16862_s11  ;;  %v7084_v55 = vsub.s32 0, %v18127_v4 }
0x1290   : > { %v6816_v12 = vadd.f32 %v15935_v6, %v15928_v13 }
0x1291   : > { %v6735_v7 = vpop.f32.mrf.mxu0  ;;  %v6810_v59 = vpop.f32.mrf.mxu1 }
0x1292   : > { %v6811_v19 = vadd.f32 %v6810_v59, %v6735_v7  ;;  %6839 = vrot.lane.b32.xlu1 %v6816_v12, %s16863_s12 }
0x1294   : > { %6837 = vrot.lane.b32.xlu0 %v6811_v19, %s16863_s12 }
0x1296   : > { %7533 = vrot.lane.b32.xlu1 %v17040_v62, %s16858_s28 }
0x1298   : > { %7535 = vrot.lane.b32.xlu0 %v17044_v1, %s16858_s28 }
0x129a   : > { %7531 = vrot.lane.b32.xlu1 %v17042_v63, %s16858_s28 }
0x129c   : > { %7529 = vrot.lane.b32.xlu0 %v17038_v61, %s16858_s28 }
0x12ff   : > { %v6824_v5 = vpop.permute.xlu1 %6823 }
0x1300   : > { %v6844_v2 = vsel %vm803_vm1, %v5956_v25, %v6824_v5 }
0x1301   : > { %v6822_v11 = vpop.permute.xlu0 %6821  ;;  %v6846_v26 = vsel %vm2246_vm10, %v6844_v2, %v6832_v54 }
0x1302   : > { %v6843_v37 = vsel %vm803_vm1, %v5955_v51, %v6822_v11  ;;  %v777_v51 = vld [vmem:[%s18037_s16 + $0x30] sm:$0xff] }
0x1303   : > { %v6845_v53 = vsel %vm2246_vm10, %v6843_v37, %v6830_v38 }
0x1304   : > { %v6840_v60 = vpop.permute.xlu1 %6839 }
0x1305   : > { %v6848_v25 = vsel %vm2249_vm11, %v6846_v26, %v6840_v60 }
0x1306   : > { %v6838_v49 = vpop.permute.xlu0 %6837 }
0x1307   : > { %v6847_v22 = vsel %vm2249_vm11, %v6845_v53, %v6838_v49 }
0x1308   : > { %15952 = vmatprep.mubr.msk.f32.mxu0 %vm338_vm0, %v6847_v22  ;;  %v7534_v33 = vpop.permute.xlu1 %7533 }
0x1309   : > { %15953 = vmatmul.mubr.msk.f32.vlgmr.msra.gmra.mxu0 %vm338_vm0, %v6848_v25 }
0x130a   : > { %15975 = vmatpush3.msra.mxu0 %v778_v30  ;;  %15990 = vmatprep.mubr.msk.f32.mxu0 %vm16865_vm12, %v16857_v0  ;;  %v7536_v36 = vpop.permute.xlu0 %7535 }
0x130b   : > { %15976 = vmatprep.subr.mxu0 %v16857_v0 }
0x130c   : > { %15977 = vmatpush3.msra.mxu0 %v777_v51  ;;  %v7532_v10 = vpop.permute.xlu1 %7531 }
0x130d   : > { %15978 = vmatprep.subr.mxu0 %v16857_v0 }
0x130e   : > { %15979 = vmatpush3.msra.mxu0 %v776_v40  ;;  %v7530_v58 = vpop.permute.xlu0 %7529 }
0x130f   : > { %15980 = vmatprep.subr.mxu0 %v16857_v0 }
0x1310   : > { %15981 = vmatpush3.msra.mxu0 %v775_v34 }
0x1311   : > { %15982 = vmatprep.subr.mxu0 %v16857_v0 }
0x1312   : > { %15983 = vmatpush3.msra.mxu0 %v774_v56 }
0x1313   : > { %15984 = vmatprep.subr.mxu0 %v16857_v0 }
0x1314   : > { %15985 = vmatpush3.msra.mxu0 %v773_v28 }
0x1315   : > { %15986 = vmatprep.subr.mxu0 %v16857_v0 }
0x1316   : > { %15987 = vmatpush3.msra.mxu0 %v772_v42 }
0x1317   : > { %15988 = vmatprep.subr.mxu0 %v16857_v0 }
0x1318   : > { %15989 = vmatpush3.msra.mxu0 %v771_v48 }
0x1319   : > { %15993 = vmatprep.subr.msk.mxu0 %vm803_vm1, %v17044_v1 }
0x13c9   : > { %v18066_v44 = vpop.f32.mrf.mxu0 }
0x13ca   : > { %15956 = vmatpush3.msra.mxu1 %v18066_v44 }
0x13cb   : > { %v18069_v41 = vpop.f32.mrf.mxu0  ;;  %15957 = vmatprep.subr.mxu1 %v16857_v0 }
0x13cc   : > { %15958 = vmatpush3.msra.mxu1 %v18069_v41 }
0x13cd   : > { %15959 = vmatprep.subr.mxu1 %v16857_v0 }
0x13ce   : > { %15960 = vmatpush3.msra.mxu1 %v17854_v29 }
0x13cf   : > { %15961 = vmatprep.subr.mxu1 %v16857_v0 }
0x13d0   : > { %15962 = vmatpush3.msra.mxu1 %v17856_v57 }
0x13d1   : > { %15963 = vmatprep.subr.mxu1 %v16857_v0 }
0x13d2   : > { %15964 = vmatpush3.msra.mxu1 %v17597_v3 }
0x13d3   : > { %15965 = vmatprep.subr.mxu1 %v16857_v0 }
0x13d4   : > { %15966 = vmatpush3.msra.mxu1 %v17599_v39 }
0x13d5   : > { %15967 = vmatprep.subr.mxu1 %v16857_v0 }
0x13d6   : > { %15968 = vmatpush3.msra.mxu1 %v17340_v46 }
0x13d7   : > { %15969 = vmatprep.subr.mxu1 %v16857_v0 }
0x13d8   : > { %15970 = vmatpush3.msra.mxu1 %v17342_v50 }
0x13d9   : > { %15972 = vmatmul.mubr.msk.f32.vlgmr.msra.gmra.mxu1 %vm338_vm0, %v16866_v43  ;;  %7337 = vmatprep.subr.mxu1 %v16857_v0 }
0x1499   : > { %v6999_v18 = vpop.f32.mrf.mxu1 }
0x149a   : > { %15991 = vmatmul.mubr.msk.f32.vlgmr.msra.gmra.mxu0 %vm338_vm0, %v6999_v18 }
0x149b   : > { %15994 = vmatpush3.xpose.msk.msra.mxu0 %vm803_vm1, %v17044_v1  ;;  %v15973_v31 = vpop.f32.mrf.mxu1  ;;  %15997 = vmatprep.mubr.msk.f32.mxu0 %vm803_vm1, %v17038_v61 }
0x149c   : > { %15995 = vmatprep.subr.msk.mxu0 %vm803_vm1, %v17040_v62 }
0x149f   : > { %15996 = vmatpush3.xpose.msk.msra.mxu0 %vm803_vm1, %v17040_v62 }
0x14a0   : > { %16000 = vmatprep.subr.msk.mxu0 %vm803_vm1, %v7536_v36 }
0x14a2   : > { %15998 = vmatmul.mubr.msk.f32.vlgmr.msra.gmra.mxu0 %vm803_vm1, %v17042_v63 }
0x14a3   : > { %16001 = vmatpush3.xpose.msk.msra.mxu0 %vm803_vm1, %v7536_v36  ;;  %16004 = vmatprep.mubr.msk.f32.mxu0 %vm803_vm1, %v7530_v58 }
0x14a4   : > { %16002 = vmatprep.subr.msk.mxu0 %vm803_vm1, %v7534_v33 }
0x14a7   : > { %16003 = vmatpush3.xpose.msk.msra.mxu0 %vm803_vm1, %v7534_v33 }
0x14a8   : > { %16007 = vmatprep.subr.msk.mxu0 %vm803_vm1, %v17044_v1 }
0x14aa   : > { %16005 = vmatmul.mubr.msk.f32.vlgmr.msra.gmra.mxu0 %vm803_vm1, %v7532_v10 }
0x14ab   : > { %16008 = vmatpush3.xpose.msk.msra.mxu0 %vm803_vm1, %v17044_v1  ;;  %16011 = vmatprep.mubr.msk.f32.mxu0 %vm803_vm1, %v7530_v58 }
0x14ac   : > { %16009 = vmatprep.subr.msk.mxu0 %vm803_vm1, %v17040_v62 }
0x14af   : > { %16010 = vmatpush3.xpose.msk.msra.mxu0 %vm803_vm1, %v17040_v62 }
0x14b0   : > { %16014 = vmatprep.subr.msk.mxu0 %vm803_vm1, %v7536_v36 }
0x14b2   : > { %16012 = vmatmul.mubr.msk.f32.vlgmr.msra.gmra.mxu0 %vm803_vm1, %v7532_v10 }
0x14b3   : > { %16015 = vmatpush3.xpose.msk.msra.mxu0 %vm803_vm1, %v7536_v36  ;;  %16018 = vmatprep.mubr.msk.f32.mxu0 %vm803_vm1, %v17038_v61 }
0x14b4   : > { %16016 = vmatprep.subr.msk.mxu0 %vm803_vm1, %v7534_v33 }
0x14b7   : > { %16017 = vmatpush3.xpose.msk.msra.mxu0 %vm803_vm1, %v7534_v33 }
0x14b8   : > { %16021 = vmatprep.subr.mxu0 %v17074_v8 }
0x14ba   : > { %16019 = vmatmul.mubr.msk.f32.vlgmr.msra.gmra.mxu0 %vm803_vm1, %v17042_v63 }
0x14bb   : > { %16022 = vmatpush3.msra.mxu0 %v17074_v8 }
0x14bc   : > { %16023 = vmatprep.subr.mxu0 %v17076_v9 }
0x14bd   : > { %16024 = vmatpush3.msra.mxu0 %v17076_v9 }
0x155a   : > { %v7072_v45 = vpop.f32.mrf.mxu0 }
0x155b   : > { %v14509_v52 = vmul.f32 -1.442695, %v7072_v45 }
0x155c   : > { %v15992_v23 = vpop.f32.mrf.mxu0 }
0x155d   : > { %16681 = vpow2.f32 %v14509_v52 }
0x1562   : > { %v15999_v7 = vpop.f32.mrf.mxu0 }
0x1564   : > { %v7520_v59 = vpop.f32.mrf.mxu0 }
0x156a   : > { %v16682_v35 = vpop.eup %16681  ;;  %v16006_v19 = vpop.f32.mrf.mxu0 }
0x156b   : > { %v7079_v27 = vadd.f32 1.0, %v16682_v35  ;;  %v18198_v36 = vsub.f32 %v15999_v7, %v16006_v19 }
0x156c   : > { %v7611_v54 = vpop.f32.mrf.mxu0 }
0x156d   : > { %16683 = vrcp.f32 %v7079_v27  ;;  %v18179_v34 = vsub.f32 %v7520_v59, %v7611_v54  ;;  %v7773_v10 = vmul.f32 %v18198_v36, %v18198_v36 }
0x156f   : > { %v7772_v42 = vmul.f32 %v18179_v34, %v18179_v34 }
0x1572   : > { %v16013_v38 = vpop.f32.mrf.mxu0 }
0x1574   : > { %v7688_v2 = vpop.f32.mrf.mxu0 }
0x157a   : > { %v16684_v47 = vpop.eup %16683  ;;  %v16020_v60 = vpop.f32.mrf.mxu0 }
0x157b   : > { %v18132_v24 = vrot.slane %v16684_v47, %v7084_v55  ;;  %v18194_v31 = vadd.f32 %v16020_v60, %v16013_v38 }
0x157c   : > { %v7763_v26 = vpop.f32.mrf.mxu0 }
0x157d   : > { %7135 = vrot.lane.b32.xlu1 %v18132_v24, %s16858_s28  ;;  %7146 = vrot.lane.b32.xlu0 %v18132_v24, %s16861_s6  ;;  %v18140_v13 = vmul.f32 %v18132_v24, %v17342_v50  ;;  %v18146_v6 = vmul.f32 %v17340_v46, %v18132_v24  ;;  %v18152_v12 = vmul.f32 %v18132_v24, %v17599_v39 }
0x157e   : > { %v18163_v49 = vmul.f32 %v17597_v3, %v18132_v24  ;;  %v18172_v25 = vadd.f32 %v7763_v26, %v7688_v2  ;;  %v18177_v40 = vmul.f32 %v18132_v24, %v17856_v57  ;;  %v18192_v18 = vmul.f32 %v17854_v29, %v18132_v24 }
0x157f   : > { %v7775_v33 = vmul.f32 %v18194_v31, %v18194_v31  ;;  %v18220_v2 = vmul.f32 %v18132_v24, %v18069_v41 }
0x1580   : > { %v7774_v56 = vmul.f32 %v18172_v25, %v18172_v25 }
0x1581   : > { %7102 = vrot.lane.b32.xlu0 %v18140_v13, %s16858_s28  ;;  %v7777_v45 = vadd.f32 %v7775_v33, %v7773_v10 }
0x1582   : > { %v7776_v48 = vadd.f32 %v7774_v56, %v7772_v42 }
0x1583   : > { %vm7787_vm15 = vcmp.eq.f32.partialorder %v7777_v45, inf  ;;  %v7790_v54 = vand.u32 2147483648, %v7777_v45  ;;  %vm7789_vm2 = vcmp.eq.f32.partialorder %v7777_v45, 0.0 }
0x1584   : > { %16685 = vrsqrt.f32 %v7776_v48  ;;  %vm7780_vm13 = vcmp.eq.f32.partialorder %v7776_v48, inf  ;;  %v7783_v27 = vand.u32 2147483648, %v7776_v48  ;;  %vm7782_vm14 = vcmp.eq.f32.partialorder %v7776_v48, 0.0 }
0x1585   : > { %7104 = vrot.lane.b32.xlu0 %v18146_v6, %s16858_s28  ;;  %16687 = vrsqrt.f32 %v7777_v45 }
0x1589   : > { %7106 = vrot.lane.b32.xlu0 %v18152_v12, %s16858_s28 }
0x1591   : > { %v16686_v52 = vpop.eup %16685 }
0x1592   : > { %v7779_v23 = vmul.f32 %v16686_v52, %v7776_v48  ;;  %v16688_v47 = vpop.eup %16687 }
0x1593   : > { %v7786_v59 = vmul.f32 %v16688_v47, %v7777_v45 }
0x1594   : > { %v7781_v35 = vsel %vm7780_vm13, %v7776_v48, %v7779_v23 }
0x1595   : > { %v18206_v32 = vsel %vm7782_vm14, %v7783_v27, %v7781_v35  ;;  %v7788_v19 = vsel %vm7787_vm15, %v7777_v45, %v7786_v59 }
0x1596   : > { %v7798_v7 = vsel %vm803_vm1, %v18206_v32, -inf  ;;  %v7792_v38 = vsel %vm803_vm1, %v18206_v32, inf }
0x15ef   : > { %v7147_v5 = vpop.permute.xlu0 %7146  ;;  %v7136_v26 = vpop.permute.xlu1 %7135 }
0x15f0   : > { %v7150_v11 = vmul.f32 %v17340_v46, %v7147_v5  ;;  %v7149_v37 = vmul.f32 %v7147_v5, %v17342_v50  ;;  %v7152_v53 = vmul.f32 %v17597_v3, %v7147_v5  ;;  %v7154_v22 = vmul.f32 %v17854_v29, %v7147_v5 }
0x15f1   : > { %v7151_v30 = vmul.f32 %v7147_v5, %v17599_v39  ;;  %v7156_v51 = vmul.f32 %v18066_v44, %v7147_v5  ;;  %v7153_v28 = vmul.f32 %v7147_v5, %v17856_v57  ;;  %v7155_v58 = vmul.f32 %v7147_v5, %v18069_v41 }
0x15f2   : > { %7167 = vrot.lane.b32.xlu1 %v7150_v11, %s16858_s28  ;;  %7165 = vrot.lane.b32.xlu0 %v7149_v37, %s16858_s28  ;;  %v18212_v5 = vsel %vm7789_vm2, %v7790_v54, %v7788_v19  ;;  %v7139_v42 = vmul.f32 %v17340_v46, %v7136_v26  ;;  %v7140_v33 = vmul.f32 %v7136_v26, %v17599_v39 }
0x15f3   : > { %v7795_v11 = vsel %vm803_vm1, %v18212_v5, inf  ;;  %v7801_v37 = vsel %vm803_vm1, %v18212_v5, -inf  ;;  %v18224_v60 = vpop.permute.xlu0 %7102  ;;  %v7141_v23 = vmul.f32 %v17597_v3, %v7136_v26  ;;  %v7142_v46 = vmul.f32 %v7136_v26, %v17856_v57 }
0x15f4   : > { %v7143_v59 = vmul.f32 %v17854_v29, %v7136_v26  ;;  %v7144_v19 = vmul.f32 %v7136_v26, %v18069_v41  ;;  %v18251_v57 = vmul.f32 %v18066_v44, %v18132_v24  ;;  %v793_v41 = vld [vmem:[%s18264_s22 + $0x70] sm:$0xff]  ;;  %v792_v24 = vld [vmem:[%s18264_s22 + $0x68] sm:$0xff] }
0x15f6   : > { %7171 = vrot.lane.b32.xlu1 %v7152_v53, %s16858_s28  ;;  %7108 = vrot.lane.b32.xlu0 %v18163_v49, %s16858_s28 }
0x15f7   : > { %v18226_v53 = vpop.permute.xlu0 %7104 }
0x15fa   : > { %7175 = vrot.lane.b32.xlu1 %v7154_v22, %s16858_s28  ;;  %7169 = vrot.lane.b32.xlu0 %v7151_v30, %s16858_s28  ;;  %v7138_v30 = vmul.f32 %v7136_v26, %v17342_v50 }
0x15fb   : > { %v18228_v22 = vpop.permute.xlu0 %7106 }
0x15fe   : > { %7179 = vrot.lane.b32.xlu1 %v7156_v51, %s16858_s28  ;;  %7110 = vrot.lane.b32.xlu0 %v18177_v40, %s16858_s28 }
0x1602   : > { %7173 = vrot.lane.b32.xlu0 %v7153_v28, %s16858_s28 }
0x1606   : > { %7112 = vrot.lane.b32.xlu0 %v18192_v18, %s16858_s28 }
0x160a   : > { %7177 = vrot.lane.b32.xlu0 %v7155_v58, %s16858_s28 }
0x1622   : > { %7799 = vmax.xlane.f32.xlu1 %v7798_v7 }
0x1629   : > { %7793 = vmin.xlane.f32.xlu0 %v7792_v38 }
0x162d   : > { %7796 = vmin.xlane.f32.xlu0 %v7795_v11 }
0x1631   : > { %7802 = vmax.xlane.f32.xlu0 %v7801_v37  ;;  %v7145_v37 = vmul.f32 %v18066_v44, %v7136_v26  ;;  %v794_v44 = vld [vmem:[%s18264_s22 + $0x78] sm:$0xff]  ;;  %v791_v26 = vld [vmem:[%s18264_s22 + $0x60] sm:$0xff] }
0x1632   : > { %7338 = vmatpush1.msra.mxu1 %v794_v44 }
0x1633   : > { %7114 = vrot.lane.b32.xlu1 %v18220_v2, %s16858_s28  ;;  %7339 = vmatprep.subr.mxu1 %v16857_v0 }
0x1634   : > { %7340 = vmatpush1.msra.mxu1 %v793_v41 }
0x1635   : > { %7341 = vmatprep.subr.mxu1 %v16857_v0 }
0x1636   : > { %7342 = vmatpush1.msra.mxu1 %v792_v24  ;;  %v7815_v24 = vadd.f32 1e-09, %v18212_v5 }
0x1637   : > { %7343 = vmatprep.subr.mxu1 %v16857_v0 }
0x1638   : > { %7344 = vmatpush1.msra.mxu1 %v791_v26 }
0x1639   : > { %7345 = vmatprep.subr.mxu1 %v16857_v0 }
0x1664   : > { %v7166_v51 = vpop.permute.xlu0 %7165  ;;  %v7168_v28 = vpop.permute.xlu1 %7167 }
0x1665   : > { %v7189_v56 = vadd.f32 %v7166_v51, %v7138_v30  ;;  %v7190_v58 = vadd.f32 %v7168_v28, %v7139_v42  ;;  %v790_v30 = vld [vmem:[%s18264_s22 + $0x58] sm:$0xff]  ;;  %v789_v51 = vld [vmem:[%s18264_s22 + $0x50] sm:$0xff]  ;;  %v787_v28 = vld [vmem:[%s18264_s22 + $0x40] sm:$0xff] }
0x1666   : > { %7346 = vmatpush1.msra.mxu1 %v790_v30  ;;  %v786_v42 = vld [vmem:[%s18264_s22 + $0x38] sm:$0xff] }
0x1667   : > { %7205 = vrot.lane.b32.xlu1 %v7189_v56, %s16861_s6  ;;  %7347 = vmatprep.subr.mxu1 %v16857_v0  ;;  %v788_v56 = vld [vmem:[%s18264_s22 + $0x48] sm:$0xff] }
0x1668   : > { %v18233_v48 = vpop.permute.xlu0 %7108  ;;  %v7172_v52 = vpop.permute.xlu1 %7171  ;;  %7348 = vmatpush1.msra.mxu1 %v789_v51 }
0x1669   : > { %v7192_v35 = vadd.f32 %v7172_v52, %v7141_v23  ;;  %7349 = vmatprep.subr.mxu1 %v16857_v0  ;;  %v781_v52 = vld [vmem:[%s18264_s22 + $0x10] sm:$0xff]  ;;  %v780_v23 = vld [vmem:[%s18264_s22 + $0x8] sm:$0xff] }
0x166a   : > { %7350 = vmatpush1.msra.mxu1 %v788_v56 }
0x166b   : > { %7207 = vrot.lane.b32.xlu1 %v7190_v58, %s16861_s6  ;;  %7351 = vmatprep.subr.mxu1 %v16857_v0  ;;  %v785_v58 = vld [vmem:[%s18264_s22 + $0x30] sm:$0xff] }
0x166c   : > { %v7170_v10 = vpop.permute.xlu0 %7169  ;;  %v7176_v7 = vpop.permute.xlu1 %7175  ;;  %7352 = vmatpush1.msra.mxu1 %v787_v28 }
0x166d   : > { %v7191_v45 = vadd.f32 %v7170_v10, %v7140_v33  ;;  %v7194_v3 = vadd.f32 %v7176_v7, %v7143_v59  ;;  %7353 = vmatprep.subr.mxu1 %v16857_v0  ;;  %v784_v33 = vld [vmem:[%s18264_s22 + $0x28] sm:$0xff]  ;;  %v783_v10 = vld [vmem:[%s18264_s22 + $0x20] sm:$0xff]  ;;  %v798_v59 = vld [vmem:[%s18264_s22 + $0x98] sm:$0xff] }
0x166e   : > { %7354 = vmatpush1.msra.mxu1 %v786_v42  ;;  %v799_v7 = vld [vmem:[%s18264_s22 + $0xa0] sm:$0xff] }
0x166f   : > { %7209 = vrot.lane.b32.xlu1 %v7191_v45, %s16861_s6  ;;  %7355 = vmatprep.subr.mxu1 %v16857_v0  ;;  %v782_v45 = vld [vmem:[%s18264_s22 + $0x18] sm:$0xff] }
0x1670   : > { %v18239_v50 = vpop.permute.xlu0 %7110  ;;  %v7180_v11 = vpop.permute.xlu1 %7179  ;;  %7356 = vmatpush1.msra.mxu1 %v785_v58 }
0x1671   : > { %v7196_v29 = vadd.f32 %v7180_v11, %v7145_v37  ;;  %7357 = vmatprep.subr.mxu1 %v16857_v0  ;;  %v7814_v11 = vadd.f32 1e-09, %v18206_v32 }
0x1672   : > { %7358 = vmatpush1.msra.mxu1 %v784_v33 }
0x1673   : > { %7211 = vrot.lane.b32.xlu1 %v7192_v35, %s16861_s6  ;;  %7359 = vmatprep.subr.mxu1 %v16857_v0  ;;  %v779_v35 = vld [vmem:[%s18264_s22] sm:$0xff] }
0x1674   : > { %v7174_v27 = vpop.permute.xlu0 %7173  ;;  %7360 = vmatpush1.msra.mxu1 %v783_v10 }
0x1675   : > { %v7193_v47 = vadd.f32 %v7174_v27, %v7142_v46  ;;  %7361 = vmatprep.subr.mxu1 %v16857_v0  ;;  %v802_v46 = vld [vmem:[%s18264_s22 + $0xb8] sm:$0xff]  ;;  %v801_v27 = vld [vmem:[%s18264_s22 + $0xb0] sm:$0xff] }
0x1676   : > { %7362 = vmatpush1.msra.mxu1 %v782_v45 }
0x1677   : > { %7213 = vrot.lane.b32.xlu1 %v7193_v47, %s16861_s6  ;;  %7363 = vmatprep.subr.mxu1 %v16857_v0  ;;  %v800_v47 = vld [vmem:[%s18264_s22 + $0xa8] sm:$0xff] }
0x1678   : > { %v18245_v39 = vpop.permute.xlu0 %7112  ;;  %7364 = vmatpush1.msra.mxu1 %v781_v52 }
0x1679   : > { %7365 = vmatprep.subr.mxu1 %v16857_v0 }
0x167a   : > { %7366 = vmatpush1.msra.mxu1 %v780_v23 }
0x167b   : > { %7215 = vrot.lane.b32.xlu1 %v7194_v3, %s16861_s6  ;;  %7367 = vmatprep.subr.mxu1 %v16857_v0  ;;  %v797_v3 = vld [vmem:[%s18264_s22 + $0x90] sm:$0xff] }
0x167c   : > { %v7178_v54 = vpop.permute.xlu0 %7177  ;;  %7368 = vmatpush1.msra.mxu1 %v779_v35 }
0x167d   : > { %v7195_v38 = vadd.f32 %v7178_v54, %v7144_v19  ;;  %7385 = vmatprep.subr.mxu1 %v16857_v0 }
0x167e   : > { %7386 = vmatpush2.msra.mxu1 %v802_v46 }
0x167f   : > { %7116 = vrot.lane.b32.xlu1 %v18251_v57, %s16858_s28  ;;  %7217 = vrot.lane.b32.xlu0 %v7195_v38, %s16861_s6 }
0x1680   : > { %7387 = vmatprep.subr.mxu1 %v16857_v0 }
0x1681   : > { %7388 = vmatpush2.msra.mxu1 %v801_v27 }
0x1682   : > { %7389 = vmatprep.subr.mxu1 %v16857_v0 }
0x1683   : > { %7219 = vrot.lane.b32.xlu1 %v7196_v29, %s16861_s6  ;;  %7909 = vrot.lane.b32.xlu0 %v17074_v8, %s16858_s28 }
0x1684   : > { %7390 = vmatpush2.msra.mxu1 %v800_v47  ;;  %v7127_v47 = vsub.f32 %v18146_v6, %v18226_v53 }
0x1685   : > { %7391 = vmatprep.subr.mxu1 %v16857_v0 }
0x1686   : > { %7392 = vmatpush2.msra.mxu1 %v799_v7 }
0x1687   : > { %7907 = vrot.lane.b32.xlu1 %v17076_v9, %s16858_s28  ;;  %7393 = vmatprep.subr.mxu1 %v16857_v0 }
0x1688   : > { %7394 = vmatpush2.msra.mxu1 %v798_v59 }
0x1689   : > { %7395 = vmatprep.subr.mxu1 %v16857_v0 }
0x168a   : > { %7396 = vmatpush2.msra.mxu1 %v797_v3 }
0x168b   : > { %8150 = vrot.lane.b32.xlu1 %v17040_v62, %s16859_s29  ;;  %7397 = vmatprep.subr.mxu1 %v16857_v0 }
0x16ab   : > { %v7800_v19 = vpop.xlane.xlu1 %7799 }
0x16af   : > { %v7115_v46 = vpop.permute.xlu1 %7114 }
0x16b2   : > { %v7794_v54 = vpop.xlane.xlu0 %7793 }
0x16b3   : > { %v7806_v38 = vsub.f32 %v7800_v19, %v7794_v54  ;;  %v7804_v30 = vsub.f32 %v18206_v32, %v7794_v54 }
0x16b5   : > { %v7808_v37 = vadd.f32 1e-09, %v7806_v38 }
0x16b6   : > { %v7797_v29 = vpop.xlane.xlu0 %7796 }
0x16b7   : > { %16689 = vrcp.f32 %v7808_v37  ;;  %v7805_v33 = vsub.f32 %v18212_v5, %v7797_v29  ;;  %v795_v5 = vld [vmem:[%s18264_s22 + $0x80] sm:$0xff] }
0x16b8   : > { %16691 = vrcp.f32 %v7814_v11 }
0x16ba   : > { %v7803_v44 = vpop.xlane.xlu0 %7802 }
0x16bb   : > { %v7807_v41 = vsub.f32 %v7803_v44, %v7797_v29 }
0x16bd   : > { %v7809_v26 = vadd.f32 1e-09, %v7807_v41 }
0x16bf   : > { %16693 = vrcp.f32 %v7809_v26 }
0x16c0   : > { %16695 = vrcp.f32 %v7815_v24 }
0x16c4   : > { %v16690_v51 = vpop.eup %16689 }
0x16c5   : > { %v7811_v56 = vmul.f32 %v16690_v51, %v7804_v30  ;;  %v16692_v28 = vpop.eup %16691 }
0x16c7   : > { %v7817_v42 = vmul.f32 %v16692_v28, %v7811_v56  ;;  %v7130_v28 = vsub.f32 %v18177_v40, %v18239_v50 }
0x16c9   : > { %v18318_v58 = vmul.f32 %v7817_v42, %v18179_v34  ;;  %v18330_v35 = vmul.f32 %v7817_v42, %v18172_v25  ;;  %v796_v34 = vld [vmem:[%s18264_s22 + $0x88] sm:$0xff] }
0x16ca   : > { %7398 = vmatpush2.msra.mxu1 %v796_v34 }
0x16cb   : > { %16025 = vmatprep.mubr.msk.f32.mxu0 %vm803_vm1, %v18318_v58  ;;  %7399 = vmatprep.subr.mxu1 %v16857_v0 }
0x16cc   : > { %v16694_v10 = vpop.eup %16693  ;;  %7400 = vmatpush2.msra.mxu1 %v795_v5 }
0x16cd   : > { %v7813_v45 = vmul.f32 %v16694_v10, %v7805_v33  ;;  %v16696_v52 = vpop.eup %16695 }
0x16cf   : > { %v18323_v23 = vmul.f32 %v16696_v52, %v7813_v45  ;;  %v7131_v52 = vsub.f32 %v18192_v18, %v18245_v39 }
0x16d1   : > { %v18327_v32 = vmul.f32 %v18323_v23, %v18198_v36  ;;  %v7126_v36 = vsub.f32 %v18140_v13, %v18224_v60  ;;  %v7128_v13 = vsub.f32 %v18152_v12, %v18228_v22  ;;  %v7129_v12 = vsub.f32 %v18163_v49, %v18233_v48 }
0x16d3   : > { %16026 = vmatmul.mubr.msk.f32.vlgmr.msra.gmra.mxu0 %vm803_vm1, %v18327_v32 }
0x16d4   : > { %16032 = vmatprep.mubr.msk.f32.mxu0 %vm803_vm1, %v18330_v35 }
0x16d9   : > { %v7206_v27 = vpop.permute.xlu1 %7205 }
0x16da   : > { %v18342_v25 = vsel %vm2246_vm10, %v7126_v36, %v7206_v27 }
0x16db   : > { %v7246_v59 = vrot.slane %v18342_v25, 7  ;;  %v7271_v19 = vrot.slane %v18342_v25, 1 }
0x16dd   : > { %v7208_v7 = vpop.permute.xlu1 %7207 }
0x16de   : > { %v7230_v3 = vsel %vm2246_vm10, %v7127_v47, %v7208_v7  ;;  %v7132_v47 = vsub.f32 %v18220_v2, %v7115_v46 }
0x16df   : > { %v16575_v54 = vpack.i.bf16 %v7230_v3, %v18342_v25  ;;  %v7247_v38 = vrot.slane %v7230_v3, 7  ;;  %v7272_v11 = vrot.slane %v7230_v3, 1 }
0x16e1   : > { %v7210_v60 = vpop.permute.xlu1 %7209  ;;  %16576 = vrot.lane.b32.xlu0 %v16575_v54, %s16864_s13  ;;  %v7273_v6 = vsel %vm7270_vm3, %v7271_v19, %v7272_v11  ;;  %v18357_v53 = vsel %vm7245_vm4, %v7246_v59, %v7247_v38 }
0x16e2   : > { %v7231_v37 = vsel %vm2246_vm10, %v7128_v13, %v7210_v60  ;;  %14510 = vmatprep.mubr.msk.f32.mxu1 %vm338_vm0, %v7273_v6 }
0x16e3   : > { %v7249_v29 = vrot.slane %v7231_v37, 7  ;;  %v7274_v44 = vrot.slane %v7231_v37, 1 }
0x16e5   : > { %v7212_v22 = vpop.permute.xlu1 %7211  ;;  %8152 = vrot.lane.b32.xlu0 %v17044_v1, %s16859_s29  ;;  %v18366_v41 = vsel %vm7270_vm3, %v7272_v11, %v7274_v44  ;;  %v18369_v24 = vsel %vm7245_vm4, %v7247_v38, %v7249_v29 }
0x16e6   : > { %v7232_v26 = vsel %vm2246_vm10, %v7129_v12, %v7212_v22  ;;  %v7823_v22 = vmul.f32 %v18323_v23, %v18194_v31 }
0x16e7   : > { %v16580_v30 = vpack.i.bf16 %v7232_v26, %v7231_v37  ;;  %v7251_v51 = vrot.slane %v7232_v26, 7  ;;  %v7276_v56 = vrot.slane %v7232_v26, 1 }
0x16e9   : > { %16581 = vrot.lane.b32.xlu1 %v16580_v30, %s16864_s13  ;;  %v7214_v49 = vpop.permute.xlu1 %7213  ;;  %8243 = vrot.lane.b32.xlu0 %v17044_v1, %s16860_s30  ;;  %v18378_v48 = vsel %vm7270_vm3, %v7274_v44, %v7276_v56  ;;  %v18381_v42 = vsel %vm7245_vm4, %v7249_v29, %v7251_v51 }
0x16ea   : > { %v7233_v33 = vsel %vm2246_vm10, %v7130_v28, %v7214_v49 }
0x16eb   : > { %v7253_v10 = vrot.slane %v7233_v33, 7  ;;  %v7278_v45 = vrot.slane %v7233_v33, 1 }
0x16ed   : > { %8146 = vrot.lane.b32.xlu1 %v17038_v61, %s16859_s29  ;;  %v7216_v40 = vpop.permute.xlu1 %7215  ;;  %7296 = vrot.lane.b32.xlu0 %v7233_v33, %s16864_s13  ;;  %v18390_v50 = vsel %vm7270_vm3, %v7276_v56, %v7278_v45  ;;  %v18393_v34 = vsel %vm7245_vm4, %v7251_v51, %v7253_v10 }
0x16ee   : > { %v7234_v5 = vsel %vm2246_vm10, %v7131_v52, %v7216_v40 }
0x16ef   : > { %v7255_v36 = vrot.slane %v7234_v5, 7  ;;  %v7280_v27 = vrot.slane %v7234_v5, 1 }
0x16f1   : > { %8148 = vrot.lane.b32.xlu1 %v17042_v63, %s16859_s29  ;;  %v7117_v18 = vpop.permute.xlu1 %7116  ;;  %7298 = vrot.lane.b32.xlu0 %v7234_v5, %s16864_s13  ;;  %v7218_v39 = vpop.permute.xlu0 %7217  ;;  %v18401_v7 = vsel %vm7270_vm3, %v7278_v45, %v7280_v27  ;;  %v18404_v3 = vsel %vm7245_vm4, %v7253_v10, %v7255_v36 }
0x16f2   : > { %v7235_v19 = vsel %vm2246_vm10, %v7132_v47, %v7218_v39  ;;  %v7133_v11 = vsub.f32 %v18251_v57, %v7117_v18 }
0x16f3   : > { %v7257_v54 = vrot.slane %v7235_v19, 7  ;;  %v7282_v38 = vrot.slane %v7235_v19, 1 }
0x16f5   : > { %8241 = vrot.lane.b32.xlu1 %v17040_v62, %s16860_s30  ;;  %v7220_v2 = vpop.permute.xlu1 %7219  ;;  %7300 = vrot.lane.b32.xlu0 %v7235_v19, %s16864_s13  ;;  %v7910_v46 = vpop.permute.xlu0 %7909  ;;  %v18412_v13 = vsel %vm7270_vm3, %v7280_v27, %v7282_v38  ;;  %v18415_v60 = vsel %vm7245_vm4, %v7255_v36, %v7257_v54 }
0x16f6   : > { %v18418_v6 = vsel %vm2246_vm10, %v7133_v11, %v7220_v2  ;;  %16028 = vmatprep.subr.mxu0 %v7910_v46 }
0x16f7   : > { %v7259_v37 = vrot.slane %v18418_v6, 7  ;;  %v7284_v57 = vrot.slane %v18418_v6, 1  ;;  %16029 = vmatpush3.msra.mxu0 %v7910_v46 }
0x16f9   : > { %8237 = vrot.lane.b32.xlu1 %v17038_v61, %s16860_s30  ;;  %v7908_v29 = vpop.permute.xlu1 %7907  ;;  %8239 = vrot.lane.b32.xlu0 %v17042_v63, %s16860_s30  ;;  %v18429_v44 = vsel %vm7270_vm3, %v7282_v38, %v7284_v57  ;;  %v18432_v12 = vsel %vm7245_vm4, %v7257_v54, %v7259_v37  ;;  %v7287_v36 = vsel %vm7270_vm3, %v7284_v57, 0.0 }
0x16fa   : > { %16030 = vmatprep.subr.mxu0 %v7908_v29 }
0x16fb   : > { %16031 = vmatpush3.msra.mxu0 %v7908_v29 }
0x16fc   : > { %16033 = vmatmul.mubr.msk.f32.vlgmr.msra.gmra.mxu0 %vm803_vm1, %v7823_v22  ;;  %16035 = vmatprep.subr.mxu0 %v17074_v8 }
0x16fd   : > { %7302 = vrot.lane.b32.xlu1 %v18418_v6, %s16864_s13  ;;  %16036 = vmatpush3.msra.mxu0 %v17074_v8  ;;  %v8151_v51 = vpop.permute.xlu1 %8150 }
0x16fe   : > { %16039 = vmatprep.mubr.msk.f32.mxu0 %vm803_vm1, %v18330_v35  ;;  %16037 = vmatprep.subr.mxu0 %v17076_v9  ;;  %v7269_v35 = vsel %vm7245_vm4, 0.0, %v7246_v59 }
0x16ff   : > { %16038 = vmatpush3.msra.mxu0 %v17076_v9 }
0x1700   : > { %16040 = vmatmul.mubr.msk.f32.vlgmr.msra.gmra.mxu0 %vm803_vm1, %v7823_v22  ;;  %16042 = vmatprep.subr.mxu0 %v7910_v46 }
0x1701   : > { %8534 = vrot.lane.b32.xlu1 %v17074_v8, %s16859_s29  ;;  %16043 = vmatpush3.msra.mxu0 %v7910_v46 }
0x1702   : > { %16046 = vmatprep.mubr.msk.f32.mxu0 %vm803_vm1, %v18318_v58  ;;  %16044 = vmatprep.subr.mxu0 %v7908_v29 }
0x1703   : > { %16045 = vmatpush3.msra.mxu0 %v7908_v29 }
0x1704   : > { %16047 = vmatmul.mubr.msk.f32.vlgmr.msra.gmra.mxu0 %vm803_vm1, %v18327_v32 }
0x1753   : > { %v16577_v31 = vpop.permute.xlu0 %16576 }
0x1754   : > { %v16578_v23 = vunpack.i.l.bf16 %v16577_v31  ;;  %v16579_v26 = vunpack.i.h.bf16 %v16577_v31 }
0x1756   : > { %v7312_v30 = vsel %vm338_vm0, %v7269_v35, %v16578_v23  ;;  %v7313_v58 = vsel %vm338_vm0, %v18357_v53, %v16579_v26 }
0x1757   : > { %v8153_v56 = vpop.permute.xlu0 %8152  ;;  %7402 = vmatmul.mubr.f32.vlgmr.msra.gmra.mxu1 %v7312_v30 }
0x1758   : > { %14511 = vmatprep.mubr.msk.f32.mxu1 %vm338_vm0, %v18366_v41  ;;  %16049 = vmatprep.subr.msk.mxu0 %vm803_vm1, %v8153_v56 }
0x1759   : > { %16063 = vmatprep.subr.msk.mxu1 %vm803_vm1, %v8153_v56  ;;  %16050 = vmatpush3.xpose.msk.msra.mxu0 %vm803_vm1, %v8153_v56 }
0x175a   : > { %16064 = vmatpush3.xpose.msk.msra.mxu1 %vm803_vm1, %v8153_v56  ;;  %16051 = vmatprep.subr.msk.mxu0 %vm803_vm1, %v8151_v51 }
0x175b   : > { %16065 = vmatprep.subr.msk.mxu1 %vm803_vm1, %v8151_v51  ;;  %v16582_v32 = vpop.permute.xlu1 %16581  ;;  %v8244_v25 = vpop.permute.xlu0 %8243  ;;  %7407 = vmatmul.mubr.f32.gmra.mxu1 %v7313_v58 }
0x175c   : > { %v16583_v59 = vunpack.i.l.bf16 %v16582_v32  ;;  %14512 = vmatprep.mubr.msk.f32.mxu1 %vm338_vm0, %v18378_v48  ;;  %v16584_v41 = vunpack.i.h.bf16 %v16582_v32 }
0x175d   : > { %16052 = vmatpush3.xpose.msk.msra.mxu0 %vm803_vm1, %v8151_v51 }
0x175e   : > { %16066 = vmatpush3.xpose.msk.msra.mxu1 %vm803_vm1, %v8151_v51  ;;  %16056 = vmatprep.subr.msk.mxu0 %vm803_vm1, %v8244_v25  ;;  %v7314_v28 = vsel %vm338_vm0, %v18369_v24, %v16583_v59  ;;  %v7315_v48 = vsel %vm338_vm0, %v18381_v42, %v16584_v41 }
0x175f   : > { %v8147_v53 = vpop.permute.xlu1 %8146  ;;  %v7297_v49 = vpop.permute.xlu0 %7296  ;;  %7412 = vmatmul.mubr.f32.gmra.mxu1 %v7314_v28 }
0x1760   : > { %14513 = vmatprep.mubr.msk.f32.mxu1 %vm338_vm0, %v18390_v50  ;;  %16053 = vmatprep.mubr.msk.f32.mxu0 %vm803_vm1, %v8147_v53  ;;  %v7316_v24 = vsel %vm338_vm0, %v18393_v34, %v7297_v49 }
0x1763   : > { %v8149_v33 = vpop.permute.xlu1 %8148  ;;  %v7299_v10 = vpop.permute.xlu0 %7298  ;;  %7417 = vmatmul.mubr.f32.gmra.mxu1 %v7315_v48 }
0x1764   : > { %14514 = vmatprep.mubr.msk.f32.mxu1 %vm338_vm0, %v18401_v7  ;;  %16054 = vmatmul.mubr.msk.f32.vlgmr.msra.gmra.mxu0 %vm803_vm1, %v8149_v33  ;;  %v7317_v42 = vsel %vm338_vm0, %v18404_v3, %v7299_v10 }
0x1765   : > { %16057 = vmatpush3.xpose.msk.msra.mxu0 %vm803_vm1, %v8244_v25 }
0x1767   : > { %v8242_v45 = vpop.permute.xlu1 %8241  ;;  %v7301_v52 = vpop.permute.xlu0 %7300  ;;  %7422 = vmatmul.mubr.f32.gmra.mxu1 %v7316_v24 }
0x1768   : > { %14515 = vmatprep.mubr.msk.f32.mxu1 %vm338_vm0, %v18412_v13  ;;  %16058 = vmatprep.subr.msk.mxu0 %vm803_vm1, %v8242_v45  ;;  %v7318_v34 = vsel %vm338_vm0, %v18415_v60, %v7301_v52 }
0x1769   : > { %16059 = vmatpush3.xpose.msk.msra.mxu0 %vm803_vm1, %v8242_v45 }
0x176a   : > { %16070 = vmatprep.subr.msk.mxu0 %vm803_vm1, %v8244_v25 }
0x176b   : > { %v8238_v40 = vpop.permute.xlu1 %8237  ;;  %v8240_v50 = vpop.permute.xlu0 %8239  ;;  %7427 = vmatmul.mubr.f32.gmra.mxu1 %v7317_v42 }
0x176c   : > { %14516 = vmatprep.mubr.msk.f32.mxu1 %vm338_vm0, %v18429_v44  ;;  %16060 = vmatprep.mubr.msk.f32.mxu0 %vm803_vm1, %v8238_v40 }
0x176d   : > { %16061 = vmatmul.mubr.msk.f32.vlgmr.msra.gmra.mxu0 %vm803_vm1, %v8240_v50 }
0x176e   : > { %16071 = vmatpush3.xpose.msk.msra.mxu0 %vm803_vm1, %v8244_v25  ;;  %16074 = vmatprep.mubr.msk.f32.mxu0 %vm803_vm1, %v8147_v53 }
0x176f   : > { %16072 = vmatprep.subr.msk.mxu0 %vm803_vm1, %v8242_v45  ;;  %v7303_v5 = vpop.permute.xlu1 %7302  ;;  %7432 = vmatmul.mubr.f32.gmra.mxu1 %v7318_v34 }
0x1770   : > { %14517 = vmatprep.mubr.msk.f32.mxu1 %vm338_vm0, %v7287_v36  ;;  %v7319_v27 = vsel %vm338_vm0, %v18432_v12, %v7303_v5 }
0x1772   : > { %16073 = vmatpush3.xpose.msk.msra.mxu0 %vm803_vm1, %v8242_v45 }
0x1773   : > { %v8535_v47 = vpop.permute.xlu1 %8534  ;;  %7437 = vmatmul.mubr.f32.gmra.mxu1 %v7319_v27 }
0x1774   : > { %16067 = vmatprep.mubr.msk.f32.mxu1 %vm803_vm1, %v8238_v40  ;;  %16077 = vmatprep.subr.mxu1 %v8535_v47 }
0x1775   : > { %16075 = vmatmul.mubr.msk.f32.vlgmr.msra.gmra.mxu0 %vm803_vm1, %v8149_v33  ;;  %16091 = vmatprep.subr.mxu0 %v8535_v47 }
0x1776   : > { %16092 = vmatpush3.msra.mxu0 %v8535_v47 }
0x1777   : > { %16068 = vmatmul.mubr.msk.f32.vlgmr.msra.gmra.mxu1 %vm803_vm1, %v8240_v50 }
0x1778   : > { %16078 = vmatpush3.msra.mxu1 %v8535_v47 }
0x1793   : > { %v18510_v18 = vpop.f32.mrf.mxu0 }
0x1795   : > { %v18512_v39 = vpop.f32.mrf.mxu0 }
0x17bc   : > { %v18514_v7 = vpop.f32.mrf.mxu0 }
0x17bd   : > { %v7995_v3 = vsub.f32 %v18510_v18, %v18514_v7 }
0x17be   : > { %v18518_v19 = vpop.f32.mrf.mxu0 }
0x17bf   : > { %v7994_v54 = vsub.f32 %v18512_v39, %v18518_v19 }
0x17c0   : > { %v16041_v38 = vpop.f32.mrf.mxu0 }
0x17c2   : > { %v18522_v11 = vpop.f32.mrf.mxu0 }
0x17c4   : > { %v16048_v2 = vpop.f32.mrf.mxu0 }
0x17c5   : > { %v18524_v46 = vadd.f32 %v16048_v2, %v16041_v38 }
0x17c6   : > { %v8137_v22 = vpop.f32.mrf.mxu0 }
0x1817   : > { %v18526_v13 = vpop.f32.mrf.mxu1 }
0x1819   : > { %v7405_v60 = vpop.f32.mrf.mxu1 }
0x181b   : > { %v18528_v6 = vpop.f32.mrf.mxu1 }
0x181d   : > { %v7410_v37 = vpop.f32.mrf.mxu1 }
0x181f   : > { %v18530_v57 = vpop.f32.mrf.mxu1 }
0x1821   : > { %v7415_v29 = vpop.f32.mrf.mxu1 }
0x1823   : > { %v18532_v44 = vpop.f32.mrf.mxu1 }
0x1824   : > { %v16055_v23 = vpop.f32.mrf.mxu0 }
0x1825   : > { %v7420_v12 = vpop.f32.mrf.mxu1 }
0x1826   : > { %v8228_v30 = vpop.f32.mrf.mxu0 }
0x1827   : > { %v18534_v31 = vpop.f32.mrf.mxu1 }
0x1829   : > { %v7425_v35 = vpop.f32.mrf.mxu1 }
0x182b   : > { %v18536_v26 = vpop.f32.mrf.mxu1 }
0x182d   : > { %v7430_v51 = vpop.f32.mrf.mxu1  ;;  %v16062_v56 = vpop.f32.mrf.mxu0 }
0x182e   : > { %v18542_v53 = vsub.f32 %v16055_v23, %v16062_v56 }
0x182f   : > { %v18538_v58 = vpop.f32.mrf.mxu1  ;;  %v8319_v25 = vpop.f32.mrf.mxu0 }
0x1830   : > { %v18544_v48 = vsub.f32 %v8228_v30, %v8319_v25  ;;  %v8481_v45 = vmul.f32 %v18542_v53, %v18542_v53 }
0x1831   : > { %v7435_v32 = vpop.f32.mrf.mxu1 }
0x1832   : > { %v8480_v40 = vmul.f32 %v18544_v48, %v18544_v48  ;;  %v8138_v32 = vadd.f32 %v8137_v22, %v18522_v11  ;;  %v16785_v22 = vld [vmem:[%s17241_s10 + $0x38] sm:$0xff] }
0x1833   : > { %v18540_v59 = vpop.f32.mrf.mxu1 }
0x1835   : > { %v16076_v41 = vpop.f32.mrf.mxu0  ;;  %v7440_v28 = vpop.f32.mrf.mxu1 }
0x1837   : > { %v16069_v49 = vpop.f32.mrf.mxu1  ;;  %v8471_v10 = vpop.f32.mrf.mxu0 }
0x1838   : > { %v18546_v33 = vadd.f32 %v16076_v41, %v16069_v49 }
0x1839   : > { %v8396_v24 = vpop.f32.mrf.mxu1 }
0x183a   : > { %v8483_v52 = vmul.f32 %v18546_v33, %v18546_v33  ;;  %v18552_v42 = vadd.f32 %v8471_v10, %v8396_v24 }
0x183c   : > { %v8485_v50 = vadd.f32 %v8483_v52, %v8481_v45  ;;  %v8482_v34 = vmul.f32 %v18552_v42, %v18552_v42 }
0x183e   : > { %16697 = vrsqrt.f32 %v8485_v50  ;;  %v8484_v5 = vadd.f32 %v8482_v34, %v8480_v40  ;;  %vm8495_vm5 = vcmp.eq.f32.partialorder %v8485_v50, inf  ;;  %v8498_v38 = vand.u32 2147483648, %v8485_v50 }
0x183f   : > { %vm8497_vm6 = vcmp.eq.f32.partialorder %v8485_v50, 0.0 }
0x1840   : > { %16699 = vrsqrt.f32 %v8484_v5  ;;  %vm8488_vm7 = vcmp.eq.f32.partialorder %v8484_v5, inf  ;;  %v8491_v29 = vand.u32 2147483648, %v8484_v5  ;;  %vm8490_vm8 = vcmp.eq.f32.partialorder %v8484_v5, 0.0 }
0x184b   : > { %v16698_v36 = vpop.eup %16697 }
0x184c   : > { %v8494_v27 = vmul.f32 %v16698_v36, %v8485_v50 }
0x184d   : > { %v16700_v47 = vpop.eup %16699 }
0x184e   : > { %v8496_v2 = vsel %vm8495_vm5, %v8485_v50, %v8494_v27  ;;  %v8487_v60 = vmul.f32 %v16700_v47, %v8484_v5 }
0x184f   : > { %v8499_v37 = vsel %vm8497_vm6, %v8498_v38, %v8496_v2 }
0x1850   : > { %v8503_v12 = vsel %vm803_vm1, %v8499_v37, inf  ;;  %v8489_v23 = vsel %vm8488_vm7, %v8484_v5, %v8487_v60  ;;  %v8509_v56 = vsel %vm803_vm1, %v8499_v37, -inf  ;;  %v8523_v40 = vadd.f32 1e-09, %v8499_v37 }
0x1851   : > { %8504 = vmin.xlane.f32.xlu0 %v8503_v12  ;;  %v8492_v35 = vsel %vm8490_vm8, %v8491_v29, %v8489_v23 }
0x1852   : > { %v8506_v30 = vsel %vm803_vm1, %v8492_v35, -inf  ;;  %v8500_v51 = vsel %vm803_vm1, %v8492_v35, inf  ;;  %v8522_v10 = vadd.f32 1e-09, %v8492_v35 }
0x1853   : > { %8507 = vmax.xlane.f32.xlu1 %v8506_v30 }
0x1855   : > { %8501 = vmin.xlane.f32.xlu0 %v8500_v51 }
0x1859   : > { %8510 = vmax.xlane.f32.xlu0 %v8509_v56  ;;  %v16790_v56 = vld [vmem:[%s17241_s10 + $0x10] sm:$0xff] }
0x1864   : > { %8621 = vrot.lane.b32.xlu1 %v17074_v8, %s16860_s30 }
0x1868   : > { %8619 = vrot.lane.b32.xlu1 %v17076_v9, %s16860_s30 }
0x186c   : > { %9060 = vrot.lane.b32.xlu1 %v17088_v15, %s16858_s28 }
0x186f   : > { %8532 = vrot.lane.b32.xlu0 %v17076_v9, %s16859_s29 }
0x1870   : > { %8870 = vrot.lane.b32.xlu1 %v18524_v46, %s16861_s6 }
0x1873   : > { %9062 = vrot.lane.b32.xlu0 %v17092_v17, %s16858_s28 }
0x1877   : > { %8868 = vrot.lane.b32.xlu0 %v8138_v32, %s16861_s6  ;;  %v16791_v32 = vld [vmem:[%s17241_s10 + $0x8] sm:$0xff] }
0x18da   : > { %v8505_v25 = vpop.xlane.xlu0 %8504 }
0x18db   : > { %v8513_v47 = vsub.f32 %v8499_v37, %v8505_v25  ;;  %v16789_v37 = vld [vmem:[%s17241_s10 + $0x18] sm:$0xff] }
0x18dc   : > { %v8508_v41 = vpop.xlane.xlu1 %8507 }
0x18de   : > { %v8502_v28 = vpop.xlane.xlu0 %8501 }
0x18df   : > { %v8514_v49 = vsub.f32 %v8508_v41, %v8502_v28  ;;  %v8512_v34 = vsub.f32 %v8492_v35, %v8502_v28  ;;  %v16792_v41 = vld [vmem:[%s17241_s10] sm:$0xff] }
0x18e0   : > { %v8622_v11 = vpop.permute.xlu1 %8621 }
0x18e1   : > { %v8516_v24 = vadd.f32 1e-09, %v8514_v49 }
0x18e2   : > { %v8511_v45 = vpop.xlane.xlu0 %8510 }
0x18e3   : > { %16701 = vrcp.f32 %v8516_v24  ;;  %v8515_v52 = vsub.f32 %v8511_v45, %v8505_v25 }
0x18e4   : > { %16703 = vrcp.f32 %v8522_v10 }
0x18e5   : > { %v8517_v46 = vadd.f32 1e-09, %v8515_v52 }
0x18e6   : > { %v8533_v50 = vpop.permute.xlu0 %8532 }
0x18e7   : > { %16705 = vrcp.f32 %v8517_v46  ;;  %16079 = vmatprep.subr.mxu1 %v8533_v50  ;;  %16093 = vmatprep.subr.mxu0 %v8533_v50 }
0x18e8   : > { %16080 = vmatpush3.msra.mxu1 %v8533_v50  ;;  %16094 = vmatpush3.msra.mxu0 %v8533_v50  ;;  %16707 = vrcp.f32 %v8523_v40 }
0x18e9   : > { %16084 = vmatprep.subr.mxu1 %v8622_v11  ;;  %16105 = vmatprep.subr.mxu0 %v16785_v22 }
0x18ea   : > { %v9063_v25 = vpop.permute.xlu0 %9062 }
0x18f0   : > { %v16702_v5 = vpop.eup %16701 }
0x18f1   : > { %v8519_v36 = vmul.f32 %v16702_v5, %v8512_v34  ;;  %v16704_v27 = vpop.eup %16703 }
0x18f3   : > { %v8525_v38 = vmul.f32 %v16704_v27, %v8519_v36  ;;  %v8869_v27 = vpop.permute.xlu0 %8868 }
0x18f4   : > { %v16706_v2 = vpop.eup %16705 }
0x18f5   : > { %v8528_v60 = vmul.f32 %v8525_v38, %v18544_v48  ;;  %v8530_v29 = vmul.f32 %v8525_v38, %v18552_v42  ;;  %v8521_v12 = vmul.f32 %v16706_v2, %v8513_v47  ;;  %v16708_v23 = vpop.eup %16707  ;;  %v8620_v48 = vpop.permute.xlu1 %8619  ;;  %v16786_v42 = vld [vmem:[%s17241_s10 + $0x30] sm:$0xff] }
0x18f7   : > { %16081 = vmatprep.mubr.msk.f32.mxu1 %vm803_vm1, %v8528_v60  ;;  %16095 = vmatprep.mubr.msk.f32.mxu0 %vm803_vm1, %v8530_v29  ;;  %v8527_v30 = vmul.f32 %v16708_v23, %v8521_v12 }
0x18f9   : > { %v8529_v35 = vmul.f32 %v8527_v30, %v18542_v53  ;;  %v8531_v51 = vmul.f32 %v8527_v30, %v18546_v33  ;;  %v16787_v53 = vld [vmem:[%s17241_s10 + $0x28] sm:$0xff]  ;;  %v16788_v33 = vld [vmem:[%s17241_s10 + $0x20] sm:$0xff]  ;;  %v9061_v28 = vpop.permute.xlu1 %9060 }
0x18fb   : > { %16082 = vmatmul.mubr.msk.f32.vlgmr.msra.gmra.mxu1 %vm803_vm1, %v8529_v35  ;;  %16096 = vmatmul.mubr.msk.f32.vlgmr.msra.gmra.mxu0 %vm803_vm1, %v8531_v51 }
0x18fc   : > { %16085 = vmatpush3.msra.mxu1 %v8622_v11  ;;  %16106 = vmatpush3.msra.mxu0 %v16785_v22 }
0x18fd   : > { %16086 = vmatprep.subr.mxu1 %v8620_v48  ;;  %16088 = vmatprep.mubr.msk.f32.mxu1 %vm803_vm1, %v8530_v29  ;;  %v8871_v36 = vpop.permute.xlu1 %8870 }
0x18fe   : > { %16107 = vmatprep.subr.mxu0 %v16786_v42  ;;  %16087 = vmatpush3.msra.mxu1 %v8620_v48 }
0x18ff   : > { %16108 = vmatpush3.msra.mxu0 %v16786_v42  ;;  %16098 = vmatprep.subr.mxu1 %v8622_v11 }
0x1900   : > { %16109 = vmatprep.subr.mxu0 %v16787_v53  ;;  %16089 = vmatmul.mubr.msk.f32.vlgmr.msra.gmra.mxu1 %vm803_vm1, %v8531_v51 }
0x1901   : > { %16099 = vmatpush3.msra.mxu1 %v8622_v11  ;;  %16110 = vmatpush3.msra.mxu0 %v16787_v53 }
0x1902   : > { %16100 = vmatprep.subr.mxu1 %v8620_v48  ;;  %16102 = vmatprep.mubr.msk.f32.mxu1 %vm803_vm1, %v8528_v60 }
0x1903   : > { %16111 = vmatprep.subr.mxu0 %v16788_v33  ;;  %16101 = vmatpush3.msra.mxu1 %v8620_v48 }
0x1904   : > { %16112 = vmatpush3.msra.mxu0 %v16788_v33  ;;  %16124 = vmatprep.subr.msk.mxu1 %vm803_vm1, %v17092_v17 }
0x1905   : > { %16113 = vmatprep.subr.mxu0 %v16789_v37  ;;  %16103 = vmatmul.mubr.msk.f32.vlgmr.msra.gmra.mxu1 %vm803_vm1, %v8529_v35 }
0x1906   : > { %16114 = vmatpush3.msra.mxu0 %v16789_v37  ;;  %16125 = vmatpush3.xpose.msk.msra.mxu1 %vm803_vm1, %v17092_v17 }
0x1907   : > { %16115 = vmatprep.subr.mxu0 %v16790_v56  ;;  %16126 = vmatprep.subr.msk.mxu1 %vm803_vm1, %v17088_v15 }
0x1908   : > { %16128 = vmatprep.mubr.msk.f32.mxu1 %vm803_vm1, %v17086_v14  ;;  %16116 = vmatpush3.msra.mxu0 %v16790_v56 }
0x1909   : > { %16117 = vmatprep.subr.mxu0 %v16791_v32 }
0x190a   : > { %16118 = vmatpush3.msra.mxu0 %v16791_v32  ;;  %16127 = vmatpush3.xpose.msk.msra.mxu1 %vm803_vm1, %v17088_v15 }
0x190b   : > { %16119 = vmatprep.subr.mxu0 %v16792_v41  ;;  %16131 = vmatprep.subr.msk.mxu1 %vm803_vm1, %v9063_v25 }
0x190c   : > { %16120 = vmatpush3.msra.mxu0 %v16792_v41 }
0x190d   : > { %16129 = vmatmul.mubr.msk.f32.vlgmr.msra.gmra.mxu1 %vm803_vm1, %v17090_v16  ;;  %16138 = vmatprep.subr.msk.mxu0 %vm803_vm1, %v17092_v17 }
0x190e   : > { %16132 = vmatpush3.xpose.msk.msra.mxu1 %vm803_vm1, %v9063_v25 }
0x190f   : > { %16133 = vmatprep.subr.msk.mxu1 %vm803_vm1, %v9061_v28 }
0x1912   : > { %16134 = vmatpush3.xpose.msk.msra.mxu1 %vm803_vm1, %v9061_v28 }
0x1913   : > { %16145 = vmatprep.subr.msk.mxu1 %vm803_vm1, %v9063_v25 }
0x19bb   : > { %v16083_v49 = vpop.f32.mrf.mxu1  ;;  %v16097_v40 = vpop.f32.mrf.mxu0 }
0x19bd   : > { %v8610_v10 = vpop.f32.mrf.mxu1  ;;  %v8774_v22 = vpop.f32.mrf.mxu0 }
0x19c0   : > { %v16090_v24 = vpop.f32.mrf.mxu1 }
0x19c1   : > { %v8707_v45 = vsub.f32 %v16083_v49, %v16090_v24 }
0x19c2   : > { %v8697_v52 = vpop.f32.mrf.mxu1 }
0x19c3   : > { %v8706_v46 = vsub.f32 %v8610_v10, %v8697_v52  ;;  %8862 = vrot.lane.b32.xlu1 %v8707_v45, %s16862_s11 }
0x19c5   : > { %v16104_v50 = vpop.f32.mrf.mxu1  ;;  %8860 = vrot.lane.b32.xlu0 %v8706_v46, %s16862_s11 }
0x19c6   : > { %v8855_v11 = vadd.f32 %v16104_v50, %v16097_v40 }
0x19c7   : > { %v8849_v34 = vpop.f32.mrf.mxu1 }
0x19c8   : > { %v8850_v5 = vadd.f32 %v8849_v34, %v8774_v22  ;;  %8878 = vrot.lane.b32.xlu1 %v8855_v11, %s16863_s12 }
0x19ca   : > { %8876 = vrot.lane.b32.xlu0 %v8850_v5, %s16863_s12 }
0x19cc   : > { %9058 = vrot.lane.b32.xlu1 %v17090_v16, %s16858_s28 }
0x19ce   : > { %9056 = vrot.lane.b32.xlu0 %v17086_v14, %s16858_s28 }
0x19d0   : > { %9436 = vrot.lane.b32.xlu1 %v17098_v20, %s16858_s28 }
0x1a35   : > { %v8863_v47 = vpop.permute.xlu1 %8862 }
0x1a36   : > { %v8883_v60 = vsel %vm803_vm1, %v7995_v3, %v8863_v47  ;;  %v16130_v3 = vpop.f32.mrf.mxu1 }
0x1a37   : > { %v8861_v38 = vpop.permute.xlu0 %8860  ;;  %v8885_v30 = vsel %vm2246_vm10, %v8883_v60, %v8871_v36 }
0x1a38   : > { %v8882_v2 = vsel %vm803_vm1, %v7994_v54, %v8861_v38  ;;  %v9047_v19 = vpop.f32.mrf.mxu1 }
0x1a39   : > { %v8884_v12 = vsel %vm2246_vm10, %v8882_v2, %v8869_v27 }
0x1a3a   : > { %v8879_v29 = vpop.permute.xlu1 %8878 }
0x1a3b   : > { %v8887_v51 = vsel %vm2249_vm11, %v8885_v30, %v8879_v29 }
0x1a3c   : > { %v8877_v23 = vpop.permute.xlu0 %8876 }
0x1a3d   : > { %v8886_v35 = vsel %vm2249_vm11, %v8884_v12, %v8877_v23 }
0x1a3e   : > { %16121 = vmatprep.mubr.msk.f32.mxu0 %vm338_vm0, %v8886_v35  ;;  %v9059_v39 = vpop.permute.xlu1 %9058 }
0x1a3f   : > { %16122 = vmatmul.mubr.msk.f32.vlgmr.msra.gmra.mxu0 %vm338_vm0, %v8887_v51 }
0x1a40   : > { %16139 = vmatpush3.xpose.msk.msra.mxu0 %vm803_vm1, %v17092_v17  ;;  %v9057_v18 = vpop.permute.xlu0 %9056 }
0x1a41   : > { %16140 = vmatprep.subr.msk.mxu0 %vm803_vm1, %v17088_v15  ;;  %16135 = vmatprep.mubr.msk.f32.mxu1 %vm803_vm1, %v9057_v18 }
0x1a42   : > { %16142 = vmatprep.mubr.msk.f32.mxu0 %vm803_vm1, %v9057_v18  ;;  %16136 = vmatmul.mubr.msk.f32.vlgmr.msra.gmra.mxu1 %vm803_vm1, %v9059_v39  ;;  %v18653_v7 = vpop.permute.xlu1 %9436 }
0x1a43   : > { %16146 = vmatpush3.xpose.msk.msra.mxu1 %vm803_vm1, %v9063_v25  ;;  %16149 = vmatprep.mubr.msk.f32.mxu1 %vm803_vm1, %v17086_v14 }
0x1a44   : > { %16141 = vmatpush3.xpose.msk.msra.mxu0 %vm803_vm1, %v17088_v15  ;;  %16147 = vmatprep.subr.msk.mxu1 %vm803_vm1, %v9061_v28 }
0x1a45   : > { %16152 = vmatprep.subr.mxu0 %v17098_v20 }
0x1a47   : > { %16143 = vmatmul.mubr.msk.f32.vlgmr.msra.gmra.mxu0 %vm803_vm1, %v9059_v39  ;;  %16148 = vmatpush3.xpose.msk.msra.mxu1 %vm803_vm1, %v9061_v28 }
0x1a48   : > { %16153 = vmatpush3.msra.mxu0 %v17098_v20  ;;  %16159 = vmatprep.subr.mxu1 %v18653_v7 }
0x1a49   : > { %16154 = vmatprep.subr.mxu0 %v17100_v21 }
0x1a4a   : > { %16150 = vmatmul.mubr.msk.f32.vlgmr.msra.gmra.mxu1 %vm803_vm1, %v17090_v16  ;;  %16155 = vmatpush3.msra.mxu0 %v17100_v21 }
0x1a4b   : > { %16160 = vmatpush3.msra.mxu1 %v18653_v7  ;;  %16166 = vmatprep.subr.mxu0 %v17098_v20 }
0x1aff   : > { %v18665_v54 = vpop.f32.mrf.mxu0 }
0x1b01   : > { %v18667_v42 = vpop.f32.mrf.mxu0 }
0x1b02   : > { %v16137_v48 = vpop.f32.mrf.mxu1 }
0x1b03   : > { %v18669_v37 = vsub.f32 %v16130_v3, %v16137_v48 }
0x1b04   : > { %v9138_v53 = vpop.f32.mrf.mxu1 }
0x1b05   : > { %v18671_v32 = vsub.f32 %v9047_v19, %v9138_v53  ;;  %v9300_v49 = vmul.f32 %v18669_v37, %v18669_v37 }
0x1b07   : > { %v16144_v33 = vpop.f32.mrf.mxu0  ;;  %v9299_v45 = vmul.f32 %v18671_v32, %v18671_v32 }
0x1b09   : > { %v9215_v41 = vpop.f32.mrf.mxu0 }
0x1b0a   : > { %v16151_v56 = vpop.f32.mrf.mxu1 }
0x1b0b   : > { %v18673_v25 = vadd.f32 %v16151_v56, %v16144_v33 }
0x1b0c   : > { %v9290_v28 = vpop.f32.mrf.mxu1 }
0x1b0d   : > { %v9302_v10 = vmul.f32 %v18673_v25, %v18673_v25  ;;  %v18679_v24 = vadd.f32 %v9290_v28, %v9215_v41 }
0x1b0f   : > { %v9304_v52 = vadd.f32 %v9302_v10, %v9300_v49  ;;  %v9301_v40 = vmul.f32 %v18679_v24, %v18679_v24 }
0x1b11   : > { %16709 = vrsqrt.f32 %v9304_v52  ;;  %v9303_v46 = vadd.f32 %v9301_v40, %v9299_v45  ;;  %vm9314_vm9 = vcmp.eq.f32.partialorder %v9304_v52, inf  ;;  %v9317_v34 = vand.u32 2147483648, %v9304_v52 }
0x1b12   : > { %vm9316_vm13 = vcmp.eq.f32.partialorder %v9304_v52, 0.0 }
0x1b13   : > { %16711 = vrsqrt.f32 %v9303_v46  ;;  %vm9307_vm14 = vcmp.eq.f32.partialorder %v9303_v46, inf  ;;  %v9310_v47 = vand.u32 2147483648, %v9303_v46  ;;  %vm9309_vm15 = vcmp.eq.f32.partialorder %v9303_v46, 0.0 }
0x1b1e   : > { %v16710_v50 = vpop.eup %16709 }
0x1b1f   : > { %v9313_v11 = vmul.f32 %v16710_v50, %v9304_v52 }
0x1b20   : > { %v16712_v22 = vpop.eup %16711 }
0x1b21   : > { %v9315_v5 = vsel %vm9314_vm9, %v9304_v52, %v9313_v11  ;;  %v9306_v36 = vmul.f32 %v16712_v22, %v9303_v46 }
0x1b22   : > { %v9318_v27 = vsel %vm9316_vm13, %v9317_v34, %v9315_v5 }
0x1b23   : > { %v9322_v38 = vsel %vm803_vm1, %v9318_v27, inf  ;;  %v9308_v2 = vsel %vm9307_vm14, %v9303_v46, %v9306_v36  ;;  %v9328_v23 = vsel %vm803_vm1, %v9318_v27, -inf  ;;  %v9342_v53 = vadd.f32 1e-09, %v9318_v27 }
0x1b24   : > { %9323 = vmin.xlane.f32.xlu0 %v9322_v38  ;;  %v9311_v60 = vsel %vm9309_vm15, %v9310_v47, %v9308_v2 }
0x1b25   : > { %v9325_v29 = vsel %vm803_vm1, %v9311_v60, -inf  ;;  %v9319_v12 = vsel %vm803_vm1, %v9311_v60, inf  ;;  %v9341_v39 = vadd.f32 1e-09, %v9311_v60 }
0x1b26   : > { %9326 = vmax.xlane.f32.xlu1 %v9325_v29 }
0x1b28   : > { %9320 = vmin.xlane.f32.xlu0 %v9319_v12 }
0x1b2c   : > { %9329 = vmax.xlane.f32.xlu0 %v9328_v23 }
0x1b37   : > { %9679 = vrot.lane.b32.xlu1 %v17092_v17, %s16859_s29 }
0x1b3b   : > { %9770 = vrot.lane.b32.xlu1 %v17092_v17, %s16860_s30 }
0x1b3f   : > { %9768 = vrot.lane.b32.xlu1 %v17088_v15, %s16860_s30 }
0x1b42   : > { %9434 = vrot.lane.b32.xlu0 %v17100_v21, %s16858_s28 }
0x1b43   : > { %9764 = vrot.lane.b32.xlu1 %v17086_v14, %s16860_s30 }
0x1b46   : > { %9677 = vrot.lane.b32.xlu0 %v17088_v15, %s16859_s29 }
0x1b47   : > { %9766 = vrot.lane.b32.xlu1 %v17090_v16, %s16860_s30 }
0x1b4a   : > { %9673 = vrot.lane.b32.xlu0 %v17086_v14, %s16859_s29 }
0x1b4b   : > { %10061 = vrot.lane.b32.xlu1 %v17098_v20, %s16859_s29 }
0x1b4e   : > { %9675 = vrot.lane.b32.xlu0 %v17090_v16, %s16859_s29 }
0x1b4f   : > { %10059 = vrot.lane.b32.xlu1 %v17100_v21, %s16859_s29 }
0x1bad   : > { %v9324_v30 = vpop.xlane.xlu0 %9323 }
0x1bae   : > { %v9332_v52 = vsub.f32 %v9318_v27, %v9324_v30 }
0x1baf   : > { %v9327_v35 = vpop.xlane.xlu1 %9326 }
0x1bb1   : > { %v9321_v51 = vpop.xlane.xlu0 %9320 }
0x1bb2   : > { %v9333_v18 = vsub.f32 %v9327_v35, %v9321_v51  ;;  %v9331_v28 = vsub.f32 %v9311_v60, %v9321_v51 }
0x1bb3   : > { %v9680_v41 = vpop.permute.xlu1 %9679 }
0x1bb4   : > { %v9335_v3 = vadd.f32 1e-09, %v9333_v18 }
0x1bb5   : > { %v9330_v19 = vpop.xlane.xlu0 %9329 }
0x1bb6   : > { %16713 = vrcp.f32 %v9335_v3  ;;  %v9334_v48 = vsub.f32 %v9330_v19, %v9324_v30 }
0x1bb7   : > { %16715 = vrcp.f32 %v9341_v39  ;;  %v9771_v50 = vpop.permute.xlu1 %9770 }
0x1bb8   : > { %v9336_v33 = vadd.f32 1e-09, %v9334_v48 }
0x1bb9   : > { %v9435_v56 = vpop.permute.xlu0 %9434 }
0x1bba   : > { %16717 = vrcp.f32 %v9336_v33  ;;  %16161 = vmatprep.subr.mxu1 %v9435_v56 }
0x1bbb   : > { %16162 = vmatpush3.msra.mxu1 %v9435_v56  ;;  %16719 = vrcp.f32 %v9342_v53  ;;  %v9769_v2 = vpop.permute.xlu1 %9768 }
0x1bbc   : > { %16173 = vmatprep.subr.mxu1 %v18653_v7 }
0x1bbd   : > { %v9678_v27 = vpop.permute.xlu0 %9677 }
0x1bc3   : > { %v16714_v49 = vpop.eup %16713 }
0x1bc4   : > { %v9338_v10 = vmul.f32 %v16714_v49, %v9331_v28  ;;  %v16716_v45 = vpop.eup %16715 }
0x1bc6   : > { %v9344_v40 = vmul.f32 %v16716_v45, %v9338_v10 }
0x1bc7   : > { %v16718_v46 = vpop.eup %16717 }
0x1bc8   : > { %v9340_v11 = vmul.f32 %v16718_v46, %v9332_v52  ;;  %v9347_v22 = vmul.f32 %v9344_v40, %v18671_v32  ;;  %v9349_v34 = vmul.f32 %v9344_v40, %v18679_v24  ;;  %v16720_v5 = vpop.eup %16719 }
0x1bca   : > { %v9346_v36 = vmul.f32 %v16720_v5, %v9340_v11  ;;  %16156 = vmatprep.mubr.msk.f32.mxu0 %vm803_vm1, %v9347_v22  ;;  %16163 = vmatprep.mubr.msk.f32.mxu1 %vm803_vm1, %v9349_v34 }
0x1bcc   : > { %v9348_v47 = vmul.f32 %v9346_v36, %v18669_v37  ;;  %v9350_v38 = vmul.f32 %v9346_v36, %v18673_v25  ;;  %v9765_v37 = vpop.permute.xlu1 %9764 }
0x1bce   : > { %16157 = vmatmul.mubr.msk.f32.vlgmr.msra.gmra.mxu0 %vm803_vm1, %v9348_v47  ;;  %16164 = vmatmul.mubr.msk.f32.vlgmr.msra.gmra.mxu1 %vm803_vm1, %v9350_v38 }
0x1bcf   : > { %16167 = vmatpush3.msra.mxu0 %v17098_v20  ;;  %16174 = vmatpush3.msra.mxu1 %v18653_v7  ;;  %v9674_v7 = vpop.permute.xlu0 %9673 }
0x1bd0   : > { %16168 = vmatprep.subr.mxu0 %v17100_v21  ;;  %16170 = vmatprep.mubr.msk.f32.mxu0 %vm803_vm1, %v9349_v34  ;;  %v9767_v32 = vpop.permute.xlu1 %9766 }
0x1bd1   : > { %16175 = vmatprep.subr.mxu1 %v9435_v56  ;;  %16177 = vmatprep.mubr.msk.f32.mxu1 %vm803_vm1, %v9347_v22 }
0x1bd2   : > { %16169 = vmatpush3.msra.mxu0 %v17100_v21  ;;  %16176 = vmatpush3.msra.mxu1 %v9435_v56 }
0x1bd3   : > { %16180 = vmatprep.subr.msk.mxu0 %vm803_vm1, %v9680_v41  ;;  %16187 = vmatprep.subr.msk.mxu1 %vm803_vm1, %v9771_v50  ;;  %v9676_v25 = vpop.permute.xlu0 %9675 }
0x1bd4   : > { %16171 = vmatmul.mubr.msk.f32.vlgmr.msra.gmra.mxu0 %vm803_vm1, %v9350_v38  ;;  %16178 = vmatmul.mubr.msk.f32.vlgmr.msra.gmra.mxu1 %vm803_vm1, %v9348_v47  ;;  %v18746_v24 = vpop.permute.xlu1 %10061 }
0x1bd5   : > { %16181 = vmatpush3.xpose.msk.msra.mxu0 %vm803_vm1, %v9680_v41  ;;  %16188 = vmatpush3.xpose.msk.msra.mxu1 %vm803_vm1, %v9771_v50 }
0x1bd6   : > { %16182 = vmatprep.subr.msk.mxu0 %vm803_vm1, %v9678_v27  ;;  %16184 = vmatprep.mubr.msk.f32.mxu0 %vm803_vm1, %v9674_v7 }
0x1bd7   : > { %16189 = vmatprep.subr.msk.mxu1 %vm803_vm1, %v9769_v2  ;;  %16191 = vmatprep.mubr.msk.f32.mxu1 %vm803_vm1, %v9765_v37 }
0x1bd8   : > { %v18754_v60 = vpop.permute.xlu1 %10059 }
0x1bd9   : > { %16183 = vmatpush3.xpose.msk.msra.mxu0 %vm803_vm1, %v9678_v27  ;;  %16190 = vmatpush3.xpose.msk.msra.mxu1 %vm803_vm1, %v9769_v2 }
0x1bda   : > { %16194 = vmatprep.subr.msk.mxu0 %vm803_vm1, %v9680_v41  ;;  %16201 = vmatprep.subr.msk.mxu1 %vm803_vm1, %v9771_v50 }
0x1bdc   : > { %16185 = vmatmul.mubr.msk.f32.vlgmr.msra.gmra.mxu0 %vm803_vm1, %v9676_v25  ;;  %16192 = vmatmul.mubr.msk.f32.vlgmr.msra.gmra.mxu1 %vm803_vm1, %v9767_v32 }
0x1bdd   : > { %16195 = vmatpush3.xpose.msk.msra.mxu0 %vm803_vm1, %v9680_v41  ;;  %16198 = vmatprep.mubr.msk.f32.mxu0 %vm803_vm1, %v9765_v37 }
0x1bde   : > { %16202 = vmatpush3.xpose.msk.msra.mxu1 %vm803_vm1, %v9771_v50  ;;  %16205 = vmatprep.mubr.msk.f32.mxu1 %vm803_vm1, %v9674_v7 }
0x1bdf   : > { %16196 = vmatprep.subr.msk.mxu0 %vm803_vm1, %v9678_v27  ;;  %16203 = vmatprep.subr.msk.mxu1 %vm803_vm1, %v9769_v2 }
0x1be1   : > { %16197 = vmatpush3.xpose.msk.msra.mxu0 %vm803_vm1, %v9678_v27 }
0x1be2   : > { %16204 = vmatpush3.xpose.msk.msra.mxu1 %vm803_vm1, %v9769_v2  ;;  %16208 = vmatprep.subr.mxu0 %v18746_v24 }
0x1be4   : > { %16199 = vmatmul.mubr.msk.f32.vlgmr.msra.gmra.mxu0 %vm803_vm1, %v9767_v32 }
0x1be5   : > { %16206 = vmatmul.mubr.msk.f32.vlgmr.msra.gmra.mxu1 %vm803_vm1, %v9676_v25  ;;  %16209 = vmatpush3.msra.mxu0 %v18746_v24 }
0x1be6   : > { %16210 = vmatprep.subr.mxu0 %v18754_v60 }
0x1be7   : > { %16211 = vmatpush3.msra.mxu0 %v18754_v60 }
0x1be8   : > { %16222 = vmatprep.subr.mxu0 %v18746_v24 }
0x1c8e   : > { %v18761_v29 = vpop.f32.mrf.mxu0  ;;  %v18763_v12 = vpop.f32.mrf.mxu1 }
0x1c8f   : > { %v9522_v23 = vsub.f32 %v18761_v29, %v18763_v12 }
0x1c90   : > { %v18767_v30 = vpop.f32.mrf.mxu0  ;;  %v18769_v35 = vpop.f32.mrf.mxu1 }
0x1c91   : > { %v9521_v51 = vsub.f32 %v18767_v30, %v18769_v35 }
0x1c94   : > { %v16172_v18 = vpop.f32.mrf.mxu0  ;;  %v16179_v39 = vpop.f32.mrf.mxu1 }
0x1c95   : > { %v9670_v3 = vadd.f32 %v16179_v39, %v16172_v18 }
0x1c96   : > { %v9589_v19 = vpop.f32.mrf.mxu0  ;;  %v9664_v48 = vpop.f32.mrf.mxu1 }
0x1c97   : > { %v9665_v53 = vadd.f32 %v9664_v48, %v9589_v19 }
0x1c9c   : > { %v16186_v33 = vpop.f32.mrf.mxu0  ;;  %v16193_v56 = vpop.f32.mrf.mxu1 }
0x1c9d   : > { %v18773_v49 = vsub.f32 %v16186_v33, %v16193_v56 }
0x1c9e   : > { %v9755_v41 = vpop.f32.mrf.mxu0  ;;  %v9846_v28 = vpop.f32.mrf.mxu1 }
0x1c9f   : > { %v18775_v52 = vsub.f32 %v9755_v41, %v9846_v28  ;;  %v10008_v11 = vmul.f32 %v18773_v49, %v18773_v49 }
0x1ca1   : > { %v10007_v5 = vmul.f32 %v18775_v52, %v18775_v52 }
0x1ca4   : > { %v16200_v10 = vpop.f32.mrf.mxu0 }
0x1ca5   : > { %v16207_v45 = vpop.f32.mrf.mxu1 }
0x1ca6   : > { %v18777_v40 = vadd.f32 %v16207_v45, %v16200_v10  ;;  %v9923_v46 = vpop.f32.mrf.mxu0 }
0x1ca7   : > { %v9998_v50 = vpop.f32.mrf.mxu1 }
0x1ca8   : > { %v10010_v22 = vmul.f32 %v18777_v40, %v18777_v40  ;;  %v18783_v34 = vadd.f32 %v9998_v50, %v9923_v46 }
0x1caa   : > { %v10012_v36 = vadd.f32 %v10010_v22, %v10008_v11  ;;  %v10009_v47 = vmul.f32 %v18783_v34, %v18783_v34 }
0x1cac   : > { %16721 = vrsqrt.f32 %v10012_v36  ;;  %v10011_v38 = vadd.f32 %v10009_v47, %v10007_v5  ;;  %vm10022_vm2 = vcmp.eq.f32.partialorder %v10012_v36, inf  ;;  %v10025_v7 = vand.u32 2147483648, %v10012_v36 }
0x1cad   : > { %vm10024_vm5 = vcmp.eq.f32.partialorder %v10012_v36, 0.0 }
0x1cae   : > { %16723 = vrsqrt.f32 %v10011_v38  ;;  %vm10015_vm6 = vcmp.eq.f32.partialorder %v10011_v38, inf  ;;  %v10018_v39 = vand.u32 2147483648, %v10011_v38  ;;  %vm10017_vm7 = vcmp.eq.f32.partialorder %v10011_v38, 0.0 }
0x1cb9   : > { %v16722_v2 = vpop.eup %16721 }
0x1cba   : > { %v10021_v27 = vmul.f32 %v16722_v2, %v10012_v36 }
0x1cbb   : > { %v16724_v37 = vpop.eup %16723 }
0x1cbc   : > { %v10023_v32 = vsel %vm10022_vm2, %v10012_v36, %v10021_v27  ;;  %v10014_v25 = vmul.f32 %v16724_v37, %v10011_v38 }
0x1cbd   : > { %v10026_v18 = vsel %vm10024_vm5, %v10025_v7, %v10023_v32 }
0x1cbe   : > { %v10030_v19 = vsel %vm803_vm1, %v10026_v18, inf  ;;  %v10016_v48 = vsel %vm10015_vm6, %v10011_v38, %v10014_v25  ;;  %v10036_v28 = vsel %vm803_vm1, %v10026_v18, -inf  ;;  %v10050_v47 = vadd.f32 1e-09, %v10026_v18 }
0x1cbf   : > { %10031 = vmin.xlane.f32.xlu0 %v10030_v19  ;;  %v10019_v33 = vsel %vm10017_vm7, %v10018_v39, %v10016_v48 }
0x1cc0   : > { %v10033_v56 = vsel %vm803_vm1, %v10019_v33, -inf  ;;  %v10027_v41 = vsel %vm803_vm1, %v10019_v33, inf  ;;  %v10049_v11 = vadd.f32 1e-09, %v10019_v33 }
0x1cc1   : > { %10034 = vmax.xlane.f32.xlu1 %v10033_v56 }
0x1cc3   : > { %10028 = vmin.xlane.f32.xlu0 %v10027_v41 }
0x1cc7   : > { %10037 = vmax.xlane.f32.xlu0 %v10036_v28 }
0x1cd2   : > { %10146 = vrot.lane.b32.xlu1 %v17100_v21, %s16860_s30 }
0x1cd6   : > { %10500 = vrot.lane.b32.xlu1 %v17088_v15, %s16864_s13 }
0x1cda   : > { %10593 = vrot.lane.b32.xlu1 %v17092_v17, %s16861_s6 }
0x1cdd   : > { %10148 = vrot.lane.b32.xlu0 %v17098_v20, %s16860_s30 }
0x1cde   : > { %10591 = vrot.lane.b32.xlu1 %v17088_v15, %s16861_s6 }
0x1ce1   : > { %10502 = vrot.lane.b32.xlu0 %v17092_v17, %s16864_s13 }
0x1ce2   : > { %10397 = vrot.lane.b32.xlu1 %v9670_v3, %s16861_s6 }
0x1ce5   : > { %10496 = vrot.lane.b32.xlu0 %v17038_v61, %s16864_s13 }
0x1ce9   : > { %10498 = vrot.lane.b32.xlu0 %v17042_v63, %s16864_s13 }
0x1ced   : > { %10395 = vrot.lane.b32.xlu0 %v9665_v53, %s16861_s6 }
0x1d48   : > { %v10032_v10 = vpop.xlane.xlu0 %10031 }
0x1d49   : > { %v10040_v32 = vsub.f32 %v10026_v18, %v10032_v10 }
0x1d4a   : > { %v10035_v45 = vpop.xlane.xlu1 %10034 }
0x1d4c   : > { %v10029_v46 = vpop.xlane.xlu0 %10028 }
0x1d4d   : > { %v10041_v50 = vsub.f32 %v10035_v45, %v10029_v46  ;;  %v10039_v53 = vsub.f32 %v10019_v33, %v10029_v46 }
0x1d4e   : > { %v10147_v2 = vpop.permute.xlu1 %10146 }
0x1d4f   : > { %v10043_v22 = vadd.f32 1e-09, %v10041_v50  ;;  %v16797_v50 = vld [vmem:[%s17241_s10 + $0x58] sm:$0xff] }
0x1d50   : > { %v10038_v5 = vpop.xlane.xlu0 %10037 }
0x1d51   : > { %16725 = vrcp.f32 %v10043_v22  ;;  %v10042_v36 = vsub.f32 %v10038_v5, %v10032_v10  ;;  %v16796_v10 = vld [vmem:[%s17241_s10 + $0x60] sm:$0xff]  ;;  %v16798_v22 = vld [vmem:[%s17241_s10 + $0x50] sm:$0xff]  ;;  %v16799_v5 = vld [vmem:[%s17241_s10 + $0x48] sm:$0xff] }
0x1d52   : > { %16727 = vrcp.f32 %v10049_v11 }
0x1d53   : > { %v10044_v3 = vadd.f32 1e-09, %v10042_v36  ;;  %v16800_v36 = vld [vmem:[%s17241_s10 + $0x40] sm:$0xff] }
0x1d54   : > { %v10149_v38 = vpop.permute.xlu0 %10148 }
0x1d55   : > { %16729 = vrcp.f32 %v10044_v3  ;;  %16215 = vmatprep.subr.mxu1 %v10149_v38 }
0x1d56   : > { %16216 = vmatpush3.msra.mxu1 %v10149_v38  ;;  %16731 = vrcp.f32 %v10050_v47 }
0x1d57   : > { %16217 = vmatprep.subr.mxu1 %v10147_v2 }
0x1d58   : > { %16218 = vmatpush3.msra.mxu1 %v10147_v2  ;;  %v18819_v18 = vpop.permute.xlu0 %10502 }
0x1d59   : > { %16229 = vmatprep.subr.mxu1 %v10149_v38 }
0x1d5e   : > { %v16726_v27 = vpop.eup %16725 }
0x1d5f   : > { %v10046_v37 = vmul.f32 %v16726_v27, %v10039_v53  ;;  %v16728_v7 = vpop.eup %16727 }
0x1d61   : > { %v10052_v25 = vmul.f32 %v16728_v7, %v10046_v37 }
0x1d62   : > { %v16730_v39 = vpop.eup %16729 }
0x1d63   : > { %v10048_v19 = vmul.f32 %v16730_v39, %v10040_v32  ;;  %v10055_v48 = vmul.f32 %v10052_v25, %v18775_v52  ;;  %v10057_v56 = vmul.f32 %v10052_v25, %v18783_v34  ;;  %v16732_v41 = vpop.eup %16731  ;;  %v18824_v52 = vpop.permute.xlu1 %10500  ;;  %v16795_v34 = vld [vmem:[%s17241_s10 + $0x68] sm:$0xff] }
0x1d65   : > { %v10054_v28 = vmul.f32 %v16732_v41, %v10048_v19  ;;  %16212 = vmatprep.mubr.msk.f32.mxu0 %vm803_vm1, %v10055_v48  ;;  %16219 = vmatprep.mubr.msk.f32.mxu1 %vm803_vm1, %v10057_v56 }
0x1d67   : > { %v10056_v33 = vmul.f32 %v10054_v28, %v18773_v49  ;;  %v10058_v45 = vmul.f32 %v10054_v28, %v18777_v40  ;;  %v16793_v49 = vld [vmem:[%s17241_s10 + $0x78] sm:$0xff]  ;;  %v18840_v40 = vpop.permute.xlu1 %10593 }
0x1d69   : > { %16213 = vmatmul.mubr.msk.f32.vlgmr.msra.gmra.mxu0 %vm803_vm1, %v10056_v33  ;;  %16220 = vmatmul.mubr.msk.f32.vlgmr.msra.gmra.mxu1 %vm803_vm1, %v10058_v45 }
0x1d6a   : > { %16223 = vmatpush3.msra.mxu0 %v18746_v24  ;;  %16230 = vmatpush3.msra.mxu1 %v10149_v38  ;;  %v18833_v24 = vpop.permute.xlu0 %10496 }
0x1d6b   : > { %16224 = vmatprep.subr.mxu0 %v18754_v60  ;;  %16226 = vmatprep.mubr.msk.f32.mxu0 %vm803_vm1, %v10057_v56  ;;  %v18855_v11 = vpop.permute.xlu1 %10591 }
0x1d6c   : > { %16231 = vmatprep.subr.mxu1 %v10147_v2  ;;  %16233 = vmatprep.mubr.msk.f32.mxu1 %vm803_vm1, %v10055_v48 }
0x1d6d   : > { %16225 = vmatpush3.msra.mxu0 %v18754_v60  ;;  %16232 = vmatpush3.msra.mxu1 %v10147_v2  ;;  %v16794_v60 = vld [vmem:[%s17241_s10 + $0x70] sm:$0xff] }
0x1d6e   : > { %16236 = vmatprep.subr.mxu0 %v16793_v49  ;;  %16255 = vmatprep.subr.msk.mxu1 %vm803_vm1, %v18819_v18  ;;  %v18850_v46 = vpop.permute.xlu0 %10498 }
0x1d6f   : > { %16227 = vmatmul.mubr.msk.f32.vlgmr.msra.gmra.mxu0 %vm803_vm1, %v10058_v45  ;;  %16234 = vmatmul.mubr.msk.f32.vlgmr.msra.gmra.mxu1 %vm803_vm1, %v10056_v33  ;;  %v10398_v48 = vpop.permute.xlu1 %10397 }
0x1d70   : > { %16237 = vmatpush3.msra.mxu0 %v16793_v49  ;;  %16256 = vmatpush3.xpose.msk.msra.mxu1 %vm803_vm1, %v18819_v18 }
0x1d71   : > { %16238 = vmatprep.subr.mxu0 %v16794_v60  ;;  %16257 = vmatprep.subr.msk.mxu1 %vm803_vm1, %v18824_v52 }
0x1d72   : > { %16259 = vmatprep.mubr.msk.f32.mxu1 %vm803_vm1, %v18833_v24  ;;  %16239 = vmatpush3.msra.mxu0 %v16794_v60  ;;  %v10396_v56 = vpop.permute.xlu0 %10395 }
0x1d73   : > { %16240 = vmatprep.subr.mxu0 %v16795_v34 }
0x1d74   : > { %16241 = vmatpush3.msra.mxu0 %v16795_v34  ;;  %16258 = vmatpush3.xpose.msk.msra.mxu1 %vm803_vm1, %v18824_v52 }
0x1d75   : > { %16242 = vmatprep.subr.mxu0 %v16796_v10  ;;  %16262 = vmatprep.subr.msk.mxu1 %vm803_vm1, %v18840_v40 }
0x1d76   : > { %16243 = vmatpush3.msra.mxu0 %v16796_v10 }
0x1d77   : > { %16244 = vmatprep.subr.mxu0 %v16797_v50  ;;  %16260 = vmatmul.mubr.msk.f32.vlgmr.msra.gmra.mxu1 %vm803_vm1, %v18850_v46 }
0x1d78   : > { %16245 = vmatpush3.msra.mxu0 %v16797_v50  ;;  %16263 = vmatpush3.xpose.msk.msra.mxu1 %vm803_vm1, %v18840_v40 }
0x1d79   : > { %16246 = vmatprep.subr.mxu0 %v16798_v22  ;;  %16264 = vmatprep.subr.msk.mxu1 %vm803_vm1, %v18855_v11 }
0x1d7a   : > { %16247 = vmatpush3.msra.mxu0 %v16798_v22 }
0x1d7b   : > { %16248 = vmatprep.subr.mxu0 %v16799_v5 }
0x1d7c   : > { %16249 = vmatpush3.msra.mxu0 %v16799_v5  ;;  %16265 = vmatpush3.xpose.msk.msra.mxu1 %vm803_vm1, %v18855_v11 }
0x1d7d   : > { %16250 = vmatprep.subr.mxu0 %v16800_v36  ;;  %16276 = vmatprep.subr.msk.mxu1 %vm803_vm1, %v18840_v40 }
0x1d7e   : > { %16251 = vmatpush3.msra.mxu0 %v16800_v36 }
0x1d7f   : > { %16269 = vmatprep.subr.msk.mxu0 %vm803_vm1, %v18819_v18 }
0x1e29   : > { %v16214_v47 = vpop.f32.mrf.mxu0  ;;  %v16221_v3 = vpop.f32.mrf.mxu1 }
0x1e2a   : > { %v10234_v38 = vsub.f32 %v16214_v47, %v16221_v3 }
0x1e2b   : > { %v10137_v2 = vpop.f32.mrf.mxu0  ;;  %v10224_v53 = vpop.f32.mrf.mxu1 }
0x1e2c   : > { %v10233_v27 = vsub.f32 %v10137_v2, %v10224_v53  ;;  %10389 = vrot.lane.b32.xlu1 %v10234_v38, %s16862_s11 }
0x1e2e   : > { %10387 = vrot.lane.b32.xlu0 %v10233_v27, %s16862_s11 }
0x1e2f   : > { %v16228_v37 = vpop.f32.mrf.mxu0  ;;  %v16235_v7 = vpop.f32.mrf.mxu1 }
0x1e30   : > { %v10382_v32 = vadd.f32 %v16235_v7, %v16228_v37 }
0x1e31   : > { %v10301_v25 = vpop.f32.mrf.mxu0  ;;  %v10376_v39 = vpop.f32.mrf.mxu1 }
0x1e32   : > { %v10377_v19 = vadd.f32 %v10376_v39, %v10301_v25  ;;  %10405 = vrot.lane.b32.xlu1 %v10382_v32, %s16863_s12 }
0x1e34   : > { %10403 = vrot.lane.b32.xlu0 %v10377_v19, %s16863_s12 }
0x1e36   : > { %10589 = vrot.lane.b32.xlu1 %v17042_v63, %s16861_s6 }
0x1e37   : > { %v16261_v30 = vpop.f32.mrf.mxu1 }
0x1e38   : > { %10587 = vrot.lane.b32.xlu0 %v17038_v61, %s16861_s6 }
0x1e39   : > { %v10578_v35 = vpop.f32.mrf.mxu1 }
0x1e3a   : > { %10884 = vrot.lane.b32.xlu1 %v17098_v20, %s16864_s13 }
0x1e3e   : > { %10882 = vrot.lane.b32.xlu1 %v17100_v21, %s16864_s13 }
0x1e9e   : > { %v10390_v41 = vpop.permute.xlu1 %10389 }
0x1e9f   : > { %v10410_v45 = vsel %vm803_vm1, %v9522_v23, %v10390_v41 }
0x1ea0   : > { %v10388_v28 = vpop.permute.xlu0 %10387  ;;  %v10412_v10 = vsel %vm2246_vm10, %v10410_v45, %v10398_v48 }
0x1ea1   : > { %v10409_v33 = vsel %vm803_vm1, %v9521_v51, %v10388_v28 }
0x1ea2   : > { %v10411_v60 = vsel %vm2246_vm10, %v10409_v33, %v10396_v56 }
0x1ea4   : > { %v10406_v49 = vpop.permute.xlu1 %10405 }
0x1ea5   : > { %v10414_v22 = vsel %vm2249_vm11, %v10412_v10, %v10406_v49 }
0x1ea6   : > { %v10404_v34 = vpop.permute.xlu0 %10403 }
0x1ea7   : > { %v10413_v50 = vsel %vm2249_vm11, %v10411_v60, %v10404_v34 }
0x1ea8   : > { %v10590_v5 = vpop.permute.xlu1 %10589  ;;  %16252 = vmatprep.mubr.msk.f32.mxu0 %vm338_vm0, %v10413_v50 }
0x1ea9   : > { %16253 = vmatmul.mubr.msk.f32.vlgmr.msra.gmra.mxu0 %vm338_vm0, %v10414_v22 }
0x1eaa   : > { %16270 = vmatpush3.xpose.msk.msra.mxu0 %vm803_vm1, %v18819_v18  ;;  %v10588_v29 = vpop.permute.xlu0 %10587 }
0x1eab   : > { %16271 = vmatprep.subr.msk.mxu0 %vm803_vm1, %v18824_v52  ;;  %16266 = vmatprep.mubr.msk.f32.mxu1 %vm803_vm1, %v10588_v29 }
0x1eac   : > { %16273 = vmatprep.mubr.msk.f32.mxu0 %vm803_vm1, %v10588_v29  ;;  %v18902_v12 = vpop.permute.xlu1 %10884  ;;  %16267 = vmatmul.mubr.msk.f32.vlgmr.msra.gmra.mxu1 %vm803_vm1, %v10590_v5 }
0x1ead   : > { %16277 = vmatpush3.xpose.msk.msra.mxu1 %vm803_vm1, %v18840_v40  ;;  %16280 = vmatprep.mubr.msk.f32.mxu1 %vm803_vm1, %v18833_v24 }
0x1eae   : > { %16272 = vmatpush3.xpose.msk.msra.mxu0 %vm803_vm1, %v18824_v52  ;;  %16278 = vmatprep.subr.msk.mxu1 %vm803_vm1, %v18855_v11 }
0x1eaf   : > { %16283 = vmatprep.subr.mxu0 %v18902_v12 }
0x1eb0   : > { %v18914_v23 = vpop.permute.xlu1 %10882 }
0x1eb1   : > { %16274 = vmatmul.mubr.msk.f32.vlgmr.msra.gmra.mxu0 %vm803_vm1, %v10590_v5  ;;  %16279 = vmatpush3.xpose.msk.msra.mxu1 %vm803_vm1, %v18855_v11 }
0x1eb2   : > { %16284 = vmatpush3.msra.mxu0 %v18902_v12 }
0x1eb3   : > { %16285 = vmatprep.subr.mxu0 %v18914_v23 }
0x1eb4   : > { %16281 = vmatmul.mubr.msk.f32.vlgmr.msra.gmra.mxu1 %vm803_vm1, %v18850_v46  ;;  %16286 = vmatpush3.msra.mxu0 %v18914_v23 }
0x1eb5   : > { %16297 = vmatprep.subr.mxu0 %v18902_v12 }
0x1f69   : > { %v18925_v51 = vpop.f32.mrf.mxu0 }
0x1f6b   : > { %v18927_v52 = vpop.f32.mrf.mxu0 }
0x1f6c   : > { %v16268_v18 = vpop.f32.mrf.mxu1 }
0x1f6d   : > { %v18929_v11 = vsub.f32 %v16261_v30, %v16268_v18 }
0x1f6e   : > { %v10669_v24 = vpop.f32.mrf.mxu1 }
0x1f6f   : > { %v18931_v47 = vsub.f32 %v10578_v35, %v10669_v24  ;;  %v10831_v2 = vmul.f32 %v18929_v11, %v18929_v11 }
0x1f71   : > { %v16275_v40 = vpop.f32.mrf.mxu0  ;;  %v10830_v37 = vmul.f32 %v18931_v47, %v18931_v47 }
0x1f73   : > { %v10746_v46 = vpop.f32.mrf.mxu0 }
0x1f74   : > { %v16282_v36 = vpop.f32.mrf.mxu1 }
0x1f75   : > { %v18933_v3 = vadd.f32 %v16282_v36, %v16275_v40 }
0x1f76   : > { %v10821_v38 = vpop.f32.mrf.mxu1 }
0x1f77   : > { %v10833_v53 = vmul.f32 %v18933_v3, %v18933_v3  ;;  %v18939_v27 = vadd.f32 %v10821_v38, %v10746_v46 }
0x1f79   : > { %v10835_v7 = vadd.f32 %v10833_v53, %v10831_v2  ;;  %v10832_v32 = vmul.f32 %v18939_v27, %v18939_v27 }
0x1f7b   : > { %16733 = vrsqrt.f32 %v10835_v7  ;;  %v10834_v25 = vadd.f32 %v10832_v32, %v10830_v37  ;;  %vm10845_vm8 = vcmp.eq.f32.partialorder %v10835_v7, inf  ;;  %v10848_v56 = vand.u32 2147483648, %v10835_v7 }
0x1f7c   : > { %vm10847_vm9 = vcmp.eq.f32.partialorder %v10835_v7, 0.0 }
0x1f7d   : > { %16735 = vrsqrt.f32 %v10834_v25  ;;  %vm10838_vm13 = vcmp.eq.f32.partialorder %v10834_v25, inf  ;;  %v10841_v45 = vand.u32 2147483648, %v10834_v25  ;;  %vm10840_vm14 = vcmp.eq.f32.partialorder %v10834_v25, 0.0 }
0x1f88   : > { %v16734_v39 = vpop.eup %16733 }
0x1f89   : > { %v10844_v19 = vmul.f32 %v16734_v39, %v10835_v7 }
0x1f8a   : > { %v16736_v48 = vpop.eup %16735 }
0x1f8b   : > { %v10846_v41 = vsel %vm10845_vm8, %v10835_v7, %v10844_v19  ;;  %v10837_v28 = vmul.f32 %v16736_v48, %v10834_v25 }
0x1f8c   : > { %v10849_v33 = vsel %vm10847_vm9, %v10848_v56, %v10846_v41 }
0x1f8d   : > { %v10853_v49 = vsel %vm803_vm1, %v10849_v33, inf  ;;  %v10839_v60 = vsel %vm10838_vm13, %v10834_v25, %v10837_v28  ;;  %v10859_v22 = vsel %vm803_vm1, %v10849_v33, -inf  ;;  %v10873_v40 = vadd.f32 1e-09, %v10849_v33 }
0x1f8e   : > { %10854 = vmin.xlane.f32.xlu0 %v10853_v49  ;;  %v10842_v34 = vsel %vm10840_vm14, %v10841_v45, %v10839_v60 }
0x1f8f   : > { %v10856_v10 = vsel %vm803_vm1, %v10842_v34, -inf  ;;  %v10850_v50 = vsel %vm803_vm1, %v10842_v34, inf  ;;  %v10872_v35 = vadd.f32 1e-09, %v10842_v34 }
0x1f90   : > { %10857 = vmax.xlane.f32.xlu1 %v10856_v10 }
0x1f92   : > { %10851 = vmin.xlane.f32.xlu0 %v10850_v50 }
0x1f96   : > { %10860 = vmax.xlane.f32.xlu0 %v10859_v22 }
0x1fa1   : > { %10969 = vrot.lane.b32.xlu1 %v17100_v21, %s16861_s6 }
0x1fa5   : > { %11305 = vrot.lane.b32.xlu1 %v17092_v17, %s16862_s11 }
0x1fa9   : > { %11303 = vrot.lane.b32.xlu1 %v17088_v15, %s16862_s11 }
0x1fac   : > { %10971 = vrot.lane.b32.xlu0 %v17098_v20, %s16861_s6 }
0x1fad   : > { %11299 = vrot.lane.b32.xlu1 %v17038_v61, %s16862_s11 }
0x1fb0   : > { %11214 = vrot.lane.b32.xlu0 %v17092_v17, %s16863_s12 }
0x1fb1   : > { %11301 = vrot.lane.b32.xlu1 %v17042_v63, %s16862_s11 }
0x1fb4   : > { %11212 = vrot.lane.b32.xlu0 %v17088_v15, %s16863_s12 }
0x1fb5   : > { %11596 = vrot.lane.b32.xlu1 %v17098_v20, %s16863_s12 }
0x1fb8   : > { %11208 = vrot.lane.b32.xlu0 %v17038_v61, %s16863_s12 }
0x1fb9   : > { %11594 = vrot.lane.b32.xlu1 %v17100_v21, %s16863_s12 }
0x1fbc   : > { %11210 = vrot.lane.b32.xlu0 %v17042_v63, %s16863_s12 }
0x2017   : > { %v10855_v5 = vpop.xlane.xlu0 %10854 }
0x2018   : > { %v10863_v37 = vsub.f32 %v10849_v33, %v10855_v5 }
0x2019   : > { %v10858_v17 = vpop.xlane.xlu1 %10857 }
0x201b   : > { %v10852_v29 = vpop.xlane.xlu0 %10851 }
0x201c   : > { %v10864_v30 = vsub.f32 %v10858_v17, %v10852_v29  ;;  %v10862_v63 = vsub.f32 %v10842_v34, %v10852_v29 }
0x201d   : > { %v10970_v61 = vpop.permute.xlu1 %10969 }
0x201e   : > { %v10866_v18 = vadd.f32 1e-09, %v10864_v30 }
0x201f   : > { %v10861_v24 = vpop.xlane.xlu0 %10860 }
0x2020   : > { %16737 = vrcp.f32 %v10866_v18  ;;  %v10865_v15 = vsub.f32 %v10861_v24, %v10855_v5 }
0x2021   : > { %16739 = vrcp.f32 %v10872_v35  ;;  %v11306_v25 = vpop.permute.xlu1 %11305 }
0x2022   : > { %v10867_v36 = vadd.f32 1e-09, %v10865_v15 }
0x2023   : > { %v10972_v46 = vpop.permute.xlu0 %10971 }
0x2024   : > { %16741 = vrcp.f32 %v10867_v36  ;;  %16290 = vmatprep.subr.mxu1 %v10972_v46 }
0x2025   : > { %16291 = vmatpush3.msra.mxu1 %v10972_v46  ;;  %16743 = vrcp.f32 %v10873_v40  ;;  %v11304_v33 = vpop.permute.xlu1 %11303 }
0x2026   : > { %16292 = vmatprep.subr.mxu1 %v10970_v61 }
0x2027   : > { %16293 = vmatpush3.msra.mxu1 %v10970_v61  ;;  %v11215_v41 = vpop.permute.xlu0 %11214 }
0x2028   : > { %16304 = vmatprep.subr.mxu1 %v10972_v46 }
0x202b   : > { %v11213_v60 = vpop.permute.xlu0 %11212 }
0x202d   : > { %v16738_v38 = vpop.eup %16737 }
0x202e   : > { %v10869_v2 = vmul.f32 %v16738_v38, %v10862_v63  ;;  %v16740_v53 = vpop.eup %16739 }
0x2030   : > { %v10875_v7 = vmul.f32 %v16740_v53, %v10869_v2 }
0x2031   : > { %v16742_v32 = vpop.eup %16741 }
0x2032   : > { %v10871_v39 = vmul.f32 %v16742_v32, %v10863_v37  ;;  %v10878_v19 = vmul.f32 %v10875_v7, %v18931_v47  ;;  %v10880_v48 = vmul.f32 %v10875_v7, %v18939_v27  ;;  %v16744_v56 = vpop.eup %16743 }
0x2034   : > { %v10877_v28 = vmul.f32 %v16744_v56, %v10871_v39  ;;  %16287 = vmatprep.mubr.msk.f32.mxu0 %vm803_vm1, %v10878_v19  ;;  %16294 = vmatprep.mubr.msk.f32.mxu1 %vm803_vm1, %v10880_v48 }
0x2036   : > { %v10879_v45 = vmul.f32 %v10877_v28, %v18929_v11  ;;  %v10881_v49 = vmul.f32 %v10877_v28, %v18933_v3  ;;  %v11300_v11 = vpop.permute.xlu1 %11299 }
0x2038   : > { %16288 = vmatmul.mubr.msk.f32.vlgmr.msra.gmra.mxu0 %vm803_vm1, %v10879_v45  ;;  %16295 = vmatmul.mubr.msk.f32.vlgmr.msra.gmra.mxu1 %vm803_vm1, %v10881_v49 }
0x2039   : > { %16298 = vmatpush3.msra.mxu0 %v18902_v12  ;;  %16305 = vmatpush3.msra.mxu1 %v10972_v46  ;;  %v11209_v12 = vpop.permute.xlu0 %11208 }
0x203a   : > { %16299 = vmatprep.subr.mxu0 %v18914_v23  ;;  %16301 = vmatprep.mubr.msk.f32.mxu0 %vm803_vm1, %v10880_v48 }
0x203b   : > { %16306 = vmatprep.subr.mxu1 %v10970_v61  ;;  %16308 = vmatprep.mubr.msk.f32.mxu1 %vm803_vm1, %v10878_v19 }
0x203c   : > { %16300 = vmatpush3.msra.mxu0 %v18914_v23  ;;  %16307 = vmatpush3.msra.mxu1 %v10970_v61  ;;  %v11302_v23 = vpop.permute.xlu1 %11301 }
0x203d   : > { %16311 = vmatprep.subr.msk.mxu0 %vm803_vm1, %v11215_v41  ;;  %16318 = vmatprep.subr.msk.mxu1 %vm803_vm1, %v11306_v25  ;;  %v11211_v47 = vpop.permute.xlu0 %11210 }
0x203e   : > { %16302 = vmatmul.mubr.msk.f32.vlgmr.msra.gmra.mxu0 %vm803_vm1, %v10881_v49  ;;  %16309 = vmatmul.mubr.msk.f32.vlgmr.msra.gmra.mxu1 %vm803_vm1, %v10879_v45 }
0x203f   : > { %16312 = vmatpush3.xpose.msk.msra.mxu0 %vm803_vm1, %v11215_v41  ;;  %16319 = vmatpush3.xpose.msk.msra.mxu1 %vm803_vm1, %v11306_v25 }
0x2040   : > { %16313 = vmatprep.subr.msk.mxu0 %vm803_vm1, %v11213_v60  ;;  %16315 = vmatprep.mubr.msk.f32.mxu0 %vm803_vm1, %v11209_v12  ;;  %v19006_v3 = vpop.permute.xlu1 %11596 }
0x2041   : > { %16320 = vmatprep.subr.msk.mxu1 %vm803_vm1, %v11304_v33  ;;  %16322 = vmatprep.mubr.msk.f32.mxu1 %vm803_vm1, %v11300_v11 }
0x2043   : > { %16314 = vmatpush3.xpose.msk.msra.mxu0 %vm803_vm1, %v11213_v60  ;;  %16321 = vmatpush3.xpose.msk.msra.mxu1 %vm803_vm1, %v11304_v33 }
0x2044   : > { %16325 = vmatprep.subr.msk.mxu0 %vm803_vm1, %v11215_v41  ;;  %16332 = vmatprep.subr.msk.mxu1 %vm803_vm1, %v11306_v25  ;;  %v19014_v27 = vpop.permute.xlu1 %11594 }
0x2046   : > { %16316 = vmatmul.mubr.msk.f32.vlgmr.msra.gmra.mxu0 %vm803_vm1, %v11211_v47  ;;  %16323 = vmatmul.mubr.msk.f32.vlgmr.msra.gmra.mxu1 %vm803_vm1, %v11302_v23 }
0x2047   : > { %16326 = vmatpush3.xpose.msk.msra.mxu0 %vm803_vm1, %v11215_v41  ;;  %16329 = vmatprep.mubr.msk.f32.mxu0 %vm803_vm1, %v11300_v11 }
0x2048   : > { %16333 = vmatpush3.xpose.msk.msra.mxu1 %vm803_vm1, %v11306_v25  ;;  %16336 = vmatprep.mubr.msk.f32.mxu1 %vm803_vm1, %v11209_v12 }
0x2049   : > { %16327 = vmatprep.subr.msk.mxu0 %vm803_vm1, %v11213_v60  ;;  %16334 = vmatprep.subr.msk.mxu1 %vm803_vm1, %v11304_v33 }
0x204b   : > { %16328 = vmatpush3.xpose.msk.msra.mxu0 %vm803_vm1, %v11213_v60 }
0x204c   : > { %16335 = vmatpush3.xpose.msk.msra.mxu1 %vm803_vm1, %v11304_v33  ;;  %16339 = vmatprep.subr.mxu0 %v19006_v3 }
0x204e   : > { %16330 = vmatmul.mubr.msk.f32.vlgmr.msra.gmra.mxu0 %vm803_vm1, %v11302_v23 }
0x204f   : > { %16337 = vmatmul.mubr.msk.f32.vlgmr.msra.gmra.mxu1 %vm803_vm1, %v11211_v47  ;;  %16340 = vmatpush3.msra.mxu0 %v19006_v3 }
0x2050   : > { %16341 = vmatprep.subr.mxu0 %v19014_v27 }
0x2051   : > { %16342 = vmatpush3.msra.mxu0 %v19014_v27 }
0x2052   : > { %16353 = vmatprep.subr.mxu0 %v19006_v3 }
0x20f8   : > { %v19021_v34 = vpop.f32.mrf.mxu0  ;;  %v19023_v10 = vpop.f32.mrf.mxu1 }
0x20f9   : > { %v11057_v50 = vsub.f32 %v19021_v34, %v19023_v10 }
0x20fa   : > { %v19027_v22 = vpop.f32.mrf.mxu0  ;;  %v19029_v5 = vpop.f32.mrf.mxu1 }
0x20fb   : > { %v11056_v17 = vsub.f32 %v19027_v22, %v19029_v5 }
0x20fe   : > { %v16303_v29 = vpop.f32.mrf.mxu0  ;;  %v16310_v30 = vpop.f32.mrf.mxu1 }
0x20ff   : > { %v11205_v35 = vadd.f32 %v16310_v30, %v16303_v29 }
0x2100   : > { %v11124_v18 = vpop.f32.mrf.mxu0  ;;  %v11199_v24 = vpop.f32.mrf.mxu1 }
0x2101   : > { %v11200_v15 = vadd.f32 %v11199_v24, %v11124_v18 }
0x2106   : > { %v16317_v40 = vpop.f32.mrf.mxu0  ;;  %v16324_v36 = vpop.f32.mrf.mxu1 }
0x2107   : > { %v19033_v63 = vsub.f32 %v16317_v40, %v16324_v36 }
0x2108   : > { %v11290_v46 = vpop.f32.mrf.mxu0  ;;  %v11381_v61 = vpop.f32.mrf.mxu1 }
0x2109   : > { %v19035_v53 = vsub.f32 %v11290_v46, %v11381_v61  ;;  %v11543_v25 = vmul.f32 %v19033_v63, %v19033_v63 }
0x210b   : > { %v11542_v48 = vmul.f32 %v19035_v53, %v19035_v53 }
0x210e   : > { %v16331_v38 = vpop.f32.mrf.mxu0 }
0x210f   : > { %v16338_v2 = vpop.f32.mrf.mxu1 }
0x2110   : > { %v19037_v37 = vadd.f32 %v16338_v2, %v16331_v38  ;;  %v11458_v7 = vpop.f32.mrf.mxu0 }
0x2111   : > { %v11533_v32 = vpop.f32.mrf.mxu1 }
0x2112   : > { %v11545_v39 = vmul.f32 %v19037_v37, %v19037_v37  ;;  %v19043_v19 = vadd.f32 %v11533_v32, %v11458_v7 }
0x2114   : > { %v11547_v56 = vadd.f32 %v11545_v39, %v11543_v25  ;;  %v11544_v41 = vmul.f32 %v19043_v19, %v19043_v19 }
0x2116   : > { %16745 = vrsqrt.f32 %v11547_v56  ;;  %v11546_v28 = vadd.f32 %v11544_v41, %v11542_v48  ;;  %vm11557_vm15 = vcmp.eq.f32.partialorder %v11547_v56, inf  ;;  %v11560_v60 = vand.u32 2147483648, %v11547_v56 }
0x2117   : > { %vm11559_vm2 = vcmp.eq.f32.partialorder %v11547_v56, 0.0 }
0x2118   : > { %16747 = vrsqrt.f32 %v11546_v28  ;;  %vm11550_vm5 = vcmp.eq.f32.partialorder %v11546_v28, inf  ;;  %v11553_v47 = vand.u32 2147483648, %v11546_v28  ;;  %vm11552_vm6 = vcmp.eq.f32.partialorder %v11546_v28, 0.0 }
0x2123   : > { %v16746_v45 = vpop.eup %16745 }
0x2124   : > { %v11556_v49 = vmul.f32 %v16746_v45, %v11547_v56 }
0x2125   : > { %v16748_v33 = vpop.eup %16747 }
0x2126   : > { %v11558_v11 = vsel %vm11557_vm15, %v11547_v56, %v11556_v49  ;;  %v11549_v12 = vmul.f32 %v16748_v33, %v11546_v28 }
0x2127   : > { %v11561_v23 = vsel %vm11559_vm2, %v11560_v60, %v11558_v11 }
0x2128   : > { %v11565_v29 = vsel %vm803_vm1, %v11561_v23, inf  ;;  %v11551_v30 = vsel %vm11550_vm5, %v11546_v28, %v11549_v12  ;;  %v11571_v36 = vsel %vm803_vm1, %v11561_v23, -inf  ;;  %v11585_v25 = vadd.f32 1e-09, %v11561_v23 }
0x2129   : > { %11566 = vmin.xlane.f32.xlu0 %v11565_v29  ;;  %v11554_v18 = vsel %vm11552_vm6, %v11553_v47, %v11551_v30 }
0x212a   : > { %v11568_v24 = vsel %vm803_vm1, %v11554_v18, -inf  ;;  %v11562_v40 = vsel %vm803_vm1, %v11554_v18, inf  ;;  %v11584_v38 = vadd.f32 1e-09, %v11554_v18 }
0x212b   : > { %11569 = vmax.xlane.f32.xlu1 %v11568_v24  ;;  %v16804_v24 = vld [vmem:[%s17241_s10 + $0xa0] sm:$0xff] }
0x212d   : > { %11563 = vmin.xlane.f32.xlu0 %v11562_v40 }
0x2131   : > { %11572 = vmax.xlane.f32.xlu0 %v11571_v36  ;;  %v16805_v36 = vld [vmem:[%s17241_s10 + $0x98] sm:$0xff] }
0x213c   : > { %11681 = vrot.lane.b32.xlu1 %v17100_v21, %s16862_s11 }
0x2140   : > { %12035 = vrot.lane.b32.xlu1 %v17040_v62, %s16864_s13 }
0x2144   : > { %12128 = vrot.lane.b32.xlu1 %v17044_v1, %s16861_s6 }
0x2147   : > { %11683 = vrot.lane.b32.xlu0 %v17098_v20, %s16862_s11 }
0x2148   : > { %12126 = vrot.lane.b32.xlu1 %v17040_v62, %s16861_s6 }
0x214b   : > { %12037 = vrot.lane.b32.xlu0 %v17044_v1, %s16864_s13 }
0x214c   : > { %11932 = vrot.lane.b32.xlu1 %v11205_v35, %s16861_s6 }
0x214f   : > { %12031 = vrot.lane.b32.xlu0 %v17086_v14, %s16864_s13 }
0x2153   : > { %12033 = vrot.lane.b32.xlu0 %v17090_v16, %s16864_s13 }
0x2157   : > { %11930 = vrot.lane.b32.xlu0 %v11200_v15, %s16861_s6 }
0x21b2   : > { %v11567_v21 = vpop.xlane.xlu0 %11566 }
0x21b3   : > { %v11575_v45 = vsub.f32 %v11561_v23, %v11567_v21 }
0x21b4   : > { %v11570_v46 = vpop.xlane.xlu1 %11569 }
0x21b6   : > { %v11564_v61 = vpop.xlane.xlu0 %11563 }
0x21b7   : > { %v11576_v20 = vsub.f32 %v11570_v46, %v11564_v61  ;;  %v11574_v15 = vsub.f32 %v11554_v18, %v11564_v61  ;;  %v16806_v46 = vld [vmem:[%s17241_s10 + $0x90] sm:$0xff]  ;;  %v16807_v61 = vld [vmem:[%s17241_s10 + $0x88] sm:$0xff] }
0x21b8   : > { %v11682_v48 = vpop.permute.xlu1 %11681 }
0x21b9   : > { %v11578_v2 = vadd.f32 1e-09, %v11576_v20  ;;  %v16808_v20 = vld [vmem:[%s17241_s10 + $0x80] sm:$0xff] }
0x21ba   : > { %v11573_v7 = vpop.xlane.xlu0 %11572 }
0x21bb   : > { %16749 = vrcp.f32 %v11578_v2  ;;  %v11577_v32 = vsub.f32 %v11573_v7, %v11567_v21 }
0x21bc   : > { %16751 = vrcp.f32 %v11584_v38 }
0x21bd   : > { %v11579_v35 = vadd.f32 1e-09, %v11577_v32 }
0x21be   : > { %v11684_v39 = vpop.permute.xlu0 %11683 }
0x21bf   : > { %16753 = vrcp.f32 %v11579_v35  ;;  %16346 = vmatprep.subr.mxu1 %v11684_v39 }
0x21c0   : > { %16347 = vmatpush3.msra.mxu1 %v11684_v39  ;;  %16755 = vrcp.f32 %v11585_v25 }
0x21c1   : > { %16348 = vmatprep.subr.mxu1 %v11682_v48 }
0x21c2   : > { %16349 = vmatpush3.msra.mxu1 %v11682_v48  ;;  %v19079_v23 = vpop.permute.xlu0 %12037 }
0x21c3   : > { %16360 = vmatprep.subr.mxu1 %v11684_v39 }
0x21c8   : > { %v16750_v56 = vpop.eup %16749 }
0x21c9   : > { %v11581_v41 = vmul.f32 %v16750_v56, %v11574_v15  ;;  %v16752_v28 = vpop.eup %16751 }
0x21cb   : > { %v11587_v49 = vmul.f32 %v16752_v28, %v11581_v41 }
0x21cc   : > { %v16754_v33 = vpop.eup %16753 }
0x21cd   : > { %v11583_v60 = vmul.f32 %v16754_v33, %v11575_v45  ;;  %v11590_v11 = vmul.f32 %v11587_v49, %v19035_v53  ;;  %v11592_v12 = vmul.f32 %v11587_v49, %v19043_v19  ;;  %v16756_v47 = vpop.eup %16755  ;;  %v19084_v53 = vpop.permute.xlu1 %12035  ;;  %v16803_v19 = vld [vmem:[%s17241_s10 + $0xa8] sm:$0xff] }
0x21cf   : > { %v11589_v29 = vmul.f32 %v16756_v47, %v11583_v60  ;;  %16343 = vmatprep.mubr.msk.f32.mxu0 %vm803_vm1, %v11590_v11  ;;  %16350 = vmatprep.mubr.msk.f32.mxu1 %vm803_vm1, %v11592_v12 }
0x21d1   : > { %v11591_v30 = vmul.f32 %v11589_v29, %v19033_v63  ;;  %v11593_v18 = vmul.f32 %v11589_v29, %v19037_v37  ;;  %v16801_v63 = vld [vmem:[%s17241_s10 + $0xb8] sm:$0xff]  ;;  %v19100_v37 = vpop.permute.xlu1 %12128 }
0x21d3   : > { %16344 = vmatmul.mubr.msk.f32.vlgmr.msra.gmra.mxu0 %vm803_vm1, %v11591_v30  ;;  %16351 = vmatmul.mubr.msk.f32.vlgmr.msra.gmra.mxu1 %vm803_vm1, %v11593_v18 }
0x21d4   : > { %16354 = vmatpush3.msra.mxu0 %v19006_v3  ;;  %16361 = vmatpush3.msra.mxu1 %v11684_v39  ;;  %v19093_v3 = vpop.permute.xlu0 %12031 }
0x21d5   : > { %16355 = vmatprep.subr.mxu0 %v19014_v27  ;;  %16357 = vmatprep.mubr.msk.f32.mxu0 %vm803_vm1, %v11592_v12  ;;  %v19115_v21 = vpop.permute.xlu1 %12126 }
0x21d6   : > { %16362 = vmatprep.subr.mxu1 %v11682_v48  ;;  %16364 = vmatprep.mubr.msk.f32.mxu1 %vm803_vm1, %v11590_v11 }
0x21d7   : > { %16356 = vmatpush3.msra.mxu0 %v19014_v27  ;;  %16363 = vmatpush3.msra.mxu1 %v11682_v48  ;;  %v16802_v27 = vld [vmem:[%s17241_s10 + $0xb0] sm:$0xff] }
0x21d8   : > { %16367 = vmatprep.subr.mxu0 %v16801_v63  ;;  %16386 = vmatprep.subr.msk.mxu1 %vm803_vm1, %v19079_v23  ;;  %v19110_v40 = vpop.permute.xlu0 %12033 }
0x21d9   : > { %16358 = vmatmul.mubr.msk.f32.vlgmr.msra.gmra.mxu0 %vm803_vm1, %v11593_v18  ;;  %16365 = vmatmul.mubr.msk.f32.vlgmr.msra.gmra.mxu1 %vm803_vm1, %v11591_v30  ;;  %v11933_v45 = vpop.permute.xlu1 %11932 }
0x21da   : > { %16368 = vmatpush3.msra.mxu0 %v16801_v63  ;;  %16387 = vmatpush3.xpose.msk.msra.mxu1 %vm803_vm1, %v19079_v23 }
0x21db   : > { %16369 = vmatprep.subr.mxu0 %v16802_v27  ;;  %16388 = vmatprep.subr.msk.mxu1 %vm803_vm1, %v19084_v53 }
0x21dc   : > { %16390 = vmatprep.mubr.msk.f32.mxu1 %vm803_vm1, %v19093_v3  ;;  %16370 = vmatpush3.msra.mxu0 %v16802_v27  ;;  %v11931_v49 = vpop.permute.xlu0 %11930 }
0x21dd   : > { %16371 = vmatprep.subr.mxu0 %v16803_v19 }
0x21de   : > { %16372 = vmatpush3.msra.mxu0 %v16803_v19  ;;  %16389 = vmatpush3.xpose.msk.msra.mxu1 %vm803_vm1, %v19084_v53 }
0x21df   : > { %16373 = vmatprep.subr.mxu0 %v16804_v24  ;;  %16393 = vmatprep.subr.msk.mxu1 %vm803_vm1, %v19100_v37 }
0x21e0   : > { %16374 = vmatpush3.msra.mxu0 %v16804_v24 }
0x21e1   : > { %16375 = vmatprep.subr.mxu0 %v16805_v36  ;;  %16391 = vmatmul.mubr.msk.f32.vlgmr.msra.gmra.mxu1 %vm803_vm1, %v19110_v40 }
0x21e2   : > { %16376 = vmatpush3.msra.mxu0 %v16805_v36  ;;  %16394 = vmatpush3.xpose.msk.msra.mxu1 %vm803_vm1, %v19100_v37 }
0x21e3   : > { %16377 = vmatprep.subr.mxu0 %v16806_v46  ;;  %16395 = vmatprep.subr.msk.mxu1 %vm803_vm1, %v19115_v21 }
0x21e4   : > { %16378 = vmatpush3.msra.mxu0 %v16806_v46 }
0x21e5   : > { %16379 = vmatprep.subr.mxu0 %v16807_v61 }
0x21e6   : > { %16380 = vmatpush3.msra.mxu0 %v16807_v61  ;;  %16396 = vmatpush3.xpose.msk.msra.mxu1 %vm803_vm1, %v19115_v21 }
0x21e7   : > { %16381 = vmatprep.subr.mxu0 %v16808_v20  ;;  %16407 = vmatprep.subr.msk.mxu1 %vm803_vm1, %v19100_v37 }
0x21e8   : > { %16382 = vmatpush3.msra.mxu0 %v16808_v20 }
0x21e9   : > { %16400 = vmatprep.subr.msk.mxu0 %vm803_vm1, %v19079_v23 }
0x2293   : > { %v16345_v38 = vpop.f32.mrf.mxu0  ;;  %v16352_v2 = vpop.f32.mrf.mxu1 }
0x2294   : > { %v11769_v7 = vsub.f32 %v16345_v38, %v16352_v2 }
0x2295   : > { %v11672_v32 = vpop.f32.mrf.mxu0  ;;  %v11759_v25 = vpop.f32.mrf.mxu1 }
0x2296   : > { %v11768_v35 = vsub.f32 %v11672_v32, %v11759_v25  ;;  %11924 = vrot.lane.b32.xlu1 %v11769_v7, %s16862_s11 }
0x2298   : > { %11922 = vrot.lane.b32.xlu0 %v11768_v35, %s16862_s11 }
0x2299   : > { %v16359_v39 = vpop.f32.mrf.mxu0  ;;  %v16366_v48 = vpop.f32.mrf.mxu1 }
0x229a   : > { %v11917_v15 = vadd.f32 %v16366_v48, %v16359_v39 }
0x229b   : > { %v11836_v56 = vpop.f32.mrf.mxu0  ;;  %v11911_v41 = vpop.f32.mrf.mxu1 }
0x229c   : > { %v11912_v28 = vadd.f32 %v11911_v41, %v11836_v56  ;;  %11940 = vrot.lane.b32.xlu1 %v11917_v15, %s16863_s12 }
0x229e   : > { %11938 = vrot.lane.b32.xlu0 %v11912_v28, %s16863_s12 }
0x22a0   : > { %12124 = vrot.lane.b32.xlu1 %v17090_v16, %s16861_s6 }
0x22a1   : > { %v16392_v22 = vpop.f32.mrf.mxu1 }
0x22a2   : > { %12122 = vrot.lane.b32.xlu0 %v17086_v14, %s16861_s6 }
0x22a3   : > { %v12113_v5 = vpop.f32.mrf.mxu1 }
0x22a4   : > { %12419 = vrot.lane.b32.xlu1 %v17074_v8, %s16864_s13 }
0x22a8   : > { %12417 = vrot.lane.b32.xlu1 %v17076_v9, %s16864_s13 }
0x2308   : > { %v11925_v33 = vpop.permute.xlu1 %11924 }
0x2309   : > { %v11945_v12 = vsel %vm803_vm1, %v11057_v50, %v11925_v33 }
0x230a   : > { %v11923_v60 = vpop.permute.xlu0 %11922  ;;  %v11947_v18 = vsel %vm2246_vm10, %v11945_v12, %v11933_v45 }
0x230b   : > { %v11944_v11 = vsel %vm803_vm1, %v11056_v17, %v11923_v60 }
0x230c   : > { %v11946_v29 = vsel %vm2246_vm10, %v11944_v11, %v11931_v49 }
0x230e   : > { %v11941_v47 = vpop.permute.xlu1 %11940 }
0x230f   : > { %v11949_v27 = vsel %vm2249_vm11, %v11947_v18, %v11941_v47 }
0x2310   : > { %v11939_v30 = vpop.permute.xlu0 %11938 }
0x2311   : > { %v11948_v63 = vsel %vm2249_vm11, %v11946_v29, %v11939_v30 }
0x2312   : > { %v12125_v19 = vpop.permute.xlu1 %12124  ;;  %16383 = vmatprep.mubr.msk.f32.mxu0 %vm338_vm0, %v11948_v63 }
0x2313   : > { %16384 = vmatmul.mubr.msk.f32.vlgmr.msra.gmra.mxu0 %vm338_vm0, %v11949_v27 }
0x2314   : > { %16401 = vmatpush3.xpose.msk.msra.mxu0 %vm803_vm1, %v19079_v23  ;;  %v12123_v34 = vpop.permute.xlu0 %12122 }
0x2315   : > { %16402 = vmatprep.subr.msk.mxu0 %vm803_vm1, %v19084_v53  ;;  %16397 = vmatprep.mubr.msk.f32.mxu1 %vm803_vm1, %v12123_v34 }
0x2316   : > { %16404 = vmatprep.mubr.msk.f32.mxu0 %vm803_vm1, %v12123_v34  ;;  %v19162_v10 = vpop.permute.xlu1 %12419  ;;  %16398 = vmatmul.mubr.msk.f32.vlgmr.msra.gmra.mxu1 %vm803_vm1, %v12125_v19 }
0x2317   : > { %16408 = vmatpush3.xpose.msk.msra.mxu1 %vm803_vm1, %v19100_v37  ;;  %16411 = vmatprep.mubr.msk.f32.mxu1 %vm803_vm1, %v19093_v3 }
0x2318   : > { %16403 = vmatpush3.xpose.msk.msra.mxu0 %vm803_vm1, %v19084_v53  ;;  %16409 = vmatprep.subr.msk.mxu1 %vm803_vm1, %v19115_v21 }
0x2319   : > { %16414 = vmatprep.subr.mxu0 %v19162_v10 }
0x231a   : > { %v19174_v50 = vpop.permute.xlu1 %12417 }
0x231b   : > { %16405 = vmatmul.mubr.msk.f32.vlgmr.msra.gmra.mxu0 %vm803_vm1, %v12125_v19  ;;  %16410 = vmatpush3.xpose.msk.msra.mxu1 %vm803_vm1, %v19115_v21 }
0x231c   : > { %16415 = vmatpush3.msra.mxu0 %v19162_v10 }
0x231d   : > { %16416 = vmatprep.subr.mxu0 %v19174_v50 }
0x231e   : > { %16412 = vmatmul.mubr.msk.f32.vlgmr.msra.gmra.mxu1 %vm803_vm1, %v19110_v40  ;;  %16417 = vmatpush3.msra.mxu0 %v19174_v50 }
0x231f   : > { %16428 = vmatprep.subr.mxu0 %v19162_v10 }
0x23d3   : > { %v19185_v17 = vpop.f32.mrf.mxu0 }
0x23d5   : > { %v19187_v53 = vpop.f32.mrf.mxu0 }
0x23d6   : > { %v16399_v23 = vpop.f32.mrf.mxu1 }
0x23d7   : > { %v19189_v24 = vsub.f32 %v16392_v22, %v16399_v23 }
0x23d8   : > { %v12204_v3 = vpop.f32.mrf.mxu1 }
0x23d9   : > { %v19191_v21 = vsub.f32 %v12113_v5, %v12204_v3  ;;  %v12366_v20 = vmul.f32 %v19189_v24, %v19189_v24 }
0x23db   : > { %v16406_v37 = vpop.f32.mrf.mxu0  ;;  %v12365_v7 = vmul.f32 %v19191_v21, %v19191_v21 }
0x23dd   : > { %v12281_v40 = vpop.f32.mrf.mxu0 }
0x23de   : > { %v16413_v36 = vpop.f32.mrf.mxu1 }
0x23df   : > { %v19193_v46 = vadd.f32 %v16413_v36, %v16406_v37 }
0x23e0   : > { %v12356_v61 = vpop.f32.mrf.mxu1 }
0x23e1   : > { %v12368_v38 = vmul.f32 %v19193_v46, %v19193_v46  ;;  %v19199_v2 = vadd.f32 %v12356_v61, %v12281_v40 }
0x23e3   : > { %v12370_v32 = vadd.f32 %v12368_v38, %v12366_v20  ;;  %v12367_v25 = vmul.f32 %v19199_v2, %v19199_v2 }
0x23e5   : > { %16757 = vrsqrt.f32 %v12370_v32  ;;  %v12369_v35 = vadd.f32 %v12367_v25, %v12365_v7  ;;  %vm12380_vm7 = vcmp.eq.f32.partialorder %v12370_v32, inf  ;;  %v12383_v56 = vand.u32 2147483648, %v12370_v32 }
0x23e6   : > { %vm12382_vm8 = vcmp.eq.f32.partialorder %v12370_v32, 0.0 }
0x23e7   : > { %16759 = vrsqrt.f32 %v12369_v35  ;;  %vm12373_vm9 = vcmp.eq.f32.partialorder %v12369_v35, inf  ;;  %v12376_v49 = vand.u32 2147483648, %v12369_v35  ;;  %vm12375_vm13 = vcmp.eq.f32.partialorder %v12369_v35, 0.0 }
0x23f2   : > { %v16758_v39 = vpop.eup %16757 }
0x23f3   : > { %v12379_v48 = vmul.f32 %v16758_v39, %v12370_v32 }
0x23f4   : > { %v16760_v15 = vpop.eup %16759 }
0x23f5   : > { %v12381_v41 = vsel %vm12380_vm7, %v12370_v32, %v12379_v48  ;;  %v12372_v28 = vmul.f32 %v16760_v15, %v12369_v35 }
0x23f6   : > { %v12384_v45 = vsel %vm12382_vm8, %v12383_v56, %v12381_v41 }
0x23f7   : > { %v12388_v33 = vsel %vm803_vm1, %v12384_v45, inf  ;;  %v12374_v60 = vsel %vm12373_vm9, %v12369_v35, %v12372_v28  ;;  %v12394_v29 = vsel %vm803_vm1, %v12384_v45, -inf  ;;  %v12408_v22 = vadd.f32 1e-09, %v12384_v45 }
0x23f8   : > { %12389 = vmin.xlane.f32.xlu0 %v12388_v33  ;;  %v12377_v11 = vsel %vm12375_vm13, %v12376_v49, %v12374_v60 }
0x23f9   : > { %v12391_v12 = vsel %vm803_vm1, %v12377_v11, -inf  ;;  %v12385_v47 = vsel %vm803_vm1, %v12377_v11, inf  ;;  %v12407_v27 = vadd.f32 1e-09, %v12377_v11 }
0x23fa   : > { %12392 = vmax.xlane.f32.xlu1 %v12391_v12 }
0x23fc   : > { %12386 = vmin.xlane.f32.xlu0 %v12385_v47 }
0x2400   : > { %12395 = vmax.xlane.f32.xlu0 %v12394_v29 }
0x240b   : > { %12504 = vrot.lane.b32.xlu1 %v17076_v9, %s16861_s6 }
0x240f   : > { %12840 = vrot.lane.b32.xlu1 %v17044_v1, %s16862_s11 }
0x2413   : > { %12838 = vrot.lane.b32.xlu1 %v17040_v62, %s16862_s11 }
0x2416   : > { %12506 = vrot.lane.b32.xlu0 %v17074_v8, %s16861_s6 }
0x2417   : > { %12834 = vrot.lane.b32.xlu1 %v17086_v14, %s16862_s11 }
0x241a   : > { %12749 = vrot.lane.b32.xlu0 %v17044_v1, %s16863_s12 }
0x241b   : > { %12836 = vrot.lane.b32.xlu1 %v17090_v16, %s16862_s11 }
0x241e   : > { %12747 = vrot.lane.b32.xlu0 %v17040_v62, %s16863_s12 }
0x241f   : > { %13131 = vrot.lane.b32.xlu1 %v17074_v8, %s16863_s12 }
0x2422   : > { %12743 = vrot.lane.b32.xlu0 %v17086_v14, %s16863_s12 }
0x2423   : > { %13129 = vrot.lane.b32.xlu1 %v17076_v9, %s16863_s12 }
0x2426   : > { %12745 = vrot.lane.b32.xlu0 %v17090_v16, %s16863_s12 }
0x2481   : > { %v12390_v30 = vpop.xlane.xlu0 %12389 }
0x2482   : > { %v12398_v40 = vsub.f32 %v12384_v45, %v12390_v30 }
0x2483   : > { %v12393_v1 = vpop.xlane.xlu1 %12392 }
0x2485   : > { %v12387_v18 = vpop.xlane.xlu0 %12386 }
0x2486   : > { %v12399_v63 = vsub.f32 %v12393_v1, %v12387_v18  ;;  %v12397_v16 = vsub.f32 %v12377_v11, %v12387_v18 }
0x2487   : > { %v12505_v14 = vpop.permute.xlu1 %12504 }
0x2488   : > { %v12401_v19 = vadd.f32 1e-09, %v12399_v63 }
0x2489   : > { %v12396_v34 = vpop.xlane.xlu0 %12395 }
0x248a   : > { %16761 = vrcp.f32 %v12401_v19  ;;  %v12400_v62 = vsub.f32 %v12396_v34, %v12390_v30 }
0x248b   : > { %16763 = vrcp.f32 %v12407_v27  ;;  %v12841_v38 = vpop.permute.xlu1 %12840 }
0x248c   : > { %v12402_v5 = vadd.f32 1e-09, %v12400_v62 }
0x248d   : > { %v12507_v23 = vpop.permute.xlu0 %12506 }
0x248e   : > { %16765 = vrcp.f32 %v12402_v5  ;;  %16421 = vmatprep.subr.mxu1 %v12507_v23 }
0x248f   : > { %16422 = vmatpush3.msra.mxu1 %v12507_v23  ;;  %16767 = vrcp.f32 %v12408_v22  ;;  %v12839_v41 = vpop.permute.xlu1 %12838 }
0x2490   : > { %16423 = vmatprep.subr.mxu1 %v12505_v14 }
0x2491   : > { %16424 = vmatpush3.msra.mxu1 %v12505_v14  ;;  %v12750_v39 = vpop.permute.xlu0 %12749 }
0x2492   : > { %16435 = vmatprep.subr.mxu1 %v12507_v23 }
0x2495   : > { %v12748_v28 = vpop.permute.xlu0 %12747 }
0x2497   : > { %v16762_v3 = vpop.eup %16761 }
0x2498   : > { %v12404_v37 = vmul.f32 %v16762_v3, %v12397_v16  ;;  %v16764_v36 = vpop.eup %16763 }
0x249a   : > { %v12410_v61 = vmul.f32 %v16764_v36, %v12404_v37 }
0x249b   : > { %v16766_v20 = vpop.eup %16765 }
0x249c   : > { %v12406_v7 = vmul.f32 %v16766_v20, %v12398_v40  ;;  %v12413_v32 = vmul.f32 %v12410_v61, %v19191_v21  ;;  %v12415_v25 = vmul.f32 %v12410_v61, %v19199_v2  ;;  %v16768_v35 = vpop.eup %16767 }
0x249e   : > { %v12412_v48 = vmul.f32 %v16768_v35, %v12406_v7  ;;  %16418 = vmatprep.mubr.msk.f32.mxu0 %vm803_vm1, %v12413_v32  ;;  %16425 = vmatprep.mubr.msk.f32.mxu1 %vm803_vm1, %v12415_v25 }
0x24a0   : > { %v12414_v15 = vmul.f32 %v12412_v48, %v19189_v24  ;;  %v12416_v56 = vmul.f32 %v12412_v48, %v19193_v46  ;;  %v12835_v24 = vpop.permute.xlu1 %12834 }
0x24a2   : > { %16419 = vmatmul.mubr.msk.f32.vlgmr.msra.gmra.mxu0 %vm803_vm1, %v12414_v15  ;;  %16426 = vmatmul.mubr.msk.f32.vlgmr.msra.gmra.mxu1 %vm803_vm1, %v12416_v56 }
0x24a3   : > { %16429 = vmatpush3.msra.mxu0 %v19162_v10  ;;  %16436 = vmatpush3.msra.mxu1 %v12507_v23  ;;  %v12744_v10 = vpop.permute.xlu0 %12743 }
0x24a4   : > { %16430 = vmatprep.subr.mxu0 %v19174_v50  ;;  %16432 = vmatprep.mubr.msk.f32.mxu0 %vm803_vm1, %v12415_v25 }
0x24a5   : > { %16437 = vmatprep.subr.mxu1 %v12505_v14  ;;  %16439 = vmatprep.mubr.msk.f32.mxu1 %vm803_vm1, %v12413_v32 }
0x24a6   : > { %16431 = vmatpush3.msra.mxu0 %v19174_v50  ;;  %16438 = vmatpush3.msra.mxu1 %v12505_v14  ;;  %v12837_v50 = vpop.permute.xlu1 %12836 }
0x24a7   : > { %16442 = vmatprep.subr.msk.mxu0 %vm803_vm1, %v12750_v39  ;;  %16449 = vmatprep.subr.msk.mxu1 %vm803_vm1, %v12841_v38  ;;  %v12746_v21 = vpop.permute.xlu0 %12745 }
0x24a8   : > { %16433 = vmatmul.mubr.msk.f32.vlgmr.msra.gmra.mxu0 %vm803_vm1, %v12416_v56  ;;  %16440 = vmatmul.mubr.msk.f32.vlgmr.msra.gmra.mxu1 %vm803_vm1, %v12414_v15 }
0x24a9   : > { %16443 = vmatpush3.xpose.msk.msra.mxu0 %vm803_vm1, %v12750_v39  ;;  %16450 = vmatpush3.xpose.msk.msra.mxu1 %vm803_vm1, %v12841_v38 }
0x24aa   : > { %16444 = vmatprep.subr.msk.mxu0 %vm803_vm1, %v12748_v28  ;;  %16446 = vmatprep.mubr.msk.f32.mxu0 %vm803_vm1, %v12744_v10  ;;  %v19266_v46 = vpop.permute.xlu1 %13131 }
0x24ab   : > { %16451 = vmatprep.subr.msk.mxu1 %vm803_vm1, %v12839_v41  ;;  %16453 = vmatprep.mubr.msk.f32.mxu1 %vm803_vm1, %v12835_v24 }
0x24ad   : > { %16445 = vmatpush3.xpose.msk.msra.mxu0 %vm803_vm1, %v12748_v28  ;;  %16452 = vmatpush3.xpose.msk.msra.mxu1 %vm803_vm1, %v12839_v41 }
0x24ae   : > { %16456 = vmatprep.subr.msk.mxu0 %vm803_vm1, %v12750_v39  ;;  %16463 = vmatprep.subr.msk.mxu1 %vm803_vm1, %v12841_v38  ;;  %v19274_v2 = vpop.permute.xlu1 %13129 }
0x24b0   : > { %16447 = vmatmul.mubr.msk.f32.vlgmr.msra.gmra.mxu0 %vm803_vm1, %v12746_v21  ;;  %16454 = vmatmul.mubr.msk.f32.vlgmr.msra.gmra.mxu1 %vm803_vm1, %v12837_v50 }
0x24b1   : > { %16457 = vmatpush3.xpose.msk.msra.mxu0 %vm803_vm1, %v12750_v39  ;;  %16460 = vmatprep.mubr.msk.f32.mxu0 %vm803_vm1, %v12835_v24 }
0x24b2   : > { %16464 = vmatpush3.xpose.msk.msra.mxu1 %vm803_vm1, %v12841_v38  ;;  %16467 = vmatprep.mubr.msk.f32.mxu1 %vm803_vm1, %v12744_v10 }
0x24b3   : > { %16458 = vmatprep.subr.msk.mxu0 %vm803_vm1, %v12748_v28  ;;  %16465 = vmatprep.subr.msk.mxu1 %vm803_vm1, %v12839_v41 }
0x24b5   : > { %16459 = vmatpush3.xpose.msk.msra.mxu0 %vm803_vm1, %v12748_v28 }
0x24b6   : > { %16466 = vmatpush3.xpose.msk.msra.mxu1 %vm803_vm1, %v12839_v41  ;;  %16470 = vmatprep.subr.mxu0 %v19266_v46 }
0x24b8   : > { %16461 = vmatmul.mubr.msk.f32.vlgmr.msra.gmra.mxu0 %vm803_vm1, %v12837_v50 }
0x24b9   : > { %16468 = vmatmul.mubr.msk.f32.vlgmr.msra.gmra.mxu1 %vm803_vm1, %v12746_v21  ;;  %16471 = vmatpush3.msra.mxu0 %v19266_v46 }
0x24ba   : > { %16472 = vmatprep.subr.mxu0 %v19274_v2 }
0x24bb   : > { %16473 = vmatpush3.msra.mxu0 %v19274_v2 }
0x24bc   : > { %16484 = vmatprep.subr.mxu0 %v19266_v46 }
0x2562   : > { %v19281_v45 = vpop.f32.mrf.mxu0  ;;  %v19283_v49 = vpop.f32.mrf.mxu1 }
0x2563   : > { %v12592_v33 = vsub.f32 %v19281_v45, %v19283_v49  ;;  %v16817_v45 = vld [vmem:[%s18037_s16 + $0x38] sm:$0xff]  ;;  %v16818_v49 = vld [vmem:[%s18037_s16 + $0x30] sm:$0xff] }
0x2564   : > { %v19287_v60 = vpop.f32.mrf.mxu0  ;;  %v19289_v11 = vpop.f32.mrf.mxu1 }
0x2565   : > { %v12591_v12 = vsub.f32 %v19287_v60, %v19289_v11  ;;  %v16820_v60 = vld [vmem:[%s18037_s16 + $0x20] sm:$0xff]  ;;  %v16821_v11 = vld [vmem:[%s18037_s16 + $0x18] sm:$0xff] }
0x2568   : > { %v16434_v47 = vpop.f32.mrf.mxu0  ;;  %v16441_v29 = vpop.f32.mrf.mxu1 }
0x256a   : > { %v12659_v30 = vpop.f32.mrf.mxu0  ;;  %v12734_v1 = vpop.f32.mrf.mxu1 }
0x2570   : > { %v16448_v18 = vpop.f32.mrf.mxu0  ;;  %v16455_v63 = vpop.f32.mrf.mxu1 }
0x2571   : > { %v19293_v34 = vsub.f32 %v16448_v18, %v16455_v63  ;;  %v12740_v18 = vadd.f32 %v16441_v29, %v16434_v47  ;;  %v12735_v63 = vadd.f32 %v12734_v1, %v12659_v30 }
0x2572   : > { %v12825_v27 = vpop.f32.mrf.mxu0  ;;  %v12916_v19 = vpop.f32.mrf.mxu1 }
0x2573   : > { %v19295_v5 = vsub.f32 %v12825_v27, %v12916_v19  ;;  %v13078_v3 = vmul.f32 %v19293_v34, %v19293_v34 }
0x2575   : > { %v13077_v40 = vmul.f32 %v19295_v5, %v19295_v5 }
0x2578   : > { %v16462_v62 = vpop.f32.mrf.mxu0 }
0x2579   : > { %v16469_v22 = vpop.f32.mrf.mxu1 }
0x257a   : > { %v19297_v23 = vadd.f32 %v16469_v22, %v16462_v62  ;;  %v12993_v14 = vpop.f32.mrf.mxu0 }
0x257b   : > { %v13068_v16 = vpop.f32.mrf.mxu1 }
0x257c   : > { %v13080_v37 = vmul.f32 %v19297_v23, %v19297_v23  ;;  %v19303_v36 = vadd.f32 %v13068_v16, %v12993_v14 }
0x257e   : > { %v13082_v61 = vadd.f32 %v13080_v37, %v13078_v3  ;;  %v13079_v20 = vmul.f32 %v19303_v36, %v19303_v36 }
0x2580   : > { %16769 = vrsqrt.f32 %v13082_v61  ;;  %v13081_v38 = vadd.f32 %v13079_v20, %v13077_v40  ;;  %vm13092_vm14 = vcmp.eq.f32.partialorder %v13082_v61, inf  ;;  %v13095_v35 = vand.u32 2147483648, %v13082_v61 }
0x2581   : > { %vm13094_vm15 = vcmp.eq.f32.partialorder %v13082_v61, 0.0 }
0x2582   : > { %16771 = vrsqrt.f32 %v13081_v38  ;;  %vm13085_vm2 = vcmp.eq.f32.partialorder %v13081_v38, inf  ;;  %v13088_v56 = vand.u32 2147483648, %v13081_v38  ;;  %vm13087_vm5 = vcmp.eq.f32.partialorder %v13081_v38, 0.0 }
0x258d   : > { %v16770_v7 = vpop.eup %16769 }
0x258e   : > { %v13091_v32 = vmul.f32 %v16770_v7, %v13082_v61 }
0x258f   : > { %v16772_v25 = vpop.eup %16771 }
0x2590   : > { %v13093_v39 = vsel %vm13092_vm14, %v13082_v61, %v13091_v32  ;;  %v13084_v48 = vmul.f32 %v16772_v25, %v13081_v38 }
0x2591   : > { %v13096_v15 = vsel %vm13094_vm15, %v13095_v35, %v13093_v39 }
0x2592   : > { %v13100_v41 = vsel %vm803_vm1, %v13096_v15, inf  ;;  %v13086_v28 = vsel %vm13085_vm2, %v13081_v38, %v13084_v48  ;;  %v13106_v21 = vsel %vm803_vm1, %v13096_v15, -inf  ;;  %v13120_v40 = vadd.f32 1e-09, %v13096_v15 }
0x2593   : > { %13101 = vmin.xlane.f32.xlu0 %v13100_v41  ;;  %v13089_v24 = vsel %vm13087_vm5, %v13088_v56, %v13086_v28  ;;  %v16816_v28 = vld [vmem:[%s17241_s10 + $0xc0] sm:$0xff] }
0x2594   : > { %v13103_v10 = vsel %vm803_vm1, %v13089_v24, -inf  ;;  %v13097_v50 = vsel %vm803_vm1, %v13089_v24, inf  ;;  %v13119_v14 = vadd.f32 1e-09, %v13089_v24 }
0x2595   : > { %13104 = vmax.xlane.f32.xlu1 %v13103_v10 }
0x2597   : > { %13098 = vmin.xlane.f32.xlu0 %v13097_v50 }
0x259b   : > { %13107 = vmax.xlane.f32.xlu0 %v13106_v21 }
0x25a6   : > { %13216 = vrot.lane.b32.xlu1 %v17076_v9, %s16862_s11 }
0x25aa   : > { %13467 = vrot.lane.b32.xlu1 %v12740_v18, %s16861_s6 }
0x25b1   : > { %13218 = vrot.lane.b32.xlu0 %v17074_v8, %s16862_s11 }
0x25b5   : > { %13465 = vrot.lane.b32.xlu0 %v12735_v63, %s16861_s6 }
0x261c   : > { %v13102_v27 = vpop.xlane.xlu0 %13101 }
0x261d   : > { %v13110_v20 = vsub.f32 %v13096_v15, %v13102_v27  ;;  %v16815_v15 = vld [vmem:[%s17241_s10 + $0xc8] sm:$0xff] }
0x261e   : > { %v13105_v19 = vpop.xlane.xlu1 %13104 }
0x2620   : > { %v13099_v62 = vpop.xlane.xlu0 %13098 }
0x2621   : > { %v13111_v22 = vsub.f32 %v13105_v19, %v13099_v62  ;;  %v13109_v8 = vsub.f32 %v13089_v24, %v13099_v62 }
0x2622   : > { %v13217_v29 = vpop.permute.xlu1 %13216 }
0x2623   : > { %v13113_v16 = vadd.f32 1e-09, %v13111_v22 }
0x2624   : > { %v13108_v3 = vpop.xlane.xlu0 %13107 }
0x2625   : > { %16773 = vrcp.f32 %v13113_v16  ;;  %v13112_v37 = vsub.f32 %v13108_v3, %v13102_v27 }
0x2626   : > { %16775 = vrcp.f32 %v13119_v14  ;;  %v13468_v3 = vpop.permute.xlu1 %13467 }
0x2627   : > { %v13114_v9 = vadd.f32 1e-09, %v13112_v37 }
0x2628   : > { %v13219_v47 = vpop.permute.xlu0 %13218 }
0x2629   : > { %16777 = vrcp.f32 %v13114_v9  ;;  %16477 = vmatprep.subr.mxu1 %v13219_v47 }
0x262a   : > { %16478 = vmatpush3.msra.mxu1 %v13219_v47  ;;  %16779 = vrcp.f32 %v13120_v40 }
0x262b   : > { %16479 = vmatprep.subr.mxu1 %v13217_v29 }
0x262c   : > { %16480 = vmatpush3.msra.mxu1 %v13217_v29  ;;  %v13466_v37 = vpop.permute.xlu0 %13465 }
0x262d   : > { %16491 = vmatprep.subr.mxu1 %v13219_v47 }
0x2632   : > { %v16774_v30 = vpop.eup %16773 }
0x2633   : > { %v13116_v1 = vmul.f32 %v16774_v30, %v13109_v8  ;;  %v16776_v61 = vpop.eup %16775 }
0x2635   : > { %v13122_v38 = vmul.f32 %v16776_v61, %v13116_v1 }
0x2636   : > { %v16778_v7 = vpop.eup %16777 }
0x2637   : > { %v13118_v32 = vmul.f32 %v16778_v7, %v13110_v20  ;;  %v13125_v25 = vmul.f32 %v13122_v38, %v19295_v5  ;;  %v13127_v35 = vmul.f32 %v13122_v38, %v19303_v36  ;;  %v16780_v39 = vpop.eup %16779  ;;  %v16812_v5 = vld [vmem:[%s17241_s10 + $0xe0] sm:$0xff]  ;;  %v16814_v36 = vld [vmem:[%s17241_s10 + $0xd0] sm:$0xff]  ;;  %v16823_v7 = vld [vmem:[%s18037_s16 + $0x8] sm:$0xff] }
0x2639   : > { %v13124_v48 = vmul.f32 %v16780_v39, %v13118_v32  ;;  %16474 = vmatprep.mubr.msk.f32.mxu0 %vm803_vm1, %v13125_v25  ;;  %16481 = vmatprep.mubr.msk.f32.mxu1 %vm803_vm1, %v13127_v35  ;;  %v16824_v32 = vld [vmem:[%s18037_s16] sm:$0xff]  ;;  %v16825_v39 = vld [vmem:[%s18264_s22 + $0x78] sm:$0xff] }
0x263b   : > { %v13126_v56 = vmul.f32 %v13124_v48, %v19293_v34  ;;  %v13128_v41 = vmul.f32 %v13124_v48, %v19297_v23  ;;  %v16809_v34 = vld [vmem:[%s17241_s10 + $0xf8] sm:$0xff]  ;;  %v16826_v48 = vld [vmem:[%s18264_s22 + $0x70] sm:$0xff] }
0x263c   : > { %v16813_v23 = vld [vmem:[%s17241_s10 + $0xd8] sm:$0xff] }
0x263d   : > { %16475 = vmatmul.mubr.msk.f32.vlgmr.msra.gmra.mxu0 %vm803_vm1, %v13126_v56  ;;  %16482 = vmatmul.mubr.msk.f32.vlgmr.msra.gmra.mxu1 %vm803_vm1, %v13128_v41 }
0x263e   : > { %16485 = vmatpush3.msra.mxu0 %v19266_v46  ;;  %16492 = vmatpush3.msra.mxu1 %v13219_v47  ;;  %v16810_v46 = vld [vmem:[%s17241_s10 + $0xf0] sm:$0xff] }
0x263f   : > { %16486 = vmatprep.subr.mxu0 %v19274_v2  ;;  %16488 = vmatprep.mubr.msk.f32.mxu0 %vm803_vm1, %v13127_v35 }
0x2640   : > { %16493 = vmatprep.subr.mxu1 %v13217_v29  ;;  %16495 = vmatprep.mubr.msk.f32.mxu1 %vm803_vm1, %v13125_v25 }
0x2641   : > { %16487 = vmatpush3.msra.mxu0 %v19274_v2  ;;  %16494 = vmatpush3.msra.mxu1 %v13217_v29  ;;  %v16811_v2 = vld [vmem:[%s17241_s10 + $0xe8] sm:$0xff] }
0x2642   : > { %16489 = vmatmul.mubr.msk.f32.vlgmr.msra.gmra.mxu0 %vm803_vm1, %v13128_v41  ;;  %16496 = vmatmul.mubr.msk.f32.vlgmr.msra.gmra.mxu1 %vm803_vm1, %v13126_v56  ;;  %v16827_v56 = vld [vmem:[%s18264_s22 + $0x68] sm:$0xff]  ;;  %v16828_v41 = vld [vmem:[%s18264_s22 + $0x60] sm:$0xff] }
0x2643   : > { %16498 = vmatprep.subr.mxu0 %v16809_v34  ;;  %16517 = vmatprep.subr.mxu1 %v16857_v0 }
0x2644   : > { %16499 = vmatpush3.msra.mxu0 %v16809_v34  ;;  %16533 = vmatprep.mubr.msk.f32.mxu1 %vm16865_vm12, %v16857_v0  ;;  %v16830_v34 = vld [vmem:[%s18264_s22 + $0x50] sm:$0xff] }
0x2645   : > { %16500 = vmatprep.subr.mxu0 %v16810_v46 }
0x2646   : > { %16501 = vmatpush3.msra.mxu0 %v16810_v46  ;;  %v16831_v46 = vld [vmem:[%s18264_s22 + $0x48] sm:$0xff] }
0x2647   : > { %16502 = vmatprep.subr.mxu0 %v16811_v2 }
0x2648   : > { %16503 = vmatpush3.msra.mxu0 %v16811_v2  ;;  %v16832_v2 = vld [vmem:[%s18264_s22 + $0x40] sm:$0xff] }
0x2649   : > { %16504 = vmatprep.subr.mxu0 %v16812_v5 }
0x264a   : > { %16505 = vmatpush3.msra.mxu0 %v16812_v5  ;;  %v16833_v5 = vld [vmem:[%s18264_s22 + $0x38] sm:$0xff] }
0x264b   : > { %16506 = vmatprep.subr.mxu0 %v16813_v23 }
0x264c   : > { %16507 = vmatpush3.msra.mxu0 %v16813_v23  ;;  %v16834_v23 = vld [vmem:[%s18264_s22 + $0x30] sm:$0xff] }
0x264d   : > { %16508 = vmatprep.subr.mxu0 %v16814_v36 }
0x264e   : > { %16509 = vmatpush3.msra.mxu0 %v16814_v36  ;;  %v16835_v36 = vld [vmem:[%s18264_s22 + $0x28] sm:$0xff] }
0x264f   : > { %16510 = vmatprep.subr.mxu0 %v16815_v15 }
0x2650   : > { %16511 = vmatpush3.msra.mxu0 %v16815_v15  ;;  %v16836_v15 = vld [vmem:[%s18264_s22 + $0x20] sm:$0xff] }
0x2651   : > { %16512 = vmatprep.subr.mxu0 %v16816_v28 }
0x2652   : > { %16513 = vmatpush3.msra.mxu0 %v16816_v28  ;;  %v16837_v28 = vld [vmem:[%s18264_s22 + $0x18] sm:$0xff] }
0x2653   : > { %16536 = vmatprep.subr.mxu0 %v16857_v0 }
0x26fd   : > { %v16476_v24 = vpop.f32.mrf.mxu0  ;;  %v16483_v10 = vpop.f32.mrf.mxu1 }
0x26fe   : > { %v13304_v50 = vsub.f32 %v16476_v24, %v16483_v10  ;;  %v16838_v24 = vld [vmem:[%s18264_s22 + $0x10] sm:$0xff]  ;;  %v16839_v10 = vld [vmem:[%s18264_s22 + $0x8] sm:$0xff] }
0x26ff   : > { %v13207_v21 = vpop.f32.mrf.mxu0  ;;  %v13294_v18 = vpop.f32.mrf.mxu1 }
0x2700   : > { %v13303_v63 = vsub.f32 %v13207_v21, %v13294_v18  ;;  %13459 = vrot.lane.b32.xlu1 %v13304_v50, %s16862_s11  ;;  %v16840_v50 = vld [vmem:[%s18264_s22] sm:$0xff]  ;;  %v16841_v21 = vld [vmem:[%s18264_s22 + $0xb8] sm:$0xff]  ;;  %v16842_v18 = vld [vmem:[%s18264_s22 + $0xb0] sm:$0xff] }
0x2702   : > { %v16490_v27 = vpop.f32.mrf.mxu0  ;;  %v16497_v19 = vpop.f32.mrf.mxu1  ;;  %13457 = vrot.lane.b32.xlu0 %v13303_v63, %s16862_s11  ;;  %v16843_v63 = vld [vmem:[%s18264_s22 + $0xa8] sm:$0xff] }
0x2703   : > { %v13452_v62 = vadd.f32 %v16497_v19, %v16490_v27  ;;  %v16844_v27 = vld [vmem:[%s18264_s22 + $0xa0] sm:$0xff]  ;;  %v16845_v19 = vld [vmem:[%s18264_s22 + $0x98] sm:$0xff] }
0x2704   : > { %v13371_v22 = vpop.f32.mrf.mxu0  ;;  %v13446_v14 = vpop.f32.mrf.mxu1 }
0x2705   : > { %v13447_v16 = vadd.f32 %v13446_v14, %v13371_v22  ;;  %13475 = vrot.lane.b32.xlu1 %v13452_v62, %s16863_s12  ;;  %v16846_v62 = vld [vmem:[%s18264_s22 + $0x90] sm:$0xff]  ;;  %v16847_v22 = vld [vmem:[%s18264_s22 + $0x88] sm:$0xff]  ;;  %v16848_v14 = vld [vmem:[%s18264_s22 + $0x80] sm:$0xff] }
0x2707   : > { %13473 = vrot.lane.b32.xlu0 %v13447_v16, %s16863_s12 }
0x2772   : > { %v13460_v40 = vpop.permute.xlu1 %13459 }
0x2773   : > { %v13480_v29 = vsel %vm803_vm1, %v12592_v33, %v13460_v40  ;;  %v16819_v33 = vld [vmem:[%s18037_s16 + $0x28] sm:$0xff] }
0x2774   : > { %v13458_v9 = vpop.permute.xlu0 %13457  ;;  %v13482_v61 = vsel %vm2246_vm10, %v13480_v29, %v13468_v3 }
0x2775   : > { %v13479_v47 = vsel %vm803_vm1, %v12591_v12, %v13458_v9  ;;  %v16822_v12 = vld [vmem:[%s18037_s16 + $0x10] sm:$0xff] }
0x2776   : > { %v13481_v30 = vsel %vm2246_vm10, %v13479_v47, %v13466_v37 }
0x2777   : > { %v13476_v8 = vpop.permute.xlu1 %13475 }
0x2778   : > { %v13484_v38 = vsel %vm2249_vm11, %v13482_v61, %v13476_v8 }
0x2779   : > { %v13474_v1 = vpop.permute.xlu0 %13473 }
0x277a   : > { %v13483_v20 = vsel %vm2249_vm11, %v13481_v30, %v13474_v1 }
0x277b   : > { %16514 = vmatprep.mubr.msk.f32.mxu0 %vm338_vm0, %v13483_v20 }
0x277c   : > { %16515 = vmatmul.mubr.msk.f32.vlgmr.msra.gmra.mxu0 %vm338_vm0, %v13484_v38 }
0x277d   : > { %16537 = vmatpush3.msra.mxu0 %v16817_v45  ;;  %16552 = vmatprep.mubr.msk.f32.mxu0 %vm16865_vm12, %v16857_v0 }
0x277e   : > { %16538 = vmatprep.subr.mxu0 %v16857_v0 }
0x277f   : > { %16539 = vmatpush3.msra.mxu0 %v16818_v49 }
0x2780   : > { %16540 = vmatprep.subr.mxu0 %v16857_v0 }
0x2781   : > { %16541 = vmatpush3.msra.mxu0 %v16819_v33 }
0x2782   : > { %16542 = vmatprep.subr.mxu0 %v16857_v0 }
0x2783   : > { %16543 = vmatpush3.msra.mxu0 %v16820_v60 }
0x2784   : > { %16544 = vmatprep.subr.mxu0 %v16857_v0 }
0x2785   : > { %16545 = vmatpush3.msra.mxu0 %v16821_v11 }
0x2786   : > { %16546 = vmatprep.subr.mxu0 %v16857_v0 }
0x2787   : > { %16547 = vmatpush3.msra.mxu0 %v16822_v12 }
0x2788   : > { %16548 = vmatprep.subr.mxu0 %v16857_v0 }
0x2789   : > { %16549 = vmatpush3.msra.mxu0 %v16823_v7 }
0x278a   : > { %16550 = vmatprep.subr.mxu0 %v16857_v0 }
0x278b   : > { %16551 = vmatpush3.msra.mxu0 %v16824_v32 }
0x283c   : > { %v19381_v25 = vpop.f32.mrf.mxu0 }
0x283d   : > { %16518 = vmatpush3.msra.mxu1 %v19381_v25 }
0x283e   : > { %v19384_v35 = vpop.f32.mrf.mxu0  ;;  %16519 = vmatprep.subr.mxu1 %v16857_v0 }
0x283f   : > { %16520 = vmatpush3.msra.mxu1 %v19384_v35 }
0x2840   : > { %16521 = vmatprep.subr.mxu1 %v16857_v0 }
0x2841   : > { %16522 = vmatpush3.msra.mxu1 %v19185_v17 }
0x2842   : > { %16523 = vmatprep.subr.mxu1 %v16857_v0 }
0x2843   : > { %16524 = vmatpush3.msra.mxu1 %v19187_v53 }
0x2844   : > { %16525 = vmatprep.subr.mxu1 %v16857_v0 }
0x2845   : > { %16526 = vmatpush3.msra.mxu1 %v18925_v51 }
0x2846   : > { %16527 = vmatprep.subr.mxu1 %v16857_v0 }
0x2847   : > { %16528 = vmatpush3.msra.mxu1 %v18927_v52 }
0x2848   : > { %16529 = vmatprep.subr.mxu1 %v16857_v0 }
0x2849   : > { %16530 = vmatpush3.msra.mxu1 %v18665_v54 }
0x284a   : > { %16531 = vmatprep.subr.mxu1 %v16857_v0 }
0x284b   : > { %16532 = vmatpush3.msra.mxu1 %v18667_v42 }
0x284c   : > { %16534 = vmatmul.mubr.msk.f32.vlgmr.msra.gmra.mxu1 %vm338_vm0, %v16866_v43  ;;  %13968 = vmatprep.subr.mxu1 %v16857_v0  ;;  %v16829_v43 = vld [vmem:[%s18264_s22 + $0x58] sm:$0xff] }
0x284d   : > { %13969 = vmatpush1.msra.mxu1 %v16825_v39 }
0x284e   : > { %13970 = vmatprep.subr.mxu1 %v16857_v0 }
0x284f   : > { %13971 = vmatpush1.msra.mxu1 %v16826_v48 }
0x2850   : > { %13972 = vmatprep.subr.mxu1 %v16857_v0 }
0x2851   : > { %13973 = vmatpush1.msra.mxu1 %v16827_v56 }
0x2852   : > { %13974 = vmatprep.subr.mxu1 %v16857_v0 }
0x2853   : > { %13975 = vmatpush1.msra.mxu1 %v16828_v41 }
0x2854   : > { %13976 = vmatprep.subr.mxu1 %v16857_v0 }
0x2855   : > { %13977 = vmatpush1.msra.mxu1 %v16829_v43 }
0x2856   : > { %13978 = vmatprep.subr.mxu1 %v16857_v0 }
0x2857   : > { %13979 = vmatpush1.msra.mxu1 %v16830_v34 }
0x2858   : > { %13980 = vmatprep.subr.mxu1 %v16857_v0 }
0x2859   : > { %13981 = vmatpush1.msra.mxu1 %v16831_v46 }
0x285a   : > { %13982 = vmatprep.subr.mxu1 %v16857_v0 }
0x285b   : > { %13983 = vmatpush1.msra.mxu1 %v16832_v2 }
0x285c   : > { %13984 = vmatprep.subr.mxu1 %v16857_v0 }
0x285d   : > { %13985 = vmatpush1.msra.mxu1 %v16833_v5 }
0x285e   : > { %13986 = vmatprep.subr.mxu1 %v16857_v0 }
0x285f   : > { %13987 = vmatpush1.msra.mxu1 %v16834_v23 }
0x2860   : > { %13988 = vmatprep.subr.mxu1 %v16857_v0 }
0x2861   : > { %13989 = vmatpush1.msra.mxu1 %v16835_v36 }
0x2862   : > { %13990 = vmatprep.subr.mxu1 %v16857_v0 }
0x2863   : > { %13991 = vmatpush1.msra.mxu1 %v16836_v15 }
0x2864   : > { %13992 = vmatprep.subr.mxu1 %v16857_v0 }
0x2865   : > { %13993 = vmatpush1.msra.mxu1 %v16837_v28 }
0x2866   : > { %13994 = vmatprep.subr.mxu1 %v16857_v0 }
0x2867   : > { %13995 = vmatpush1.msra.mxu1 %v16838_v24 }
0x2868   : > { %13996 = vmatprep.subr.mxu1 %v16857_v0 }
0x2869   : > { %13997 = vmatpush1.msra.mxu1 %v16839_v10 }
0x286a   : > { %13998 = vmatprep.subr.mxu1 %v16857_v0 }
0x286b   : > { %13999 = vmatpush1.msra.mxu1 %v16840_v50 }
0x286c   : > { %14016 = vmatprep.subr.mxu1 %v16857_v0 }
0x286d   : > { %14017 = vmatpush2.msra.mxu1 %v16841_v21 }
0x286e   : > { %14018 = vmatprep.subr.mxu1 %v16857_v0 }
0x286f   : > { %14019 = vmatpush2.msra.mxu1 %v16842_v18 }
0x2870   : > { %14020 = vmatprep.subr.mxu1 %v16857_v0 }
0x2871   : > { %14021 = vmatpush2.msra.mxu1 %v16843_v63 }
0x2872   : > { %14022 = vmatprep.subr.mxu1 %v16857_v0 }
0x2873   : > { %14023 = vmatpush2.msra.mxu1 %v16844_v27 }
0x2874   : > { %14024 = vmatprep.subr.mxu1 %v16857_v0 }
0x2875   : > { %14025 = vmatpush2.msra.mxu1 %v16845_v19 }
0x2876   : > { %14026 = vmatprep.subr.mxu1 %v16857_v0 }
0x2877   : > { %14027 = vmatpush2.msra.mxu1 %v16846_v62 }
0x2878   : > { %14028 = vmatprep.subr.mxu1 %v16857_v0 }
0x2879   : > { %14029 = vmatpush2.msra.mxu1 %v16847_v22 }
0x287a   : > { %14030 = vmatprep.subr.mxu1 %v16857_v0 }
0x287b   : > { %14031 = vmatpush2.msra.mxu1 %v16848_v14 }
0x290c   : > { %v13632_v16 = vpop.f32.mrf.mxu1 }
0x290d   : > { %16553 = vmatmul.mubr.msk.f32.vlgmr.msra.gmra.mxu0 %vm338_vm0, %v13632_v16 }
0x290e   : > { %v16535_v3 = vpop.f32.mrf.mxu1 }
0x29cd   : > { %v13705_v37 = vpop.f32.mrf.mxu0 }
0x29ce   : > { %v14720_v40 = vmul.f32 -1.442695, %v13705_v37 }
0x29cf   : > { %v16554_v9 = vpop.f32.mrf.mxu0 }
0x29d0   : > { %16781 = vpow2.f32 %v14720_v40 }
0x29dd   : > { %v16782_v47 = vpop.eup %16781 }
0x29de   : > { %v13712_v29 = vadd.f32 1.0, %v16782_v47 }
0x29e0   : > { %16783 = vrcp.f32 %v13712_v29 }
0x29ed   : > { %v16784_v8 = vpop.eup %16783 }
0x29ee   : > { %v13718_v30 = vrot.slane %v16784_v8, %v7084_v55 }
0x29f0   : > { %13768 = vrot.lane.b32.xlu1 %v13718_v30, %s16858_s28  ;;  %13779 = vrot.lane.b32.xlu0 %v13718_v30, %s16861_s6  ;;  %v13719_v33 = vmul.f32 %v13718_v30, %v18667_v42  ;;  %v13720_v60 = vmul.f32 %v18665_v54, %v13718_v30  ;;  %v19476_v11 = vmul.f32 %v13718_v30, %v18927_v52 }
0x29f1   : > { %v19481_v12 = vmul.f32 %v18925_v51, %v13718_v30  ;;  %v19486_v7 = vmul.f32 %v13718_v30, %v19187_v53  ;;  %v19491_v32 = vmul.f32 %v19185_v17, %v13718_v30  ;;  %v19496_v39 = vmul.f32 %v13718_v30, %v19384_v35 }
0x29f2   : > { %v19501_v48 = vmul.f32 %v19381_v25, %v13718_v30 }
0x2a62   : > { %v13780_v0 = vpop.permute.xlu0 %13779  ;;  %v13769_v56 = vpop.permute.xlu1 %13768 }
0x2a63   : > { %v13783_v1 = vmul.f32 %v18665_v54, %v13780_v0  ;;  %v13782_v61 = vmul.f32 %v13780_v0, %v18667_v42  ;;  %v13785_v20 = vmul.f32 %v18925_v51, %v13780_v0  ;;  %v13784_v38 = vmul.f32 %v13780_v0, %v18927_v52 }
0x2a64   : > { %v13787_v4 = vmul.f32 %v19185_v17, %v13780_v0  ;;  %v13786_v55 = vmul.f32 %v13780_v0, %v19187_v53  ;;  %v13789_v45 = vmul.f32 %v19381_v25, %v13780_v0  ;;  %v13788_v49 = vmul.f32 %v13780_v0, %v19384_v35 }
0x2a65   : > { %13800 = vrot.lane.b32.xlu1 %v13783_v1, %s16858_s28  ;;  %13798 = vrot.lane.b32.xlu0 %v13782_v61, %s16858_s28  ;;  %v13771_v41 = vmul.f32 %v13769_v56, %v18667_v42  ;;  %v13772_v2 = vmul.f32 %v18665_v54, %v13769_v56  ;;  %v13773_v36 = vmul.f32 %v13769_v56, %v18927_v52 }
0x2a66   : > { %v13774_v24 = vmul.f32 %v18925_v51, %v13769_v56  ;;  %v13775_v50 = vmul.f32 %v13769_v56, %v19187_v53  ;;  %v13776_v18 = vmul.f32 %v19185_v17, %v13769_v56  ;;  %v13777_v27 = vmul.f32 %v13769_v56, %v19384_v35 }
0x2a67   : > { %v13778_v62 = vmul.f32 %v19381_v25, %v13769_v56 }
0x2a69   : > { %13804 = vrot.lane.b32.xlu1 %v13785_v20, %s16858_s28  ;;  %13802 = vrot.lane.b32.xlu0 %v13784_v38, %s16858_s28 }
0x2a6d   : > { %13808 = vrot.lane.b32.xlu1 %v13787_v4, %s16858_s28  ;;  %13806 = vrot.lane.b32.xlu0 %v13786_v55, %s16858_s28 }
0x2a71   : > { %13812 = vrot.lane.b32.xlu1 %v13789_v45, %s16858_s28  ;;  %13810 = vrot.lane.b32.xlu0 %v13788_v49, %s16858_s28 }
0x2a75   : > { %13735 = vrot.lane.b32.xlu0 %v13719_v33, %s16858_s28 }
0x2a79   : > { %13737 = vrot.lane.b32.xlu0 %v13720_v60, %s16858_s28 }
0x2a7d   : > { %13739 = vrot.lane.b32.xlu0 %v19476_v11, %s16858_s28 }
0x2a81   : > { %13741 = vrot.lane.b32.xlu0 %v19481_v12, %s16858_s28 }
0x2a85   : > { %13743 = vrot.lane.b32.xlu0 %v19486_v7, %s16858_s28 }
0x2a89   : > { %13745 = vrot.lane.b32.xlu0 %v19491_v32, %s16858_s28 }
0x2a8d   : > { %13747 = vrot.lane.b32.xlu0 %v19496_v39, %s16858_s28 }
0x2a91   : > { %13749 = vrot.lane.b32.xlu0 %v19501_v48, %s16858_s28 }
0x2ad7   : > { %v13799_v43 = vpop.permute.xlu0 %13798  ;;  %v13801_v46 = vpop.permute.xlu1 %13800 }
0x2ad8   : > { %v13822_v34 = vadd.f32 %v13799_v43, %v13771_v41  ;;  %v13823_v5 = vadd.f32 %v13801_v46, %v13772_v2 }
0x2ada   : > { %13838 = vrot.lane.b32.xlu1 %v13822_v34, %s16861_s6 }
0x2adb   : > { %v13803_v23 = vpop.permute.xlu0 %13802  ;;  %v13805_v28 = vpop.permute.xlu1 %13804 }
0x2adc   : > { %v13824_v15 = vadd.f32 %v13803_v23, %v13773_v36  ;;  %v13825_v42 = vadd.f32 %v13805_v28, %v13774_v24 }
0x2ade   : > { %13840 = vrot.lane.b32.xlu1 %v13823_v5, %s16861_s6 }
0x2adf   : > { %v13807_v10 = vpop.permute.xlu0 %13806  ;;  %v13809_v21 = vpop.permute.xlu1 %13808 }
0x2ae0   : > { %v13826_v54 = vadd.f32 %v13807_v10, %v13775_v50  ;;  %v13827_v52 = vadd.f32 %v13809_v21, %v13776_v18 }
0x2ae2   : > { %13842 = vrot.lane.b32.xlu1 %v13824_v15, %s16861_s6 }
0x2ae3   : > { %v13811_v63 = vpop.permute.xlu0 %13810  ;;  %v13813_v19 = vpop.permute.xlu1 %13812 }
0x2ae4   : > { %v13828_v51 = vadd.f32 %v13811_v63, %v13777_v27  ;;  %v13829_v53 = vadd.f32 %v13813_v19, %v13778_v62 }
0x2ae6   : > { %13844 = vrot.lane.b32.xlu1 %v13825_v42, %s16861_s6 }
0x2ae7   : > { %v13736_v22 = vpop.permute.xlu0 %13735 }
0x2ae8   : > { %v13759_v16 = vsub.f32 %v13719_v33, %v13736_v22 }
0x2aea   : > { %13846 = vrot.lane.b32.xlu1 %v13826_v54, %s16861_s6 }
0x2aeb   : > { %v13738_v14 = vpop.permute.xlu0 %13737 }
0x2aec   : > { %v13760_v35 = vsub.f32 %v13720_v60, %v13738_v14 }
0x2aee   : > { %13848 = vrot.lane.b32.xlu1 %v13827_v52, %s16861_s6 }
0x2aef   : > { %v13740_v17 = vpop.permute.xlu0 %13739 }
0x2af0   : > { %v13761_v1 = vsub.f32 %v19476_v11, %v13740_v17 }
0x2af2   : > { %13850 = vrot.lane.b32.xlu1 %v13828_v51, %s16861_s6 }
0x2af3   : > { %v13742_v3 = vpop.permute.xlu0 %13741 }
0x2af4   : > { %v13762_v49 = vsub.f32 %v19481_v12, %v13742_v3 }
0x2af6   : > { %13852 = vrot.lane.b32.xlu1 %v13829_v53, %s16861_s6 }
0x2af7   : > { %v13744_v47 = vpop.permute.xlu0 %13743 }
0x2af8   : > { %v13763_v46 = vsub.f32 %v19486_v7, %v13744_v47 }
0x2afb   : > { %v13746_v33 = vpop.permute.xlu0 %13745 }
0x2afc   : > { %v13764_v24 = vsub.f32 %v19491_v32, %v13746_v33 }
0x2aff   : > { %v13748_v36 = vpop.permute.xlu0 %13747 }
0x2b00   : > { %v13765_v18 = vsub.f32 %v19496_v39, %v13748_v36 }
0x2b03   : > { %v13750_v52 = vpop.permute.xlu0 %13749 }
0x2b04   : > { %v13766_v53 = vsub.f32 %v19501_v48, %v13750_v52 }
0x2b4c   : > { %v13839_v37 = vpop.permute.xlu1 %13838 }
0x2b4d   : > { %v19522_v40 = vsel %vm2246_vm10, %v13759_v16, %v13839_v37 }
0x2b4e   : > { %13919 = vrot.lane.b32.xlu0 %v19522_v40, %s16864_s13  ;;  %v13878_v29 = vrot.slane %v19522_v40, 7  ;;  %v13902_v8 = vrot.slane %v19522_v40, 1 }
0x2b50   : > { %v13841_v9 = vpop.permute.xlu1 %13840 }
0x2b51   : > { %v13863_v25 = vsel %vm2246_vm10, %v13760_v35, %v13841_v9  ;;  %v13901_v35 = vsel %vm7245_vm4, 0.0, %v13878_v29 }
0x2b52   : > { %v13879_v30 = vrot.slane %v13863_v25, 7  ;;  %v13903_v0 = vrot.slane %v13863_v25, 1  ;;  %13921 = vrot.lane.b32.xlu1 %v13863_v25, %s16864_s13 }
0x2b54   : > { %v13843_v61 = vpop.permute.xlu1 %13842  ;;  %v13904_v20 = vsel %vm7270_vm3, %v13902_v8, %v13903_v0  ;;  %v13880_v38 = vsel %vm7245_vm4, %v13878_v29, %v13879_v30 }
0x2b55   : > { %v13864_v4 = vsel %vm2246_vm10, %v13761_v1, %v13843_v61  ;;  %14721 = vmatprep.mubr.msk.f32.mxu1 %vm338_vm0, %v13904_v20 }
0x2b56   : > { %v13881_v55 = vrot.slane %v13864_v4, 7  ;;  %v13905_v45 = vrot.slane %v13864_v4, 1  ;;  %13923 = vrot.lane.b32.xlu0 %v13864_v4, %s16864_s13 }
0x2b58   : > { %v13845_v60 = vpop.permute.xlu1 %13844  ;;  %v13906_v56 = vsel %vm7270_vm3, %v13903_v0, %v13905_v45  ;;  %v13882_v11 = vsel %vm7245_vm4, %v13879_v30, %v13881_v55 }
0x2b59   : > { %v13865_v41 = vsel %vm2246_vm10, %v13762_v49, %v13845_v60 }
0x2b5a   : > { %v13883_v43 = vrot.slane %v13865_v41, 7  ;;  %v13907_v34 = vrot.slane %v13865_v41, 1  ;;  %13925 = vrot.lane.b32.xlu1 %v13865_v41, %s16864_s13 }
0x2b5c   : > { %v13847_v2 = vpop.permute.xlu1 %13846  ;;  %v13908_v5 = vsel %vm7270_vm3, %v13905_v45, %v13907_v34  ;;  %v13884_v23 = vsel %vm7245_vm4, %v13881_v55, %v13883_v43 }
0x2b5d   : > { %v13866_v12 = vsel %vm2246_vm10, %v13763_v46, %v13847_v2 }
0x2b5e   : > { %v13885_v15 = vrot.slane %v13866_v12, 7  ;;  %v13909_v28 = vrot.slane %v13866_v12, 1  ;;  %13927 = vrot.lane.b32.xlu0 %v13866_v12, %s16864_s13 }
0x2b60   : > { %v13849_v42 = vpop.permute.xlu1 %13848  ;;  %v13910_v10 = vsel %vm7270_vm3, %v13907_v34, %v13909_v28  ;;  %v13886_v50 = vsel %vm7245_vm4, %v13883_v43, %v13885_v15 }
0x2b61   : > { %v13867_v7 = vsel %vm2246_vm10, %v13764_v24, %v13849_v42 }
0x2b62   : > { %v13887_v54 = vrot.slane %v13867_v7, 7  ;;  %v13911_v21 = vrot.slane %v13867_v7, 1  ;;  %13929 = vrot.lane.b32.xlu1 %v13867_v7, %s16864_s13 }
0x2b64   : > { %v13851_v63 = vpop.permute.xlu1 %13850  ;;  %v13912_v27 = vsel %vm7270_vm3, %v13909_v28, %v13911_v21  ;;  %v13888_v51 = vsel %vm7245_vm4, %v13885_v15, %v13887_v54 }
0x2b65   : > { %v13868_v32 = vsel %vm2246_vm10, %v13765_v18, %v13851_v63 }
0x2b66   : > { %v13889_v19 = vrot.slane %v13868_v32, 7  ;;  %v13913_v62 = vrot.slane %v13868_v32, 1  ;;  %13931 = vrot.lane.b32.xlu0 %v13868_v32, %s16864_s13 }
0x2b68   : > { %v13853_v22 = vpop.permute.xlu1 %13852  ;;  %v13914_v14 = vsel %vm7270_vm3, %v13911_v21, %v13913_v62  ;;  %v13890_v17 = vsel %vm7245_vm4, %v13887_v54, %v13889_v19 }
0x2b69   : > { %v13869_v39 = vsel %vm2246_vm10, %v13766_v53, %v13853_v22 }
0x2b6a   : > { %v13891_v16 = vrot.slane %v13869_v39, 7  ;;  %v13915_v3 = vrot.slane %v13869_v39, 1  ;;  %13933 = vrot.lane.b32.xlu1 %v13869_v39, %s16864_s13 }
0x2b6c   : > { %v13916_v37 = vsel %vm7270_vm3, %v13913_v62, %v13915_v3  ;;  %v13892_v40 = vsel %vm7245_vm4, %v13889_v19, %v13891_v16  ;;  %v13918_v45 = vsel %vm7270_vm3, %v13915_v3, 0.0 }
0x2bc0   : > { %v13920_v9 = vpop.permute.xlu0 %13919 }
0x2bc1   : > { %v13943_v48 = vsel %vm338_vm0, %v13901_v35, %v13920_v9 }
0x2bc2   : > { %14033 = vmatmul.mubr.f32.vlgmr.msra.gmra.mxu1 %v13943_v48 }
0x2bc3   : > { %14722 = vmatprep.mubr.msk.f32.mxu1 %vm338_vm0, %v13906_v56 }
0x2bc4   : > { %v13922_v25 = vpop.permute.xlu1 %13921 }
0x2bc5   : > { %v13944_v47 = vsel %vm338_vm0, %v13880_v38, %v13922_v25 }
0x2bc6   : > { %14038 = vmatmul.mubr.f32.gmra.mxu1 %v13944_v47 }
0x2bc7   : > { %14723 = vmatprep.mubr.msk.f32.mxu1 %vm338_vm0, %v13908_v5 }
0x2bc8   : > { %v13924_v8 = vpop.permute.xlu0 %13923 }
0x2bc9   : > { %v13945_v30 = vsel %vm338_vm0, %v13882_v11, %v13924_v8 }
0x2bca   : > { %14043 = vmatmul.mubr.f32.gmra.mxu1 %v13945_v30 }
0x2bcb   : > { %14724 = vmatprep.mubr.msk.f32.mxu1 %vm338_vm0, %v13910_v10 }
0x2bcc   : > { %v13926_v0 = vpop.permute.xlu1 %13925 }
0x2bcd   : > { %v13946_v29 = vsel %vm338_vm0, %v13884_v23, %v13926_v0 }
0x2bce   : > { %14048 = vmatmul.mubr.f32.gmra.mxu1 %v13946_v29 }
0x2bcf   : > { %14725 = vmatprep.mubr.msk.f32.mxu1 %vm338_vm0, %v13912_v27 }
0x2bd0   : > { %v13928_v1 = vpop.permute.xlu0 %13927 }
0x2bd1   : > { %v13947_v61 = vsel %vm338_vm0, %v13886_v50, %v13928_v1 }
0x2bd2   : > { %14053 = vmatmul.mubr.f32.gmra.mxu1 %v13947_v61 }
0x2bd3   : > { %14726 = vmatprep.mubr.msk.f32.mxu1 %vm338_vm0, %v13914_v14 }
0x2bd4   : > { %v13930_v20 = vpop.permute.xlu1 %13929 }
0x2bd5   : > { %v13948_v38 = vsel %vm338_vm0, %v13888_v51, %v13930_v20 }
0x2bd6   : > { %14058 = vmatmul.mubr.f32.gmra.mxu1 %v13948_v38 }
0x2bd7   : > { %14727 = vmatprep.mubr.msk.f32.mxu1 %vm338_vm0, %v13916_v37 }
0x2bd8   : > { %v13932_v4 = vpop.permute.xlu0 %13931 }
0x2bd9   : > { %v13949_v55 = vsel %vm338_vm0, %v13890_v17, %v13932_v4 }
0x2bda   : > { %14063 = vmatmul.mubr.f32.gmra.mxu1 %v13949_v55 }
0x2bdb   : > { %14728 = vmatprep.mubr.msk.f32.mxu1 %vm338_vm0, %v13918_v45 }
0x2bdc   : > { %v13934_v49 = vpop.permute.xlu1 %13933 }
0x2bdd   : > { %v13950_v33 = vsel %vm338_vm0, %v13892_v40, %v13934_v49 }
0x2bde   : > { %14068 = vmatmul.mubr.f32.gmra.mxu1 %v13950_v33 }
0x2c82   : > { %v14034_v60 = vpop.f32.mrf.mxu1 }
0x2c83   : > { %14081 = vrot.lane.b32.xlu0 %v14034_v60, %s16864_s13 }
0x2c84   : > { %v14036_v56 = vpop.f32.mrf.mxu1 }
0x2c86   : > { %v14039_v11 = vpop.f32.mrf.mxu1 }
0x2c87   : > { %14083 = vrot.lane.b32.xlu1 %v14039_v11, %s16864_s13 }
0x2c88   : > { %v14041_v41 = vpop.f32.mrf.mxu1 }
0x2c8a   : > { %v14044_v43 = vpop.f32.mrf.mxu1 }
0x2c8b   : > { %14085 = vrot.lane.b32.xlu0 %v14044_v43, %s16864_s13 }
0x2c8c   : > { %v14046_v34 = vpop.f32.mrf.mxu1 }
0x2c8e   : > { %v14049_v46 = vpop.f32.mrf.mxu1 }
0x2c8f   : > { %14087 = vrot.lane.b32.xlu1 %v14049_v46, %s16864_s13 }
0x2c90   : > { %v14051_v2 = vpop.f32.mrf.mxu1 }
0x2c92   : > { %v14054_v5 = vpop.f32.mrf.mxu1 }
0x2c93   : > { %14089 = vrot.lane.b32.xlu0 %v14054_v5, %s16864_s13 }
0x2c94   : > { %v14056_v23 = vpop.f32.mrf.mxu1 }
0x2c96   : > { %v14059_v12 = vpop.f32.mrf.mxu1 }
0x2c97   : > { %14091 = vrot.lane.b32.xlu1 %v14059_v12, %s16864_s13 }
0x2c98   : > { %v14061_v36 = vpop.f32.mrf.mxu1 }
0x2c9a   : > { %v14064_v15 = vpop.f32.mrf.mxu1 }
0x2c9b   : > { %14093 = vrot.lane.b32.xlu0 %v14064_v15, %s16864_s13 }
0x2c9c   : > { %v14066_v28 = vpop.f32.mrf.mxu1 }
0x2c9e   : > { %v14069_v24 = vpop.f32.mrf.mxu1 }
0x2c9f   : > { %14095 = vrot.lane.b32.xlu1 %v14069_v24, %s16864_s13 }
0x2ca0   : > { %v14071_v42 = vpop.f32.mrf.mxu1 }
0x2cf5   : > { %v14082_v10 = vpop.permute.xlu0 %14081 }
0x2cf6   : > { %v14105_v50 = vsel %vm338_vm0, %v18526_v13, %v14082_v10 }
0x2cf7   : > { %14113 = vst [vmem:[%s304_s25] sm:$0xff] %v14105_v50 }
0x2cf9   : > { %v14084_v7 = vpop.permute.xlu1 %14083 }
0x2cfa   : > { %v14106_v54 = vsel %vm338_vm0, %v18528_v6, %v14084_v7 }
0x2cfb   : > { %14114 = vst [vmem:[%s304_s25 + $0x8] sm:$0xff] %v14106_v54 }
0x2cfd   : > { %v14086_v21 = vpop.permute.xlu0 %14085 }
0x2cfe   : > { %v14107_v18 = vsel %vm338_vm0, %v18530_v57, %v14086_v21 }
0x2cff   : > { %14115 = vst [vmem:[%s304_s25 + $0x10] sm:$0xff] %v14107_v18 }
0x2d01   : > { %v14088_v52 = vpop.permute.xlu1 %14087 }
0x2d02   : > { %v14108_v63 = vsel %vm338_vm0, %v18532_v44, %v14088_v52 }
0x2d03   : > { %14116 = vst [vmem:[%s304_s25 + $0x18] sm:$0xff] %v14108_v63 }
0x2d05   : > { %v14090_v27 = vpop.permute.xlu0 %14089 }
0x2d06   : > { %v14109_v13 = vsel %vm338_vm0, %v18534_v31, %v14090_v27 }
0x2d07   : > { %14117 = vst [vmem:[%s304_s25 + $0x20] sm:$0xff] %v14109_v13 }
0x2d09   : > { %v14092_v51 = vpop.permute.xlu1 %14091 }
0x2d0a   : > { %v14110_v6 = vsel %vm338_vm0, %v18536_v26, %v14092_v51 }
0x2d0b   : > { %14118 = vst [vmem:[%s304_s25 + $0x28] sm:$0xff] %v14110_v6 }
0x2d0d   : > { %v14094_v32 = vpop.permute.xlu0 %14093 }
0x2d0e   : > { %v14111_v57 = vsel %vm338_vm0, %v18538_v58, %v14094_v32 }
0x2d0f   : > { %14119 = vst [vmem:[%s304_s25 + $0x30] sm:$0xff] %v14111_v57 }
0x2d11   : > { %v14096_v19 = vpop.permute.xlu1 %14095 }
0x2d12   : > { %v14112_v44 = vsel %vm338_vm0, %v18540_v59, %v14096_v19 }
0x2d13   : > { %14120 = vst [vmem:[%s304_s25 + $0x38] sm:$0xff] %v14112_v44 }
0x2d14 PF: > { %s15_s18 = sadd.s32 1, %s16855_s18  }
0x2d15   : > { %p12_p4 = scmp.ge.s32.totalorder %s15_s18, 4  }
0x2d17   :  { %14 = sbr.rel (!%p12_p4) target bundleno = 1 (0x1), region = 87 }

</bundles_post_ra>
